<compile_context>
chip_gen: v6e
topology: v6e:2x2x1
jax: 0.10.0
libtpu: 0.0.40
codegen_flags: <defaults>
</compile_context>

<pallas_src>
import functools

import numpy as np

import jax
import jax.numpy as jnp
from jax.experimental import pallas as pl
from jax.experimental.pallas import tpu as pltpu

CP = 16  # channel padding: sublane-aligned and bf16 packing-aligned


# ----------------------------- in-kernel helpers ------------------------------

def _bn(y, gamma, beta, eps=1e-5):
    """BatchNorm2d, training mode (per-call batch statistics), on (C, M) columns."""
    mean = jnp.mean(y, axis=1, keepdims=True)
    var = jnp.mean(jnp.square(y - mean), axis=1, keepdims=True)
    return (y - mean) * jax.lax.rsqrt(var + eps) * gamma + beta


def _lrelu(y):
    return jnp.where(y > 0.0, y, 0.2 * y)


def _im2col(x, mask_ref, patches_ref, *, k, wb):
    """k x k, stride-1, pad-1 im2col of a (CP, M) activation into patches_ref[:k*k*CP, :M].

    Column m of `x` is spatial position (h, w) = ((m // wb) % hb, m % wb) inside a
    batch-like group of hb*wb columns.  Tap (ki, kj) is brought under column m with one
    lane roll of the whole array; the host-built 0/1 mask zeroes taps that fall into the
    zero padding (this also stops rolled data from leaking across group boundaries).
    """
    m = x.shape[1]
    for ki in range(k):
        for kj in range(k):
            t = ki * k + kj
            delta = (ki - 1) * wb + (kj - 1)
            xs = pltpu.roll(x, (-delta) % m, axis=1) if delta else x
            tap = xs * mask_ref[pl.ds(t, 1), :]
            patches_ref[pl.ds(t * CP, CP), pl.ds(0, m)] = tap.astype(patches_ref.dtype)


def _conv(w_ref, patches_ref, k, col0, m):
    """One whole conv call: a single (CP, k*k*CP) @ (k*k*CP, m) MXU matmul."""
    p = patches_ref[pl.ds(0, k * k * CP), pl.ds(col0, m)]
    return jnp.dot(w_ref[...], p, preferred_element_type=jnp.float32)


def _downsel(y, sel_ref, m_in, m_out):
    """Keep the stride-2 output columns: one 0/1 selection matmul per conv call."""
    s = sel_ref[pl.ds(0, m_in), pl.ds(0, m_out)]
    return jnp.dot(y.astype(jnp.bfloat16), s, preferred_element_type=jnp.float32)


# --------------------------------- the kernel ----------------------------------

def _multitask_kernel(
    x_ref,
    dw1_ref, dg1_ref, db1_ref, dw2_ref,
    ew1_ref, ew2_ref, eg2_ref, eb2_ref, ew3_ref,
    aw1_ref, aw2_ref, ag2_ref, ab2_ref,
    mask3_ref, mask4a_ref, mask4b_ref, sel1_ref, sel2_ref,
    xp_ref, z_ref, feat_ref,
    patches_ref, tail_ref,
    *, B, H, W,
):
    H2, W2, H4, W4 = H // 2, W // 2, H // 4, W // 4
    M0 = B * H * W         # x / x' columns               (b, h, w)
    M1 = B * H2 * W2       # level-1 columns per branch   (b, h2, w2)
    M2 = B * H4 * W4       # level-2 columns per branch   (b, h4, w4)

    # ---- shared_layer: conv3x3 s1 p1 (nc->ngf), BN, ReLU ---------------------------
    xv = x_ref[...]
    _im2col(xv, mask3_ref, patches_ref, k=3, wb=W)
    h1 = _conv(dw1_ref, patches_ref, 3, 0, M0)
    h1 = jnp.maximum(_bn(h1, dg1_ref[...], db1_ref[...]), 0.0)

    # ---- shared_layer: conv3x3 s1 p1 (ngf->nc); final Tanh dropped  ->  x' ---------
    _im2col(h1, mask3_ref, patches_ref, k=3, wb=W)
    xp = _conv(dw2_ref, patches_ref, 3, 0, M0)
    xp_ref[...] = xp

    # ---- level 1: conv4x4 s2 p1 + LeakyReLU.  One im2col over the stacked [x | x'] -
    _im2col(jnp.concatenate([xv, xp], axis=1), mask4a_ref, patches_ref, k=4, wb=W)
    a1r = _lrelu(_downsel(_conv(aw1_ref, patches_ref, 4, 0, M0), sel1_ref, M0, M1))
    a1f = _lrelu(_downsel(_conv(aw1_ref, patches_ref, 4, M0, M0), sel1_ref, M0, M1))
    e1 = _lrelu(_downsel(_conv(ew1_ref, patches_ref, 4, M0, M0), sel1_ref, M0, M1))

    # ---- level 2: conv4x4 s2 p1 + BN + LeakyReLU.  One im2col over [e1 | a1r | a1f] -
    _im2col(jnp.concatenate([e1, a1r, a1f], axis=1), mask4b_ref, patches_ref, k=4, wb=W2)
    e2 = _downsel(_conv(ew2_ref, patches_ref, 4, 0, M1), sel2_ref, M1, M2)
    e2 = _lrelu(_bn(e2, eg2_ref[...], eb2_ref[...]))
    # encoder_adv features; BatchNorm statistics computed per call (real | fake).
    fr = _downsel(_conv(aw2_ref, patches_ref, 4, M1, M1), sel2_ref, M1, M2)
    ff = _downsel(_conv(aw2_ref, patches_ref, 4, 2 * M1, M1), sel2_ref, M1, M2)
    feat_ref[:, pl.ds(0, M2)] = _lrelu(_bn(fr, ag2_ref[...], ab2_ref[...]))
    feat_ref[:, pl.ds(M2, M2)] = _lrelu(_bn(ff, ag2_ref[...], ab2_ref[...]))

    # ---- encoder_enc: conv4x4 s1 p0 (2*ngf -> nz), full spatial contraction -> z' ---
    # Only column b*(H4*W4) per batch is a valid output; the zero tail keeps the
    # lane-offset tap reads in-bounds.  Other columns are discarded by the wrapper.
    tail_ref[:, pl.ds(M2, M2)] = jnp.zeros((CP, M2), jnp.float32)
    tail_ref[:, pl.ds(0, M2)] = e2
    for t in range(H4 * W4):
        patches_ref[pl.ds(t * CP, CP), pl.ds(0, M2)] = (
            tail_ref[:, pl.ds(t, M2)].astype(patches_ref.dtype))
    z_ref[...] = jnp.dot(ew3_ref[...],
                         patches_ref[pl.ds(0, H4 * W4 * CP), pl.ds(0, M2)],
                         preferred_element_type=jnp.float32)


# ------------------------------ host-side plumbing ------------------------------

def _to_cols(x):
    """(B, C, H, W) -> (CP, B*H*W) f32: channels on sublanes, flat spatial on lanes."""
    b, c, h, w = x.shape
    x = jnp.transpose(x, (1, 0, 2, 3)).reshape(c, b * h * w)
    return jnp.pad(x, ((0, CP - c), (0, 0))).astype(jnp.float32)


def _wmat(w):
    """(O, I, kh, kw) conv weight -> (CP, kh*kw*CP) bf16, tap-major / channel-minor."""
    o, i, kh, kw = w.shape
    w = jnp.pad(w, ((0, CP - o), (0, CP - i), (0, 0), (0, 0)))
    return jnp.transpose(w, (0, 2, 3, 1)).reshape(CP, kh * kw * CP).astype(jnp.bfloat16)


def _bnp(v):
    return jnp.pad(v.astype(jnp.float32), (0, CP - v.shape[0])).reshape(CP, 1)


def _tap_masks(k, hb, wb, groups):
    """(CP, groups*hb*wb) 0/1 zero-padding mask per tap of a k x k stride-1 pad-1 conv."""
    m = np.arange(groups * hb * wb)
    h, w = (m // wb) % hb, m % wb
    rows = np.zeros((CP, m.size), np.float32)
    for ki in range(k):
        for kj in range(k):
            dh, dw = ki - 1, kj - 1
            rows[ki * k + kj] = ((h + dh >= 0) & (h + dh < hb) &
                                 (w + dw >= 0) & (w + dw < wb))
    return jnp.asarray(rows)


def _stride2_sel(groups, hb, wb):
    """0/1 block-diagonal selector keeping the stride-2 output columns of a layer."""
    ho, wo = hb // 2, wb // 2
    sel = np.zeros((groups * hb * wb, groups * ho * wo), np.float32)
    for g in range(groups):
        for r in range(ho):
            for c in range(wo):
                sel[g * hb * wb + 2 * r * wb + 2 * c, g * ho * wo + r * wo + c] = 1.0
    return jnp.asarray(sel, dtype=jnp.bfloat16)


def _full_spec(shape):
    nd = len(shape)
    return pl.BlockSpec(shape, lambda i: (0,) * nd)


def init_params(key, nc, ngf, nz):
    def conv_w(k, shape):
        return 0.02 * jax.random.normal(k, shape, jnp.float32)  # DCGAN init

    ks = jax.random.split(key, 10)
    p = {}
    # Decoder(opt).net: conv3x3(nc->ngf), BN, ReLU, conv3x3(ngf->nc), Tanh (dropped)
    p["dec_w1"] = conv_w(ks[0], (ngf, nc, 3, 3))
    p["dec_g1"] = 1.0 + 0.02 * jax.random.normal(ks[1], (ngf,), jnp.float32)
    p["dec_b1"] = jnp.zeros((ngf,), jnp.float32)
    p["dec_w2"] = conv_w(ks[2], (nc, ngf, 3, 3))
    # Encoder(opt) (encoder_enc)
    p["enc_w1"] = conv_w(ks[3], (ngf, nc, 4, 4))
    p["enc_w2"] = conv_w(ks[4], (2 * ngf, ngf, 4, 4))
    p["enc_g2"] = 1.0 + 0.02 * jax.random.normal(ks[5], (2 * ngf,), jnp.float32)
    p["enc_b2"] = jnp.zeros((2 * ngf,), jnp.float32)
    p["enc_w3"] = conv_w(ks[6], (nz, 2 * ngf, 4, 4))
    # Encoder(opt, 1) minus its final conv (encoder_adv trunk)
    p["adv_w1"] = conv_w(ks[7], (ngf, nc, 4, 4))
    p["adv_w2"] = conv_w(ks[8], (2 * ngf, ngf, 4, 4))
    p["adv_g2"] = 1.0 + 0.02 * jax.random.normal(ks[9], (2 * ngf,), jnp.float32)
    p["adv_b2"] = jnp.zeros((2 * ngf,), jnp.float32)
    return p


def multitask_loss_forward(params, x_nchw):
    x = x_nchw.astype(jnp.float32)
    B, nc, H, W = x.shape
    ngf = params["dec_w1"].shape[0]
    nz = params["enc_w3"].shape[0]
    assert H == 16 and W == 16, "stand-in architecture assumes isize == 16"
    assert max(nc, ngf, 2 * ngf, nz) <= CP
    H2, W2, H4, W4 = H // 2, W // 2, H // 4, W // 4
    M0, M1, M2 = B * H * W, B * H2 * W2, B * H4 * W4

    inputs = (
        _to_cols(x),
        _wmat(params["dec_w1"]), _bnp(params["dec_g1"]), _bnp(params["dec_b1"]),
        _wmat(params["dec_w2"]),
        _wmat(params["enc_w1"]), _wmat(params["enc_w2"]),
        _bnp(params["enc_g2"]), _bnp(params["enc_b2"]),
        _wmat(params["enc_w3"]),
        _wmat(params["adv_w1"]), _wmat(params["adv_w2"]),
        _bnp(params["adv_g2"]), _bnp(params["adv_b2"]),
        _tap_masks(3, H, W, B),          # shared-layer 3x3 convs on x / h1
        _tap_masks(4, H, W, 2 * B),      # level-1 4x4 convs on [x | x']
        _tap_masks(4, H2, W2, 3 * B),    # level-2 4x4 convs on [e1 | a1_r | a1_f]
        _stride2_sel(B, H, W),           # 16x16 -> 8x8 column selector
        _stride2_sel(B, H2, W2),         # 8x8 -> 4x4 column selector
    )

    out_shape = (
        jax.ShapeDtypeStruct((CP, M0), jnp.float32),       # x' columns
        jax.ShapeDtypeStruct((CP, M2), jnp.float32),       # z' (column b*H4*W4 per batch)
        jax.ShapeDtypeStruct((CP, 2 * M2), jnp.float32),   # [feat_real | feat_fake]
    )

    scratch = [
        pltpu.VMEM((16 * CP, 2 * M0), jnp.bfloat16),       # shared im2col patches (K, M)
        pltpu.VMEM((CP, 2 * M2), jnp.float32),             # zero-tailed e2 for the final conv
    ]

    kernel = functools.partial(_multitask_kernel, B=B, H=H, W=W)
    xp_cm, z_cm, feat_cm = pl.pallas_call(
        kernel,
        out_shape=out_shape,
        grid=(1,),
        in_specs=[_full_spec(a.shape) for a in inputs],
        out_specs=tuple(_full_spec(s.shape) for s in out_shape),
        scratch_shapes=scratch,
        compiler_params=pltpu.CompilerParams(
            dimension_semantics=("arbitrary",),
            vmem_limit_bytes=32 * 1024 * 1024,
        ),
    )(*inputs)

    x_prime = jnp.transpose(xp_cm[:nc].reshape(nc, B, H, W), (1, 0, 2, 3))
    z_prime = jnp.transpose(z_cm[:nz].reshape(nz, B, H4 * W4)[:, :, 0], (1, 0))
    z_prime = z_prime.reshape(B, nz, 1, 1)
    feats = feat_cm[:2 * ngf].reshape(2 * ngf, 2, B, H4, W4)
    feat_real = jnp.transpose(feats[:, 0], (1, 0, 2, 3))
    feat_fake = jnp.transpose(feats[:, 1], (1, 0, 2, 3))
    return x_prime, z_prime, feat_real, feat_fake


if __name__ == "__main__":
    B, nc, isize, ngf, nz = 2, 3, 16, 8, 8
    key = jax.random.PRNGKey(0)
    kp, kx = jax.random.split(key)
    params = init_params(kp, nc, ngf, nz)
    x = jax.random.normal(kx, (B, nc, isize, isize), jnp.float32)

    outs = jax.jit(multitask_loss_forward)(params, x)
    outs = jax.block_until_ready(outs)

    x_prime, z_prime, feat_real, feat_fake = outs
    assert x_prime.shape == (B, nc, isize, isize)
    assert z_prime.shape == (B, nz, 1, 1)
    assert feat_real.shape == (B, 2 * ngf, isize // 4, isize // 4)
    assert feat_fake.shape == (B, 2 * ngf, isize // 4, isize // 4)
    assert all(bool(jnp.all(jnp.isfinite(o))) for o in outs)
    print("KERNEL_OK")
</pallas_src>

<mosaic_0001>
module attributes {stable_mosaic.version = 11 : i64} {
  func.func @_multitask_kernel(%arg0: i32, %arg1: memref<16x512xf32, #tpu.memory_space<vmem>>, %arg2: memref<16x144xbf16, #tpu.memory_space<vmem>>, %arg3: memref<16x1xf32, #tpu.memory_space<vmem>>, %arg4: memref<16x1xf32, #tpu.memory_space<vmem>>, %arg5: memref<16x144xbf16, #tpu.memory_space<vmem>>, %arg6: memref<16x256xbf16, #tpu.memory_space<vmem>>, %arg7: memref<16x256xbf16, #tpu.memory_space<vmem>>, %arg8: memref<16x1xf32, #tpu.memory_space<vmem>>, %arg9: memref<16x1xf32, #tpu.memory_space<vmem>>, %arg10: memref<16x256xbf16, #tpu.memory_space<vmem>>, %arg11: memref<16x256xbf16, #tpu.memory_space<vmem>>, %arg12: memref<16x256xbf16, #tpu.memory_space<vmem>>, %arg13: memref<16x1xf32, #tpu.memory_space<vmem>>, %arg14: memref<16x1xf32, #tpu.memory_space<vmem>>, %arg15: memref<16x512xf32, #tpu.memory_space<vmem>>, %arg16: memref<16x1024xf32, #tpu.memory_space<vmem>>, %arg17: memref<16x384xf32, #tpu.memory_space<vmem>>, %arg18: memref<512x128xbf16, #tpu.memory_space<vmem>>, %arg19: memref<128x32xbf16, #tpu.memory_space<vmem>>, %arg20: memref<16x512xf32, #tpu.memory_space<vmem>>, %arg21: memref<16x32xf32, #tpu.memory_space<vmem>>, %arg22: memref<16x64xf32, #tpu.memory_space<vmem>>, %arg23: memref<256x1024xbf16, #tpu.memory_space<vmem>>, %arg24: memref<16x64xf32, #tpu.memory_space<vmem>>) attributes {dimension_semantics = [#tpu.dimension_semantics<arbitrary>], iteration_bounds = array<i64: 1>, scalar_prefetch = 0 : i64, scratch_operands = 2 : i64, tpu.core_type = #tpu.core_type<tc>, window_params = [{pipeline_mode = #tpu.pipeline_mode<synchronous>, transform_indices = @transform_0, window_bounds = array<i64: 16, 512>}, {pipeline_mode = #tpu.pipeline_mode<synchronous>, transform_indices = @transform_1, window_bounds = array<i64: 16, 144>}, {pipeline_mode = #tpu.pipeline_mode<synchronous>, transform_indices = @transform_2, window_bounds = array<i64: 16, 1>}, {pipeline_mode = #tpu.pipeline_mode<synchronous>, transform_indices = @transform_3, window_bounds = array<i64: 16, 1>}, {pipeline_mode = #tpu.pipeline_mode<synchronous>, transform_indices = @transform_4, window_bounds = array<i64: 16, 144>}, {pipeline_mode = #tpu.pipeline_mode<synchronous>, transform_indices = @transform_5, window_bounds = array<i64: 16, 256>}, {pipeline_mode = #tpu.pipeline_mode<synchronous>, transform_indices = @transform_6, window_bounds = array<i64: 16, 256>}, {pipeline_mode = #tpu.pipeline_mode<synchronous>, transform_indices = @transform_7, window_bounds = array<i64: 16, 1>}, {pipeline_mode = #tpu.pipeline_mode<synchronous>, transform_indices = @transform_8, window_bounds = array<i64: 16, 1>}, {pipeline_mode = #tpu.pipeline_mode<synchronous>, transform_indices = @transform_9, window_bounds = array<i64: 16, 256>}, {pipeline_mode = #tpu.pipeline_mode<synchronous>, transform_indices = @transform_10, window_bounds = array<i64: 16, 256>}, {pipeline_mode = #tpu.pipeline_mode<synchronous>, transform_indices = @transform_11, window_bounds = array<i64: 16, 256>}, {pipeline_mode = #tpu.pipeline_mode<synchronous>, transform_indices = @transform_12, window_bounds = array<i64: 16, 1>}, {pipeline_mode = #tpu.pipeline_mode<synchronous>, transform_indices = @transform_13, window_bounds = array<i64: 16, 1>}, {pipeline_mode = #tpu.pipeline_mode<synchronous>, transform_indices = @transform_14, window_bounds = array<i64: 16, 512>}, {pipeline_mode = #tpu.pipeline_mode<synchronous>, transform_indices = @transform_15, window_bounds = array<i64: 16, 1024>}, {pipeline_mode = #tpu.pipeline_mode<synchronous>, transform_indices = @transform_16, window_bounds = array<i64: 16, 384>}, {pipeline_mode = #tpu.pipeline_mode<synchronous>, transform_indices = @transform_17, window_bounds = array<i64: 512, 128>}, {pipeline_mode = #tpu.pipeline_mode<synchronous>, transform_indices = @transform_18, window_bounds = array<i64: 128, 32>}, {pipeline_mode = #tpu.pipeline_mode<synchronous>, transform_indices = @transform_19, window_bounds = array<i64: 16, 512>}, {pipeline_mode = #tpu.pipeline_mode<synchronous>, transform_indices = @transform_20, window_bounds = array<i64: 16, 32>}, {pipeline_mode = #tpu.pipeline_mode<synchronous>, transform_indices = @transform_21, window_bounds = array<i64: 16, 64>}]} {
    %c0 = arith.constant 0 : index
    %c0_0 = arith.constant 0 : index
    %0 = vector.load %arg1[%c0, %c0_0] : memref<16x512xf32, #tpu.memory_space<vmem>>, vector<16x512xf32>
    %c17_i32 = arith.constant 17 : i32
    %1 = tpu.dynamic_rotate %0 by %c17_i32 dim 1 : vector<16x512xf32>, i32 -> vector<16x512xf32>
    %c0_1 = arith.constant 0 : index
    %c0_2 = arith.constant 0 : index
    %2 = vector.load %arg15[%c0_1, %c0_2] : memref<16x512xf32, #tpu.memory_space<vmem>>, vector<1x512xf32>
    %3 = vector.broadcast %2 : vector<1x512xf32> to vector<16x512xf32>
    %4 = arith.mulf %1, %3 : vector<16x512xf32>
    %5 = arith.truncf %4 : vector<16x512xf32> to vector<16x512xbf16>
    %c0_3 = arith.constant 0 : index
    %c0_4 = arith.constant 0 : index
    %6 = vector.load %arg23[%c0_3, %c0_4] : memref<256x1024xbf16, #tpu.memory_space<vmem>>, vector<16x512xbf16>
    tpu.vector_store %arg23[%c0_3, %c0_4], %5 {strides = array<i32>} : memref<256x1024xbf16, #tpu.memory_space<vmem>>, vector<16x512xbf16>,
    %c16_i32 = arith.constant 16 : i32
    %7 = tpu.dynamic_rotate %0 by %c16_i32 dim 1 : vector<16x512xf32>, i32 -> vector<16x512xf32>
    %c1 = arith.constant 1 : index
    %c0_5 = arith.constant 0 : index
    %8 = vector.load %arg15[%c1, %c0_5] : memref<16x512xf32, #tpu.memory_space<vmem>>, vector<1x512xf32>
    %9 = vector.broadcast %8 : vector<1x512xf32> to vector<16x512xf32>
    %10 = arith.mulf %7, %9 : vector<16x512xf32>
    %11 = arith.truncf %10 : vector<16x512xf32> to vector<16x512xbf16>
    %c16 = arith.constant 16 : index
    %c0_6 = arith.constant 0 : index
    %12 = vector.load %arg23[%c16, %c0_6] : memref<256x1024xbf16, #tpu.memory_space<vmem>>, vector<16x512xbf16>
    tpu.vector_store %arg23[%c16, %c0_6], %11 {strides = array<i32>} : memref<256x1024xbf16, #tpu.memory_space<vmem>>, vector<16x512xbf16>,
    %c15_i32 = arith.constant 15 : i32
    %13 = tpu.dynamic_rotate %0 by %c15_i32 dim 1 : vector<16x512xf32>, i32 -> vector<16x512xf32>
    %c2 = arith.constant 2 : index
    %c0_7 = arith.constant 0 : index
    %14 = vector.load %arg15[%c2, %c0_7] : memref<16x512xf32, #tpu.memory_space<vmem>>, vector<1x512xf32>
    %15 = vector.broadcast %14 : vector<1x512xf32> to vector<16x512xf32>
    %16 = arith.mulf %13, %15 : vector<16x512xf32>
    %17 = arith.truncf %16 : vector<16x512xf32> to vector<16x512xbf16>
    %c32 = arith.constant 32 : index
    %c0_8 = arith.constant 0 : index
    %18 = vector.load %arg23[%c32, %c0_8] : memref<256x1024xbf16, #tpu.memory_space<vmem>>, vector<16x512xbf16>
    tpu.vector_store %arg23[%c32, %c0_8], %17 {strides = array<i32>} : memref<256x1024xbf16, #tpu.memory_space<vmem>>, vector<16x512xbf16>,
    %c1_i32 = arith.constant 1 : i32
    %19 = tpu.dynamic_rotate %0 by %c1_i32 dim 1 : vector<16x512xf32>, i32 -> vector<16x512xf32>
    %c3 = arith.constant 3 : index
    %c0_9 = arith.constant 0 : index
    %20 = vector.load %arg15[%c3, %c0_9] : memref<16x512xf32, #tpu.memory_space<vmem>>, vector<1x512xf32>
    %21 = vector.broadcast %20 : vector<1x512xf32> to vector<16x512xf32>
    %22 = arith.mulf %19, %21 : vector<16x512xf32>
    %23 = arith.truncf %22 : vector<16x512xf32> to vector<16x512xbf16>
    %c48 = arith.constant 48 : index
    %c0_10 = arith.constant 0 : index
    %24 = vector.load %arg23[%c48, %c0_10] : memref<256x1024xbf16, #tpu.memory_space<vmem>>, vector<16x512xbf16>
    tpu.vector_store %arg23[%c48, %c0_10], %23 {strides = array<i32>} : memref<256x1024xbf16, #tpu.memory_space<vmem>>, vector<16x512xbf16>,
    %c4 = arith.constant 4 : index
    %c0_11 = arith.constant 0 : index
    %25 = vector.load %arg15[%c4, %c0_11] : memref<16x512xf32, #tpu.memory_space<vmem>>, vector<1x512xf32>
    %26 = vector.broadcast %25 : vector<1x512xf32> to vector<16x512xf32>
    %27 = arith.mulf %0, %26 : vector<16x512xf32>
    %28 = arith.truncf %27 : vector<16x512xf32> to vector<16x512xbf16>
    %c64 = arith.constant 64 : index
    %c0_12 = arith.constant 0 : index
    %29 = vector.load %arg23[%c64, %c0_12] : memref<256x1024xbf16, #tpu.memory_space<vmem>>, vector<16x512xbf16>
    tpu.vector_store %arg23[%c64, %c0_12], %28 {strides = array<i32>} : memref<256x1024xbf16, #tpu.memory_space<vmem>>, vector<16x512xbf16>,
    %c511_i32 = arith.constant 511 : i32
    %30 = tpu.dynamic_rotate %0 by %c511_i32 dim 1 : vector<16x512xf32>, i32 -> vector<16x512xf32>
    %c5 = arith.constant 5 : index
    %c0_13 = arith.constant 0 : index
    %31 = vector.load %arg15[%c5, %c0_13] : memref<16x512xf32, #tpu.memory_space<vmem>>, vector<1x512xf32>
    %32 = vector.broadcast %31 : vector<1x512xf32> to vector<16x512xf32>
    %33 = arith.mulf %30, %32 : vector<16x512xf32>
    %34 = arith.truncf %33 : vector<16x512xf32> to vector<16x512xbf16>
    %c80 = arith.constant 80 : index
    %c0_14 = arith.constant 0 : index
    %35 = vector.load %arg23[%c80, %c0_14] : memref<256x1024xbf16, #tpu.memory_space<vmem>>, vector<16x512xbf16>
    tpu.vector_store %arg23[%c80, %c0_14], %34 {strides = array<i32>} : memref<256x1024xbf16, #tpu.memory_space<vmem>>, vector<16x512xbf16>,
    %c497_i32 = arith.constant 497 : i32
    %36 = tpu.dynamic_rotate %0 by %c497_i32 dim 1 : vector<16x512xf32>, i32 -> vector<16x512xf32>
    %c6 = arith.constant 6 : index
    %c0_15 = arith.constant 0 : index
    %37 = vector.load %arg15[%c6, %c0_15] : memref<16x512xf32, #tpu.memory_space<vmem>>, vector<1x512xf32>
    %38 = vector.broadcast %37 : vector<1x512xf32> to vector<16x512xf32>
    %39 = arith.mulf %36, %38 : vector<16x512xf32>
    %40 = arith.truncf %39 : vector<16x512xf32> to vector<16x512xbf16>
    %c96 = arith.constant 96 : index
    %c0_16 = arith.constant 0 : index
    %41 = vector.load %arg23[%c96, %c0_16] : memref<256x1024xbf16, #tpu.memory_space<vmem>>, vector<16x512xbf16>
    tpu.vector_store %arg23[%c96, %c0_16], %40 {strides = array<i32>} : memref<256x1024xbf16, #tpu.memory_space<vmem>>, vector<16x512xbf16>,
    %c496_i32 = arith.constant 496 : i32
    %42 = tpu.dynamic_rotate %0 by %c496_i32 dim 1 : vector<16x512xf32>, i32 -> vector<16x512xf32>
    %c7 = arith.constant 7 : index
    %c0_17 = arith.constant 0 : index
    %43 = vector.load %arg15[%c7, %c0_17] : memref<16x512xf32, #tpu.memory_space<vmem>>, vector<1x512xf32>
    %44 = vector.broadcast %43 : vector<1x512xf32> to vector<16x512xf32>
    %45 = arith.mulf %42, %44 : vector<16x512xf32>
    %46 = arith.truncf %45 : vector<16x512xf32> to vector<16x512xbf16>
    %c112 = arith.constant 112 : index
    %c0_18 = arith.constant 0 : index
    %47 = vector.load %arg23[%c112, %c0_18] : memref<256x1024xbf16, #tpu.memory_space<vmem>>, vector<16x512xbf16>
    tpu.vector_store %arg23[%c112, %c0_18], %46 {strides = array<i32>} : memref<256x1024xbf16, #tpu.memory_space<vmem>>, vector<16x512xbf16>,
    %c495_i32 = arith.constant 495 : i32
    %48 = tpu.dynamic_rotate %0 by %c495_i32 dim 1 : vector<16x512xf32>, i32 -> vector<16x512xf32>
    %c8 = arith.constant 8 : index
    %c0_19 = arith.constant 0 : index
    %49 = vector.load %arg15[%c8, %c0_19] : memref<16x512xf32, #tpu.memory_space<vmem>>, vector<1x512xf32>
    %50 = vector.broadcast %49 : vector<1x512xf32> to vector<16x512xf32>
    %51 = arith.mulf %48, %50 : vector<16x512xf32>
    %52 = arith.truncf %51 : vector<16x512xf32> to vector<16x512xbf16>
    %c128 = arith.constant 128 : index
    %c0_20 = arith.constant 0 : index
    %53 = vector.load %arg23[%c128, %c0_20] : memref<256x1024xbf16, #tpu.memory_space<vmem>>, vector<16x512xbf16>
    tpu.vector_store %arg23[%c128, %c0_20], %52 {strides = array<i32>} : memref<256x1024xbf16, #tpu.memory_space<vmem>>, vector<16x512xbf16>,
    %c0_21 = arith.constant 0 : index
    %c0_22 = arith.constant 0 : index
    %54 = vector.load %arg23[%c0_21, %c0_22] : memref<256x1024xbf16, #tpu.memory_space<vmem>>, vector<144x512xbf16>
    %c0_23 = arith.constant 0 : index
    %c0_24 = arith.constant 0 : index
    %55 = vector.load %arg2[%c0_23, %c0_24] : memref<16x144xbf16, #tpu.memory_space<vmem>>, vector<16x144xbf16>
    %cst = arith.constant dense<0.000000e+00> : vector<16x512xf32>
    %56 = tpu.matmul %55, %54, %cst {dimension_numbers = #tpu.dot_dimension_numbers<[1], [0], [0], [1], [0, 0, 1, 1], [], []>} : vector<16x144xbf16>, vector<144x512xbf16>, vector<16x512xf32> -> vector<16x512xf32>
    %c0_25 = arith.constant 0 : index
    %c0_26 = arith.constant 0 : index
    %57 = vector.load %arg3[%c0_25, %c0_26] : memref<16x1xf32, #tpu.memory_space<vmem>>, vector<16x1xf32>
    %c0_27 = arith.constant 0 : index
    %c0_28 = arith.constant 0 : index
    %58 = vector.load %arg4[%c0_27, %c0_28] : memref<16x1xf32, #tpu.memory_space<vmem>>, vector<16x1xf32>
    %cst_29 = arith.constant dense<0.000000e+00> : vector<16xf32>
    %59 = vector.multi_reduction <add>, %56, %cst_29 [1] : vector<16x512xf32> to vector<16xf32>
    %60 = vector.shape_cast %59 : vector<16xf32> to vector<16x1xf32>
    %cst_30 = arith.constant 5.120000e+02 : f32
    %61 = vector.broadcast %cst_30 : f32 to vector<16x1xf32>
    %62 = arith.divf %60, %61 : vector<16x1xf32>
    %63 = vector.broadcast %62 : vector<16x1xf32> to vector<16x512xf32>
    %64 = arith.subf %56, %63 : vector<16x512xf32>
    %65 = arith.mulf %64, %64 : vector<16x512xf32>
    %cst_31 = arith.constant dense<0.000000e+00> : vector<16xf32>
    %66 = vector.multi_reduction <add>, %65, %cst_31 [1] : vector<16x512xf32> to vector<16xf32>
    %67 = vector.shape_cast %66 : vector<16xf32> to vector<16x1xf32>
    %cst_32 = arith.constant 5.120000e+02 : f32
    %68 = vector.broadcast %cst_32 : f32 to vector<16x1xf32>
    %69 = arith.divf %67, %68 : vector<16x1xf32>
    %70 = vector.broadcast %62 : vector<16x1xf32> to vector<16x512xf32>
    %71 = arith.subf %56, %70 : vector<16x512xf32>
    %cst_33 = arith.constant 9.99999974E-6 : f32
    %72 = vector.broadcast %cst_33 : f32 to vector<16x1xf32>
    %73 = arith.addf %69, %72 : vector<16x1xf32>
    %74 = math.rsqrt %73 : vector<16x1xf32>
    %75 = vector.broadcast %74 : vector<16x1xf32> to vector<16x512xf32>
    %76 = arith.mulf %71, %75 : vector<16x512xf32>
    %77 = vector.broadcast %57 : vector<16x1xf32> to vector<16x512xf32>
    %78 = arith.mulf %76, %77 : vector<16x512xf32>
    %79 = vector.broadcast %58 : vector<16x1xf32> to vector<16x512xf32>
    %80 = arith.addf %78, %79 : vector<16x512xf32>
    %cst_34 = arith.constant 0.000000e+00 : f32
    %81 = vector.broadcast %cst_34 : f32 to vector<16x512xf32>
    %82 = arith.maximumf %80, %81 : vector<16x512xf32>
    %c17_i32_35 = arith.constant 17 : i32
    %83 = tpu.dynamic_rotate %82 by %c17_i32_35 dim 1 : vector<16x512xf32>, i32 -> vector<16x512xf32>
    %c0_36 = arith.constant 0 : index
    %c0_37 = arith.constant 0 : index
    %84 = vector.load %arg15[%c0_36, %c0_37] : memref<16x512xf32, #tpu.memory_space<vmem>>, vector<1x512xf32>
    %85 = vector.broadcast %84 : vector<1x512xf32> to vector<16x512xf32>
    %86 = arith.mulf %83, %85 : vector<16x512xf32>
    %87 = arith.truncf %86 : vector<16x512xf32> to vector<16x512xbf16>
    %c0_38 = arith.constant 0 : index
    %c0_39 = arith.constant 0 : index
    %88 = vector.load %arg23[%c0_38, %c0_39] : memref<256x1024xbf16, #tpu.memory_space<vmem>>, vector<16x512xbf16>
    tpu.vector_store %arg23[%c0_38, %c0_39], %87 {strides = array<i32>} : memref<256x1024xbf16, #tpu.memory_space<vmem>>, vector<16x512xbf16>,
    %c16_i32_40 = arith.constant 16 : i32
    %89 = tpu.dynamic_rotate %82 by %c16_i32_40 dim 1 : vector<16x512xf32>, i32 -> vector<16x512xf32>
    %c1_41 = arith.constant 1 : index
    %c0_42 = arith.constant 0 : index
    %90 = vector.load %arg15[%c1_41, %c0_42] : memref<16x512xf32, #tpu.memory_space<vmem>>, vector<1x512xf32>
    %91 = vector.broadcast %90 : vector<1x512xf32> to vector<16x512xf32>
    %92 = arith.mulf %89, %91 : vector<16x512xf32>
    %93 = arith.truncf %92 : vector<16x512xf32> to vector<16x512xbf16>
    %c16_43 = arith.constant 16 : index
    %c0_44 = arith.constant 0 : index
    %94 = vector.load %arg23[%c16_43, %c0_44] : memref<256x1024xbf16, #tpu.memory_space<vmem>>, vector<16x512xbf16>
    tpu.vector_store %arg23[%c16_43, %c0_44], %93 {strides = array<i32>} : memref<256x1024xbf16, #tpu.memory_space<vmem>>, vector<16x512xbf16>,
    %c15_i32_45 = arith.constant 15 : i32
    %95 = tpu.dynamic_rotate %82 by %c15_i32_45 dim 1 : vector<16x512xf32>, i32 -> vector<16x512xf32>
    %c2_46 = arith.constant 2 : index
    %c0_47 = arith.constant 0 : index
    %96 = vector.load %arg15[%c2_46, %c0_47] : memref<16x512xf32, #tpu.memory_space<vmem>>, vector<1x512xf32>
    %97 = vector.broadcast %96 : vector<1x512xf32> to vector<16x512xf32>
    %98 = arith.mulf %95, %97 : vector<16x512xf32>
    %99 = arith.truncf %98 : vector<16x512xf32> to vector<16x512xbf16>
    %c32_48 = arith.constant 32 : index
    %c0_49 = arith.constant 0 : index
    %100 = vector.load %arg23[%c32_48, %c0_49] : memref<256x1024xbf16, #tpu.memory_space<vmem>>, vector<16x512xbf16>
    tpu.vector_store %arg23[%c32_48, %c0_49], %99 {strides = array<i32>} : memref<256x1024xbf16, #tpu.memory_space<vmem>>, vector<16x512xbf16>,
    %c1_i32_50 = arith.constant 1 : i32
    %101 = tpu.dynamic_rotate %82 by %c1_i32_50 dim 1 : vector<16x512xf32>, i32 -> vector<16x512xf32>
    %c3_51 = arith.constant 3 : index
    %c0_52 = arith.constant 0 : index
    %102 = vector.load %arg15[%c3_51, %c0_52] : memref<16x512xf32, #tpu.memory_space<vmem>>, vector<1x512xf32>
    %103 = vector.broadcast %102 : vector<1x512xf32> to vector<16x512xf32>
    %104 = arith.mulf %101, %103 : vector<16x512xf32>
    %105 = arith.truncf %104 : vector<16x512xf32> to vector<16x512xbf16>
    %c48_53 = arith.constant 48 : index
    %c0_54 = arith.constant 0 : index
    %106 = vector.load %arg23[%c48_53, %c0_54] : memref<256x1024xbf16, #tpu.memory_space<vmem>>, vector<16x512xbf16>
    tpu.vector_store %arg23[%c48_53, %c0_54], %105 {strides = array<i32>} : memref<256x1024xbf16, #tpu.memory_space<vmem>>, vector<16x512xbf16>,
    %c4_55 = arith.constant 4 : index
    %c0_56 = arith.constant 0 : index
    %107 = vector.load %arg15[%c4_55, %c0_56] : memref<16x512xf32, #tpu.memory_space<vmem>>, vector<1x512xf32>
    %108 = vector.broadcast %107 : vector<1x512xf32> to vector<16x512xf32>
    %109 = arith.mulf %82, %108 : vector<16x512xf32>
    %110 = arith.truncf %109 : vector<16x512xf32> to vector<16x512xbf16>
    %c64_57 = arith.constant 64 : index
    %c0_58 = arith.constant 0 : index
    %111 = vector.load %arg23[%c64_57, %c0_58] : memref<256x1024xbf16, #tpu.memory_space<vmem>>, vector<16x512xbf16>
    tpu.vector_store %arg23[%c64_57, %c0_58], %110 {strides = array<i32>} : memref<256x1024xbf16, #tpu.memory_space<vmem>>, vector<16x512xbf16>,
    %c511_i32_59 = arith.constant 511 : i32
    %112 = tpu.dynamic_rotate %82 by %c511_i32_59 dim 1 : vector<16x512xf32>, i32 -> vector<16x512xf32>
    %c5_60 = arith.constant 5 : index
    %c0_61 = arith.constant 0 : index
    %113 = vector.load %arg15[%c5_60, %c0_61] : memref<16x512xf32, #tpu.memory_space<vmem>>, vector<1x512xf32>
    %114 = vector.broadcast %113 : vector<1x512xf32> to vector<16x512xf32>
    %115 = arith.mulf %112, %114 : vector<16x512xf32>
    %116 = arith.truncf %115 : vector<16x512xf32> to vector<16x512xbf16>
    %c80_62 = arith.constant 80 : index
    %c0_63 = arith.constant 0 : index
    %117 = vector.load %arg23[%c80_62, %c0_63] : memref<256x1024xbf16, #tpu.memory_space<vmem>>, vector<16x512xbf16>
    tpu.vector_store %arg23[%c80_62, %c0_63], %116 {strides = array<i32>} : memref<256x1024xbf16, #tpu.memory_space<vmem>>, vector<16x512xbf16>,
    %c497_i32_64 = arith.constant 497 : i32
    %118 = tpu.dynamic_rotate %82 by %c497_i32_64 dim 1 : vector<16x512xf32>, i32 -> vector<16x512xf32>
    %c6_65 = arith.constant 6 : index
    %c0_66 = arith.constant 0 : index
    %119 = vector.load %arg15[%c6_65, %c0_66] : memref<16x512xf32, #tpu.memory_space<vmem>>, vector<1x512xf32>
    %120 = vector.broadcast %119 : vector<1x512xf32> to vector<16x512xf32>
    %121 = arith.mulf %118, %120 : vector<16x512xf32>
    %122 = arith.truncf %121 : vector<16x512xf32> to vector<16x512xbf16>
    %c96_67 = arith.constant 96 : index
    %c0_68 = arith.constant 0 : index
    %123 = vector.load %arg23[%c96_67, %c0_68] : memref<256x1024xbf16, #tpu.memory_space<vmem>>, vector<16x512xbf16>
    tpu.vector_store %arg23[%c96_67, %c0_68], %122 {strides = array<i32>} : memref<256x1024xbf16, #tpu.memory_space<vmem>>, vector<16x512xbf16>,
    %c496_i32_69 = arith.constant 496 : i32
    %124 = tpu.dynamic_rotate %82 by %c496_i32_69 dim 1 : vector<16x512xf32>, i32 -> vector<16x512xf32>
    %c7_70 = arith.constant 7 : index
    %c0_71 = arith.constant 0 : index
    %125 = vector.load %arg15[%c7_70, %c0_71] : memref<16x512xf32, #tpu.memory_space<vmem>>, vector<1x512xf32>
    %126 = vector.broadcast %125 : vector<1x512xf32> to vector<16x512xf32>
    %127 = arith.mulf %124, %126 : vector<16x512xf32>
    %128 = arith.truncf %127 : vector<16x512xf32> to vector<16x512xbf16>
    %c112_72 = arith.constant 112 : index
    %c0_73 = arith.constant 0 : index
    %129 = vector.load %arg23[%c112_72, %c0_73] : memref<256x1024xbf16, #tpu.memory_space<vmem>>, vector<16x512xbf16>
    tpu.vector_store %arg23[%c112_72, %c0_73], %128 {strides = array<i32>} : memref<256x1024xbf16, #tpu.memory_space<vmem>>, vector<16x512xbf16>,
    %c495_i32_74 = arith.constant 495 : i32
    %130 = tpu.dynamic_rotate %82 by %c495_i32_74 dim 1 : vector<16x512xf32>, i32 -> vector<16x512xf32>
    %c8_75 = arith.constant 8 : index
    %c0_76 = arith.constant 0 : index
    %131 = vector.load %arg15[%c8_75, %c0_76] : memref<16x512xf32, #tpu.memory_space<vmem>>, vector<1x512xf32>
    %132 = vector.broadcast %131 : vector<1x512xf32> to vector<16x512xf32>
    %133 = arith.mulf %130, %132 : vector<16x512xf32>
    %134 = arith.truncf %133 : vector<16x512xf32> to vector<16x512xbf16>
    %c128_77 = arith.constant 128 : index
    %c0_78 = arith.constant 0 : index
    %135 = vector.load %arg23[%c128_77, %c0_78] : memref<256x1024xbf16, #tpu.memory_space<vmem>>, vector<16x512xbf16>
    tpu.vector_store %arg23[%c128_77, %c0_78], %134 {strides = array<i32>} : memref<256x1024xbf16, #tpu.memory_space<vmem>>, vector<16x512xbf16>,
    %c0_79 = arith.constant 0 : index
    %c0_80 = arith.constant 0 : index
    %136 = vector.load %arg23[%c0_79, %c0_80] : memref<256x1024xbf16, #tpu.memory_space<vmem>>, vector<144x512xbf16>
    %c0_81 = arith.constant 0 : index
    %c0_82 = arith.constant 0 : index
    %137 = vector.load %arg5[%c0_81, %c0_82] : memref<16x144xbf16, #tpu.memory_space<vmem>>, vector<16x144xbf16>
    %cst_83 = arith.constant dense<0.000000e+00> : vector<16x512xf32>
    %138 = tpu.matmul %137, %136, %cst_83 {dimension_numbers = #tpu.dot_dimension_numbers<[1], [0], [0], [1], [0, 0, 1, 1], [], []>} : vector<16x144xbf16>, vector<144x512xbf16>, vector<16x512xf32> -> vector<16x512xf32>
    %c0_84 = arith.constant 0 : index
    %c0_85 = arith.constant 0 : index
    %139 = vector.load %arg20[%c0_84, %c0_85] : memref<16x512xf32, #tpu.memory_space<vmem>>, vector<16x512xf32>
    tpu.vector_store %arg20[%c0_84, %c0_85], %138 {strides = array<i32>} : memref<16x512xf32, #tpu.memory_space<vmem>>, vector<16x512xf32>,
    %140 = tpu.concatenate %0, %138 in 1 : vector<16x512xf32>, vector<16x512xf32> -> vector<16x1024xf32>
    %c17_i32_86 = arith.constant 17 : i32
    %141 = tpu.dynamic_rotate %140 by %c17_i32_86 dim 1 : vector<16x1024xf32>, i32 -> vector<16x1024xf32>
    %c0_87 = arith.constant 0 : index
    %c0_88 = arith.constant 0 : index
    %142 = vector.load %arg16[%c0_87, %c0_88] : memref<16x1024xf32, #tpu.memory_space<vmem>>, vector<1x1024xf32>
    %143 = vector.broadcast %142 : vector<1x1024xf32> to vector<16x1024xf32>
    %144 = arith.mulf %141, %143 : vector<16x1024xf32>
    %145 = arith.truncf %144 : vector<16x1024xf32> to vector<16x1024xbf16>
    %c0_89 = arith.constant 0 : index
    %c0_90 = arith.constant 0 : index
    %146 = vector.load %arg23[%c0_89, %c0_90] : memref<256x1024xbf16, #tpu.memory_space<vmem>>, vector<16x1024xbf16>
    tpu.vector_store %arg23[%c0_89, %c0_90], %145 {strides = array<i32>} : memref<256x1024xbf16, #tpu.memory_space<vmem>>, vector<16x1024xbf16>,
    %c16_i32_91 = arith.constant 16 : i32
    %147 = tpu.dynamic_rotate %140 by %c16_i32_91 dim 1 : vector<16x1024xf32>, i32 -> vector<16x1024xf32>
    %c1_92 = arith.constant 1 : index
    %c0_93 = arith.constant 0 : index
    %148 = vector.load %arg16[%c1_92, %c0_93] : memref<16x1024xf32, #tpu.memory_space<vmem>>, vector<1x1024xf32>
    %149 = vector.broadcast %148 : vector<1x1024xf32> to vector<16x1024xf32>
    %150 = arith.mulf %147, %149 : vector<16x1024xf32>
    %151 = arith.truncf %150 : vector<16x1024xf32> to vector<16x1024xbf16>
    %c16_94 = arith.constant 16 : index
    %c0_95 = arith.constant 0 : index
    %152 = vector.load %arg23[%c16_94, %c0_95] : memref<256x1024xbf16, #tpu.memory_space<vmem>>, vector<16x1024xbf16>
    tpu.vector_store %arg23[%c16_94, %c0_95], %151 {strides = array<i32>} : memref<256x1024xbf16, #tpu.memory_space<vmem>>, vector<16x1024xbf16>,
    %c15_i32_96 = arith.constant 15 : i32
    %153 = tpu.dynamic_rotate %140 by %c15_i32_96 dim 1 : vector<16x1024xf32>, i32 -> vector<16x1024xf32>
    %c2_97 = arith.constant 2 : index
    %c0_98 = arith.constant 0 : index
    %154 = vector.load %arg16[%c2_97, %c0_98] : memref<16x1024xf32, #tpu.memory_space<vmem>>, vector<1x1024xf32>
    %155 = vector.broadcast %154 : vector<1x1024xf32> to vector<16x1024xf32>
    %156 = arith.mulf %153, %155 : vector<16x1024xf32>
    %157 = arith.truncf %156 : vector<16x1024xf32> to vector<16x1024xbf16>
    %c32_99 = arith.constant 32 : index
    %c0_100 = arith.constant 0 : index
    %158 = vector.load %arg23[%c32_99, %c0_100] : memref<256x1024xbf16, #tpu.memory_space<vmem>>, vector<16x1024xbf16>
    tpu.vector_store %arg23[%c32_99, %c0_100], %157 {strides = array<i32>} : memref<256x1024xbf16, #tpu.memory_space<vmem>>, vector<16x1024xbf16>,
    %c14_i32 = arith.constant 14 : i32
    %159 = tpu.dynamic_rotate %140 by %c14_i32 dim 1 : vector<16x1024xf32>, i32 -> vector<16x1024xf32>
    %c3_101 = arith.constant 3 : index
    %c0_102 = arith.constant 0 : index
    %160 = vector.load %arg16[%c3_101, %c0_102] : memref<16x1024xf32, #tpu.memory_space<vmem>>, vector<1x1024xf32>
    %161 = vector.broadcast %160 : vector<1x1024xf32> to vector<16x1024xf32>
    %162 = arith.mulf %159, %161 : vector<16x1024xf32>
    %163 = arith.truncf %162 : vector<16x1024xf32> to vector<16x1024xbf16>
    %c48_103 = arith.constant 48 : index
    %c0_104 = arith.constant 0 : index
    %164 = vector.load %arg23[%c48_103, %c0_104] : memref<256x1024xbf16, #tpu.memory_space<vmem>>, vector<16x1024xbf16>
    tpu.vector_store %arg23[%c48_103, %c0_104], %163 {strides = array<i32>} : memref<256x1024xbf16, #tpu.memory_space<vmem>>, vector<16x1024xbf16>,
    %c1_i32_105 = arith.constant 1 : i32
    %165 = tpu.dynamic_rotate %140 by %c1_i32_105 dim 1 : vector<16x1024xf32>, i32 -> vector<16x1024xf32>
    %c4_106 = arith.constant 4 : index
    %c0_107 = arith.constant 0 : index
    %166 = vector.load %arg16[%c4_106, %c0_107] : memref<16x1024xf32, #tpu.memory_space<vmem>>, vector<1x1024xf32>
    %167 = vector.broadcast %166 : vector<1x1024xf32> to vector<16x1024xf32>
    %168 = arith.mulf %165, %167 : vector<16x1024xf32>
    %169 = arith.truncf %168 : vector<16x1024xf32> to vector<16x1024xbf16>
    %c64_108 = arith.constant 64 : index
    %c0_109 = arith.constant 0 : index
    %170 = vector.load %arg23[%c64_108, %c0_109] : memref<256x1024xbf16, #tpu.memory_space<vmem>>, vector<16x1024xbf16>
    tpu.vector_store %arg23[%c64_108, %c0_109], %169 {strides = array<i32>} : memref<256x1024xbf16, #tpu.memory_space<vmem>>, vector<16x1024xbf16>,
    %c5_110 = arith.constant 5 : index
    %c0_111 = arith.constant 0 : index
    %171 = vector.load %arg16[%c5_110, %c0_111] : memref<16x1024xf32, #tpu.memory_space<vmem>>, vector<1x1024xf32>
    %172 = vector.broadcast %171 : vector<1x1024xf32> to vector<16x1024xf32>
    %173 = arith.mulf %140, %172 : vector<16x1024xf32>
    %174 = arith.truncf %173 : vector<16x1024xf32> to vector<16x1024xbf16>
    %c80_112 = arith.constant 80 : index
    %c0_113 = arith.constant 0 : index
    %175 = vector.load %arg23[%c80_112, %c0_113] : memref<256x1024xbf16, #tpu.memory_space<vmem>>, vector<16x1024xbf16>
    tpu.vector_store %arg23[%c80_112, %c0_113], %174 {strides = array<i32>} : memref<256x1024xbf16, #tpu.memory_space<vmem>>, vector<16x1024xbf16>,
    %c1023_i32 = arith.constant 1023 : i32
    %176 = tpu.dynamic_rotate %140 by %c1023_i32 dim 1 : vector<16x1024xf32>, i32 -> vector<16x1024xf32>
    %c6_114 = arith.constant 6 : index
    %c0_115 = arith.constant 0 : index
    %177 = vector.load %arg16[%c6_114, %c0_115] : memref<16x1024xf32, #tpu.memory_space<vmem>>, vector<1x1024xf32>
    %178 = vector.broadcast %177 : vector<1x1024xf32> to vector<16x1024xf32>
    %179 = arith.mulf %176, %178 : vector<16x1024xf32>
    %180 = arith.truncf %179 : vector<16x1024xf32> to vector<16x1024xbf16>
    %c96_116 = arith.constant 96 : index
    %c0_117 = arith.constant 0 : index
    %181 = vector.load %arg23[%c96_116, %c0_117] : memref<256x1024xbf16, #tpu.memory_space<vmem>>, vector<16x1024xbf16>
    tpu.vector_store %arg23[%c96_116, %c0_117], %180 {strides = array<i32>} : memref<256x1024xbf16, #tpu.memory_space<vmem>>, vector<16x1024xbf16>,
    %c1022_i32 = arith.constant 1022 : i32
    %182 = tpu.dynamic_rotate %140 by %c1022_i32 dim 1 : vector<16x1024xf32>, i32 -> vector<16x1024xf32>
    %c7_118 = arith.constant 7 : index
    %c0_119 = arith.constant 0 : index
    %183 = vector.load %arg16[%c7_118, %c0_119] : memref<16x1024xf32, #tpu.memory_space<vmem>>, vector<1x1024xf32>
    %184 = vector.broadcast %183 : vector<1x1024xf32> to vector<16x1024xf32>
    %185 = arith.mulf %182, %184 : vector<16x1024xf32>
    %186 = arith.truncf %185 : vector<16x1024xf32> to vector<16x1024xbf16>
    %c112_120 = arith.constant 112 : index
    %c0_121 = arith.constant 0 : index
    %187 = vector.load %arg23[%c112_120, %c0_121] : memref<256x1024xbf16, #tpu.memory_space<vmem>>, vector<16x1024xbf16>
    tpu.vector_store %arg23[%c112_120, %c0_121], %186 {strides = array<i32>} : memref<256x1024xbf16, #tpu.memory_space<vmem>>, vector<16x1024xbf16>,
    %c1009_i32 = arith.constant 1009 : i32
    %188 = tpu.dynamic_rotate %140 by %c1009_i32 dim 1 : vector<16x1024xf32>, i32 -> vector<16x1024xf32>
    %c8_122 = arith.constant 8 : index
    %c0_123 = arith.constant 0 : index
    %189 = vector.load %arg16[%c8_122, %c0_123] : memref<16x1024xf32, #tpu.memory_space<vmem>>, vector<1x1024xf32>
    %190 = vector.broadcast %189 : vector<1x1024xf32> to vector<16x1024xf32>
    %191 = arith.mulf %188, %190 : vector<16x1024xf32>
    %192 = arith.truncf %191 : vector<16x1024xf32> to vector<16x1024xbf16>
    %c128_124 = arith.constant 128 : index
    %c0_125 = arith.constant 0 : index
    %193 = vector.load %arg23[%c128_124, %c0_125] : memref<256x1024xbf16, #tpu.memory_space<vmem>>, vector<16x1024xbf16>
    tpu.vector_store %arg23[%c128_124, %c0_125], %192 {strides = array<i32>} : memref<256x1024xbf16, #tpu.memory_space<vmem>>, vector<16x1024xbf16>,
    %c1008_i32 = arith.constant 1008 : i32
    %194 = tpu.dynamic_rotate %140 by %c1008_i32 dim 1 : vector<16x1024xf32>, i32 -> vector<16x1024xf32>
    %c9 = arith.constant 9 : index
    %c0_126 = arith.constant 0 : index
    %195 = vector.load %arg16[%c9, %c0_126] : memref<16x1024xf32, #tpu.memory_space<vmem>>, vector<1x1024xf32>
    %196 = vector.broadcast %195 : vector<1x1024xf32> to vector<16x1024xf32>
    %197 = arith.mulf %194, %196 : vector<16x1024xf32>
    %198 = arith.truncf %197 : vector<16x1024xf32> to vector<16x1024xbf16>
    %c144 = arith.constant 144 : index
    %c0_127 = arith.constant 0 : index
    %199 = vector.load %arg23[%c144, %c0_127] : memref<256x1024xbf16, #tpu.memory_space<vmem>>, vector<16x1024xbf16>
    tpu.vector_store %arg23[%c144, %c0_127], %198 {strides = array<i32>} : memref<256x1024xbf16, #tpu.memory_space<vmem>>, vector<16x1024xbf16>,
    %c1007_i32 = arith.constant 1007 : i32
    %200 = tpu.dynamic_rotate %140 by %c1007_i32 dim 1 : vector<16x1024xf32>, i32 -> vector<16x1024xf32>
    %c10 = arith.constant 10 : index
    %c0_128 = arith.constant 0 : index
    %201 = vector.load %arg16[%c10, %c0_128] : memref<16x1024xf32, #tpu.memory_space<vmem>>, vector<1x1024xf32>
    %202 = vector.broadcast %201 : vector<1x1024xf32> to vector<16x1024xf32>
    %203 = arith.mulf %200, %202 : vector<16x1024xf32>
    %204 = arith.truncf %203 : vector<16x1024xf32> to vector<16x1024xbf16>
    %c160 = arith.constant 160 : index
    %c0_129 = arith.constant 0 : index
    %205 = vector.load %arg23[%c160, %c0_129] : memref<256x1024xbf16, #tpu.memory_space<vmem>>, vector<16x1024xbf16>
    tpu.vector_store %arg23[%c160, %c0_129], %204 {strides = array<i32>} : memref<256x1024xbf16, #tpu.memory_space<vmem>>, vector<16x1024xbf16>,
    %c1006_i32 = arith.constant 1006 : i32
    %206 = tpu.dynamic_rotate %140 by %c1006_i32 dim 1 : vector<16x1024xf32>, i32 -> vector<16x1024xf32>
    %c11 = arith.constant 11 : index
    %c0_130 = arith.constant 0 : index
    %207 = vector.load %arg16[%c11, %c0_130] : memref<16x1024xf32, #tpu.memory_space<vmem>>, vector<1x1024xf32>
    %208 = vector.broadcast %207 : vector<1x1024xf32> to vector<16x1024xf32>
    %209 = arith.mulf %206, %208 : vector<16x1024xf32>
    %210 = arith.truncf %209 : vector<16x1024xf32> to vector<16x1024xbf16>
    %c176 = arith.constant 176 : index
    %c0_131 = arith.constant 0 : index
    %211 = vector.load %arg23[%c176, %c0_131] : memref<256x1024xbf16, #tpu.memory_space<vmem>>, vector<16x1024xbf16>
    tpu.vector_store %arg23[%c176, %c0_131], %210 {strides = array<i32>} : memref<256x1024xbf16, #tpu.memory_space<vmem>>, vector<16x1024xbf16>,
    %c993_i32 = arith.constant 993 : i32
    %212 = tpu.dynamic_rotate %140 by %c993_i32 dim 1 : vector<16x1024xf32>, i32 -> vector<16x1024xf32>
    %c12 = arith.constant 12 : index
    %c0_132 = arith.constant 0 : index
    %213 = vector.load %arg16[%c12, %c0_132] : memref<16x1024xf32, #tpu.memory_space<vmem>>, vector<1x1024xf32>
    %214 = vector.broadcast %213 : vector<1x1024xf32> to vector<16x1024xf32>
    %215 = arith.mulf %212, %214 : vector<16x1024xf32>
    %216 = arith.truncf %215 : vector<16x1024xf32> to vector<16x1024xbf16>
    %c192 = arith.constant 192 : index
    %c0_133 = arith.constant 0 : index
    %217 = vector.load %arg23[%c192, %c0_133] : memref<256x1024xbf16, #tpu.memory_space<vmem>>, vector<16x1024xbf16>
    tpu.vector_store %arg23[%c192, %c0_133], %216 {strides = array<i32>} : memref<256x1024xbf16, #tpu.memory_space<vmem>>, vector<16x1024xbf16>,
    %c992_i32 = arith.constant 992 : i32
    %218 = tpu.dynamic_rotate %140 by %c992_i32 dim 1 : vector<16x1024xf32>, i32 -> vector<16x1024xf32>
    %c13 = arith.constant 13 : index
    %c0_134 = arith.constant 0 : index
    %219 = vector.load %arg16[%c13, %c0_134] : memref<16x1024xf32, #tpu.memory_space<vmem>>, vector<1x1024xf32>
    %220 = vector.broadcast %219 : vector<1x1024xf32> to vector<16x1024xf32>
    %221 = arith.mulf %218, %220 : vector<16x1024xf32>
    %222 = arith.truncf %221 : vector<16x1024xf32> to vector<16x1024xbf16>
    %c208 = arith.constant 208 : index
    %c0_135 = arith.constant 0 : index
    %223 = vector.load %arg23[%c208, %c0_135] : memref<256x1024xbf16, #tpu.memory_space<vmem>>, vector<16x1024xbf16>
    tpu.vector_store %arg23[%c208, %c0_135], %222 {strides = array<i32>} : memref<256x1024xbf16, #tpu.memory_space<vmem>>, vector<16x1024xbf16>,
    %c991_i32 = arith.constant 991 : i32
    %224 = tpu.dynamic_rotate %140 by %c991_i32 dim 1 : vector<16x1024xf32>, i32 -> vector<16x1024xf32>
    %c14 = arith.constant 14 : index
    %c0_136 = arith.constant 0 : index
    %225 = vector.load %arg16[%c14, %c0_136] : memref<16x1024xf32, #tpu.memory_space<vmem>>, vector<1x1024xf32>
    %226 = vector.broadcast %225 : vector<1x1024xf32> to vector<16x1024xf32>
    %227 = arith.mulf %224, %226 : vector<16x1024xf32>
    %228 = arith.truncf %227 : vector<16x1024xf32> to vector<16x1024xbf16>
    %c224 = arith.constant 224 : index
    %c0_137 = arith.constant 0 : index
    %229 = vector.load %arg23[%c224, %c0_137] : memref<256x1024xbf16, #tpu.memory_space<vmem>>, vector<16x1024xbf16>
    tpu.vector_store %arg23[%c224, %c0_137], %228 {strides = array<i32>} : memref<256x1024xbf16, #tpu.memory_space<vmem>>, vector<16x1024xbf16>,
    %c990_i32 = arith.constant 990 : i32
    %230 = tpu.dynamic_rotate %140 by %c990_i32 dim 1 : vector<16x1024xf32>, i32 -> vector<16x1024xf32>
    %c15 = arith.constant 15 : index
    %c0_138 = arith.constant 0 : index
    %231 = vector.load %arg16[%c15, %c0_138] : memref<16x1024xf32, #tpu.memory_space<vmem>>, vector<1x1024xf32>
    %232 = vector.broadcast %231 : vector<1x1024xf32> to vector<16x1024xf32>
    %233 = arith.mulf %230, %232 : vector<16x1024xf32>
    %234 = arith.truncf %233 : vector<16x1024xf32> to vector<16x1024xbf16>
    %c240 = arith.constant 240 : index
    %c0_139 = arith.constant 0 : index
    %235 = vector.load %arg23[%c240, %c0_139] : memref<256x1024xbf16, #tpu.memory_space<vmem>>, vector<16x1024xbf16>
    tpu.vector_store %arg23[%c240, %c0_139], %234 {strides = array<i32>} : memref<256x1024xbf16, #tpu.memory_space<vmem>>, vector<16x1024xbf16>,
    %c0_140 = arith.constant 0 : index
    %c0_141 = arith.constant 0 : index
    %236 = vector.load %arg23[%c0_140, %c0_141] : memref<256x1024xbf16, #tpu.memory_space<vmem>>, vector<256x512xbf16>
    %c0_142 = arith.constant 0 : index
    %c0_143 = arith.constant 0 : index
    %237 = vector.load %arg11[%c0_142, %c0_143] : memref<16x256xbf16, #tpu.memory_space<vmem>>, vector<16x256xbf16>
    %cst_144 = arith.constant dense<0.000000e+00> : vector<16x512xf32>
    %238 = tpu.matmul %237, %236, %cst_144 {dimension_numbers = #tpu.dot_dimension_numbers<[1], [0], [0], [1], [0, 0, 1, 1], [], []>} : vector<16x256xbf16>, vector<256x512xbf16>, vector<16x512xf32> -> vector<16x512xf32>
    %c0_145 = arith.constant 0 : index
    %c0_146 = arith.constant 0 : index
    %239 = vector.load %arg18[%c0_145, %c0_146] : memref<512x128xbf16, #tpu.memory_space<vmem>>, vector<512x128xbf16>
    %240 = arith.truncf %238 : vector<16x512xf32> to vector<16x512xbf16>
    %cst_147 = arith.constant dense<0.000000e+00> : vector<16x128xf32>
    %241 = tpu.matmul %240, %239, %cst_147 {dimension_numbers = #tpu.dot_dimension_numbers<[1], [0], [0], [1], [0, 0, 1, 1], [], []>} : vector<16x512xbf16>, vector<512x128xbf16>, vector<16x128xf32> -> vector<16x128xf32>
    %cst_148 = arith.constant 0.000000e+00 : f32
    %242 = vector.broadcast %cst_148 : f32 to vector<16x128xf32>
    %243 = arith.cmpf ogt, %241, %242 : vector<16x128xf32>
    %cst_149 = arith.constant 2.000000e-01 : f32
    %244 = vector.broadcast %cst_149 : f32 to vector<16x128xf32>
    %245 = arith.mulf %244, %241 : vector<16x128xf32>
    %246 = arith.select %243, %241, %245 : vector<16x128xi1>, vector<16x128xf32>
    %c0_150 = arith.constant 0 : index
    %c512 = arith.constant 512 : index
    %247 = vector.load %arg23[%c0_150, %c512] : memref<256x1024xbf16, #tpu.memory_space<vmem>>, vector<256x512xbf16>
    %c0_151 = arith.constant 0 : index
    %c0_152 = arith.constant 0 : index
    %248 = vector.load %arg11[%c0_151, %c0_152] : memref<16x256xbf16, #tpu.memory_space<vmem>>, vector<16x256xbf16>
    %cst_153 = arith.constant dense<0.000000e+00> : vector<16x512xf32>
    %249 = tpu.matmul %248, %247, %cst_153 {dimension_numbers = #tpu.dot_dimension_numbers<[1], [0], [0], [1], [0, 0, 1, 1], [], []>} : vector<16x256xbf16>, vector<256x512xbf16>, vector<16x512xf32> -> vector<16x512xf32>
    %c0_154 = arith.constant 0 : index
    %c0_155 = arith.constant 0 : index
    %250 = vector.load %arg18[%c0_154, %c0_155] : memref<512x128xbf16, #tpu.memory_space<vmem>>, vector<512x128xbf16>
    %251 = arith.truncf %249 : vector<16x512xf32> to vector<16x512xbf16>
    %cst_156 = arith.constant dense<0.000000e+00> : vector<16x128xf32>
    %252 = tpu.matmul %251, %250, %cst_156 {dimension_numbers = #tpu.dot_dimension_numbers<[1], [0], [0], [1], [0, 0, 1, 1], [], []>} : vector<16x512xbf16>, vector<512x128xbf16>, vector<16x128xf32> -> vector<16x128xf32>
    %cst_157 = arith.constant 0.000000e+00 : f32
    %253 = vector.broadcast %cst_157 : f32 to vector<16x128xf32>
    %254 = arith.cmpf ogt, %252, %253 : vector<16x128xf32>
    %cst_158 = arith.constant 2.000000e-01 : f32
    %255 = vector.broadcast %cst_158 : f32 to vector<16x128xf32>
    %256 = arith.mulf %255, %252 : vector<16x128xf32>
    %257 = arith.select %254, %252, %256 : vector<16x128xi1>, vector<16x128xf32>
    %c0_159 = arith.constant 0 : index
    %c512_160 = arith.constant 512 : index
    %258 = vector.load %arg23[%c0_159, %c512_160] : memref<256x1024xbf16, #tpu.memory_space<vmem>>, vector<256x512xbf16>
    %c0_161 = arith.constant 0 : index
    %c0_162 = arith.constant 0 : index
    %259 = vector.load %arg6[%c0_161, %c0_162] : memref<16x256xbf16, #tpu.memory_space<vmem>>, vector<16x256xbf16>
    %cst_163 = arith.constant dense<0.000000e+00> : vector<16x512xf32>
    %260 = tpu.matmul %259, %258, %cst_163 {dimension_numbers = #tpu.dot_dimension_numbers<[1], [0], [0], [1], [0, 0, 1, 1], [], []>} : vector<16x256xbf16>, vector<256x512xbf16>, vector<16x512xf32> -> vector<16x512xf32>
    %c0_164 = arith.constant 0 : index
    %c0_165 = arith.constant 0 : index
    %261 = vector.load %arg18[%c0_164, %c0_165] : memref<512x128xbf16, #tpu.memory_space<vmem>>, vector<512x128xbf16>
    %262 = arith.truncf %260 : vector<16x512xf32> to vector<16x512xbf16>
    %cst_166 = arith.constant dense<0.000000e+00> : vector<16x128xf32>
    %263 = tpu.matmul %262, %261, %cst_166 {dimension_numbers = #tpu.dot_dimension_numbers<[1], [0], [0], [1], [0, 0, 1, 1], [], []>} : vector<16x512xbf16>, vector<512x128xbf16>, vector<16x128xf32> -> vector<16x128xf32>
    %cst_167 = arith.constant 0.000000e+00 : f32
    %264 = vector.broadcast %cst_167 : f32 to vector<16x128xf32>
    %265 = arith.cmpf ogt, %263, %264 : vector<16x128xf32>
    %cst_168 = arith.constant 2.000000e-01 : f32
    %266 = vector.broadcast %cst_168 : f32 to vector<16x128xf32>
    %267 = arith.mulf %266, %263 : vector<16x128xf32>
    %268 = arith.select %265, %263, %267 : vector<16x128xi1>, vector<16x128xf32>
    %269 = tpu.concatenate %268, %246, %257 in 1 : vector<16x128xf32>, vector<16x128xf32>, vector<16x128xf32> -> vector<16x384xf32>
    %c9_i32 = arith.constant 9 : i32
    %270 = tpu.dynamic_rotate %269 by %c9_i32 dim 1 : vector<16x384xf32>, i32 -> vector<16x384xf32>
    %c0_169 = arith.constant 0 : index
    %c0_170 = arith.constant 0 : index
    %271 = vector.load %arg17[%c0_169, %c0_170] : memref<16x384xf32, #tpu.memory_space<vmem>>, vector<1x384xf32>
    %272 = vector.broadcast %271 : vector<1x384xf32> to vector<16x384xf32>
    %273 = arith.mulf %270, %272 : vector<16x384xf32>
    %274 = arith.truncf %273 : vector<16x384xf32> to vector<16x384xbf16>
    %c0_171 = arith.constant 0 : index
    %c0_172 = arith.constant 0 : index
    %275 = vector.load %arg23[%c0_171, %c0_172] : memref<256x1024xbf16, #tpu.memory_space<vmem>>, vector<16x384xbf16>
    tpu.vector_store %arg23[%c0_171, %c0_172], %274 {strides = array<i32>} : memref<256x1024xbf16, #tpu.memory_space<vmem>>, vector<16x384xbf16>,
    %c8_i32 = arith.constant 8 : i32
    %276 = tpu.dynamic_rotate %269 by %c8_i32 dim 1 : vector<16x384xf32>, i32 -> vector<16x384xf32>
    %c1_173 = arith.constant 1 : index
    %c0_174 = arith.constant 0 : index
    %277 = vector.load %arg17[%c1_173, %c0_174] : memref<16x384xf32, #tpu.memory_space<vmem>>, vector<1x384xf32>
    %278 = vector.broadcast %277 : vector<1x384xf32> to vector<16x384xf32>
    %279 = arith.mulf %276, %278 : vector<16x384xf32>
    %280 = arith.truncf %279 : vector<16x384xf32> to vector<16x384xbf16>
    %c16_175 = arith.constant 16 : index
    %c0_176 = arith.constant 0 : index
    %281 = vector.load %arg23[%c16_175, %c0_176] : memref<256x1024xbf16, #tpu.memory_space<vmem>>, vector<16x384xbf16>
    tpu.vector_store %arg23[%c16_175, %c0_176], %280 {strides = array<i32>} : memref<256x1024xbf16, #tpu.memory_space<vmem>>, vector<16x384xbf16>,
    %c7_i32 = arith.constant 7 : i32
    %282 = tpu.dynamic_rotate %269 by %c7_i32 dim 1 : vector<16x384xf32>, i32 -> vector<16x384xf32>
    %c2_177 = arith.constant 2 : index
    %c0_178 = arith.constant 0 : index
    %283 = vector.load %arg17[%c2_177, %c0_178] : memref<16x384xf32, #tpu.memory_space<vmem>>, vector<1x384xf32>
    %284 = vector.broadcast %283 : vector<1x384xf32> to vector<16x384xf32>
    %285 = arith.mulf %282, %284 : vector<16x384xf32>
    %286 = arith.truncf %285 : vector<16x384xf32> to vector<16x384xbf16>
    %c32_179 = arith.constant 32 : index
    %c0_180 = arith.constant 0 : index
    %287 = vector.load %arg23[%c32_179, %c0_180] : memref<256x1024xbf16, #tpu.memory_space<vmem>>, vector<16x384xbf16>
    tpu.vector_store %arg23[%c32_179, %c0_180], %286 {strides = array<i32>} : memref<256x1024xbf16, #tpu.memory_space<vmem>>, vector<16x384xbf16>,
    %c6_i32 = arith.constant 6 : i32
    %288 = tpu.dynamic_rotate %269 by %c6_i32 dim 1 : vector<16x384xf32>, i32 -> vector<16x384xf32>
    %c3_181 = arith.constant 3 : index
    %c0_182 = arith.constant 0 : index
    %289 = vector.load %arg17[%c3_181, %c0_182] : memref<16x384xf32, #tpu.memory_space<vmem>>, vector<1x384xf32>
    %290 = vector.broadcast %289 : vector<1x384xf32> to vector<16x384xf32>
    %291 = arith.mulf %288, %290 : vector<16x384xf32>
    %292 = arith.truncf %291 : vector<16x384xf32> to vector<16x384xbf16>
    %c48_183 = arith.constant 48 : index
    %c0_184 = arith.constant 0 : index
    %293 = vector.load %arg23[%c48_183, %c0_184] : memref<256x1024xbf16, #tpu.memory_space<vmem>>, vector<16x384xbf16>
    tpu.vector_store %arg23[%c48_183, %c0_184], %292 {strides = array<i32>} : memref<256x1024xbf16, #tpu.memory_space<vmem>>, vector<16x384xbf16>,
    %c1_i32_185 = arith.constant 1 : i32
    %294 = tpu.dynamic_rotate %269 by %c1_i32_185 dim 1 : vector<16x384xf32>, i32 -> vector<16x384xf32>
    %c4_186 = arith.constant 4 : index
    %c0_187 = arith.constant 0 : index
    %295 = vector.load %arg17[%c4_186, %c0_187] : memref<16x384xf32, #tpu.memory_space<vmem>>, vector<1x384xf32>
    %296 = vector.broadcast %295 : vector<1x384xf32> to vector<16x384xf32>
    %297 = arith.mulf %294, %296 : vector<16x384xf32>
    %298 = arith.truncf %297 : vector<16x384xf32> to vector<16x384xbf16>
    %c64_188 = arith.constant 64 : index
    %c0_189 = arith.constant 0 : index
    %299 = vector.load %arg23[%c64_188, %c0_189] : memref<256x1024xbf16, #tpu.memory_space<vmem>>, vector<16x384xbf16>
    tpu.vector_store %arg23[%c64_188, %c0_189], %298 {strides = array<i32>} : memref<256x1024xbf16, #tpu.memory_space<vmem>>, vector<16x384xbf16>,
    %c5_190 = arith.constant 5 : index
    %c0_191 = arith.constant 0 : index
    %300 = vector.load %arg17[%c5_190, %c0_191] : memref<16x384xf32, #tpu.memory_space<vmem>>, vector<1x384xf32>
    %301 = vector.broadcast %300 : vector<1x384xf32> to vector<16x384xf32>
    %302 = arith.mulf %269, %301 : vector<16x384xf32>
    %303 = arith.truncf %302 : vector<16x384xf32> to vector<16x384xbf16>
    %c80_192 = arith.constant 80 : index
    %c0_193 = arith.constant 0 : index
    %304 = vector.load %arg23[%c80_192, %c0_193] : memref<256x1024xbf16, #tpu.memory_space<vmem>>, vector<16x384xbf16>
    tpu.vector_store %arg23[%c80_192, %c0_193], %303 {strides = array<i32>} : memref<256x1024xbf16, #tpu.memory_space<vmem>>, vector<16x384xbf16>,
    %c383_i32 = arith.constant 383 : i32
    %305 = tpu.dynamic_rotate %269 by %c383_i32 dim 1 : vector<16x384xf32>, i32 -> vector<16x384xf32>
    %c6_194 = arith.constant 6 : index
    %c0_195 = arith.constant 0 : index
    %306 = vector.load %arg17[%c6_194, %c0_195] : memref<16x384xf32, #tpu.memory_space<vmem>>, vector<1x384xf32>
    %307 = vector.broadcast %306 : vector<1x384xf32> to vector<16x384xf32>
    %308 = arith.mulf %305, %307 : vector<16x384xf32>
    %309 = arith.truncf %308 : vector<16x384xf32> to vector<16x384xbf16>
    %c96_196 = arith.constant 96 : index
    %c0_197 = arith.constant 0 : index
    %310 = vector.load %arg23[%c96_196, %c0_197] : memref<256x1024xbf16, #tpu.memory_space<vmem>>, vector<16x384xbf16>
    tpu.vector_store %arg23[%c96_196, %c0_197], %309 {strides = array<i32>} : memref<256x1024xbf16, #tpu.memory_space<vmem>>, vector<16x384xbf16>,
    %c382_i32 = arith.constant 382 : i32
    %311 = tpu.dynamic_rotate %269 by %c382_i32 dim 1 : vector<16x384xf32>, i32 -> vector<16x384xf32>
    %c7_198 = arith.constant 7 : index
    %c0_199 = arith.constant 0 : index
    %312 = vector.load %arg17[%c7_198, %c0_199] : memref<16x384xf32, #tpu.memory_space<vmem>>, vector<1x384xf32>
    %313 = vector.broadcast %312 : vector<1x384xf32> to vector<16x384xf32>
    %314 = arith.mulf %311, %313 : vector<16x384xf32>
    %315 = arith.truncf %314 : vector<16x384xf32> to vector<16x384xbf16>
    %c112_200 = arith.constant 112 : index
    %c0_201 = arith.constant 0 : index
    %316 = vector.load %arg23[%c112_200, %c0_201] : memref<256x1024xbf16, #tpu.memory_space<vmem>>, vector<16x384xbf16>
    tpu.vector_store %arg23[%c112_200, %c0_201], %315 {strides = array<i32>} : memref<256x1024xbf16, #tpu.memory_space<vmem>>, vector<16x384xbf16>,
    %c377_i32 = arith.constant 377 : i32
    %317 = tpu.dynamic_rotate %269 by %c377_i32 dim 1 : vector<16x384xf32>, i32 -> vector<16x384xf32>
    %c8_202 = arith.constant 8 : index
    %c0_203 = arith.constant 0 : index
    %318 = vector.load %arg17[%c8_202, %c0_203] : memref<16x384xf32, #tpu.memory_space<vmem>>, vector<1x384xf32>
    %319 = vector.broadcast %318 : vector<1x384xf32> to vector<16x384xf32>
    %320 = arith.mulf %317, %319 : vector<16x384xf32>
    %321 = arith.truncf %320 : vector<16x384xf32> to vector<16x384xbf16>
    %c128_204 = arith.constant 128 : index
    %c0_205 = arith.constant 0 : index
    %322 = vector.load %arg23[%c128_204, %c0_205] : memref<256x1024xbf16, #tpu.memory_space<vmem>>, vector<16x384xbf16>
    tpu.vector_store %arg23[%c128_204, %c0_205], %321 {strides = array<i32>} : memref<256x1024xbf16, #tpu.memory_space<vmem>>, vector<16x384xbf16>,
    %c376_i32 = arith.constant 376 : i32
    %323 = tpu.dynamic_rotate %269 by %c376_i32 dim 1 : vector<16x384xf32>, i32 -> vector<16x384xf32>
    %c9_206 = arith.constant 9 : index
    %c0_207 = arith.constant 0 : index
    %324 = vector.load %arg17[%c9_206, %c0_207] : memref<16x384xf32, #tpu.memory_space<vmem>>, vector<1x384xf32>
    %325 = vector.broadcast %324 : vector<1x384xf32> to vector<16x384xf32>
    %326 = arith.mulf %323, %325 : vector<16x384xf32>
    %327 = arith.truncf %326 : vector<16x384xf32> to vector<16x384xbf16>
    %c144_208 = arith.constant 144 : index
    %c0_209 = arith.constant 0 : index
    %328 = vector.load %arg23[%c144_208, %c0_209] : memref<256x1024xbf16, #tpu.memory_space<vmem>>, vector<16x384xbf16>
    tpu.vector_store %arg23[%c144_208, %c0_209], %327 {strides = array<i32>} : memref<256x1024xbf16, #tpu.memory_space<vmem>>, vector<16x384xbf16>,
    %c375_i32 = arith.constant 375 : i32
    %329 = tpu.dynamic_rotate %269 by %c375_i32 dim 1 : vector<16x384xf32>, i32 -> vector<16x384xf32>
    %c10_210 = arith.constant 10 : index
    %c0_211 = arith.constant 0 : index
    %330 = vector.load %arg17[%c10_210, %c0_211] : memref<16x384xf32, #tpu.memory_space<vmem>>, vector<1x384xf32>
    %331 = vector.broadcast %330 : vector<1x384xf32> to vector<16x384xf32>
    %332 = arith.mulf %329, %331 : vector<16x384xf32>
    %333 = arith.truncf %332 : vector<16x384xf32> to vector<16x384xbf16>
    %c160_212 = arith.constant 160 : index
    %c0_213 = arith.constant 0 : index
    %334 = vector.load %arg23[%c160_212, %c0_213] : memref<256x1024xbf16, #tpu.memory_space<vmem>>, vector<16x384xbf16>
    tpu.vector_store %arg23[%c160_212, %c0_213], %333 {strides = array<i32>} : memref<256x1024xbf16, #tpu.memory_space<vmem>>, vector<16x384xbf16>,
    %c374_i32 = arith.constant 374 : i32
    %335 = tpu.dynamic_rotate %269 by %c374_i32 dim 1 : vector<16x384xf32>, i32 -> vector<16x384xf32>
    %c11_214 = arith.constant 11 : index
    %c0_215 = arith.constant 0 : index
    %336 = vector.load %arg17[%c11_214, %c0_215] : memref<16x384xf32, #tpu.memory_space<vmem>>, vector<1x384xf32>
    %337 = vector.broadcast %336 : vector<1x384xf32> to vector<16x384xf32>
    %338 = arith.mulf %335, %337 : vector<16x384xf32>
    %339 = arith.truncf %338 : vector<16x384xf32> to vector<16x384xbf16>
    %c176_216 = arith.constant 176 : index
    %c0_217 = arith.constant 0 : index
    %340 = vector.load %arg23[%c176_216, %c0_217] : memref<256x1024xbf16, #tpu.memory_space<vmem>>, vector<16x384xbf16>
    tpu.vector_store %arg23[%c176_216, %c0_217], %339 {strides = array<i32>} : memref<256x1024xbf16, #tpu.memory_space<vmem>>, vector<16x384xbf16>,
    %c369_i32 = arith.constant 369 : i32
    %341 = tpu.dynamic_rotate %269 by %c369_i32 dim 1 : vector<16x384xf32>, i32 -> vector<16x384xf32>
    %c12_218 = arith.constant 12 : index
    %c0_219 = arith.constant 0 : index
    %342 = vector.load %arg17[%c12_218, %c0_219] : memref<16x384xf32, #tpu.memory_space<vmem>>, vector<1x384xf32>
    %343 = vector.broadcast %342 : vector<1x384xf32> to vector<16x384xf32>
    %344 = arith.mulf %341, %343 : vector<16x384xf32>
    %345 = arith.truncf %344 : vector<16x384xf32> to vector<16x384xbf16>
    %c192_220 = arith.constant 192 : index
    %c0_221 = arith.constant 0 : index
    %346 = vector.load %arg23[%c192_220, %c0_221] : memref<256x1024xbf16, #tpu.memory_space<vmem>>, vector<16x384xbf16>
    tpu.vector_store %arg23[%c192_220, %c0_221], %345 {strides = array<i32>} : memref<256x1024xbf16, #tpu.memory_space<vmem>>, vector<16x384xbf16>,
    %c368_i32 = arith.constant 368 : i32
    %347 = tpu.dynamic_rotate %269 by %c368_i32 dim 1 : vector<16x384xf32>, i32 -> vector<16x384xf32>
    %c13_222 = arith.constant 13 : index
    %c0_223 = arith.constant 0 : index
    %348 = vector.load %arg17[%c13_222, %c0_223] : memref<16x384xf32, #tpu.memory_space<vmem>>, vector<1x384xf32>
    %349 = vector.broadcast %348 : vector<1x384xf32> to vector<16x384xf32>
    %350 = arith.mulf %347, %349 : vector<16x384xf32>
    %351 = arith.truncf %350 : vector<16x384xf32> to vector<16x384xbf16>
    %c208_224 = arith.constant 208 : index
    %c0_225 = arith.constant 0 : index
    %352 = vector.load %arg23[%c208_224, %c0_225] : memref<256x1024xbf16, #tpu.memory_space<vmem>>, vector<16x384xbf16>
    tpu.vector_store %arg23[%c208_224, %c0_225], %351 {strides = array<i32>} : memref<256x1024xbf16, #tpu.memory_space<vmem>>, vector<16x384xbf16>,
    %c367_i32 = arith.constant 367 : i32
    %353 = tpu.dynamic_rotate %269 by %c367_i32 dim 1 : vector<16x384xf32>, i32 -> vector<16x384xf32>
    %c14_226 = arith.constant 14 : index
    %c0_227 = arith.constant 0 : index
    %354 = vector.load %arg17[%c14_226, %c0_227] : memref<16x384xf32, #tpu.memory_space<vmem>>, vector<1x384xf32>
    %355 = vector.broadcast %354 : vector<1x384xf32> to vector<16x384xf32>
    %356 = arith.mulf %353, %355 : vector<16x384xf32>
    %357 = arith.truncf %356 : vector<16x384xf32> to vector<16x384xbf16>
    %c224_228 = arith.constant 224 : index
    %c0_229 = arith.constant 0 : index
    %358 = vector.load %arg23[%c224_228, %c0_229] : memref<256x1024xbf16, #tpu.memory_space<vmem>>, vector<16x384xbf16>
    tpu.vector_store %arg23[%c224_228, %c0_229], %357 {strides = array<i32>} : memref<256x1024xbf16, #tpu.memory_space<vmem>>, vector<16x384xbf16>,
    %c366_i32 = arith.constant 366 : i32
    %359 = tpu.dynamic_rotate %269 by %c366_i32 dim 1 : vector<16x384xf32>, i32 -> vector<16x384xf32>
    %c15_230 = arith.constant 15 : index
    %c0_231 = arith.constant 0 : index
    %360 = vector.load %arg17[%c15_230, %c0_231] : memref<16x384xf32, #tpu.memory_space<vmem>>, vector<1x384xf32>
    %361 = vector.broadcast %360 : vector<1x384xf32> to vector<16x384xf32>
    %362 = arith.mulf %359, %361 : vector<16x384xf32>
    %363 = arith.truncf %362 : vector<16x384xf32> to vector<16x384xbf16>
    %c240_232 = arith.constant 240 : index
    %c0_233 = arith.constant 0 : index
    %364 = vector.load %arg23[%c240_232, %c0_233] : memref<256x1024xbf16, #tpu.memory_space<vmem>>, vector<16x384xbf16>
    tpu.vector_store %arg23[%c240_232, %c0_233], %363 {strides = array<i32>} : memref<256x1024xbf16, #tpu.memory_space<vmem>>, vector<16x384xbf16>,
    %c0_234 = arith.constant 0 : index
    %c0_235 = arith.constant 0 : index
    %365 = vector.load %arg23[%c0_234, %c0_235] : memref<256x1024xbf16, #tpu.memory_space<vmem>>, vector<256x128xbf16>
    %c0_236 = arith.constant 0 : index
    %c0_237 = arith.constant 0 : index
    %366 = vector.load %arg7[%c0_236, %c0_237] : memref<16x256xbf16, #tpu.memory_space<vmem>>, vector<16x256xbf16>
    %cst_238 = arith.constant dense<0.000000e+00> : vector<16x128xf32>
    %367 = tpu.matmul %366, %365, %cst_238 {dimension_numbers = #tpu.dot_dimension_numbers<[1], [0], [0], [1], [0, 0, 1, 1], [], []>} : vector<16x256xbf16>, vector<256x128xbf16>, vector<16x128xf32> -> vector<16x128xf32>
    %c0_239 = arith.constant 0 : index
    %c0_240 = arith.constant 0 : index
    %368 = vector.load %arg19[%c0_239, %c0_240] : memref<128x32xbf16, #tpu.memory_space<vmem>>, vector<128x32xbf16>
    %369 = arith.truncf %367 : vector<16x128xf32> to vector<16x128xbf16>
    %cst_241 = arith.constant dense<0.000000e+00> : vector<16x32xf32>
    %370 = tpu.matmul %369, %368, %cst_241 {dimension_numbers = #tpu.dot_dimension_numbers<[1], [0], [0], [1], [0, 0, 1, 1], [], []>} : vector<16x128xbf16>, vector<128x32xbf16>, vector<16x32xf32> -> vector<16x32xf32>
    %c0_242 = arith.constant 0 : index
    %c0_243 = arith.constant 0 : index
    %371 = vector.load %arg8[%c0_242, %c0_243] : memref<16x1xf32, #tpu.memory_space<vmem>>, vector<16x1xf32>
    %c0_244 = arith.constant 0 : index
    %c0_245 = arith.constant 0 : index
    %372 = vector.load %arg9[%c0_244, %c0_245] : memref<16x1xf32, #tpu.memory_space<vmem>>, vector<16x1xf32>
    %cst_246 = arith.constant dense<0.000000e+00> : vector<16xf32>
    %373 = vector.multi_reduction <add>, %370, %cst_246 [1] : vector<16x32xf32> to vector<16xf32>
    %374 = vector.shape_cast %373 : vector<16xf32> to vector<16x1xf32>
    %cst_247 = arith.constant 3.200000e+01 : f32
    %375 = vector.broadcast %cst_247 : f32 to vector<16x1xf32>
    %376 = arith.divf %374, %375 : vector<16x1xf32>
    %377 = vector.broadcast %376 : vector<16x1xf32> to vector<16x32xf32>
    %378 = arith.subf %370, %377 : vector<16x32xf32>
    %379 = arith.mulf %378, %378 : vector<16x32xf32>
    %cst_248 = arith.constant dense<0.000000e+00> : vector<16xf32>
    %380 = vector.multi_reduction <add>, %379, %cst_248 [1] : vector<16x32xf32> to vector<16xf32>
    %381 = vector.shape_cast %380 : vector<16xf32> to vector<16x1xf32>
    %cst_249 = arith.constant 3.200000e+01 : f32
    %382 = vector.broadcast %cst_249 : f32 to vector<16x1xf32>
    %383 = arith.divf %381, %382 : vector<16x1xf32>
    %384 = vector.broadcast %376 : vector<16x1xf32> to vector<16x32xf32>
    %385 = arith.subf %370, %384 : vector<16x32xf32>
    %cst_250 = arith.constant 9.99999974E-6 : f32
    %386 = vector.broadcast %cst_250 : f32 to vector<16x1xf32>
    %387 = arith.addf %383, %386 : vector<16x1xf32>
    %388 = math.rsqrt %387 : vector<16x1xf32>
    %389 = vector.broadcast %388 : vector<16x1xf32> to vector<16x32xf32>
    %390 = arith.mulf %385, %389 : vector<16x32xf32>
    %391 = vector.broadcast %371 : vector<16x1xf32> to vector<16x32xf32>
    %392 = arith.mulf %390, %391 : vector<16x32xf32>
    %393 = vector.broadcast %372 : vector<16x1xf32> to vector<16x32xf32>
    %394 = arith.addf %392, %393 : vector<16x32xf32>
    %cst_251 = arith.constant 0.000000e+00 : f32
    %395 = vector.broadcast %cst_251 : f32 to vector<16x32xf32>
    %396 = arith.cmpf ogt, %394, %395 : vector<16x32xf32>
    %cst_252 = arith.constant 2.000000e-01 : f32
    %397 = vector.broadcast %cst_252 : f32 to vector<16x32xf32>
    %398 = arith.mulf %397, %394 : vector<16x32xf32>
    %399 = arith.select %396, %394, %398 : vector<16x32xi1>, vector<16x32xf32>
    %c0_253 = arith.constant 0 : index
    %c128_254 = arith.constant 128 : index
    %400 = vector.load %arg23[%c0_253, %c128_254] : memref<256x1024xbf16, #tpu.memory_space<vmem>>, vector<256x128xbf16>
    %c0_255 = arith.constant 0 : index
    %c0_256 = arith.constant 0 : index
    %401 = vector.load %arg12[%c0_255, %c0_256] : memref<16x256xbf16, #tpu.memory_space<vmem>>, vector<16x256xbf16>
    %cst_257 = arith.constant dense<0.000000e+00> : vector<16x128xf32>
    %402 = tpu.matmul %401, %400, %cst_257 {dimension_numbers = #tpu.dot_dimension_numbers<[1], [0], [0], [1], [0, 0, 1, 1], [], []>} : vector<16x256xbf16>, vector<256x128xbf16>, vector<16x128xf32> -> vector<16x128xf32>
    %c0_258 = arith.constant 0 : index
    %c0_259 = arith.constant 0 : index
    %403 = vector.load %arg19[%c0_258, %c0_259] : memref<128x32xbf16, #tpu.memory_space<vmem>>, vector<128x32xbf16>
    %404 = arith.truncf %402 : vector<16x128xf32> to vector<16x128xbf16>
    %cst_260 = arith.constant dense<0.000000e+00> : vector<16x32xf32>
    %405 = tpu.matmul %404, %403, %cst_260 {dimension_numbers = #tpu.dot_dimension_numbers<[1], [0], [0], [1], [0, 0, 1, 1], [], []>} : vector<16x128xbf16>, vector<128x32xbf16>, vector<16x32xf32> -> vector<16x32xf32>
    %c0_261 = arith.constant 0 : index
    %c256 = arith.constant 256 : index
    %406 = vector.load %arg23[%c0_261, %c256] : memref<256x1024xbf16, #tpu.memory_space<vmem>>, vector<256x128xbf16>
    %c0_262 = arith.constant 0 : index
    %c0_263 = arith.constant 0 : index
    %407 = vector.load %arg12[%c0_262, %c0_263] : memref<16x256xbf16, #tpu.memory_space<vmem>>, vector<16x256xbf16>
    %cst_264 = arith.constant dense<0.000000e+00> : vector<16x128xf32>
    %408 = tpu.matmul %407, %406, %cst_264 {dimension_numbers = #tpu.dot_dimension_numbers<[1], [0], [0], [1], [0, 0, 1, 1], [], []>} : vector<16x256xbf16>, vector<256x128xbf16>, vector<16x128xf32> -> vector<16x128xf32>
    %c0_265 = arith.constant 0 : index
    %c0_266 = arith.constant 0 : index
    %409 = vector.load %arg19[%c0_265, %c0_266] : memref<128x32xbf16, #tpu.memory_space<vmem>>, vector<128x32xbf16>
    %410 = arith.truncf %408 : vector<16x128xf32> to vector<16x128xbf16>
    %cst_267 = arith.constant dense<0.000000e+00> : vector<16x32xf32>
    %411 = tpu.matmul %410, %409, %cst_267 {dimension_numbers = #tpu.dot_dimension_numbers<[1], [0], [0], [1], [0, 0, 1, 1], [], []>} : vector<16x128xbf16>, vector<128x32xbf16>, vector<16x32xf32> -> vector<16x32xf32>
    %c0_268 = arith.constant 0 : index
    %c0_269 = arith.constant 0 : index
    %412 = vector.load %arg13[%c0_268, %c0_269] : memref<16x1xf32, #tpu.memory_space<vmem>>, vector<16x1xf32>
    %c0_270 = arith.constant 0 : index
    %c0_271 = arith.constant 0 : index
    %413 = vector.load %arg14[%c0_270, %c0_271] : memref<16x1xf32, #tpu.memory_space<vmem>>, vector<16x1xf32>
    %cst_272 = arith.constant dense<0.000000e+00> : vector<16xf32>
    %414 = vector.multi_reduction <add>, %405, %cst_272 [1] : vector<16x32xf32> to vector<16xf32>
    %415 = vector.shape_cast %414 : vector<16xf32> to vector<16x1xf32>
    %cst_273 = arith.constant 3.200000e+01 : f32
    %416 = vector.broadcast %cst_273 : f32 to vector<16x1xf32>
    %417 = arith.divf %415, %416 : vector<16x1xf32>
    %418 = vector.broadcast %417 : vector<16x1xf32> to vector<16x32xf32>
    %419 = arith.subf %405, %418 : vector<16x32xf32>
    %420 = arith.mulf %419, %419 : vector<16x32xf32>
    %cst_274 = arith.constant dense<0.000000e+00> : vector<16xf32>
    %421 = vector.multi_reduction <add>, %420, %cst_274 [1] : vector<16x32xf32> to vector<16xf32>
    %422 = vector.shape_cast %421 : vector<16xf32> to vector<16x1xf32>
    %cst_275 = arith.constant 3.200000e+01 : f32
    %423 = vector.broadcast %cst_275 : f32 to vector<16x1xf32>
    %424 = arith.divf %422, %423 : vector<16x1xf32>
    %425 = vector.broadcast %417 : vector<16x1xf32> to vector<16x32xf32>
    %426 = arith.subf %405, %425 : vector<16x32xf32>
    %cst_276 = arith.constant 9.99999974E-6 : f32
    %427 = vector.broadcast %cst_276 : f32 to vector<16x1xf32>
    %428 = arith.addf %424, %427 : vector<16x1xf32>
    %429 = math.rsqrt %428 : vector<16x1xf32>
    %430 = vector.broadcast %429 : vector<16x1xf32> to vector<16x32xf32>
    %431 = arith.mulf %426, %430 : vector<16x32xf32>
    %432 = vector.broadcast %412 : vector<16x1xf32> to vector<16x32xf32>
    %433 = arith.mulf %431, %432 : vector<16x32xf32>
    %434 = vector.broadcast %413 : vector<16x1xf32> to vector<16x32xf32>
    %435 = arith.addf %433, %434 : vector<16x32xf32>
    %cst_277 = arith.constant 0.000000e+00 : f32
    %436 = vector.broadcast %cst_277 : f32 to vector<16x32xf32>
    %437 = arith.cmpf ogt, %435, %436 : vector<16x32xf32>
    %cst_278 = arith.constant 2.000000e-01 : f32
    %438 = vector.broadcast %cst_278 : f32 to vector<16x32xf32>
    %439 = arith.mulf %438, %435 : vector<16x32xf32>
    %440 = arith.select %437, %435, %439 : vector<16x32xi1>, vector<16x32xf32>
    %c0_279 = arith.constant 0 : index
    %c0_280 = arith.constant 0 : index
    %441 = vector.load %arg22[%c0_279, %c0_280] : memref<16x64xf32, #tpu.memory_space<vmem>>, vector<16x32xf32>
    tpu.vector_store %arg22[%c0_279, %c0_280], %440 {strides = array<i32>} : memref<16x64xf32, #tpu.memory_space<vmem>>, vector<16x32xf32>,
    %c0_281 = arith.constant 0 : index
    %c0_282 = arith.constant 0 : index
    %442 = vector.load %arg13[%c0_281, %c0_282] : memref<16x1xf32, #tpu.memory_space<vmem>>, vector<16x1xf32>
    %c0_283 = arith.constant 0 : index
    %c0_284 = arith.constant 0 : index
    %443 = vector.load %arg14[%c0_283, %c0_284] : memref<16x1xf32, #tpu.memory_space<vmem>>, vector<16x1xf32>
    %cst_285 = arith.constant dense<0.000000e+00> : vector<16xf32>
    %444 = vector.multi_reduction <add>, %411, %cst_285 [1] : vector<16x32xf32> to vector<16xf32>
    %445 = vector.shape_cast %444 : vector<16xf32> to vector<16x1xf32>
    %cst_286 = arith.constant 3.200000e+01 : f32
    %446 = vector.broadcast %cst_286 : f32 to vector<16x1xf32>
    %447 = arith.divf %445, %446 : vector<16x1xf32>
    %448 = vector.broadcast %447 : vector<16x1xf32> to vector<16x32xf32>
    %449 = arith.subf %411, %448 : vector<16x32xf32>
    %450 = arith.mulf %449, %449 : vector<16x32xf32>
    %cst_287 = arith.constant dense<0.000000e+00> : vector<16xf32>
    %451 = vector.multi_reduction <add>, %450, %cst_287 [1] : vector<16x32xf32> to vector<16xf32>
    %452 = vector.shape_cast %451 : vector<16xf32> to vector<16x1xf32>
    %cst_288 = arith.constant 3.200000e+01 : f32
    %453 = vector.broadcast %cst_288 : f32 to vector<16x1xf32>
    %454 = arith.divf %452, %453 : vector<16x1xf32>
    %455 = vector.broadcast %447 : vector<16x1xf32> to vector<16x32xf32>
    %456 = arith.subf %411, %455 : vector<16x32xf32>
    %cst_289 = arith.constant 9.99999974E-6 : f32
    %457 = vector.broadcast %cst_289 : f32 to vector<16x1xf32>
    %458 = arith.addf %454, %457 : vector<16x1xf32>
    %459 = math.rsqrt %458 : vector<16x1xf32>
    %460 = vector.broadcast %459 : vector<16x1xf32> to vector<16x32xf32>
    %461 = arith.mulf %456, %460 : vector<16x32xf32>
    %462 = vector.broadcast %442 : vector<16x1xf32> to vector<16x32xf32>
    %463 = arith.mulf %461, %462 : vector<16x32xf32>
    %464 = vector.broadcast %443 : vector<16x1xf32> to vector<16x32xf32>
    %465 = arith.addf %463, %464 : vector<16x32xf32>
    %cst_290 = arith.constant 0.000000e+00 : f32
    %466 = vector.broadcast %cst_290 : f32 to vector<16x32xf32>
    %467 = arith.cmpf ogt, %465, %466 : vector<16x32xf32>
    %cst_291 = arith.constant 2.000000e-01 : f32
    %468 = vector.broadcast %cst_291 : f32 to vector<16x32xf32>
    %469 = arith.mulf %468, %465 : vector<16x32xf32>
    %470 = arith.select %467, %465, %469 : vector<16x32xi1>, vector<16x32xf32>
    %c0_292 = arith.constant 0 : index
    %c32_293 = arith.constant 32 : index
    %471 = vector.load %arg22[%c0_292, %c32_293] : memref<16x64xf32, #tpu.memory_space<vmem>>, vector<16x32xf32>
    tpu.vector_store %arg22[%c0_292, %c32_293], %470 {strides = array<i32>} : memref<16x64xf32, #tpu.memory_space<vmem>>, vector<16x32xf32>,
    %cst_294 = arith.constant 0.000000e+00 : f32
    %472 = vector.broadcast %cst_294 : f32 to vector<16x32xf32>
    %c0_295 = arith.constant 0 : index
    %c32_296 = arith.constant 32 : index
    %473 = vector.load %arg24[%c0_295, %c32_296] : memref<16x64xf32, #tpu.memory_space<vmem>>, vector<16x32xf32>
    tpu.vector_store %arg24[%c0_295, %c32_296], %472 {strides = array<i32>} : memref<16x64xf32, #tpu.memory_space<vmem>>, vector<16x32xf32>,
    %c0_297 = arith.constant 0 : index
    %c0_298 = arith.constant 0 : index
    %474 = vector.load %arg24[%c0_297, %c0_298] : memref<16x64xf32, #tpu.memory_space<vmem>>, vector<16x32xf32>
    tpu.vector_store %arg24[%c0_297, %c0_298], %399 {strides = array<i32>} : memref<16x64xf32, #tpu.memory_space<vmem>>, vector<16x32xf32>,
    %c0_299 = arith.constant 0 : index
    %c0_300 = arith.constant 0 : index
    %475 = vector.load %arg24[%c0_299, %c0_300] : memref<16x64xf32, #tpu.memory_space<vmem>>, vector<16x32xf32>
    %476 = arith.truncf %475 : vector<16x32xf32> to vector<16x32xbf16>
    %c0_301 = arith.constant 0 : index
    %c0_302 = arith.constant 0 : index
    %477 = vector.load %arg23[%c0_301, %c0_302] : memref<256x1024xbf16, #tpu.memory_space<vmem>>, vector<16x32xbf16>
    tpu.vector_store %arg23[%c0_301, %c0_302], %476 {strides = array<i32>} : memref<256x1024xbf16, #tpu.memory_space<vmem>>, vector<16x32xbf16>,
    %c0_303 = arith.constant 0 : index
    %c1_304 = arith.constant 1 : index
    %478 = vector.load %arg24[%c0_303, %c1_304] : memref<16x64xf32, #tpu.memory_space<vmem>>, vector<16x32xf32>
    %479 = arith.truncf %478 : vector<16x32xf32> to vector<16x32xbf16>
    %c16_305 = arith.constant 16 : index
    %c0_306 = arith.constant 0 : index
    %480 = vector.load %arg23[%c16_305, %c0_306] : memref<256x1024xbf16, #tpu.memory_space<vmem>>, vector<16x32xbf16>
    tpu.vector_store %arg23[%c16_305, %c0_306], %479 {strides = array<i32>} : memref<256x1024xbf16, #tpu.memory_space<vmem>>, vector<16x32xbf16>,
    %c0_307 = arith.constant 0 : index
    %c2_308 = arith.constant 2 : index
    %481 = vector.load %arg24[%c0_307, %c2_308] : memref<16x64xf32, #tpu.memory_space<vmem>>, vector<16x32xf32>
    %482 = arith.truncf %481 : vector<16x32xf32> to vector<16x32xbf16>
    %c32_309 = arith.constant 32 : index
    %c0_310 = arith.constant 0 : index
    %483 = vector.load %arg23[%c32_309, %c0_310] : memref<256x1024xbf16, #tpu.memory_space<vmem>>, vector<16x32xbf16>
    tpu.vector_store %arg23[%c32_309, %c0_310], %482 {strides = array<i32>} : memref<256x1024xbf16, #tpu.memory_space<vmem>>, vector<16x32xbf16>,
    %c0_311 = arith.constant 0 : index
    %c3_312 = arith.constant 3 : index
    %484 = vector.load %arg24[%c0_311, %c3_312] : memref<16x64xf32, #tpu.memory_space<vmem>>, vector<16x32xf32>
    %485 = arith.truncf %484 : vector<16x32xf32> to vector<16x32xbf16>
    %c48_313 = arith.constant 48 : index
    %c0_314 = arith.constant 0 : index
    %486 = vector.load %arg23[%c48_313, %c0_314] : memref<256x1024xbf16, #tpu.memory_space<vmem>>, vector<16x32xbf16>
    tpu.vector_store %arg23[%c48_313, %c0_314], %485 {strides = array<i32>} : memref<256x1024xbf16, #tpu.memory_space<vmem>>, vector<16x32xbf16>,
    %c0_315 = arith.constant 0 : index
    %c4_316 = arith.constant 4 : index
    %487 = vector.load %arg24[%c0_315, %c4_316] : memref<16x64xf32, #tpu.memory_space<vmem>>, vector<16x32xf32>
    %488 = arith.truncf %487 : vector<16x32xf32> to vector<16x32xbf16>
    %c64_317 = arith.constant 64 : index
    %c0_318 = arith.constant 0 : index
    %489 = vector.load %arg23[%c64_317, %c0_318] : memref<256x1024xbf16, #tpu.memory_space<vmem>>, vector<16x32xbf16>
    tpu.vector_store %arg23[%c64_317, %c0_318], %488 {strides = array<i32>} : memref<256x1024xbf16, #tpu.memory_space<vmem>>, vector<16x32xbf16>,
    %c0_319 = arith.constant 0 : index
    %c5_320 = arith.constant 5 : index
    %490 = vector.load %arg24[%c0_319, %c5_320] : memref<16x64xf32, #tpu.memory_space<vmem>>, vector<16x32xf32>
    %491 = arith.truncf %490 : vector<16x32xf32> to vector<16x32xbf16>
    %c80_321 = arith.constant 80 : index
    %c0_322 = arith.constant 0 : index
    %492 = vector.load %arg23[%c80_321, %c0_322] : memref<256x1024xbf16, #tpu.memory_space<vmem>>, vector<16x32xbf16>
    tpu.vector_store %arg23[%c80_321, %c0_322], %491 {strides = array<i32>} : memref<256x1024xbf16, #tpu.memory_space<vmem>>, vector<16x32xbf16>,
    %c0_323 = arith.constant 0 : index
    %c6_324 = arith.constant 6 : index
    %493 = vector.load %arg24[%c0_323, %c6_324] : memref<16x64xf32, #tpu.memory_space<vmem>>, vector<16x32xf32>
    %494 = arith.truncf %493 : vector<16x32xf32> to vector<16x32xbf16>
    %c96_325 = arith.constant 96 : index
    %c0_326 = arith.constant 0 : index
    %495 = vector.load %arg23[%c96_325, %c0_326] : memref<256x1024xbf16, #tpu.memory_space<vmem>>, vector<16x32xbf16>
    tpu.vector_store %arg23[%c96_325, %c0_326], %494 {strides = array<i32>} : memref<256x1024xbf16, #tpu.memory_space<vmem>>, vector<16x32xbf16>,
    %c0_327 = arith.constant 0 : index
    %c7_328 = arith.constant 7 : index
    %496 = vector.load %arg24[%c0_327, %c7_328] : memref<16x64xf32, #tpu.memory_space<vmem>>, vector<16x32xf32>
    %497 = arith.truncf %496 : vector<16x32xf32> to vector<16x32xbf16>
    %c112_329 = arith.constant 112 : index
    %c0_330 = arith.constant 0 : index
    %498 = vector.load %arg23[%c112_329, %c0_330] : memref<256x1024xbf16, #tpu.memory_space<vmem>>, vector<16x32xbf16>
    tpu.vector_store %arg23[%c112_329, %c0_330], %497 {strides = array<i32>} : memref<256x1024xbf16, #tpu.memory_space<vmem>>, vector<16x32xbf16>,
    %c0_331 = arith.constant 0 : index
    %c8_332 = arith.constant 8 : index
    %499 = vector.load %arg24[%c0_331, %c8_332] : memref<16x64xf32, #tpu.memory_space<vmem>>, vector<16x32xf32>
    %500 = arith.truncf %499 : vector<16x32xf32> to vector<16x32xbf16>
    %c128_333 = arith.constant 128 : index
    %c0_334 = arith.constant 0 : index
    %501 = vector.load %arg23[%c128_333, %c0_334] : memref<256x1024xbf16, #tpu.memory_space<vmem>>, vector<16x32xbf16>
    tpu.vector_store %arg23[%c128_333, %c0_334], %500 {strides = array<i32>} : memref<256x1024xbf16, #tpu.memory_space<vmem>>, vector<16x32xbf16>,
    %c0_335 = arith.constant 0 : index
    %c9_336 = arith.constant 9 : index
    %502 = vector.load %arg24[%c0_335, %c9_336] : memref<16x64xf32, #tpu.memory_space<vmem>>, vector<16x32xf32>
    %503 = arith.truncf %502 : vector<16x32xf32> to vector<16x32xbf16>
    %c144_337 = arith.constant 144 : index
    %c0_338 = arith.constant 0 : index
    %504 = vector.load %arg23[%c144_337, %c0_338] : memref<256x1024xbf16, #tpu.memory_space<vmem>>, vector<16x32xbf16>
    tpu.vector_store %arg23[%c144_337, %c0_338], %503 {strides = array<i32>} : memref<256x1024xbf16, #tpu.memory_space<vmem>>, vector<16x32xbf16>,
    %c0_339 = arith.constant 0 : index
    %c10_340 = arith.constant 10 : index
    %505 = vector.load %arg24[%c0_339, %c10_340] : memref<16x64xf32, #tpu.memory_space<vmem>>, vector<16x32xf32>
    %506 = arith.truncf %505 : vector<16x32xf32> to vector<16x32xbf16>
    %c160_341 = arith.constant 160 : index
    %c0_342 = arith.constant 0 : index
    %507 = vector.load %arg23[%c160_341, %c0_342] : memref<256x1024xbf16, #tpu.memory_space<vmem>>, vector<16x32xbf16>
    tpu.vector_store %arg23[%c160_341, %c0_342], %506 {strides = array<i32>} : memref<256x1024xbf16, #tpu.memory_space<vmem>>, vector<16x32xbf16>,
    %c0_343 = arith.constant 0 : index
    %c11_344 = arith.constant 11 : index
    %508 = vector.load %arg24[%c0_343, %c11_344] : memref<16x64xf32, #tpu.memory_space<vmem>>, vector<16x32xf32>
    %509 = arith.truncf %508 : vector<16x32xf32> to vector<16x32xbf16>
    %c176_345 = arith.constant 176 : index
    %c0_346 = arith.constant 0 : index
    %510 = vector.load %arg23[%c176_345, %c0_346] : memref<256x1024xbf16, #tpu.memory_space<vmem>>, vector<16x32xbf16>
    tpu.vector_store %arg23[%c176_345, %c0_346], %509 {strides = array<i32>} : memref<256x1024xbf16, #tpu.memory_space<vmem>>, vector<16x32xbf16>,
    %c0_347 = arith.constant 0 : index
    %c12_348 = arith.constant 12 : index
    %511 = vector.load %arg24[%c0_347, %c12_348] : memref<16x64xf32, #tpu.memory_space<vmem>>, vector<16x32xf32>
    %512 = arith.truncf %511 : vector<16x32xf32> to vector<16x32xbf16>
    %c192_349 = arith.constant 192 : index
    %c0_350 = arith.constant 0 : index
    %513 = vector.load %arg23[%c192_349, %c0_350] : memref<256x1024xbf16, #tpu.memory_space<vmem>>, vector<16x32xbf16>
    tpu.vector_store %arg23[%c192_349, %c0_350], %512 {strides = array<i32>} : memref<256x1024xbf16, #tpu.memory_space<vmem>>, vector<16x32xbf16>,
    %c0_351 = arith.constant 0 : index
    %c13_352 = arith.constant 13 : index
    %514 = vector.load %arg24[%c0_351, %c13_352] : memref<16x64xf32, #tpu.memory_space<vmem>>, vector<16x32xf32>
    %515 = arith.truncf %514 : vector<16x32xf32> to vector<16x32xbf16>
    %c208_353 = arith.constant 208 : index
    %c0_354 = arith.constant 0 : index
    %516 = vector.load %arg23[%c208_353, %c0_354] : memref<256x1024xbf16, #tpu.memory_space<vmem>>, vector<16x32xbf16>
    tpu.vector_store %arg23[%c208_353, %c0_354], %515 {strides = array<i32>} : memref<256x1024xbf16, #tpu.memory_space<vmem>>, vector<16x32xbf16>,
    %c0_355 = arith.constant 0 : index
    %c14_356 = arith.constant 14 : index
    %517 = vector.load %arg24[%c0_355, %c14_356] : memref<16x64xf32, #tpu.memory_space<vmem>>, vector<16x32xf32>
    %518 = arith.truncf %517 : vector<16x32xf32> to vector<16x32xbf16>
    %c224_357 = arith.constant 224 : index
    %c0_358 = arith.constant 0 : index
    %519 = vector.load %arg23[%c224_357, %c0_358] : memref<256x1024xbf16, #tpu.memory_space<vmem>>, vector<16x32xbf16>
    tpu.vector_store %arg23[%c224_357, %c0_358], %518 {strides = array<i32>} : memref<256x1024xbf16, #tpu.memory_space<vmem>>, vector<16x32xbf16>,
    %c0_359 = arith.constant 0 : index
    %c15_360 = arith.constant 15 : index
    %520 = vector.load %arg24[%c0_359, %c15_360] : memref<16x64xf32, #tpu.memory_space<vmem>>, vector<16x32xf32>
    %521 = arith.truncf %520 : vector<16x32xf32> to vector<16x32xbf16>
    %c240_361 = arith.constant 240 : index
    %c0_362 = arith.constant 0 : index
    %522 = vector.load %arg23[%c240_361, %c0_362] : memref<256x1024xbf16, #tpu.memory_space<vmem>>, vector<16x32xbf16>
    tpu.vector_store %arg23[%c240_361, %c0_362], %521 {strides = array<i32>} : memref<256x1024xbf16, #tpu.memory_space<vmem>>, vector<16x32xbf16>,
    %c0_363 = arith.constant 0 : index
    %c0_364 = arith.constant 0 : index
    %523 = vector.load %arg10[%c0_363, %c0_364] : memref<16x256xbf16, #tpu.memory_space<vmem>>, vector<16x256xbf16>
    %c0_365 = arith.constant 0 : index
    %c0_366 = arith.constant 0 : index
    %524 = vector.load %arg23[%c0_365, %c0_366] : memref<256x1024xbf16, #tpu.memory_space<vmem>>, vector<256x32xbf16>
    %cst_367 = arith.constant dense<0.000000e+00> : vector<16x32xf32>
    %525 = tpu.matmul %523, %524, %cst_367 {dimension_numbers = #tpu.dot_dimension_numbers<[1], [0], [0], [1], [0, 0, 1, 1], [], []>} : vector<16x256xbf16>, vector<256x32xbf16>, vector<16x32xf32> -> vector<16x32xf32>
    %c0_368 = arith.constant 0 : index
    %c0_369 = arith.constant 0 : index
    %526 = vector.load %arg21[%c0_368, %c0_369] : memref<16x32xf32, #tpu.memory_space<vmem>>, vector<16x32xf32>
    tpu.vector_store %arg21[%c0_368, %c0_369], %525 {strides = array<i32>} : memref<16x32xf32, #tpu.memory_space<vmem>>, vector<16x32xf32>,
    return
  }
  func.func @transform_0(%arg0: i32) -> (i32, i32) {
    %c0_i32 = arith.constant 0 : i32
    %c0_i32_0 = arith.constant 0 : i32
    %c0_i32_1 = arith.constant 0 : i32
    return %c0_i32, %c0_i32_0 : i32, i32
  }
  func.func @transform_1(%arg0: i32) -> (i32, i32) {
    %c0_i32 = arith.constant 0 : i32
    %c0_i32_0 = arith.constant 0 : i32
    %c0_i32_1 = arith.constant 0 : i32
    return %c0_i32, %c0_i32_0 : i32, i32
  }
  func.func @transform_2(%arg0: i32) -> (i32, i32) {
    %c0_i32 = arith.constant 0 : i32
    %c0_i32_0 = arith.constant 0 : i32
    %c0_i32_1 = arith.constant 0 : i32
    return %c0_i32, %c0_i32_0 : i32, i32
  }
  func.func @transform_3(%arg0: i32) -> (i32, i32) {
    %c0_i32 = arith.constant 0 : i32
    %c0_i32_0 = arith.constant 0 : i32
    %c0_i32_1 = arith.constant 0 : i32
    return %c0_i32, %c0_i32_0 : i32, i32
  }
  func.func @transform_4(%arg0: i32) -> (i32, i32) {
    %c0_i32 = arith.constant 0 : i32
    %c0_i32_0 = arith.constant 0 : i32
    %c0_i32_1 = arith.constant 0 : i32
    return %c0_i32, %c0_i32_0 : i32, i32
  }
  func.func @transform_5(%arg0: i32) -> (i32, i32) {
    %c0_i32 = arith.constant 0 : i32
    %c0_i32_0 = arith.constant 0 : i32
    %c0_i32_1 = arith.constant 0 : i32
    return %c0_i32, %c0_i32_0 : i32, i32
  }
  func.func @transform_6(%arg0: i32) -> (i32, i32) {
    %c0_i32 = arith.constant 0 : i32
    %c0_i32_0 = arith.constant 0 : i32
    %c0_i32_1 = arith.constant 0 : i32
    return %c0_i32, %c0_i32_0 : i32, i32
  }
  func.func @transform_7(%arg0: i32) -> (i32, i32) {
    %c0_i32 = arith.constant 0 : i32
    %c0_i32_0 = arith.constant 0 : i32
    %c0_i32_1 = arith.constant 0 : i32
    return %c0_i32, %c0_i32_0 : i32, i32
  }
  func.func @transform_8(%arg0: i32) -> (i32, i32) {
    %c0_i32 = arith.constant 0 : i32
    %c0_i32_0 = arith.constant 0 : i32
    %c0_i32_1 = arith.constant 0 : i32
    return %c0_i32, %c0_i32_0 : i32, i32
  }
  func.func @transform_9(%arg0: i32) -> (i32, i32) {
    %c0_i32 = arith.constant 0 : i32
    %c0_i32_0 = arith.constant 0 : i32
    %c0_i32_1 = arith.constant 0 : i32
    return %c0_i32, %c0_i32_0 : i32, i32
  }
  func.func @transform_10(%arg0: i32) -> (i32, i32) {
    %c0_i32 = arith.constant 0 : i32
    %c0_i32_0 = arith.constant 0 : i32
    %c0_i32_1 = arith.constant 0 : i32
    return %c0_i32, %c0_i32_0 : i32, i32
  }
  func.func @transform_11(%arg0: i32) -> (i32, i32) {
    %c0_i32 = arith.constant 0 : i32
    %c0_i32_0 = arith.constant 0 : i32
    %c0_i32_1 = arith.constant 0 : i32
    return %c0_i32, %c0_i32_0 : i32, i32
  }
  func.func @transform_12(%arg0: i32) -> (i32, i32) {
    %c0_i32 = arith.constant 0 : i32
    %c0_i32_0 = arith.constant 0 : i32
    %c0_i32_1 = arith.constant 0 : i32
    return %c0_i32, %c0_i32_0 : i32, i32
  }
  func.func @transform_13(%arg0: i32) -> (i32, i32) {
    %c0_i32 = arith.constant 0 : i32
    %c0_i32_0 = arith.constant 0 : i32
    %c0_i32_1 = arith.constant 0 : i32
    return %c0_i32, %c0_i32_0 : i32, i32
  }
  func.func @transform_14(%arg0: i32) -> (i32, i32) {
    %c0_i32 = arith.constant 0 : i32
    %c0_i32_0 = arith.constant 0 : i32
    %c0_i32_1 = arith.constant 0 : i32
    return %c0_i32, %c0_i32_0 : i32, i32
  }
  func.func @transform_15(%arg0: i32) -> (i32, i32) {
    %c0_i32 = arith.constant 0 : i32
    %c0_i32_0 = arith.constant 0 : i32
    %c0_i32_1 = arith.constant 0 : i32
    return %c0_i32, %c0_i32_0 : i32, i32
  }
  func.func @transform_16(%arg0: i32) -> (i32, i32) {
    %c0_i32 = arith.constant 0 : i32
    %c0_i32_0 = arith.constant 0 : i32
    %c0_i32_1 = arith.constant 0 : i32
    return %c0_i32, %c0_i32_0 : i32, i32
  }
  func.func @transform_17(%arg0: i32) -> (i32, i32) {
    %c0_i32 = arith.constant 0 : i32
    %c0_i32_0 = arith.constant 0 : i32
    %c0_i32_1 = arith.constant 0 : i32
    return %c0_i32, %c0_i32_0 : i32, i32
  }
  func.func @transform_18(%arg0: i32) -> (i32, i32) {
    %c0_i32 = arith.constant 0 : i32
    %c0_i32_0 = arith.constant 0 : i32
    %c0_i32_1 = arith.constant 0 : i32
    return %c0_i32, %c0_i32_0 : i32, i32
  }
  func.func @transform_19(%arg0: i32) -> (i32, i32) {
    %c0_i32 = arith.constant 0 : i32
    %c0_i32_0 = arith.constant 0 : i32
    %c0_i32_1 = arith.constant 0 : i32
    return %c0_i32, %c0_i32_0 : i32, i32
  }
  func.func @transform_20(%arg0: i32) -> (i32, i32) {
    %c0_i32 = arith.constant 0 : i32
    %c0_i32_0 = arith.constant 0 : i32
    %c0_i32_1 = arith.constant 0 : i32
    return %c0_i32, %c0_i32_0 : i32, i32
  }
  func.func @transform_21(%arg0: i32) -> (i32, i32) {
    %c0_i32 = arith.constant 0 : i32
    %c0_i32_0 = arith.constant 0 : i32
    %c0_i32_1 = arith.constant 0 : i32
    return %c0_i32, %c0_i32_0 : i32, i32
  }
}

</mosaic_0001>

<bundles_post_ra>
// kernel: multitask_loss_forward.1
= control target key start
LH: loop header
LB: loop body
LE: loop exit
PB: predicated region body
PF: predicated region fallthrough
CT: control target
= control target key end

     0   :  { %s15721_s28 = smov 112   ;;  %s15719_s24 = smov 113   ;;  %v90_v8 = vlaneseq  ;;  %vm1033_vm1 = vcmask 130048   ;;  %s15643_s0 = inlined_call_operand.vmem [shape: f32[16,512], index: 0, kind: input, shape index: {}]   ;;  %s15644_s15 = inlined_call_operand.vmem [shape: f32[16,1024], index: 15, kind: input, shape index: {}]   ;;  %s15645_s14 = inlined_call_operand.vmem [shape: f32[16,512], index: 14, kind: input, shape index: {}]   ;;  %s15646_s1 = inlined_call_operand.vmem [shape: bf16[16,144], index: 1, kind: input, shape index: {}]   ;;  %s15647_s2 = inlined_call_operand.vmem [shape: f32[16,1], index: 2, kind: input, shape index: {}]   ;;  %s15648_s3 = inlined_call_operand.vmem [shape: f32[16,1], index: 3, kind: input, shape index: {}]   ;;  %s15649_s4 = inlined_call_operand.vmem [shape: bf16[16,144], index: 4, kind: input, shape index: {}]   ;;  %s15650_s19 = inlined_call_operand.vmem [shape: f32[16,512], index: 19, kind: output, shape index: {0}]   ;;  %s15651_s10 = inlined_call_operand.vmem [shape: bf16[16,256], index: 10, kind: input, shape index: {}]   ;;  %s15652_s17 = inlined_call_operand.vmem [shape: bf16[512,128], index: 17, kind: input, shape index: {}]   ;;  %s15653_s5 = inlined_call_operand.vmem [shape: bf16[16,256], index: 5, kind: input, shape index: {}]   ;;  %s15654_s16 = inlined_call_operand.vmem [shape: f32[16,384], index: 16, kind: input, shape index: {}]   ;;  %s15655_s6 = inlined_call_operand.vmem [shape: bf16[16,256], index: 6, kind: input, shape index: {}]   ;;  %s15656_s11 = inlined_call_operand.vmem [shape: bf16[16,256], index: 11, kind: input, shape index: {}]   ;;  %s15657_s18 = inlined_call_operand.vmem [shape: bf16[128,32], index: 18, kind: input, shape index: {}]   ;;  %s15658_s7 = inlined_call_operand.vmem [shape: f32[16,1], index: 7, kind: input, shape index: {}]   ;;  %s15659_s8 = inlined_call_operand.vmem [shape: f32[16,1], index: 8, kind: input, shape index: {}]   ;;  %s15660_s9 = inlined_call_operand.vmem [shape: bf16[16,256], index: 9, kind: input, shape index: {}]   ;;  %s15661_s12 = inlined_call_operand.vmem [shape: f32[16,1], index: 12, kind: input, shape index: {}]   ;;  %s15662_s13 = inlined_call_operand.vmem [shape: f32[16,1], index: 13, kind: input, shape index: {}]   ;;  %s15663_s20 = inlined_call_operand.vmem [shape: f32[16,32], index: 20, kind: output, shape index: {1}]   ;;  %s15664_s21 = inlined_call_operand.vmem [shape: f32[16,64], index: 21, kind: output, shape index: {2}]  }
   0x1   :  { %15986 = sst [smem:[#allocation118_spill]] %s15643_s0  ;;  %s15712_s29 = smov 127  }
   0x2   :  { %15987 = sst [smem:[#allocation119_spill]] %s15644_s15  ;;  %s15697_s0 = smov 1   ;;  %v10587_v9 = vshrl.u32 %v90_v8, 7  ;;  %v10599_v12 = vand.u32 127, %v90_v8 }
   0x3   :  { %15988 = sst [smem:[#allocation120_spill]] %s15645_s14  ;;  %s15675_s30 = smov 16  }
   0x4   :  { %15989 = sst [smem:[#allocation121_spill]] %s15646_s1  ;;  %s15673_s27 = smov 111   ;;  %15998 = vst [vmem:[#allocation4_spill] sm:$0xff] %v10599_v12  ;;  %v10602_v14 = vsub.s32 0, %v10587_v9  ;;  %vm654_vm0 = vcmp.lt.s32.totalorder %v10599_v12, 112  ;;  %v10619_v18 = vsub.s32 1, %v10587_v9 }
   0x5   :  { %15990 = sst [smem:[#allocation122_spill]] %s15647_s2  ;;  %s15695_s2 = smov 15   ;;  %vm570_vm2 = vcmp.lt.s32.totalorder %v10599_v12, 113  ;;  %v10677_v54 = vsub.s32 2, %v10587_v9  ;;  %v10680_v55 = vsub.s32 3, %v10587_v9  ;;  %vm486_vm3 = vcmp.lt.s32.totalorder %v10599_v12, 127 }
   0x6   :  { %15991 = sst [smem:[#allocation123_spill]] %s15648_s3  ;;  %s15671_s3 = smov 17   ;;  %15999 = vst [vmem:[#allocation5_spill] sm:$0xff] %v10602_v14  ;;  %16003 = vst [vmem:[#allocation8_spill] sm:$0xff] %v10619_v18  ;;  %vm343_vm4 = vcmp.lt.s32.totalorder %v10599_v12, 1  ;;  %vm259_vm5 = vcmp.lt.s32.totalorder %v10599_v12, 15 }
   0x7   :  { %15992 = sst [smem:[#allocation124_spill]] %s15661_s12  ;;  %16009 = vst [vmem:[#allocation13_spill] sm:$0xff] %v10677_v54  ;;  %16010 = vst [vmem:[#allocation14_spill] sm:$0xff] %v10680_v55  ;;  %vm175_vm6 = vcmp.lt.s32.totalorder %v10599_v12, 16  ;;  %vm92_vm7 = vcmp.lt.s32.totalorder %v10599_v12, 17  ;;  %vm738_vm8 = vcmp.lt.s32.totalorder %v10599_v12, 111 }
   0x8   :  { %15993 = sst [smem:[#allocation125_spill]] %s15662_s13  ;;  %s16070_s14 = smov 15   ;;  %vm3291_vm9 = vcmp.lt.s32.totalorder %v10599_v12, 126  ;;  %vm2722_vm10 = vcmp.lt.s32.totalorder %v10599_v12, 14  ;;  %vm4550_vm11 = vcmp.lt.s32.totalorder %v10599_v12, 94  ;;  %vm4384_vm12 = vcmp.lt.s32.totalorder %v10599_v12, 95 }
   0x9   :  { %15994 = sst [smem:[#allocation126_spill]] %s15663_s20  ;;  %s15757_s25 = smov 14   ;;  %vm4218_vm13 = vcmp.lt.s32.totalorder %v10599_v12, 96  ;;  %vm4052_vm14 = vcmp.lt.s32.totalorder %v10599_v12, 97  ;;  %vm3886_vm15 = vcmp.lt.s32.totalorder %v10599_v12, 110 }
   0xa   :  { %15995 = sst [smem:[#allocation127_spill]] %s15664_s21  ;;  %s15765_s22 = smov 96  }
   0xb   :  { %s15996_s26 = sld [smem:[#allocation118_spill]]  ;;  %s16110_s12 = smov 112  }
   0xc   :  { %s15997_s15 = sld [smem:[#allocation119_spill]]  ;;  %s16112_s13 = smov 113  }
   0xd   :  { %s16002_s23 = sld [smem:[#allocation120_spill]]  ;;  %s10324_s20 = smov 32  }
   0xe   :  { %s16005_s1 = sld [smem:[#allocation121_spill]] }
  0x11   :  { %v10438_v0 = vld [vmem:[%s15996_s26 + $0x8] sm:$0xff]  ;;  %v10443_v1 = vld [vmem:[%s15996_s26] sm:$0xff]  ;;  %v10466_v4 = vld [vmem:[%s15996_s26 + $0x30] sm:$0xff] }
  0x12   :  { %642 = vrot.lane.b32.xlu1 %v10438_v0, %s15721_s28  ;;  %638 = vrot.lane.b32.xlu0 %v10443_v1, %s15721_s28  ;;  %v10452_v2 = vld [vmem:[%s15996_s26 + $0x28] sm:$0xff]  ;;  %v10457_v3 = vld [vmem:[%s15996_s26 + $0x20] sm:$0xff] }
  0x13   :  { %v10471_v5 = vld [vmem:[%s15996_s26 + $0x10] sm:$0xff]  ;;  %v10492_v6 = vld [vmem:[%s15996_s26 + $0x38] sm:$0xff] }
  0x14   :  { %v10497_v7 = vld [vmem:[%s15996_s26 + $0x18] sm:$0xff]  ;;  %v10000_v23 = vld [vmem:[%s16005_s1 + $0x4] ss:$8 sps:$4 sm:$0xff]  }
  0x15   :  { %v8935_v10 = vld [vmem:[%s15997_s15 + $0x41] ss:$8 sm:$0xf]  ;;  %v10611_v17 = vld [vmem:[%s16002_s23 + $0x7] ss:$8 sm:$0xf]  ;;  %8761 = vmatprep.mubr.msk.bf16.mxu0 %vm1033_vm1, %v10000_v23  ;;  %8762 = vmatprep.mubr.msk.bf16.mxu1 %vm1033_vm1, %v10000_v23 }
  0x16   :  { %644 = vrot.lane.b32.xlu1 %v10452_v2, %s15721_s28  ;;  %640 = vrot.lane.b32.xlu0 %v10457_v3, %s15721_s28  ;;  %v8936_v11 = vld [vmem:[%s15997_s15 + $0x41] ss:$8 sm:$0xf0]  ;;  %v669_v19 = vrot.slane %v10611_v17, %v10602_v14  ;;  %v673_v26 = vrot.slane %v10611_v17, %v10619_v18  ;;  %v8925_v32 = vld [vmem:[%s15997_s15 + $0x40] ss:$8 sm:$0xf]  ;;  %v677_v8 = vrot.slane %v10611_v17, %v10677_v54 }
  0x17   :  { %v10604_v15 = vor.u32 %v8936_v11, %v8935_v10  ;;  %v8926_v33 = vld [vmem:[%s15997_s15 + $0x40] ss:$8 sm:$0xf0]  ;;  %v10669_v47 = vld [vmem:[%s16002_s23 + $0x6] ss:$8 sm:$0xf]  ;;  %v681_v10 = vrot.slane %v10611_v17, %v10680_v55 }
  0x18   :  { %v10660_v42 = vor.u32 %v8926_v33, %v8925_v32  ;;  %v585_v50 = vrot.slane %v10669_v47, %v10602_v14  ;;  %v589_v58 = vrot.slane %v10669_v47, %v10619_v18  ;;  %v8698_v11 = vld [vmem:[%s16002_s23 + $0x4] ss:$8 sm:$0xf] }
  0x19   :  { %16000 = vst [vmem:[#allocation6_spill] sm:$0xff] %v10604_v15  ;;  %v3602_v20 = vrot.slane %v10604_v15, %v10602_v14  ;;  %v3606_v27 = vrot.slane %v10604_v15, %v10619_v18  ;;  %v417_v17 = vrot.slane %v8698_v11, %v10602_v14 }
  0x1a   :  { %648 = vrot.lane.b32.xlu1 %v10466_v4, %s15721_s28  ;;  %646 = vrot.lane.b32.xlu0 %v10471_v5, %s15721_s28  ;;  %16006 = vst [vmem:[#allocation10_spill] sm:$0xff] %v10660_v42  ;;  %v3459_v51 = vrot.slane %v10660_v42, %v10602_v14  ;;  %v3463_v59 = vrot.slane %v10660_v42, %v10619_v18 }
  0x1e   :  { %556 = vrot.lane.b32.xlu1 %v10457_v3, %s15719_s24  ;;  %554 = vrot.lane.b32.xlu0 %v10443_v1, %s15719_s24 }
  0x22   :  { %560 = vrot.lane.b32.xlu1 %v10452_v2, %s15719_s24  ;;  %558 = vrot.lane.b32.xlu0 %v10438_v0, %s15719_s24 }
  0x26   :  { %564 = vrot.lane.b32.xlu1 %v10466_v4, %s15719_s24  ;;  %562 = vrot.lane.b32.xlu0 %v10471_v5, %s15719_s24 }
  0x2a   :  { %652 = vrot.lane.b32.xlu1 %v10492_v6, %s15721_s28  ;;  %650 = vrot.lane.b32.xlu0 %v10497_v7, %s15721_s28 }
  0x2e   :  { %472 = vrot.lane.b32.xlu1 %v10457_v3, %s15712_s29  ;;  %470 = vrot.lane.b32.xlu0 %v10443_v1, %s15712_s29 }
  0x32   :  { %476 = vrot.lane.b32.xlu1 %v10452_v2, %s15712_s29  ;;  %474 = vrot.lane.b32.xlu0 %v10438_v0, %s15712_s29 }
  0x36   :  { %480 = vrot.lane.b32.xlu1 %v10466_v4, %s15712_s29  ;;  %478 = vrot.lane.b32.xlu0 %v10471_v5, %s15712_s29 }
  0x3a   :  { %568 = vrot.lane.b32.xlu1 %v10492_v6, %s15719_s24  ;;  %566 = vrot.lane.b32.xlu0 %v10497_v7, %s15719_s24 }
  0x3e   :  { %484 = vrot.lane.b32.xlu1 %v10492_v6, %s15712_s29  ;;  %482 = vrot.lane.b32.xlu0 %v10497_v7, %s15712_s29  ;;  %s16067_s29 = smov 127  }
  0x42   :  { %329 = vrot.lane.b32.xlu1 %v10457_v3, %s15697_s0  ;;  %327 = vrot.lane.b32.xlu0 %v10443_v1, %s15697_s0 }
  0x46   :  { %333 = vrot.lane.b32.xlu1 %v10452_v2, %s15697_s0  ;;  %331 = vrot.lane.b32.xlu0 %v10438_v0, %s15697_s0 }
  0x4a   :  { %341 = vrot.lane.b32.xlu1 %v10492_v6, %s15697_s0  ;;  %339 = vrot.lane.b32.xlu0 %v10497_v7, %s15697_s0 }
  0x4e   :  { %245 = vrot.lane.b32.xlu1 %v10457_v3, %s15695_s2  ;;  %243 = vrot.lane.b32.xlu0 %v10443_v1, %s15695_s2 }
  0x52   :  { %249 = vrot.lane.b32.xlu1 %v10452_v2, %s15695_s2  ;;  %247 = vrot.lane.b32.xlu0 %v10438_v0, %s15695_s2 }
  0x56   :  { %257 = vrot.lane.b32.xlu1 %v10492_v6, %s15695_s2  ;;  %255 = vrot.lane.b32.xlu0 %v10497_v7, %s15695_s2 }
  0x5a   :  { %337 = vrot.lane.b32.xlu1 %v10466_v4, %s15697_s0  ;;  %335 = vrot.lane.b32.xlu0 %v10471_v5, %s15697_s0  ;;  %s10308_s0 = smov 119  }
  0x5e   :  { %161 = vrot.lane.b32.xlu1 %v10457_v3, %s15675_s30  ;;  %159 = vrot.lane.b32.xlu0 %v10443_v1, %s15675_s30 }
  0x62   :  { %165 = vrot.lane.b32.xlu1 %v10452_v2, %s15675_s30  ;;  %163 = vrot.lane.b32.xlu0 %v10438_v0, %s15675_s30 }
  0x66   :  { %173 = vrot.lane.b32.xlu1 %v10492_v6, %s15675_s30  ;;  %171 = vrot.lane.b32.xlu0 %v10497_v7, %s15675_s30 }
  0x6a   :  { %253 = vrot.lane.b32.xlu1 %v10466_v4, %s15695_s2  ;;  %251 = vrot.lane.b32.xlu0 %v10471_v5, %s15695_s2  ;;  %s16065_s2 = sld [smem:[#allocation122_spill]] }
  0x6e   :  { %76 = vrot.lane.b32.xlu1 %v10457_v3, %s15671_s3  ;;  %74 = vrot.lane.b32.xlu0 %v10443_v1, %s15671_s3 }
  0x72   :  { %80 = vrot.lane.b32.xlu1 %v10452_v2, %s15671_s3  ;;  %78 = vrot.lane.b32.xlu0 %v10438_v0, %s15671_s3 }
  0x76   :  { %88 = vrot.lane.b32.xlu1 %v10492_v6, %s15671_s3  ;;  %86 = vrot.lane.b32.xlu0 %v10497_v7, %s15671_s3 }
  0x7a   :  { %169 = vrot.lane.b32.xlu1 %v10466_v4, %s15675_s30  ;;  %167 = vrot.lane.b32.xlu0 %v10471_v5, %s15675_s30  ;;  %s16066_s30 = sld [smem:[#allocation123_spill]] }
  0x7e   :  { %84 = vrot.lane.b32.xlu1 %v10466_v4, %s15671_s3  ;;  %82 = vrot.lane.b32.xlu0 %v10471_v5, %s15671_s3  ;;  %s15763_s3 = smov 94  }
  0x82   :  { %724 = vrot.lane.b32.xlu1 %v10457_v3, %s15673_s27  ;;  %722 = vrot.lane.b32.xlu0 %v10443_v1, %s15673_s27 }
  0x84   :  { %v643_v13 = vpop.permute.xlu1 %642  ;;  %v10606_v16 = vpop.permute.xlu0 %638 }
  0x85   :  { %16001 = vst [vmem:[#allocation7_spill] sm:$0xff] %v10606_v16  ;;  %v659_v24 = vsel %vm654_vm0, %v10606_v16, %v643_v13 }
  0x86   :  { %728 = vrot.lane.b32.xlu1 %v10452_v2, %s15673_s27  ;;  %726 = vrot.lane.b32.xlu0 %v10438_v0, %s15673_s27  ;;  %v686_v28 = vmul.f32 %v669_v19, %v659_v24  ;;  %v3639_v29 = vmul.f32 %v3602_v20, %v659_v24 }
  0x88   :  { %v645_v21 = vpop.permute.xlu1 %644  ;;  %v10625_v22 = vpop.permute.xlu0 %640 }
  0x89   :  { %16004 = vst [vmem:[#allocation9_spill] sm:$0xff] %v10625_v22  ;;  %v660_v25 = vsel %vm654_vm0, %v10625_v22, %v645_v21 }
  0x8a   :  { %732 = vrot.lane.b32.xlu1 %v10466_v4, %s15673_s27  ;;  %730 = vrot.lane.b32.xlu0 %v10471_v5, %s15673_s27  ;;  %v690_v34 = vmul.f32 %v669_v19, %v660_v25  ;;  %v3647_v35 = vmul.f32 %v3602_v20, %v660_v25 }
  0x8c   :  { %v649_v30 = vpop.permute.xlu1 %648  ;;  %v647_v31 = vpop.permute.xlu0 %646  ;;  %v10133_v49 = vpack.c.bf16 %v690_v34, %v686_v28 }
  0x8d   :  { %v658_v36 = vsel %vm654_vm0, %v645_v21, %v649_v30  ;;  %v657_v37 = vsel %vm654_vm0, %v643_v13, %v647_v31 }
  0x8e   :  { %v691_v38 = vmul.f32 %v673_v26, %v658_v36  ;;  %v3648_v39 = vmul.f32 %v3606_v27, %v658_v36  ;;  %v687_v40 = vmul.f32 %v673_v26, %v657_v37  ;;  %v3640_v41 = vmul.f32 %v3606_v27, %v657_v37  ;;  %736 = vrot.lane.b32.xlu1 %v10492_v6, %s15673_s27  ;;  %v8906_v37 = vld [vmem:[%s15997_s15 + $0x6] ss:$8 sm:$0xf0] }
  0x8f   :  { %734 = vrot.lane.b32.xlu0 %v10497_v7, %s15673_s27  ;;  %s16072_s27 = smov 17  }
  0x90   :  { %v9506_v43 = vpack.c.bf16 %v3648_v39, %v3647_v35  ;;  %v9502_v44 = vpack.c.bf16 %v3640_v41, %v3639_v29  ;;  %v10662_v45 = vpop.permute.xlu1 %556  ;;  %v10664_v46 = vpop.permute.xlu0 %554  ;;  %v10132_v48 = vpack.c.bf16 %v691_v38, %v687_v40 }
  0x91   :  { %16007 = vst [vmem:[#allocation11_spill] sm:$0xff] %v10662_v45  ;;  %16008 = vst [vmem:[#allocation12_spill] sm:$0xff] %v10664_v46 }
  0x92   :  { %3707 = vst [vmem:[#allocation2 + $0x260] sm:$0xff] %v9506_v43  ;;  %3703 = vst [vmem:[#allocation2 + $0x240] sm:$0xff] %v9502_v44  ;;  %1037 = vmatprep.subr.bf16.mxu0 %v10132_v48 }
  0x93   :  { %1038 = vmatpush1.bf16.msra.mxu0 %v10133_v49 }
  0x94   :  { %v561_v52 = vpop.permute.xlu1 %560  ;;  %v559_v53 = vpop.permute.xlu0 %558 }
  0x95   :  { %v576_v56 = vsel %vm570_vm2, %v10662_v45, %v561_v52  ;;  %v575_v57 = vsel %vm570_vm2, %v10664_v46, %v559_v53 }
  0x96   :  { %v606_v60 = vmul.f32 %v585_v50, %v576_v56  ;;  %v3504_v61 = vmul.f32 %v3459_v51, %v576_v56  ;;  %v602_v13 = vmul.f32 %v585_v50, %v575_v57  ;;  %v3496_v19 = vmul.f32 %v3459_v51, %v575_v57  ;;  %v8703_v51 = vld [vmem:[%s16002_s23 + $0x5] ss:$8 sm:$0xf] }
  0x98   :  { %v10692_v62 = vpop.permute.xlu1 %564  ;;  %v10694_v63 = vpop.permute.xlu0 %562  ;;  %v10135_v44 = vpack.c.bf16 %v606_v60, %v602_v13  ;;  %v501_v60 = vrot.slane %v8703_v51, %v10602_v14  ;;  %v593_v13 = vrot.slane %v10669_v47, %v10677_v54 }
  0x99   :  { %v574_v20 = vsel %vm570_vm2, %v561_v52, %v10692_v62  ;;  %v573_v21 = vsel %vm570_vm2, %v559_v53, %v10694_v63  ;;  %v10752_v52 = vmul.f32 %v417_v17, %v10443_v1 }
  0x9a   :  { %v607_v23 = vmul.f32 %v589_v58, %v574_v20  ;;  %v3505_v24 = vmul.f32 %v3463_v59, %v574_v20  ;;  %v603_v25 = vmul.f32 %v589_v58, %v573_v21  ;;  %v3497_v26 = vmul.f32 %v3463_v59, %v573_v21 }
  0x9b   :  { %v10758_v58 = vmul.f32 %v417_v17, %v10457_v3  ;;  %v505_v3 = vrot.slane %v8703_v51, %v10619_v18  ;;  %v429_v20 = vrot.slane %v8698_v11, %v10680_v55  ;;  %v509_v17 = vrot.slane %v8703_v51, %v10677_v54 }
  0x9c   :  { %v9498_v27 = vpack.c.bf16 %v3505_v24, %v3504_v61  ;;  %v9494_v28 = vpack.c.bf16 %v3497_v26, %v3496_v19  ;;  %v10710_v29 = vpop.permute.xlu1 %652  ;;  %v10712_v32 = vpop.permute.xlu0 %650  ;;  %v10134_v43 = vpack.c.bf16 %v607_v23, %v603_v25  ;;  %v425_v19 = vrot.slane %v8698_v11, %v10677_v54 }
  0x9d   :  { %16011 = vst [vmem:[#allocation15_spill] sm:$0xff] %v10710_v29  ;;  %16012 = vst [vmem:[#allocation16_spill] sm:$0xff] %v10712_v32  ;;  %v10717_v33 = vsel %vm654_vm0, %v649_v30, %v10710_v29  ;;  %v662_v34 = vsel %vm654_vm0, %v10710_v29, %v10625_v22  ;;  %v10726_v35 = vsel %vm654_vm0, %v647_v31, %v10712_v32  ;;  %v8905_v30 = vld [vmem:[%s15997_s15 + $0x6] ss:$8 sm:$0xf] }
  0x9e   :  { %16013 = vst [vmem:[#allocation17_spill] sm:$0xff] %v10717_v33  ;;  %16014 = vst [vmem:[#allocation18_spill] sm:$0xff] %v10726_v35  ;;  %v661_v36 = vsel %vm654_vm0, %v10712_v32, %v10606_v16  ;;  %v692_v38 = vmul.f32 %v677_v8, %v10717_v33  ;;  %v693_v39 = vmul.f32 %v681_v10, %v662_v34  ;;  %1039 = vmatprep.subr.bf16.mxu0 %v10134_v43 }
  0x9f   :  { %v688_v40 = vmul.f32 %v677_v8, %v10726_v35  ;;  %v421_v31 = vrot.slane %v8698_v11, %v10619_v18  ;;  %3560 = vst [vmem:[#allocation2 + $0x200] sm:$0xff] %v9494_v28  ;;  %3564 = vst [vmem:[#allocation2 + $0x220] sm:$0xff] %v9498_v27  ;;  %v689_v41 = vmul.f32 %v681_v10, %v661_v36  ;;  %1040 = vmatpush1.bf16.msra.mxu0 %v10135_v44 }
  0xa0   :  { %v10741_v48 = vpop.permute.xlu1 %472  ;;  %v10743_v49 = vpop.permute.xlu0 %470  ;;  %v10745_v50 = vor.u32 %v8906_v37, %v8905_v30  ;;  %v597_v26 = vrot.slane %v10669_v47, %v10680_v55 }
  0xa1   :  { %16015 = vst [vmem:[#allocation19_spill] sm:$0xff] %v10741_v48  ;;  %16016 = vst [vmem:[#allocation20_spill] sm:$0xff] %v10743_v49  ;;  %v10755_v53 = vmul.f32 %v421_v31, %v10438_v0  ;;  %v10136_v56 = vpack.c.bf16 %v693_v39, %v689_v41  ;;  %v10137_v57 = vpack.c.bf16 %v692_v38, %v688_v40 }
  0xa2   :  { %16017 = vst [vmem:[#allocation21_spill] sm:$0xff] %v10745_v50  ;;  %v439_v59 = vmul.f32 %v421_v31, %v10452_v2  ;;  %v3150_v61 = vrot.slane %v10745_v50, %v10602_v14  ;;  %v3154_v2 = vrot.slane %v10745_v50, %v10619_v18  ;;  %v513_v39 = vrot.slane %v8703_v51, %v10680_v55 }
  0xa3   :  { %1080 = vmatprep.subr.bf16.mxu1 %v10136_v56  ;;  %v436_v40 = vmul.f32 %v425_v19, %v10471_v5  ;;  %v437_v31 = vmul.f32 %v429_v20, %v10497_v7 }
  0xa4   :  { %v477_v8 = vpop.permute.xlu1 %476  ;;  %v475_v10 = vpop.permute.xlu0 %474  ;;  %1081 = vmatpush1.bf16.msra.mxu1 %v10137_v57  ;;  %v10138_v47 = vpack.c.bf16 %v439_v59, %v10755_v53  ;;  %v440_v57 = vmul.f32 %v425_v19, %v10466_v4 }
  0xa5   :  { %v492_v1 = vsel %vm486_vm3, %v10741_v48, %v477_v8  ;;  %v491_v0 = vsel %vm486_vm3, %v10743_v49, %v475_v10 }
  0xa6   :  { %v522_v21 = vmul.f32 %v501_v60, %v492_v1  ;;  %v10777_v23 = vmul.f32 %v3150_v61, %v492_v1  ;;  %v518_v27 = vmul.f32 %v501_v60, %v491_v0  ;;  %v10782_v28 = vmul.f32 %v3150_v61, %v491_v0 }
  0xa7   :  { %v10141_v1 = vpack.c.bf16 %v10758_v58, %v10752_v52 }
  0xa8   :  { %v481_v24 = vpop.permute.xlu1 %480  ;;  %v479_v25 = vpop.permute.xlu0 %478  ;;  %v10140_v61 = vpack.c.bf16 %v522_v21, %v518_v27  ;;  %v8693_v27 = vld [vmem:[%s16002_s23 + $0x3] ss:$8 sm:$0xf] }
  0xa9   :  { %v490_v34 = vsel %vm486_vm3, %v477_v8, %v481_v24  ;;  %v489_v36 = vsel %vm486_vm3, %v475_v10, %v479_v25  ;;  %v441_v8 = vmul.f32 %v429_v20, %v10492_v6 }
  0xaa   :  { %v523_v11 = vmul.f32 %v505_v3, %v490_v34  ;;  %v10788_v30 = vmul.f32 %v3154_v2, %v490_v34  ;;  %v519_v37 = vmul.f32 %v505_v3, %v489_v36  ;;  %v10790_v38 = vmul.f32 %v3154_v2, %v489_v36 }
  0xac   :  { %v10796_v41 = vpop.permute.xlu1 %568  ;;  %v10798_v43 = vpop.permute.xlu0 %566  ;;  %v10139_v60 = vpack.c.bf16 %v523_v11, %v519_v37  ;;  %v10148_v11 = vpack.c.bf16 %v441_v8, %v437_v31 }
  0xad   :  { %16018 = vst [vmem:[#allocation22_spill] sm:$0xff] %v10796_v41  ;;  %16019 = vst [vmem:[#allocation23_spill] sm:$0xff] %v10798_v43  ;;  %v10804_v44 = vsel %vm570_vm2, %v10692_v62, %v10796_v41  ;;  %v578_v51 = vsel %vm570_vm2, %v10796_v41, %v10662_v45  ;;  %v10814_v5 = vsel %vm570_vm2, %v10694_v63, %v10798_v43 }
  0xae   :  { %16020 = vst [vmem:[#allocation24_spill] sm:$0xff] %v10804_v44  ;;  %16021 = vst [vmem:[#allocation25_spill] sm:$0xff] %v10814_v5  ;;  %v577_v7 = vsel %vm570_vm2, %v10798_v43, %v10664_v46  ;;  %v608_v53 = vmul.f32 %v593_v13, %v10804_v44  ;;  %v609_v62 = vmul.f32 %v597_v26, %v578_v51  ;;  %1041 = vmatprep.subr.bf16.mxu0 %v10139_v60 }
  0xaf   :  { %v604_v56 = vmul.f32 %v593_v13, %v10814_v5  ;;  %v605_v59 = vmul.f32 %v597_v26, %v577_v7  ;;  %1042 = vmatpush1.bf16.msra.mxu0 %v10140_v61  ;;  %v10149_v51 = vpack.c.bf16 %v440_v57, %v436_v40 }
  0xb0   :  { %v10824_v10 = vpop.permute.xlu1 %484  ;;  %v10826_v63 = vpop.permute.xlu0 %482  ;;  %1043 = vmatprep.subr.bf16.mxu0 %v10138_v47  ;;  %v358_v47 = vrot.slane %v8693_v27, %v10602_v14 }
  0xb1   :  { %16022 = vst [vmem:[#allocation26_spill] sm:$0xff] %v10824_v10  ;;  %16023 = vst [vmem:[#allocation27_spill] sm:$0xff] %v10826_v63  ;;  %v10837_v4 = vsel %vm486_vm3, %v481_v24, %v10824_v10  ;;  %v494_v6 = vsel %vm486_vm3, %v10824_v10, %v10741_v48  ;;  %v10846_v52 = vsel %vm486_vm3, %v479_v25, %v10826_v63 }
  0xb2   :  { %16024 = vst [vmem:[#allocation28_spill] sm:$0xff] %v10837_v4  ;;  %16025 = vst [vmem:[#allocation29_spill] sm:$0xff] %v10846_v52  ;;  %v524_v58 = vmul.f32 %v509_v17, %v10837_v4  ;;  %v525_v2 = vmul.f32 %v513_v39, %v494_v6  ;;  %v493_v13 = vsel %vm486_vm3, %v10826_v63, %v10743_v49 }
  0xb3   :  { %v520_v19 = vmul.f32 %v509_v17, %v10846_v52  ;;  %v521_v20 = vmul.f32 %v513_v39, %v493_v13  ;;  %v10144_v21 = vpack.c.bf16 %v609_v62, %v605_v59  ;;  %v10145_v25 = vpack.c.bf16 %v608_v53, %v604_v56  ;;  %1044 = vmatpush1.bf16.msra.mxu0 %v10141_v1  ;;  %v10898_v13 = vld [vmem:[%s16002_s23 + $0x2] ss:$8 sm:$0xf] }
  0xb4   :  { %v10854_v24 = vpop.permute.xlu1 %329  ;;  %v10856_v26 = vpop.permute.xlu0 %327  ;;  %v362_v39 = vrot.slane %v8693_v27, %v10619_v18 }
  0xb5   :  { %16026 = vst [vmem:[#allocation30_spill] sm:$0xff] %v10854_v24  ;;  %16027 = vst [vmem:[#allocation31_spill] sm:$0xff] %v10856_v26  ;;  %1082 = vmatprep.subr.bf16.mxu1 %v10144_v21  ;;  %v10146_v34 = vpack.c.bf16 %v525_v2, %v521_v20  ;;  %v10147_v36 = vpack.c.bf16 %v524_v58, %v520_v19  ;;  %v8885_v2 = vld [vmem:[%s15997_s15 + $0x4] ss:$8 sm:$0xf] }
  0xb6   :  { %1083 = vmatpush1.bf16.msra.mxu1 %v10145_v25  ;;  %v8886_v19 = vld [vmem:[%s15997_s15 + $0x4] ss:$8 sm:$0xf0]  ;;  %v278_v25 = vrot.slane %v10898_v13, %v10619_v18 }
  0xb7   :  { %1084 = vmatprep.subr.bf16.mxu1 %v10146_v34  ;;  %v274_v34 = vrot.slane %v10898_v13, %v10602_v14 }
  0xb8   :  { %v334_v17 = vpop.permute.xlu1 %333  ;;  %v332_v37 = vpop.permute.xlu0 %331 }
  0xb9   :  { %v10867_v7 = vsel %vm343_vm4, %v10854_v24, %v334_v17  ;;  %v10872_v31 = vsel %vm343_vm4, %v10856_v26, %v332_v37 }
  0xba   :  { %1085 = vmatpush1.bf16.msra.mxu1 %v10147_v36  ;;  %16028 = vst [vmem:[#allocation32_spill] sm:$0xff] %v10867_v7  ;;  %16029 = vst [vmem:[#allocation33_spill] sm:$0xff] %v10872_v31  ;;  %v380_v57 = vmul.f32 %v362_v39, %v10867_v7  ;;  %v376_v59 = vmul.f32 %v362_v39, %v10872_v31  ;;  %v10912_v36 = vor.u32 %v8886_v19, %v8885_v2 }
  0xbb   :  { %1086 = vmatprep.subr.bf16.mxu1 %v10148_v11 }
  0xbc   :  { %v10874_v53 = vpop.permute.xlu1 %341  ;;  %v10876_v62 = vpop.permute.xlu0 %339  ;;  %v10150_v6 = vpack.c.bf16 %v380_v57, %v376_v59  ;;  %16034 = vst [vmem:[#allocation38_spill] sm:$0xff] %v10912_v36 }
  0xbd   :  { %16030 = vst [vmem:[#allocation34_spill] sm:$0xff] %v10874_v53  ;;  %16031 = vst [vmem:[#allocation35_spill] sm:$0xff] %v10876_v62  ;;  %v351_v40 = vsel %vm343_vm4, %v10874_v53, %v10854_v24  ;;  %v350_v56 = vsel %vm343_vm4, %v10876_v62, %v10856_v26 }
  0xbe   :  { %v379_v60 = vmul.f32 %v358_v47, %v351_v40  ;;  %v375_v61 = vmul.f32 %v358_v47, %v350_v56  ;;  %1087 = vmatpush1.bf16.msra.mxu1 %v10149_v51  ;;  %1045 = vmatprep.subr.bf16.mxu0 %v10150_v6  ;;  %v366_v40 = vrot.slane %v8693_v27, %v10677_v54 }
  0xbf   :  { %v370_v56 = vrot.slane %v8693_v27, %v10680_v55 }
  0xc0   :  { %v10888_v8 = vpop.permute.xlu1 %245  ;;  %v10890_v1 = vpop.permute.xlu0 %243  ;;  %v10151_v58 = vpack.c.bf16 %v379_v60, %v375_v61  ;;  %v2898_v60 = vrot.slane %v10912_v36, %v10677_v54  ;;  %v2902_v61 = vrot.slane %v10912_v36, %v10680_v55 }
  0xc1   :  { %16032 = vst [vmem:[#allocation36_spill] sm:$0xff] %v10888_v8  ;;  %16033 = vst [vmem:[#allocation37_spill] sm:$0xff] %v10890_v1 }
  0xc2   :  { %1046 = vmatpush1.bf16.msra.mxu0 %v10151_v58 }
  0xc4   :  { %v10904_v20 = vpop.permute.xlu1 %249  ;;  %v10906_v21 = vpop.permute.xlu0 %247 }
  0xc5   :  { %v10918_v11 = vsel %vm259_vm5, %v10888_v8, %v10904_v20  ;;  %v10924_v39 = vsel %vm259_vm5, %v10890_v1, %v10906_v21 }
  0xc6   :  { %16035 = vst [vmem:[#allocation39_spill] sm:$0xff] %v10918_v11  ;;  %16036 = vst [vmem:[#allocation40_spill] sm:$0xff] %v10924_v39  ;;  %v296_v6 = vmul.f32 %v278_v25, %v10918_v11  ;;  %v292_v27 = vmul.f32 %v278_v25, %v10924_v39  ;;  %v8792_v11 = vld [vmem:[%s16002_s23 + $0x6] ss:$8 sm:$0xf] }
  0xc8   :  { %v10926_v47 = vpop.permute.xlu1 %257  ;;  %v10928_v51 = vpop.permute.xlu0 %255 }
  0xc9   :  { %16037 = vst [vmem:[#allocation41_spill] sm:$0xff] %v10926_v47  ;;  %16038 = vst [vmem:[#allocation42_spill] sm:$0xff] %v10928_v51  ;;  %v267_v57 = vsel %vm259_vm5, %v10926_v47, %v10888_v8  ;;  %v266_v59 = vsel %vm259_vm5, %v10928_v51, %v10890_v1 }
  0xca   :  { %v295_v58 = vmul.f32 %v274_v34, %v267_v57  ;;  %v291_v2 = vmul.f32 %v274_v34, %v266_v59 }
  0xcc   :  { %v338_v19 = vpop.permute.xlu1 %337  ;;  %v336_v3 = vpop.permute.xlu0 %335 }
  0xcd   :  { %v345_v0 = vsel %vm343_vm4, %v338_v19, %v10874_v53  ;;  %v347_v45 = vsel %vm343_vm4, %v334_v17, %v338_v19  ;;  %v344_v46 = vsel %vm343_vm4, %v336_v3, %v10876_v62  ;;  %v346_v22 = vsel %vm343_vm4, %v332_v37, %v336_v3  ;;  %v8865_v3 = vld [vmem:[%s15997_s15 + $0x2] ss:$8 sm:$0xf] }
  0xce   :  { %v381_v16 = vmul.f32 %v366_v40, %v347_v45  ;;  %v382_v25 = vmul.f32 %v370_v56, %v345_v0  ;;  %v2937_v57 = vmul.f32 %v2898_v60, %v347_v45  ;;  %v2938_v34 = vmul.f32 %v2902_v61, %v345_v0  ;;  %v10966_v45 = vld [vmem:[%s16002_s23 + $0x1] ss:$8 sm:$0xf]  ;;  %v8866_v0 = vld [vmem:[%s15997_s15 + $0x2] ss:$8 sm:$0xf0] }
  0xcf   :  { %v377_v59 = vmul.f32 %v366_v40, %v346_v22  ;;  %v378_v48 = vmul.f32 %v370_v56, %v344_v46  ;;  %v2929_v49 = vmul.f32 %v2898_v60, %v346_v22  ;;  %v2930_v41 = vmul.f32 %v2902_v61, %v344_v46 }
  0xd0   :  { %v9467_v44 = vpack.c.bf16 %v2938_v34, %v2937_v57  ;;  %v10956_v53 = vpop.permute.xlu1 %161  ;;  %v10958_v29 = vpop.permute.xlu0 %159  ;;  %v10152_v17 = vpack.c.bf16 %v296_v6, %v292_v27  ;;  %v10153_v19 = vpack.c.bf16 %v295_v58, %v291_v2  ;;  %v190_v37 = vrot.slane %v10966_v45, %v10602_v14 }
  0xd1   :  { %16039 = vst [vmem:[#allocation43_spill] sm:$0xff] %v10956_v53  ;;  %16040 = vst [vmem:[#allocation44_spill] sm:$0xff] %v10958_v29  ;;  %v9463_v43 = vpack.c.bf16 %v2930_v41, %v2929_v49  ;;  %v10154_v22 = vpack.c.bf16 %v382_v25, %v378_v48  ;;  %v10155_v46 = vpack.c.bf16 %v381_v16, %v377_v59 }
  0xd2   :  { %1047 = vmatprep.subr.bf16.mxu0 %v10152_v17  ;;  %2996 = vst [vmem:[#allocation2 + $0x128] sm:$0xff] %v9467_v44  ;;  %v194_v44 = vrot.slane %v10966_v45, %v10619_v18  ;;  %v10980_v16 = vor.u32 %v8866_v0, %v8865_v3  ;;  %v282_v60 = vrot.slane %v10898_v13, %v10677_v54 }
  0xd3   :  { %1048 = vmatpush1.bf16.msra.mxu0 %v10153_v19  ;;  %2992 = vst [vmem:[#allocation2 + $0x108] sm:$0xff] %v9463_v43  ;;  %1088 = vmatprep.subr.bf16.mxu1 %v10154_v22  ;;  %v286_v61 = vrot.slane %v10898_v13, %v10680_v55 }
  0xd4   :  { %v10972_v49 = vpop.permute.xlu1 %165  ;;  %v10974_v41 = vpop.permute.xlu0 %163  ;;  %1089 = vmatpush1.bf16.msra.mxu1 %v10155_v46  ;;  %16041 = vst [vmem:[#allocation45_spill] sm:$0xff] %v10980_v16  ;;  %v2589_v58 = vrot.slane %v10980_v16, %v10677_v54  ;;  %v2593_v2 = vrot.slane %v10980_v16, %v10680_v55 }
  0xd5   :  { %v10986_v48 = vsel %vm175_vm6, %v10956_v53, %v10972_v49  ;;  %v10992_v43 = vsel %vm175_vm6, %v10958_v29, %v10974_v41 }
  0xd6   :  { %16042 = vst [vmem:[#allocation46_spill] sm:$0xff] %v10986_v48  ;;  %16043 = vst [vmem:[#allocation47_spill] sm:$0xff] %v10992_v43  ;;  %v212_v25 = vmul.f32 %v194_v44, %v10986_v48  ;;  %v208_v13 = vmul.f32 %v194_v44, %v10992_v43 }
  0xd8   :  { %v10994_v40 = vpop.permute.xlu1 %173  ;;  %v10996_v56 = vpop.permute.xlu0 %171 }
  0xd9   :  { %16044 = vst [vmem:[#allocation48_spill] sm:$0xff] %v10994_v40  ;;  %16045 = vst [vmem:[#allocation49_spill] sm:$0xff] %v10996_v56  ;;  %v183_v6 = vsel %vm175_vm6, %v10994_v40, %v10956_v53  ;;  %v182_v27 = vsel %vm175_vm6, %v10996_v56, %v10958_v29 }
  0xda   :  { %v211_v57 = vmul.f32 %v190_v37, %v183_v6  ;;  %v207_v34 = vmul.f32 %v190_v37, %v182_v27 }
  0xdc   :  { %v254_v59 = vpop.permute.xlu1 %253  ;;  %v252_v17 = vpop.permute.xlu0 %251  ;;  %v10157_v35 = vpack.c.bf16 %v211_v57, %v207_v34 }
  0xdd   :  { %v261_v19 = vsel %vm259_vm5, %v254_v59, %v10926_v47  ;;  %v263_v3 = vsel %vm259_vm5, %v10904_v20, %v254_v59  ;;  %v260_v22 = vsel %vm259_vm5, %v252_v17, %v10928_v51  ;;  %v262_v46 = vsel %vm259_vm5, %v10906_v21, %v252_v17  ;;  %v8855_v21 = vld [vmem:[%s15997_s15 + $0x1] ss:$8 sm:$0xf] }
  0xde   :  { %v297_v0 = vmul.f32 %v282_v60, %v263_v3  ;;  %v298_v44 = vmul.f32 %v286_v61, %v261_v19  ;;  %v2628_v37 = vmul.f32 %v2589_v58, %v263_v3  ;;  %v2629_v6 = vmul.f32 %v2593_v2, %v261_v19 }
  0xdf   :  { %v293_v27 = vmul.f32 %v282_v60, %v262_v46  ;;  %v294_v62 = vmul.f32 %v286_v61, %v260_v22  ;;  %v2620_v5 = vmul.f32 %v2589_v58, %v262_v46  ;;  %v2621_v47 = vmul.f32 %v2593_v2, %v260_v22  ;;  %v101_v60 = vld [vmem:[%s16002_s23] ss:$8 sm:$0xf]  ;;  %v8856_v2 = vld [vmem:[%s15997_s15 + $0x1] ss:$8 sm:$0xf0] }
  0xe0   :  { %v9451_v33 = vpack.c.bf16 %v2629_v6, %v2628_v37  ;;  %v11028_v32 = vpop.permute.xlu1 %76  ;;  %v11030_v20 = vpop.permute.xlu0 %74  ;;  %v10156_v59 = vpack.c.bf16 %v212_v25, %v208_v13  ;;  %v2289_v25 = vld [vmem:[%s15997_s15] ss:$8 sm:$0xf0]  ;;  %v198_v3 = vrot.slane %v10966_v45, %v10677_v54  ;;  %v202_v22 = vrot.slane %v10966_v45, %v10680_v55  ;;  %v8945_v45 = vld [vmem:[%s15997_s15 + $0x42] ss:$8 sm:$0xf] }
  0xe1   :  { %16046 = vst [vmem:[#allocation50_spill] sm:$0xff] %v11028_v32  ;;  %16047 = vst [vmem:[#allocation51_spill] sm:$0xff] %v11030_v20  ;;  %v9447_v51 = vpack.c.bf16 %v2621_v47, %v2620_v5  ;;  %v10158_v61 = vpack.c.bf16 %v298_v44, %v294_v62  ;;  %v10159_v58 = vpack.c.bf16 %v297_v0, %v293_v27  ;;  %v2288_v47 = vld [vmem:[%s15997_s15] ss:$8 sm:$0xf] }
  0xe2   :  { %1049 = vmatprep.subr.bf16.mxu0 %v10156_v59  ;;  %2687 = vst [vmem:[#allocation2 + $0xa8] sm:$0xff] %v9451_v33  ;;  %v106_v62 = vrot.slane %v101_v60, %v10602_v14  ;;  %v11062_v34 = vor.u32 %v2289_v25, %v2288_v47  ;;  %v8946_v6 = vld [vmem:[%s15997_s15 + $0x42] ss:$8 sm:$0xf0] }
  0xe3   :  { %1050 = vmatpush1.bf16.msra.mxu0 %v10157_v35  ;;  %2683 = vst [vmem:[#allocation2 + $0x88] sm:$0xff] %v9447_v51  ;;  %1090 = vmatprep.subr.bf16.mxu1 %v10158_v61  ;;  %v110_v35 = vrot.slane %v101_v60, %v10619_v18  ;;  %v11050_v51 = vor.u32 %v8856_v2, %v8855_v21 }
  0xe4   :  { %v81_v5 = vpop.permute.xlu1 %80  ;;  %v79_v33 = vpop.permute.xlu0 %78  ;;  %1091 = vmatpush1.bf16.msra.mxu1 %v10159_v58  ;;  %16051 = vst [vmem:[#allocation55_spill] sm:$0xff] %v11062_v34  ;;  %v114_v58 = vrot.slane %v101_v60, %v10677_v54  ;;  %v118_v2 = vrot.slane %v101_v60, %v10680_v55  ;;  %v2303_v47 = vrot.slane %v11062_v34, %v10677_v54 }
  0xe5   :  { %16048 = vst [vmem:[#allocation52_spill] sm:$0xff] %v11050_v51  ;;  %v11055_v13 = vsel %vm92_vm7, %v11028_v32, %v81_v5  ;;  %v11060_v57 = vsel %vm92_vm7, %v11030_v20, %v79_v33  ;;  %v2446_v44 = vrot.slane %v11050_v51, %v10677_v54  ;;  %v2450_v37 = vrot.slane %v11050_v51, %v10680_v55 }
  0xe6   :  { %16049 = vst [vmem:[#allocation53_spill] sm:$0xff] %v11055_v13  ;;  %16050 = vst [vmem:[#allocation54_spill] sm:$0xff] %v11060_v57  ;;  %v128_v27 = vmul.f32 %v110_v35, %v11055_v13  ;;  %v124_v59 = vmul.f32 %v110_v35, %v11060_v57  ;;  %v2307_v15 = vrot.slane %v11062_v34, %v10680_v55 }
  0xe8   :  { %v11064_v17 = vpop.permute.xlu1 %88  ;;  %v11066_v19 = vpop.permute.xlu0 %86  ;;  %v10160_v1 = vpack.c.bf16 %v128_v27, %v124_v59 }
  0xe9   :  { %16052 = vst [vmem:[#allocation56_spill] sm:$0xff] %v11064_v17  ;;  %16053 = vst [vmem:[#allocation57_spill] sm:$0xff] %v11066_v19  ;;  %v100_v46 = vsel %vm92_vm7, %v11064_v17, %v11028_v32  ;;  %v99_v0 = vsel %vm92_vm7, %v11066_v19, %v11030_v20  ;;  %v11098_v32 = vor.u32 %v8946_v6, %v8945_v45 }
  0xea   :  { %v127_v21 = vmul.f32 %v106_v62, %v100_v46  ;;  %v123_v61 = vmul.f32 %v106_v62, %v99_v0  ;;  %1051 = vmatprep.subr.bf16.mxu0 %v10160_v1 }
  0xeb   :  { %16054 = vst [vmem:[#allocation58_spill] sm:$0xff] %v11098_v32 }
  0xec   :  { %v170_v25 = vpop.permute.xlu1 %169  ;;  %v168_v42 = vpop.permute.xlu0 %167  ;;  %v10161_v57 = vpack.c.bf16 %v127_v21, %v123_v61 }
  0xed   :  { %v177_v35 = vsel %vm175_vm6, %v170_v25, %v10994_v40  ;;  %v179_v62 = vsel %vm175_vm6, %v10972_v49, %v170_v25  ;;  %v176_v60 = vsel %vm175_vm6, %v168_v42, %v10996_v56  ;;  %v178_v46 = vsel %vm175_vm6, %v10974_v41, %v168_v42 }
  0xee   :  { %v213_v0 = vmul.f32 %v198_v3, %v179_v62  ;;  %v214_v53 = vmul.f32 %v202_v22, %v177_v35  ;;  %v11112_v45 = vmul.f32 %v2446_v44, %v179_v62  ;;  %v11114_v6 = vmul.f32 %v2450_v37, %v177_v35  ;;  %1052 = vmatpush1.bf16.msra.mxu0 %v10161_v57 }
  0xef   :  { %v209_v20 = vmul.f32 %v198_v3, %v178_v46  ;;  %v210_v40 = vmul.f32 %v202_v22, %v176_v60  ;;  %v11116_v8 = vmul.f32 %v2446_v44, %v178_v46  ;;  %v11118_v29 = vmul.f32 %v2450_v37, %v176_v60 }
  0xf0   :  { %16055 = vst [vmem:[#allocation59_spill] sm:$0xff] %v11112_v45  ;;  %16056 = vst [vmem:[#allocation60_spill] sm:$0xff] %v11114_v6  ;;  %v9443_v49 = vpack.c.bf16 %v11114_v6, %v11112_v45  ;;  %v85_v25 = vpop.permute.xlu1 %84  ;;  %v83_v56 = vpop.permute.xlu0 %82 }
  0xf1   :  { %16057 = vst [vmem:[#allocation61_spill] sm:$0xff] %v11116_v8  ;;  %16058 = vst [vmem:[#allocation62_spill] sm:$0xff] %v11118_v29  ;;  %v9439_v42 = vpack.c.bf16 %v11118_v29, %v11116_v8  ;;  %v94_v41 = vsel %vm92_vm7, %v85_v25, %v11064_v17  ;;  %v96_v3 = vsel %vm92_vm7, %v81_v5, %v85_v25 }
  0xf2   :  { %v129_v22 = vmul.f32 %v114_v58, %v96_v3  ;;  %v130_v44 = vmul.f32 %v118_v2, %v94_v41  ;;  %v2342_v37 = vmul.f32 %v2303_v47, %v96_v3  ;;  %v2343_v35 = vmul.f32 %v2307_v15, %v94_v41  ;;  %2544 = vst [vmem:[#allocation2 + $0x68] sm:$0xff] %v9443_v49  ;;  %v8718_v41 = vld [vmem:[%s16002_s23 + $0x20] ss:$8 sm:$0xf] }
  0xf3   :  { %v93_v27 = vsel %vm92_vm7, %v83_v56, %v11066_v19  ;;  %v95_v59 = vsel %vm92_vm7, %v79_v33, %v83_v56  ;;  %v10162_v21 = vpack.c.bf16 %v214_v53, %v210_v40  ;;  %v10163_v61 = vpack.c.bf16 %v213_v0, %v209_v20  ;;  %2540 = vst [vmem:[#allocation2 + $0x48] sm:$0xff] %v9439_v42 }
  0xf4   :  { %v9435_v62 = vpack.c.bf16 %v2343_v35, %v2342_v37  ;;  %v125_v60 = vmul.f32 %v114_v58, %v95_v59  ;;  %v126_v5 = vmul.f32 %v118_v2, %v93_v27  ;;  %v11134_v46 = vpop.permute.xlu1 %724  ;;  %v11136_v25 = vpop.permute.xlu0 %722  ;;  %v2334_v1 = vmul.f32 %v2303_v47, %v95_v59 }
  0xf5   :  { %16059 = vst [vmem:[#allocation63_spill] sm:$0xff] %v11134_v46  ;;  %16060 = vst [vmem:[#allocation64_spill] sm:$0xff] %v11136_v25  ;;  %v2335_v49 = vmul.f32 %v2307_v15, %v93_v27  ;;  %1092 = vmatprep.subr.bf16.mxu1 %v10162_v21  ;;  %v753_v20 = vrot.slane %v8718_v41, %v10602_v14  ;;  %v3745_v15 = vrot.slane %v11098_v32, %v10602_v14 }
  0xf6   :  { %1093 = vmatpush1.bf16.msra.mxu1 %v10163_v61  ;;  %2401 = vst [vmem:[#allocation2 + $0x28] sm:$0xff] %v9435_v62  ;;  %v10166_v58 = vpack.c.bf16 %v130_v44, %v126_v5  ;;  %v10167_v2 = vpack.c.bf16 %v129_v22, %v125_v60  ;;  %v757_v42 = vrot.slane %v8718_v41, %v10619_v18 }
  0xf7   :  { %v9431_v40 = vpack.c.bf16 %v2335_v49, %v2334_v1  ;;  %v3749_v3 = vrot.slane %v11098_v32, %v10619_v18  ;;  %v761_v27 = vrot.slane %v8718_v41, %v10677_v54  ;;  %v765_v59 = vrot.slane %v8718_v41, %v10680_v55 }
  0xf8   :  { %v729_v33 = vpop.permute.xlu1 %728  ;;  %v727_v57 = vpop.permute.xlu0 %726  ;;  %1094 = vmatprep.subr.bf16.mxu1 %v10166_v58 }
  0xf9   :  { %v744_v47 = vsel %vm738_vm8, %v11134_v46, %v729_v33  ;;  %2397 = vst [vmem:[#allocation2 + $0x8] sm:$0xff] %v9431_v40  ;;  %v743_v0 = vsel %vm738_vm8, %v11136_v25, %v727_v57 }
  0xfa   :  { %1095 = vmatpush1.bf16.msra.mxu1 %v10167_v2  ;;  %v774_v37 = vmul.f32 %v753_v20, %v744_v47  ;;  %v3790_v35 = vmul.f32 %v3745_v15, %v744_v47  ;;  %v770_v21 = vmul.f32 %v753_v20, %v743_v0  ;;  %v3782_v61 = vmul.f32 %v3745_v15, %v743_v0 }
  0xfc   :  { %v733_v44 = vpop.permute.xlu1 %732  ;;  %v731_v22 = vpop.permute.xlu0 %730 }
  0xfd   :  { %v742_v62 = vsel %vm738_vm8, %v729_v33, %v733_v44  ;;  %v741_v60 = vsel %vm738_vm8, %v727_v57, %v731_v22 }
  0xfe   :  { %v775_v5 = vmul.f32 %v757_v42, %v742_v62  ;;  %v3791_v1 = vmul.f32 %v3749_v3, %v742_v62  ;;  %v771_v49 = vmul.f32 %v757_v42, %v741_v60  ;;  %v3783_v40 = vmul.f32 %v3749_v3, %v741_v60  ;;  %v9998_v62 = vld [vmem:[%s16005_s1] ss:$8 sps:$4 sm:$0xff]   ;;  %s16068_s1 = smov 1  }
 0x100   :  { %v9514_v58 = vpack.c.bf16 %v3791_v1, %v3790_v35  ;;  %v9510_v2 = vpack.c.bf16 %v3783_v40, %v3782_v61  ;;  %v11164_v47 = vpop.permute.xlu1 %736  ;;  %v10168_v35 = vpack.c.bf16 %v775_v5, %v771_v49  ;;  %v10169_v61 = vpack.c.bf16 %v774_v37, %v770_v21 }
 0x101   :  { %16061 = vst [vmem:[#allocation65_spill] sm:$0xff] %v11164_v47  ;;  %v11169_v41 = vsel %vm738_vm8, %v733_v44, %v11164_v47  ;;  %v746_v20 = vsel %vm738_vm8, %v11164_v47, %v11134_v46  ;;  %v11175_v15 = vpop.permute.xlu0 %734 }
 0x102   :  { %16062 = vst [vmem:[#allocation66_spill] sm:$0xff] %v11169_v41  ;;  %16063 = vst [vmem:[#allocation67_spill] sm:$0xff] %v11175_v15  ;;  %v776_v33 = vmul.f32 %v761_v27, %v11169_v41  ;;  %v777_v57 = vmul.f32 %v765_v59, %v746_v20  ;;  %v11181_v0 = vsel %vm738_vm8, %v731_v22, %v11175_v15  ;;  %1067 = vmatprep.subr.bf16.mxu0 %v10168_v35  ;;  %v10298_v22 = vmov 0   ;;  %v1124_v35 = vld [vmem:[%s16065_s2 + $0x8] sm:$0xff] }
 0x103   :  { %3850 = vst [vmem:[#allocation2 + $0x2a0] sm:$0xff] %v9514_v58  ;;  %3846 = vst [vmem:[#allocation2 + $0x280] sm:$0xff] %v9510_v2  ;;  %v745_v42 = vsel %vm738_vm8, %v11175_v15, %v11136_v25  ;;  %v772_v3 = vmul.f32 %v761_v27, %v11181_v0  ;;  %1068 = vmatpush2.bf16.msra.mxu0 %v10169_v61  ;;  %9997 = vset.pattern.permute.xlu0 %v10298_v22  ;;  %v1125_v61 = vld [vmem:[%s16066_s30] sm:$0xff] }
 0x104   :  { %16064 = vst [vmem:[#allocation68_spill] sm:$0xff] %v11181_v0  ;;  %v773_v44 = vmul.f32 %v765_v59, %v745_v42  ;;  %9996 = vset.pattern.permute.xlu1 %v10298_v22 }
 0x105   :  { %v10171_v1 = vpack.c.bf16 %v776_v33, %v772_v3 }
 0x106   :  { %v10170_v60 = vpack.c.bf16 %v777_v57, %v773_v44  ;;  %1070 = vmatmul.mubr.bf16.vlgmr.msra.gmra.mxu0 %v9998_v62  ;;  %v1123_v44 = vld [vmem:[%s16065_s2] sm:$0xff]  ;;  %s15759_s2 = smov 95  }
 0x108   :  { %1110 = vmatprep.subr.bf16.mxu1 %v10170_v60 }
 0x109   :  { %1111 = vmatpush2.bf16.msra.mxu1 %v10171_v1 }
 0x10c   :  { %1113 = vmatmul.mubr.bf16.vlgmr.msra.gmra.mxu1 %v9998_v62  ;;  %v1126_v62 = vld [vmem:[%s16066_s30 + $0x8] sm:$0xff]  ;;  %s16071_s30 = smov 16  }
 0x1c6   :  { %v1071_v40 = vpop.f32.mrf.mxu0 }
 0x1c8   :  { %v1073_v27 = vpop.f32.mrf.mxu0 }
 0x1c9   :  { %v1127_v5 = vadd.f32 %v1073_v27, %v1071_v40 }
 0x1ca   :  { %v1075_v59 = vpop.f32.mrf.mxu0 }
 0x1cc   :  { %v1114_v37 = vpop.f32.mrf.mxu1  ;;  %v1077_v49 = vpop.f32.mrf.mxu0 }
 0x1cd   :  { %v1128_v21 = vadd.f32 %v1127_v5, %v1114_v37  ;;  %v1132_v58 = vadd.f32 %v1077_v49, %v1075_v59 }
 0x1ce   :  { %v1116_v2 = vpop.f32.mrf.mxu1 }
 0x1cf   :  { %v1129_v20 = vadd.f32 %v1128_v21, %v1116_v2 }
 0x1d0   :  { %v1118_v42 = vpop.f32.mrf.mxu1 }
 0x1d1   :  { %v1133_v57 = vadd.f32 %v1132_v58, %v1118_v42  ;;  %1130 = vadd.xlane.f32.xlu0 %v1129_v20 }
 0x1d2   :  { %v1120_v33 = vpop.f32.mrf.mxu1 }
 0x1d3   :  { %v1134_v3 = vadd.f32 %v1133_v57, %v1120_v33 }
 0x1d5   :  { %1135 = vadd.xlane.f32.xlu1 %v1134_v3 }
 0x1e6   :  { %1182 = vperm.xlu1 %9996, %v1123_v44  }
 0x1e7   :  { %1187 = vperm.xlu0 %9997, %v1124_v35  }
 0x1ea   :  { %1200 = vperm.xlu1 %9996, %v1125_v61  }
 0x1ee   :  { %1205 = vperm.xlu1 %9996, %v1126_v62  }
 0x25a   :  { %v1131_v60 = vpop.xlane.xlu0 %1130 }
 0x25b   :  { %v1138_v1 = vmul.f32 0.001953125, %v1131_v60 }
 0x25d   :  { %v1140_v22 = vsub.f32 %v1071_v40, %v1138_v1  ;;  %v1141_v5 = vsub.f32 %v1073_v27, %v1138_v1  ;;  %v1142_v21 = vsub.f32 %v1114_v37, %v1138_v1  ;;  %v1143_v20 = vsub.f32 %v1116_v2, %v1138_v1 }
 0x25e   :  { %v1136_v58 = vpop.xlane.xlu1 %1135 }
 0x25f   :  { %v1139_v57 = vmul.f32 0.001953125, %v1136_v58  ;;  %v1148_v3 = vmul.f32 %v1140_v22, %v1140_v22  ;;  %v1149_v35 = vmul.f32 %v1141_v5, %v1141_v5  ;;  %v1150_v44 = vmul.f32 %v1142_v21, %v1142_v21 }
 0x260   :  { %v1151_v25 = vmul.f32 %v1143_v20, %v1143_v20 }
 0x261   :  { %v1156_v53 = vadd.f32 %v1149_v35, %v1148_v3  ;;  %v1144_v56 = vsub.f32 %v1075_v59, %v1139_v57  ;;  %v1145_v46 = vsub.f32 %v1077_v49, %v1139_v57  ;;  %v1146_v61 = vsub.f32 %v1118_v42, %v1139_v57 }
 0x262   :  { %v11203_v19 = vsub.f32 %v1120_v33, %v1139_v57  ;;  %v11207_v58 = vpop.permute.xlu0 %1187 }
 0x263   :  { %v1157_v17 = vadd.f32 %v1156_v53, %v1150_v44  ;;  %v1152_v62 = vmul.f32 %v1144_v56, %v1144_v56  ;;  %v1153_v47 = vmul.f32 %v1145_v46, %v1145_v46  ;;  %v1154_v40 = vmul.f32 %v1146_v61, %v1146_v61 }
 0x264   :  { %v1155_v37 = vmul.f32 %v11203_v19, %v11203_v19 }
 0x265   :  { %v1158_v60 = vadd.f32 %v1157_v17, %v1151_v25  ;;  %v1161_v27 = vadd.f32 %v1153_v47, %v1152_v62  ;;  %v1183_v17 = vpop.permute.xlu1 %1182 }
 0x267   :  { %1159 = vadd.xlane.f32.xlu0 %v1158_v60  ;;  %v1162_v2 = vadd.f32 %v1161_v27, %v1154_v40 }
 0x269   :  { %v1163_v1 = vadd.f32 %v1162_v2, %v1155_v37  ;;  %v1201_v40 = vpop.permute.xlu1 %1200 }
 0x26b   :  { %1164 = vadd.xlane.f32.xlu0 %v1163_v1 }
 0x2f0   :  { %v1160_v59 = vpop.xlane.xlu0 %1159 }
 0x2f1   :  { %v1166_v49 = vmul.f32 0.001953125, %v1160_v59 }
 0x2f3   :  { %v1168_v42 = vadd.f32 1e-05, %v1166_v49 }
 0x2f4   :  { %v1165_v53 = vpop.xlane.xlu0 %1164 }
 0x2f5   :  { %10059 = vrsqrt.f32 %v1168_v42  ;;  %v1167_v33 = vmul.f32 0.001953125, %v1165_v53  ;;  %v1206_v42 = vpop.permute.xlu1 %1205 }
 0x2f7   :  { %v1169_v57 = vadd.f32 1e-05, %v1167_v33 }
 0x2f9   :  { %10061 = vrsqrt.f32 %v1169_v57 }
 0x302   :  { %v10060_v25 = vpop.eup %10059 }
 0x303   :  { %v1172_v47 = vmul.f32 %v10060_v25, %v1140_v22  ;;  %v1173_v3 = vmul.f32 %v10060_v25, %v1141_v5  ;;  %v1174_v35 = vmul.f32 %v10060_v25, %v1142_v21 }
 0x305   :  { %v1190_v44 = vmul.f32 %v1183_v17, %v1172_v47  ;;  %v1191_v62 = vmul.f32 %v1183_v17, %v1173_v3  ;;  %v1192_v37 = vmul.f32 %v1183_v17, %v1174_v35 }
 0x306   :  { %v10062_v60 = vpop.eup %10061 }
 0x307   :  { %v1208_v27 = vadd.f32 %v1201_v40, %v1190_v44  ;;  %v1209_v2 = vadd.f32 %v1201_v40, %v1191_v62  ;;  %v1176_v59 = vmul.f32 %v10062_v60, %v1144_v56  ;;  %v1210_v49 = vadd.f32 %v1201_v40, %v1192_v37 }
 0x308   :  { %v1177_v5 = vmul.f32 %v10062_v60, %v1145_v46  ;;  %v1178_v53 = vmul.f32 %v10062_v60, %v1146_v61  ;;  %v1175_v46 = vmul.f32 %v10060_v25, %v1143_v20 }
 0x309   :  { %v11209_v1 = vmax.f32 %v1208_v27, 0.0  ;;  %v11215_v22 = vmax.f32 %v1209_v2, 0.0  ;;  %v1194_v21 = vmul.f32 %v11207_v58, %v1176_v59  ;;  %v11222_v56 = vmax.f32 %v1210_v49, 0.0 }
 0x30a   :  { %v1195_v33 = vmul.f32 %v11207_v58, %v1177_v5  ;;  %v1196_v47 = vmul.f32 %v11207_v58, %v1178_v53  ;;  %v1193_v61 = vmul.f32 %v1183_v17, %v1175_v46  ;;  %v1179_v17 = vmul.f32 %v10062_v60, %v11203_v19  ;;  %v8895_v60 = vld [vmem:[%s15997_s15 + $0x5] ss:$8 sm:$0xf] }
 0x30b   :  { %1692 = vrot.lane.b32.xlu0 %v11209_v1, %s15719_s24  ;;  %1774 = vrot.lane.b32.xlu1 %v11209_v1, %s15721_s28  ;;  %v1212_v57 = vadd.f32 %v1206_v42, %v1194_v21  ;;  %v11297_v5 = vld [vmem:[%s15996_s26] sm:$0xff]  ;;  %v11315_v46 = vld [vmem:[%s15996_s26 + $0x28] sm:$0xff] }
 0x30c   :  { %v1213_v3 = vadd.f32 %v1206_v42, %v1195_v33  ;;  %v1214_v44 = vadd.f32 %v1206_v42, %v1196_v47  ;;  %v1211_v20 = vadd.f32 %v1201_v40, %v1193_v61  ;;  %v1197_v40 = vmul.f32 %v11207_v58, %v1179_v17  ;;  %v8896_v58 = vld [vmem:[%s15997_s15 + $0x5] ss:$8 sm:$0xf0] }
 0x30d   :  { %v11230_v35 = vmax.f32 %v1212_v57, 0.0  ;;  %v11284_v2 = vor.u32 %v8896_v58, %v8895_v60  ;;  %v11309_v33 = vld [vmem:[%s15996_s26 + $0x20] sm:$0xff]  ;;  %v11353_v17 = vld [vmem:[%s15996_s26 + $0x10] sm:$0xff] }
 0x30e   :  { %v11236_v62 = vmax.f32 %v1213_v3, 0.0  ;;  %v11242_v25 = vmax.f32 %v1214_v44, 0.0  ;;  %v11248_v27 = vmax.f32 %v1211_v20, 0.0  ;;  %v1215_v37 = vadd.f32 %v1206_v42, %v1197_v40  ;;  %v11303_v42 = vld [vmem:[%s15996_s26 + $0x8] sm:$0xff]  ;;  %v11365_v58 = vld [vmem:[%s15996_s26 + $0x30] sm:$0xff] }
 0x30f   :  { %1696 = vrot.lane.b32.xlu0 %v11215_v22, %s15719_s24  ;;  %1778 = vrot.lane.b32.xlu1 %v11215_v22, %s15721_s28  ;;  %16069 = vst [vmem:[#allocation69_spill] sm:$0xff] %v11284_v2  ;;  %v3007_v59 = vrot.slane %v11284_v2, %v10602_v14  ;;  %v3011_v49 = vrot.slane %v11284_v2, %v10619_v18 }
 0x310   :  { %v11276_v19 = vmax.f32 %v1215_v37, 0.0  ;;  %v3015_v44 = vrot.slane %v11284_v2, %v10677_v54  ;;  %v3019_v20 = vrot.slane %v11284_v2, %v10680_v55  ;;  %v11359_v37 = vld [vmem:[%s15996_s26 + $0x18] sm:$0xff] }
 0x311   :  { %v3044_v21 = vmul.f32 %v11297_v5, %v3007_v59  ;;  %v3045_v53 = vmul.f32 %v11303_v42, %v3011_v49  ;;  %v3052_v57 = vmul.f32 %v11309_v33, %v3007_v59  ;;  %v3053_v47 = vmul.f32 %v11315_v46, %v3011_v49  ;;  %v11371_v49 = vld [vmem:[%s15996_s26 + $0x38] sm:$0xff] }
 0x312   :  { %v3046_v40 = vmul.f32 %v11353_v17, %v3015_v44  ;;  %v3047_v60 = vmul.f32 %v11359_v37, %v3019_v20  ;;  %v3054_v59 = vmul.f32 %v11365_v58, %v3015_v44 }
 0x313   :  { %1700 = vrot.lane.b32.xlu0 %v11222_v56, %s15719_s24  ;;  %1782 = vrot.lane.b32.xlu1 %v11222_v56, %s15721_s28  ;;  %v9470_v3 = vpack.c.bf16 %v3045_v53, %v3044_v21  ;;  %v9474_v61 = vpack.c.bf16 %v3053_v47, %v3052_v57  ;;  %v3055_v21 = vmul.f32 %v11371_v49, %v3019_v20  ;;  %v10001_v20 = vld [vmem:[%s15649_s4 + $0x4] ss:$8 sps:$4 sm:$0xff]  }
 0x314   :  { %v9471_v53 = vpack.c.bf16 %v3047_v60, %v3046_v40  ;;  %8845 = vmatprep.mubr.msk.bf16.mxu0 %vm1033_vm1, %v10001_v20  ;;  %8846 = vmatprep.mubr.msk.bf16.mxu1 %vm1033_vm1, %v10001_v20 }
 0x315   :  { %3108 = vst [vmem:[#allocation2 + $0x140] sm:$0xff] %v9470_v3  ;;  %3112 = vst [vmem:[#allocation2 + $0x160] sm:$0xff] %v9474_v61  ;;  %v9475_v57 = vpack.c.bf16 %v3055_v21, %v3054_v59 }
 0x316   :  { %3109 = vst [vmem:[#allocation2 + $0x148] sm:$0xff] %v9471_v53  ;;  %v11446_v53 = vld [vmem:[%s16002_s23 + $0x7] ss:$8 sm:$0xf] }
 0x317   :  { %1610 = vrot.lane.b32.xlu0 %v11209_v1, %s16067_s29  ;;  %1776 = vrot.lane.b32.xlu1 %v11230_v35, %s15721_s28  ;;  %3113 = vst [vmem:[#allocation2 + $0x168] sm:$0xff] %v9475_v57  ;;  %v1807_v57 = vrot.slane %v11446_v53, %v10619_v18  ;;  %v1803_v0 = vrot.slane %v11446_v53, %v10602_v14 }
 0x318   :  { %v1811_v52 = vrot.slane %v11446_v53, %v10677_v54  ;;  %v1815_v4 = vrot.slane %v11446_v53, %v10680_v55  ;;  %v1729_v53 = vrot.slane %v8792_v11, %v10677_v54 }
 0x31b   :  { %1614 = vrot.lane.b32.xlu0 %v11215_v22, %s16067_s29  ;;  %1780 = vrot.lane.b32.xlu1 %v11236_v62, %s15721_s28 }
 0x31f   :  { %1618 = vrot.lane.b32.xlu0 %v11222_v56, %s16067_s29  ;;  %1784 = vrot.lane.b32.xlu1 %v11242_v25, %s15721_s28 }
 0x323   :  { %1786 = vrot.lane.b32.xlu0 %v11248_v27, %s15721_s28  ;;  %1694 = vrot.lane.b32.xlu1 %v11230_v35, %s15719_s24 }
 0x327   :  { %1704 = vrot.lane.b32.xlu0 %v11248_v27, %s15719_s24  ;;  %1698 = vrot.lane.b32.xlu1 %v11236_v62, %s15719_s24 }
 0x32b   :  { %1470 = vrot.lane.b32.xlu0 %v11209_v1, %s16068_s1  ;;  %1702 = vrot.lane.b32.xlu1 %v11242_v25, %s15719_s24 }
 0x32f   :  { %1474 = vrot.lane.b32.xlu0 %v11215_v22, %s16068_s1  ;;  %1612 = vrot.lane.b32.xlu1 %v11230_v35, %s16067_s29 }
 0x333   :  { %1482 = vrot.lane.b32.xlu0 %v11248_v27, %s16068_s1  ;;  %1616 = vrot.lane.b32.xlu1 %v11236_v62, %s16067_s29 }
 0x337   :  { %1622 = vrot.lane.b32.xlu0 %v11248_v27, %s16067_s29  ;;  %1620 = vrot.lane.b32.xlu1 %v11242_v25, %s16067_s29 }
 0x33b   :  { %1388 = vrot.lane.b32.xlu0 %v11209_v1, %s16070_s14  ;;  %1788 = vrot.lane.b32.xlu1 %v11276_v19, %s15721_s28  ;;  %s16073_s28 = smov 111  }
 0x33f   :  { %1392 = vrot.lane.b32.xlu0 %v11215_v22, %s16070_s14  ;;  %1706 = vrot.lane.b32.xlu1 %v11276_v19, %s15719_s24  ;;  %s15767_s24 = smov 126  }
 0x343   :  { %1400 = vrot.lane.b32.xlu0 %v11248_v27, %s16070_s14  ;;  %1472 = vrot.lane.b32.xlu1 %v11230_v35, %s16068_s1 }
 0x347   :  { %1306 = vrot.lane.b32.xlu0 %v11209_v1, %s16071_s30  ;;  %1476 = vrot.lane.b32.xlu1 %v11236_v62, %s16068_s1 }
 0x34b   :  { %1310 = vrot.lane.b32.xlu0 %v11215_v22, %s16071_s30  ;;  %1484 = vrot.lane.b32.xlu1 %v11276_v19, %s16068_s1 }
 0x34f   :  { %1318 = vrot.lane.b32.xlu0 %v11248_v27, %s16071_s30  ;;  %1624 = vrot.lane.b32.xlu1 %v11276_v19, %s16067_s29 }
 0x353   :  { %1478 = vrot.lane.b32.xlu0 %v11222_v56, %s16068_s1  ;;  %1390 = vrot.lane.b32.xlu1 %v11230_v35, %s16070_s14 }
 0x357   :  { %1224 = vrot.lane.b32.xlu0 %v11209_v1, %s16072_s27  ;;  %1394 = vrot.lane.b32.xlu1 %v11236_v62, %s16070_s14 }
 0x35b   :  { %1228 = vrot.lane.b32.xlu0 %v11215_v22, %s16072_s27  ;;  %1402 = vrot.lane.b32.xlu1 %v11276_v19, %s16070_s14 }
 0x35f   :  { %1236 = vrot.lane.b32.xlu0 %v11248_v27, %s16072_s27  ;;  %1308 = vrot.lane.b32.xlu1 %v11230_v35, %s16071_s30 }
 0x363   :  { %1396 = vrot.lane.b32.xlu0 %v11222_v56, %s16070_s14  ;;  %1312 = vrot.lane.b32.xlu1 %v11236_v62, %s16071_s30 }
 0x367   :  { %1856 = vrot.lane.b32.xlu0 %v11209_v1, %s16073_s28  ;;  %1320 = vrot.lane.b32.xlu1 %v11276_v19, %s16071_s30 }
 0x36b   :  { %1860 = vrot.lane.b32.xlu0 %v11215_v22, %s16073_s28  ;;  %1480 = vrot.lane.b32.xlu1 %v11242_v25, %s16068_s1 }
 0x36f   :  { %1864 = vrot.lane.b32.xlu0 %v11222_v56, %s16073_s28  ;;  %1226 = vrot.lane.b32.xlu1 %v11230_v35, %s16072_s27 }
 0x373   :  { %1314 = vrot.lane.b32.xlu0 %v11222_v56, %s16071_s30  ;;  %1230 = vrot.lane.b32.xlu1 %v11236_v62, %s16072_s27 }
 0x377   :  { %1232 = vrot.lane.b32.xlu0 %v11222_v56, %s16072_s27  ;;  %1238 = vrot.lane.b32.xlu1 %v11276_v19, %s16072_s27 }
 0x37b   :  { %1868 = vrot.lane.b32.xlu0 %v11248_v27, %s16073_s28  ;;  %1398 = vrot.lane.b32.xlu1 %v11242_v25, %s16070_s14 }
 0x37d   :  { %v11410_v47 = vpop.permute.xlu0 %1692  ;;  %v11412_v3 = vpop.permute.xlu1 %1774 }
 0x37f   :  { %1858 = vrot.lane.b32.xlu1 %v11230_v35, %s16073_s28  ;;  %3259 = vrot.lane.b32.xlu0 %v11297_v5, %s15767_s24 }
 0x381   :  { %v1697_v61 = vpop.permute.xlu0 %1696  ;;  %v1779_v44 = vpop.permute.xlu1 %1778 }
 0x382   :  { %v1794_v32 = vsel %vm654_vm0, %v11412_v3, %v1779_v44 }
 0x383   :  { %1862 = vrot.lane.b32.xlu1 %v11236_v62, %s16073_s28  ;;  %3263 = vrot.lane.b32.xlu0 %v11303_v42, %s15767_s24  ;;  %v1820_v13 = vmul.f32 %v1803_v0, %v1794_v32 }
 0x385   :  { %v11425_v40 = vpop.permute.xlu0 %1700  ;;  %v11427_v60 = vpop.permute.xlu1 %1782 }
 0x386   :  { %v1792_v15 = vsel %vm654_vm0, %v1779_v44, %v11427_v60 }
 0x387   :  { %1866 = vrot.lane.b32.xlu1 %v11242_v25, %s16073_s28  ;;  %3267 = vrot.lane.b32.xlu0 %v11353_v17, %s15767_s24  ;;  %v1821_v45 = vmul.f32 %v1807_v57, %v1792_v15 }
 0x389   :  { %v11435_v59 = vpop.permute.xlu0 %1610  ;;  %v11437_v21 = vpop.permute.xlu1 %1776 }
 0x38b   :  { %1316 = vrot.lane.b32.xlu1 %v11242_v25, %s16071_s30  ;;  %3271 = vrot.lane.b32.xlu0 %v11359_v37, %s15767_s24 }
 0x38d   :  { %v11450_v20 = vpop.permute.xlu0 %1614  ;;  %v1781_v41 = vpop.permute.xlu1 %1780 }
 0x38e   :  { %v1795_v8 = vsel %vm654_vm0, %v11437_v21, %v1781_v41 }
 0x38f   :  { %1234 = vrot.lane.b32.xlu1 %v11242_v25, %s16072_s27  ;;  %v1824_v43 = vmul.f32 %v1803_v0, %v1795_v8  ;;  %v1710_v8 = vsel %vm570_vm2, %v1697_v61, %v11425_v40  ;;  %v1721_v0 = vrot.slane %v8792_v11, %v10602_v14  ;;  %2690 = vrot.lane.b32.xlu0 %v11297_v5, %s15757_s25 }
 0x391   :  { %v11465_v29 = vpop.permute.xlu0 %1618  ;;  %v11467_v6 = vpop.permute.xlu1 %1784  ;;  %v10173_v39 = vpack.c.bf16 %v1824_v43, %v1820_v13 }
 0x392   :  { %v1793_v24 = vsel %vm654_vm0, %v1781_v41, %v11467_v6  ;;  %v1725_v41 = vrot.slane %v8792_v11, %v10619_v18 }
 0x393   :  { %v1825_v26 = vmul.f32 %v1807_v57, %v1793_v24  ;;  %1870 = vrot.lane.b32.xlu1 %v11276_v19, %s16073_s28  ;;  %2694 = vrot.lane.b32.xlu0 %v11303_v42, %s15757_s25 }
 0x394   :  { %v1739_v13 = vmul.f32 %v1725_v41, %v1710_v8 }
 0x395   :  { %v1787_v44 = vpop.permute.xlu0 %1786  ;;  %v11474_v48 = vpop.permute.xlu1 %1694  ;;  %v10172_v15 = vpack.c.bf16 %v1825_v26, %v1821_v45  ;;  %v1712_v26 = vsel %vm570_vm2, %v11410_v47, %v1697_v61  ;;  %v11508_v61 = vld [vmem:[%s16002_s23 + $0x4] ss:$8 sm:$0xf] }
 0x397   :  { %3261 = vrot.lane.b32.xlu1 %v11309_v33, %s15767_s24  ;;  %2168 = vmatprep.subr.bf16.mxu0 %v10172_v15  ;;  %v1738_v15 = vmul.f32 %v1721_v0, %v1712_v26  ;;  %v1561_v26 = vrot.slane %v11508_v61, %v10619_v18 }
 0x398   :  { %2169 = vmatpush1.bf16.msra.mxu0 %v10173_v39  ;;  %2698 = vrot.lane.b32.xlu0 %v11353_v17, %s15757_s25 }
 0x399   :  { %v11482_v32 = vpop.permute.xlu0 %1704  ;;  %v1699_v24 = vpop.permute.xlu1 %1698  ;;  %v1575_v34 = vmul.f32 %v1561_v26, %v11215_v22 }
 0x39a   :  { %v1713_v43 = vsel %vm570_vm2, %v11474_v48, %v1699_v24 }
 0x39b   :  { %3265 = vrot.lane.b32.xlu1 %v11315_v46, %s15767_s24  ;;  %v1742_v31 = vmul.f32 %v1721_v0, %v1713_v43  ;;  %v11527_v43 = vld [vmem:[%s16002_s23 + $0x5] ss:$8 sm:$0xf] }
 0x39c   :  { %2702 = vrot.lane.b32.xlu0 %v11359_v37, %s15757_s25 }
 0x39d   :  { %v11496_v45 = vpop.permute.xlu0 %1470  ;;  %v11498_v57 = vpop.permute.xlu1 %1702  ;;  %v10175_v0 = vpack.c.bf16 %v1742_v31, %v1738_v15  ;;  %v1628_v31 = vsel %vm486_vm3, %v11450_v20, %v11465_v29 }
 0x39e   :  { %v1711_v39 = vsel %vm570_vm2, %v1699_v24, %v11498_v57  ;;  %v1557_v24 = vrot.slane %v11508_v61, %v10602_v14 }
 0x39f   :  { %v1743_v10 = vmul.f32 %v1725_v41, %v1711_v39  ;;  %3269 = vrot.lane.b32.xlu1 %v11365_v58, %s15767_s24  ;;  %v1643_v39 = vrot.slane %v11527_v43, %v10619_v18 }
 0x3a0   :  { %v1574_v15 = vmul.f32 %v1557_v24, %v11209_v1  ;;  %v1578_v51 = vmul.f32 %v1557_v24, %v11230_v35  ;;  %v1579_v1 = vmul.f32 %v1561_v26, %v11236_v62  ;;  %v1796_v35 = vsel %vm654_vm0, %v1787_v44, %v11412_v3  ;;  %4518 = vrot.lane.b32.xlu0 %v11297_v5, %s15763_s3 }
 0x3a1   :  { %v11512_v8 = vpop.permute.xlu0 %1474  ;;  %v11514_v7 = vpop.permute.xlu1 %1612  ;;  %v10174_v41 = vpack.c.bf16 %v1743_v10, %v1739_v13  ;;  %v1639_v13 = vrot.slane %v11527_v43, %v10602_v14  ;;  %v1657_v22 = vmul.f32 %v1643_v39, %v1628_v31  ;;  %v1823_v2 = vmul.f32 %v1815_v4, %v1796_v35 }
 0x3a3   :  { %3273 = vrot.lane.b32.xlu1 %v11371_v49, %s15767_s24  ;;  %2170 = vmatprep.subr.bf16.mxu0 %v10174_v41  ;;  %v1630_v41 = vsel %vm486_vm3, %v11435_v59, %v11450_v20  ;;  %v1790_v20 = vsel %vm654_vm0, %v11427_v60, %v1787_v44  ;;  %v1733_v60 = vrot.slane %v8792_v11, %v10680_v55 }
 0x3a4   :  { %2171 = vmatpush1.bf16.msra.mxu0 %v10175_v0  ;;  %v1656_v24 = vmul.f32 %v1639_v13, %v1630_v41  ;;  %v1822_v50 = vmul.f32 %v1811_v52, %v1790_v20  ;;  %4522 = vrot.lane.b32.xlu0 %v11303_v42, %s15763_s3 }
 0x3a5   :  { %v11531_v63 = vpop.permute.xlu0 %1482  ;;  %v1617_v10 = vpop.permute.xlu1 %1616 }
 0x3a6   :  { %v1631_v0 = vsel %vm486_vm3, %v11514_v7, %v1617_v10 }
 0x3a7   :  { %2692 = vrot.lane.b32.xlu1 %v11309_v33, %s15757_s25  ;;  %v1660_v26 = vmul.f32 %v1639_v13, %v1631_v0 }
 0x3a8   :  { %4526 = vrot.lane.b32.xlu0 %v11353_v17, %s15763_s3 }
 0x3a9   :  { %v11558_v16 = vpop.permute.xlu0 %1622  ;;  %v11560_v36 = vpop.permute.xlu1 %1620  ;;  %v10177_v35 = vpack.c.bf16 %v1660_v26, %v1656_v24 }
 0x3aa   :  { %v1629_v62 = vsel %vm486_vm3, %v1617_v10, %v11560_v36  ;;  %v1714_v10 = vsel %vm570_vm2, %v11482_v32, %v11410_v47 }
 0x3ab   :  { %v1661_v31 = vmul.f32 %v1643_v39, %v1629_v62  ;;  %2696 = vrot.lane.b32.xlu1 %v11315_v46, %s15757_s25  ;;  %v1708_v39 = vsel %vm570_vm2, %v11425_v40, %v11482_v32  ;;  %v10178_v40 = vpack.c.bf16 %v1579_v1, %v1575_v34  ;;  %v1741_v32 = vmul.f32 %v1733_v60, %v1714_v10 }
 0x3ac   :  { %v1740_v47 = vmul.f32 %v1729_v53, %v1708_v39  ;;  %4530 = vrot.lane.b32.xlu0 %v11359_v37, %s15763_s3 }
 0x3ad   :  { %v11577_v3 = vpop.permute.xlu0 %1388  ;;  %v1789_v44 = vpop.permute.xlu1 %1788  ;;  %v10176_v20 = vpack.c.bf16 %v1661_v31, %v1657_v22  ;;  %v10180_v22 = vpack.c.bf16 %v1578_v51, %v1574_v15 }
 0x3ae   :  { %v1791_v13 = vsel %vm654_vm0, %v11467_v6, %v1789_v44  ;;  %v1797_v11 = vsel %vm654_vm0, %v1789_v44, %v11437_v21  ;;  %v1490_v44 = vsel %vm343_vm4, %v11496_v45, %v11512_v8 }
 0x3af   :  { %v1826_v41 = vmul.f32 %v1811_v52, %v1791_v13  ;;  %v1827_v0 = vmul.f32 %v1815_v4, %v1797_v11  ;;  %2700 = vrot.lane.b32.xlu1 %v11365_v58, %s15757_s25  ;;  %2172 = vmatprep.subr.bf16.mxu0 %v10176_v20  ;;  %v1647_v13 = vrot.slane %v11527_v43, %v10677_v54 }
 0x3b0   :  { %2173 = vmatpush1.bf16.msra.mxu0 %v10177_v35  ;;  %v1651_v11 = vrot.slane %v11527_v43, %v10680_v55  ;;  %v1626_v20 = vsel %vm486_vm3, %v11465_v29, %v11558_v16  ;;  %v1632_v35 = vsel %vm486_vm3, %v11558_v16, %v11435_v59  ;;  %4352 = vrot.lane.b32.xlu0 %v11297_v5, %s15759_s2 }
 0x3b1   :  { %v11597_v62 = vpop.permute.xlu0 %1392  ;;  %v1707_v6 = vpop.permute.xlu1 %1706  ;;  %2174 = vmatprep.subr.bf16.mxu0 %v10178_v40  ;;  %v10179_v1 = vpack.c.bf16 %v1827_v0, %v1823_v2  ;;  %v10181_v24 = vpack.c.bf16 %v1826_v41, %v1822_v50  ;;  %v11614_v2 = vld [vmem:[%s16002_s23 + $0x3] ss:$8 sm:$0xf]  ;;  %v1565_v0 = vrot.slane %v11508_v61, %v10677_v54  ;;  %v1569_v40 = vrot.slane %v11508_v61, %v10680_v55 }
 0x3b2   :  { %v1709_v4 = vsel %vm570_vm2, %v11498_v57, %v1707_v6  ;;  %v1715_v52 = vsel %vm570_vm2, %v1707_v6, %v11474_v48  ;;  %v1499_v50 = vrot.slane %v11614_v2, %v10602_v14  ;;  %v1658_v29 = vmul.f32 %v1647_v13, %v1626_v20 }
 0x3b3   :  { %v1744_v34 = vmul.f32 %v1729_v53, %v1709_v4  ;;  %v1745_v21 = vmul.f32 %v1733_v60, %v1715_v52  ;;  %2704 = vrot.lane.b32.xlu1 %v11371_v49, %s15757_s25  ;;  %2211 = vmatprep.subr.bf16.mxu1 %v10179_v1  ;;  %v1492_v53 = vsel %vm343_vm4, %v11531_v63, %v11496_v45  ;;  %s15761_s25 = smov 97  }
 0x3b4   :  { %2175 = vmatpush1.bf16.msra.mxu0 %v10180_v22  ;;  %2212 = vmatpush1.bf16.msra.mxu1 %v10181_v24  ;;  %v1503_v60 = vrot.slane %v11614_v2, %v10619_v18  ;;  %v1516_v10 = vmul.f32 %v1499_v50, %v1492_v53  ;;  %v1580_v4 = vmul.f32 %v1565_v0, %v11242_v25 }
 0x3b5   :  { %v11609_v26 = vpop.permute.xlu0 %1400  ;;  %v1473_v57 = vpop.permute.xlu1 %1472  ;;  %v10182_v48 = vpack.c.bf16 %v1745_v21, %v1741_v32  ;;  %v10183_v31 = vpack.c.bf16 %v1744_v34, %v1740_v47  ;;  %v1581_v52 = vmul.f32 %v1569_v40, %v11276_v19  ;;  %v1659_v16 = vmul.f32 %v1651_v11, %v1632_v35  ;;  %4356 = vrot.lane.b32.xlu0 %v11303_v42, %s15759_s2 }
 0x3b6   :  { %v1517_v47 = vmul.f32 %v1503_v60, %v1490_v44  ;;  %v1576_v19 = vmul.f32 %v1565_v0, %v11222_v56  ;;  %v1577_v24 = vmul.f32 %v1569_v40, %v11248_v27  ;;  %v11689_v56 = vld [vmem:[%s16002_s23 + $0x2] ss:$8 sm:$0xf]  ;;  %v1410_v44 = vsel %vm259_vm5, %v11609_v26, %v11577_v3 }
 0x3b7   :  { %4520 = vrot.lane.b32.xlu1 %v11309_v33, %s15763_s3  ;;  %2213 = vmatprep.subr.bf16.mxu1 %v10182_v48  ;;  %v1417_v27 = vrot.slane %v11689_v56, %v10602_v14 }
 0x3b8   :  { %2214 = vmatpush1.bf16.msra.mxu1 %v10183_v31 }
 0x3b9   :  { %v11622_v51 = vpop.permute.xlu0 %1306  ;;  %v11624_v15 = vpop.permute.xlu1 %1476  ;;  %4360 = vrot.lane.b32.xlu0 %v11353_v17, %s15759_s2  ;;  %v1434_v0 = vmul.f32 %v1417_v27, %v1410_v44 }
 0x3ba   :  { %v1491_v39 = vsel %vm343_vm4, %v1473_v57, %v11624_v15 }
 0x3bb   :  { %4524 = vrot.lane.b32.xlu1 %v11315_v46, %s15763_s3  ;;  %v1521_v32 = vmul.f32 %v1503_v60, %v1491_v39  ;;  %v10188_v60 = vpack.c.bf16 %v1581_v52, %v1577_v24  ;;  %v1421_v39 = vrot.slane %v11689_v56, %v10619_v18  ;;  %v1507_v24 = vrot.slane %v11614_v2, %v10677_v54 }
 0x3bd   :  { %v11647_v41 = vpop.permute.xlu0 %1310  ;;  %v11649_v45 = vpop.permute.xlu1 %1484  ;;  %v10184_v22 = vpack.c.bf16 %v1521_v32, %v1517_v47  ;;  %4364 = vrot.lane.b32.xlu0 %v11359_v37, %s15759_s2 }
 0x3be   :  { %v1493_v43 = vsel %vm343_vm4, %v11649_v45, %v1473_v57 }
 0x3bf   :  { %v1520_v6 = vmul.f32 %v1499_v50, %v1493_v43  ;;  %4528 = vrot.lane.b32.xlu1 %v11365_v58, %s15763_s3  ;;  %2176 = vmatprep.subr.bf16.mxu0 %v10184_v22 }
 0x3c1   :  { %v11672_v59 = vpop.permute.xlu0 %1318  ;;  %v1625_v34 = vpop.permute.xlu1 %1624  ;;  %v10185_v57 = vpack.c.bf16 %v1520_v6, %v1516_v10  ;;  %v1408_v10 = vsel %vm259_vm5, %v11577_v3, %v11597_v62  ;;  %4186 = vrot.lane.b32.xlu0 %v11297_v5, %s15765_s22 }
 0x3c2   :  { %v1627_v61 = vsel %vm486_vm3, %v11560_v36, %v1625_v34  ;;  %v1633_v25 = vsel %vm486_vm3, %v1625_v34, %v11514_v7  ;;  %v1435_v43 = vmul.f32 %v1421_v39, %v1408_v10 }
 0x3c3   :  { %v1662_v21 = vmul.f32 %v1647_v13, %v1627_v61  ;;  %v1663_v1 = vmul.f32 %v1651_v11, %v1633_v25  ;;  %4532 = vrot.lane.b32.xlu1 %v11371_v49, %s15763_s3  ;;  %2177 = vmatpush1.bf16.msra.mxu0 %v10185_v57  ;;  %v10189_v11 = vpack.c.bf16 %v1580_v4, %v1576_v19 }
 0x3c4   :  { %v1328_v25 = vsel %vm175_vm6, %v11672_v59, %v11622_v51  ;;  %v1511_v57 = vrot.slane %v11614_v2, %v10680_v55 }
 0x3c5   :  { %v1479_v48 = vpop.permute.xlu0 %1478  ;;  %v1391_v36 = vpop.permute.xlu1 %1390  ;;  %v10186_v31 = vpack.c.bf16 %v1663_v1, %v1659_v16  ;;  %v10187_v7 = vpack.c.bf16 %v1662_v21, %v1658_v29  ;;  %v11734_v29 = vld [vmem:[%s16002_s23 + $0x1] ss:$8 sm:$0xf]  ;;  %4190 = vrot.lane.b32.xlu0 %v11303_v42, %s15765_s22  ;;  %v1326_v21 = vsel %vm175_vm6, %v11622_v51, %v11647_v41 }
 0x3c6   :  { %v1335_v16 = vrot.slane %v11734_v29, %v10602_v14  ;;  %v1339_v19 = vrot.slane %v11734_v29, %v10619_v18  ;;  %v1486_v51 = vsel %vm343_vm4, %v1479_v48, %v11531_v63 }
 0x3c7   :  { %4354 = vrot.lane.b32.xlu1 %v11309_v33, %s15759_s2  ;;  %2215 = vmatprep.subr.bf16.mxu1 %v10186_v31  ;;  %v1488_v31 = vsel %vm343_vm4, %v11512_v8, %v1479_v48  ;;  %v1519_v2 = vmul.f32 %v1511_v57, %v1486_v51 }
 0x3c8   :  { %2216 = vmatpush1.bf16.msra.mxu1 %v10187_v7  ;;  %v1352_v22 = vmul.f32 %v1335_v16, %v1328_v25  ;;  %v1518_v63 = vmul.f32 %v1507_v24, %v1488_v31 }
 0x3c9   :  { %v11697_v50 = vpop.permute.xlu0 %1224  ;;  %v11699_v53 = vpop.permute.xlu1 %1394  ;;  %2217 = vmatprep.subr.bf16.mxu1 %v10188_v60  ;;  %4194 = vrot.lane.b32.xlu0 %v11353_v17, %s15765_s22 }
 0x3ca   :  { %v1409_v13 = vsel %vm259_vm5, %v1391_v36, %v11699_v53 }
 0x3cb   :  { %4358 = vrot.lane.b32.xlu1 %v11315_v46, %s15759_s2  ;;  %v1439_v40 = vmul.f32 %v1421_v39, %v1409_v13 }
 0x3cc   :  { %2218 = vmatpush1.bf16.msra.mxu1 %v10189_v11 }
 0x3cd   :  { %v11718_v20 = vpop.permute.xlu0 %1228  ;;  %v11720_v35 = vpop.permute.xlu1 %1402  ;;  %v10190_v4 = vpack.c.bf16 %v1439_v40, %v1435_v43  ;;  %4198 = vrot.lane.b32.xlu0 %v11359_v37, %s15765_s22 }
 0x3ce   :  { %v1411_v3 = vsel %vm259_vm5, %v11720_v35, %v1391_v36  ;;  %v1244_v25 = vsel %vm92_vm7, %v11697_v50, %v11718_v20 }
 0x3cf   :  { %v1438_v47 = vmul.f32 %v1417_v27, %v1411_v3  ;;  %4362 = vrot.lane.b32.xlu1 %v11365_v58, %s15759_s2  ;;  %2178 = vmatprep.subr.bf16.mxu0 %v10190_v4  ;;  %v1353_v27 = vmul.f32 %v1339_v19, %v1326_v21  ;;  %v1429_v21 = vrot.slane %v11689_v56, %v10680_v55 }
 0x3d1   :  { %v11729_v32 = vpop.permute.xlu0 %1236  ;;  %v1309_v6 = vpop.permute.xlu1 %1308  ;;  %v10191_v52 = vpack.c.bf16 %v1438_v47, %v1434_v0  ;;  %4020 = vrot.lane.b32.xlu0 %v11297_v5, %s15761_s25 }
 0x3d2   :  { %v1246_v4 = vsel %vm92_vm7, %v11729_v32, %v11697_v50 }
 0x3d3   :  { %4366 = vrot.lane.b32.xlu1 %v11371_v49, %s15759_s2  ;;  %2179 = vmatpush1.bf16.msra.mxu0 %v10191_v52  ;;  %s16104_s2 = smov 14  }
 0x3d5   :  { %v1397_v34 = vpop.permute.xlu0 %1396  ;;  %v11742_v61 = vpop.permute.xlu1 %1312  ;;  %4024 = vrot.lane.b32.xlu0 %v11303_v42, %s15761_s25 }
 0x3d6   :  { %v1327_v1 = vsel %vm175_vm6, %v1309_v6, %v11742_v61 }
 0x3d7   :  { %4188 = vrot.lane.b32.xlu1 %v11309_v33, %s15765_s22  ;;  %v1357_v60 = vmul.f32 %v1339_v19, %v1327_v1  ;;  %v1425_v19 = vrot.slane %v11689_v56, %v10677_v54 }
 0x3d9   :  { %v11765_v36 = vpop.permute.xlu1 %1320  ;;  %v11776_v44 = vpop.permute.xlu0 %1856  ;;  %v10192_v0 = vpack.c.bf16 %v1357_v60, %v1353_v27  ;;  %4028 = vrot.lane.b32.xlu0 %v11353_v17, %s15761_s25  ;;  %v1406_v17 = vsel %vm259_vm5, %v11597_v62, %v1397_v34 }
 0x3da   :  { %v1329_v7 = vsel %vm175_vm6, %v11765_v36, %v1309_v6  ;;  %v1436_v56 = vmul.f32 %v1425_v19, %v1406_v17 }
 0x3db   :  { %v1356_v39 = vmul.f32 %v1335_v16, %v1329_v7  ;;  %4192 = vrot.lane.b32.xlu1 %v11315_v46, %s15765_s22  ;;  %2180 = vmatprep.subr.bf16.mxu0 %v10192_v0  ;;  %v1343_v0 = vrot.slane %v11734_v29, %v10677_v54 }
 0x3dd   :  { %v1481_v10 = vpop.permute.xlu1 %1480  ;;  %v10193_v3 = vpack.c.bf16 %v1356_v39, %v1352_v22  ;;  %v1861_v43 = vpop.permute.xlu0 %1860  ;;  %4032 = vrot.lane.b32.xlu0 %v11359_v37, %s15761_s25  ;;  %v8802_v37 = vld [vmem:[%s16002_s23 + $0x20] ss:$8 sm:$0xf] }
 0x3de   :  { %v1487_v8 = vsel %vm343_vm4, %v1481_v10, %v11649_v45  ;;  %v1489_v48 = vsel %vm343_vm4, %v11624_v15, %v1481_v10  ;;  %v11799_v15 = vld [vmem:[%s16002_s23] ss:$8 sm:$0xf]  ;;  %s10305_s23 = smov 110  }
 0x3df   :  { %v1522_v13 = vmul.f32 %v1507_v24, %v1489_v48  ;;  %v1523_v11 = vmul.f32 %v1511_v57, %v1487_v8  ;;  %4196 = vrot.lane.b32.xlu1 %v11365_v58, %s15765_s22  ;;  %2181 = vmatpush1.bf16.msra.mxu0 %v10193_v3  ;;  %v1253_v5 = vrot.slane %v11799_v15, %v10602_v14 }
 0x3e0   :  { %v1257_v42 = vrot.slane %v11799_v15, %v10619_v18  ;;  %v1885_v48 = vrot.slane %v8802_v37, %v10602_v14  ;;  %v1347_v3 = vrot.slane %v11734_v29, %v10680_v55  ;;  %v1261_v29 = vrot.slane %v11799_v15, %v10677_v54 }
 0x3e1   :  { %v1227_v40 = vpop.permute.xlu1 %1226  ;;  %v10194_v45 = vpack.c.bf16 %v1523_v11, %v1519_v2  ;;  %v10195_v47 = vpack.c.bf16 %v1522_v13, %v1518_v63  ;;  %v11809_v52 = vpop.permute.xlu0 %1864  ;;  %v1270_v22 = vmul.f32 %v1253_v5, %v1246_v4  ;;  %v1876_v13 = vsel %vm738_vm8, %v11776_v44, %v1861_v43 }
 0x3e2   :  { %v1271_v51 = vmul.f32 %v1257_v42, %v1244_v25 }
 0x3e3   :  { %4200 = vrot.lane.b32.xlu1 %v11371_v49, %s15765_s22  ;;  %2219 = vmatprep.subr.bf16.mxu1 %v10194_v45 }
 0x3e4   :  { %2220 = vmatpush1.bf16.msra.mxu1 %v10195_v47 }
 0x3e5   :  { %v11801_v6 = vpop.permute.xlu1 %1230 }
 0x3e6   :  { %v1245_v16 = vsel %vm92_vm7, %v1227_v40, %v11801_v6 }
 0x3e7   :  { %4022 = vrot.lane.b32.xlu1 %v11309_v33, %s15761_s25  ;;  %v1404_v33 = vsel %vm259_vm5, %v1397_v34, %v11609_v26  ;;  %v1275_v24 = vmul.f32 %v1257_v42, %v1245_v16  ;;  %v1315_v26 = vpop.permute.xlu0 %1314 }
 0x3e8   :  { %v1437_v31 = vmul.f32 %v1429_v21, %v1404_v33 }
 0x3e9   :  { %v11828_v1 = vpop.permute.xlu1 %1238  ;;  %v10196_v39 = vpack.c.bf16 %v1275_v24, %v1271_v51 }
 0x3ea   :  { %v1247_v50 = vsel %vm92_vm7, %v11828_v1, %v1227_v40  ;;  %v1324_v40 = vsel %vm175_vm6, %v11647_v41, %v1315_v26 }
 0x3eb   :  { %v1274_v57 = vmul.f32 %v1253_v5, %v1247_v50  ;;  %4026 = vrot.lane.b32.xlu1 %v11315_v46, %s15761_s25  ;;  %2182 = vmatprep.subr.bf16.mxu0 %v10196_v39  ;;  %v1233_v2 = vpop.permute.xlu0 %1232  ;;  %v1902_v5 = vmul.f32 %v1885_v48, %v1876_v13  ;;  %v1354_v25 = vmul.f32 %v1343_v0, %v1324_v40  ;;  %v8915_v39 = vld [vmem:[%s15997_s15 + $0x7] ss:$8 sm:$0xf] }
 0x3ed   :  { %v1399_v7 = vpop.permute.xlu1 %1398  ;;  %v10197_v63 = vpack.c.bf16 %v1274_v57, %v1270_v22 }
 0x3ee   :  { %v1405_v62 = vsel %vm259_vm5, %v1399_v7, %v11720_v35  ;;  %v1407_v34 = vsel %vm259_vm5, %v11699_v53, %v1399_v7  ;;  %v1889_v53 = vrot.slane %v8802_v37, %v10619_v18 }
 0x3ef   :  { %v1440_v27 = vmul.f32 %v1425_v19, %v1407_v34  ;;  %v1441_v60 = vmul.f32 %v1429_v21, %v1405_v62  ;;  %4030 = vrot.lane.b32.xlu1 %v11365_v58, %s15761_s25  ;;  %2183 = vmatpush1.bf16.msra.mxu0 %v10197_v63  ;;  %v1874_v58 = vsel %vm738_vm8, %v1861_v43, %v11809_v52  ;;  %v1869_v45 = vpop.permute.xlu0 %1868 }
 0x3f0   :  { %v1903_v11 = vmul.f32 %v1889_v53, %v1874_v58  ;;  %v1322_v43 = vsel %vm175_vm6, %v1315_v26, %v11672_v59  ;;  %v1265_v19 = vrot.slane %v11799_v15, %v10680_v55  ;;  %v1240_v21 = vsel %vm92_vm7, %v1233_v2, %v11729_v32 }
 0x3f1   :  { %v11851_v46 = vpop.permute.xlu1 %1858  ;;  %v10198_v35 = vpack.c.bf16 %v1441_v60, %v1437_v31  ;;  %v10199_v10 = vpack.c.bf16 %v1440_v27, %v1436_v56  ;;  %v1355_v41 = vmul.f32 %v1347_v3, %v1322_v43  ;;  %v1242_v59 = vsel %vm92_vm7, %v11718_v20, %v1233_v2 }
 0x3f2   :  { %v1272_v32 = vmul.f32 %v1261_v29, %v1242_v59  ;;  %v1273_v56 = vmul.f32 %v1265_v19, %v1240_v21  ;;  %v1893_v31 = vrot.slane %v8802_v37, %v10677_v54  ;;  %v1897_v20 = vrot.slane %v8802_v37, %v10680_v55 }
 0x3f3   :  { %4034 = vrot.lane.b32.xlu1 %v11371_v49, %s15761_s25  ;;  %2221 = vmatprep.subr.bf16.mxu1 %v10198_v35  ;;  %v11891_v33 = vpop.permute.xlu0 %3259  ;;  %v1878_v7 = vsel %vm738_vm8, %v1869_v45, %v11776_v44  ;;  %v16077_v59 = vpack.c.bf16 %v10788_v30, %v10790_v38  ;;  %s16096_s25 = smov 95  }
 0x3f4   :  { %2222 = vmatpush1.bf16.msra.mxu1 %v10199_v10  ;;  %16074 = vst [vmem:[#allocation70_spill] sm:$0xff] %v11891_v33 }
 0x3f5   :  { %v1863_v8 = vpop.permute.xlu1 %1862 }
 0x3f6   :  { %v1877_v49 = vsel %vm738_vm8, %v11851_v46, %v1863_v8 }
 0x3f7   :  { %v1906_v42 = vmul.f32 %v1885_v48, %v1877_v49  ;;  %v3264_v44 = vpop.permute.xlu0 %3263 }
 0x3f9   :  { %v1867_v47 = vpop.permute.xlu1 %1866  ;;  %v10201_v51 = vpack.c.bf16 %v1906_v42, %v1902_v5 }
 0x3fa   :  { %v1875_v4 = vsel %vm738_vm8, %v1863_v8, %v1867_v47 }
 0x3fb   :  { %v1907_v16 = vmul.f32 %v1889_v53, %v1875_v4 }
 0x3fd   :  { %v1317_v22 = vpop.permute.xlu1 %1316  ;;  %v10200_v57 = vpack.c.bf16 %v1907_v16, %v1903_v11 }
 0x3fe   :  { %v1323_v17 = vsel %vm175_vm6, %v1317_v22, %v11765_v36  ;;  %v1325_v15 = vsel %vm175_vm6, %v11742_v61, %v1317_v22  ;;  %v10003_v36 = vld [vmem:[%s15649_s4] ss:$8 sps:$4 sm:$0xff]   ;;  %v1872_v61 = vsel %vm738_vm8, %v11809_v52, %v1869_v45  ;;  %v8916_v52 = vld [vmem:[%s15997_s15 + $0x7] ss:$8 sm:$0xf0]  ;;  %v3304_v45 = vsel %vm3291_vm9, %v11891_v33, %v3264_v44  ;;  %s10307_s4 = smov 6  }
 0x3ff   :  { %v1358_v50 = vmul.f32 %v1343_v0, %v1325_v15  ;;  %v1359_v24 = vmul.f32 %v1347_v3, %v1323_v17  ;;  %2198 = vmatprep.subr.bf16.mxu0 %v10200_v57  ;;  %v1904_v2 = vmul.f32 %v1893_v31, %v1872_v61  ;;  %v11927_v53 = vor.u32 %v8916_v52, %v8915_v39  ;;  %v11932_v0 = vpop.permute.xlu0 %3267  ;;  %v8875_v57 = vld [vmem:[%s15997_s15 + $0x3] ss:$8 sm:$0xf] }
 0x400   :  { %2199 = vmatpush2.bf16.msra.mxu0 %v10201_v51  ;;  %v16078_v22 = vpack.c.bf16 %v10777_v23, %v10782_v28  ;;  %v8876_v23 = vld [vmem:[%s15997_s15 + $0x3] ss:$8 sm:$0xf0] }
 0x401   :  { %v1235_v26 = vpop.permute.xlu1 %1234  ;;  %v10202_v63 = vpack.c.bf16 %v1359_v24, %v1355_v41  ;;  %v10203_v37 = vpack.c.bf16 %v1358_v50, %v1354_v25  ;;  %16075 = vst [vmem:[#allocation71_spill] sm:$0xff] %v11927_v53  ;;  %v3316_v49 = vrot.slane %v11927_v53, %v10602_v14  ;;  %v11976_v28 = vor.u32 %v8876_v23, %v8875_v57  ;;  %v4706_v57 = vld [vmem:[#allocation2 + $0x160] sm:$0xff] }
 0x402   :  { %v1241_v62 = vsel %vm92_vm7, %v1235_v26, %v11828_v1  ;;  %v1243_v34 = vsel %vm92_vm7, %v11801_v6, %v1235_v26  ;;  %v1905_v1 = vmul.f32 %v1897_v20, %v1878_v7 }
 0x403   :  { %v1276_v27 = vmul.f32 %v1261_v29, %v1243_v34  ;;  %v1277_v60 = vmul.f32 %v1265_v19, %v1241_v62  ;;  %2201 = vmatmul.mubr.bf16.vlgmr.msra.gmra.mxu0 %v10003_v36  ;;  %2223 = vmatprep.subr.bf16.mxu1 %v10202_v63  ;;  %v3353_v4 = vmul.f32 %v3316_v49, %v3304_v45  ;;  %v11958_v17 = vpop.permute.xlu0 %3271 }
 0x404   :  { %2224 = vmatpush1.bf16.msra.mxu1 %v10203_v37  ;;  %16083 = vst [vmem:[#allocation77_spill] sm:$0xff] %v11976_v28  ;;  %v2755_v38 = vrot.slane %v11976_v28, %v10677_v54  ;;  %v2759_v61 = vrot.slane %v11976_v28, %v10680_v55  ;;  %v3300_v33 = vsel %vm3291_vm9, %v11932_v0, %v11958_v17 }
 0x405   :  { %v1871_v35 = vpop.permute.xlu1 %1870  ;;  %v10204_v48 = vpack.c.bf16 %v1277_v60, %v1273_v56  ;;  %v10205_v13 = vpack.c.bf16 %v1276_v27, %v1272_v32 }
 0x406   :  { %v1873_v6 = vsel %vm738_vm8, %v1867_v47, %v1871_v35  ;;  %v1879_v10 = vsel %vm738_vm8, %v1871_v35, %v11851_v46  ;;  %v3320_v46 = vrot.slane %v11927_v53, %v10619_v18  ;;  %v3302_v47 = vsel %vm3291_vm9, %v3264_v44, %v11932_v0  ;;  %v16090_v35 = vld [vmem:[#allocation69_spill] sm:$0xff] }
 0x407   :  { %v1908_v58 = vmul.f32 %v1893_v31, %v1873_v6  ;;  %v1909_v8 = vmul.f32 %v1897_v20, %v1879_v10  ;;  %2225 = vmatprep.subr.bf16.mxu1 %v10204_v48  ;;  %v11962_v50 = vpop.permute.xlu0 %2690  ;;  %v8996_v0 = vld [vmem:[%s15997_s15 + $0x47] ss:$8 sm:$0xf0] }
 0x408   :  { %2226 = vmatpush1.bf16.msra.mxu1 %v10205_v13  ;;  %v3354_v42 = vmul.f32 %v3320_v46, %v3302_v47  ;;  %16079 = vst [vmem:[#allocation73_spill] sm:$0xff] %v11962_v50  ;;  %v8965_v50 = vld [vmem:[%s15997_s15 + $0x44] ss:$8 sm:$0xf] }
 0x409   :  { %v11929_v11 = vpop.permute.xlu1 %3261  ;;  %v10206_v3 = vpack.c.bf16 %v1909_v8, %v1905_v1  ;;  %v10207_v40 = vpack.c.bf16 %v1908_v58, %v1904_v2  ;;  %v12016_v2 = vsub.s32 4, %v10587_v9  ;;  %v12019_v1 = vsub.s32 5, %v10587_v9 }
 0x40a   :  { %16076 = vst [vmem:[#allocation72_spill] sm:$0xff] %v11929_v11 }
 0x40b   :  { %2241 = vmatprep.subr.bf16.mxu1 %v10206_v3  ;;  %v11969_v51 = vpop.permute.xlu0 %2694  ;;  %16088 = vst [vmem:[#allocation82_spill] sm:$0xff] %v12016_v2  ;;  %16089 = vst [vmem:[#allocation83_spill] sm:$0xff] %v12019_v1  ;;  %v3023_v6 = vrot.slane %v16090_v35, %v12016_v2  ;;  %v3027_v10 = vrot.slane %v16090_v35, %v12019_v1  ;;  %v8995_v2 = vld [vmem:[%s15997_s15 + $0x47] ss:$8 sm:$0xf] }
 0x40c   :  { %2242 = vmatpush2.bf16.msra.mxu1 %v10207_v40  ;;  %16081 = vst [vmem:[#allocation75_spill] sm:$0xff] %v11969_v51  ;;  %v12061_v40 = vsub.s32 7, %v10587_v9 }
 0x40d   :  { %v3266_v5 = vpop.permute.xlu1 %3265 }
 0x40e   :  { %v3305_v43 = vsel %vm3291_vm9, %v11929_v11, %v3266_v5  ;;  %16093 = vst [vmem:[#allocation85_spill] sm:$0xff] %v12061_v40 }
 0x40f   :  { %v3361_v16 = vmul.f32 %v3316_v49, %v3305_v43  ;;  %2244 = vmatmul.mubr.bf16.vlgmr.msra.gmra.mxu1 %v10003_v36  ;;  %v2699_v32 = vpop.permute.xlu0 %2698 }
 0x410   :  { %v2733_v31 = vsel %vm2722_vm10, %v11969_v51, %v2699_v32 }
 0x411   :  { %v11947_v25 = vpop.permute.xlu1 %3269  ;;  %v10209_v21 = vpack.c.bf16 %v3361_v16, %v3353_v4  ;;  %v11987_v26 = vmul.f32 %v2755_v38, %v2733_v31 }
 0x412   :  { %v3303_v29 = vsel %vm3291_vm9, %v3266_v5, %v11947_v25 }
 0x413   :  { %v3362_v19 = vmul.f32 %v3320_v46, %v3303_v29  ;;  %16084 = vst [vmem:[#allocation78_spill] sm:$0xff] %v11987_v26  ;;  %v11993_v7 = vpop.permute.xlu0 %2702  ;;  %v12052_v46 = vsub.s32 6, %v10587_v9  ;;  %v3035_v9 = vrot.slane %v16090_v35, %v12061_v40  ;;  %v3328_v40 = vrot.slane %v11927_v53, %v10680_v55 }
 0x414   :  { %16086 = vst [vmem:[#allocation80_spill] sm:$0xff] %v11993_v7  ;;  %v2731_v34 = vsel %vm2722_vm10, %v2699_v32, %v11993_v7  ;;  %v3324_v7 = vrot.slane %v11927_v53, %v10677_v54  ;;  %v16124_v53 = vld [vmem:[#allocation45_spill] sm:$0xff] }
 0x415   :  { %v10208_v41 = vpack.c.bf16 %v3362_v19, %v3354_v42  ;;  %v11960_v15 = vpop.permute.xlu1 %3273  ;;  %v12003_v60 = vmul.f32 %v2759_v61, %v2731_v34  ;;  %16091 = vst [vmem:[#allocation69_spill] sm:$0xff] %v12052_v46  ;;  %v3031_v5 = vrot.slane %v16090_v35, %v12052_v46  ;;  %v16121_v46 = vld [vmem:[#allocation21_spill] sm:$0xff] }
 0x416   :  { %v3158_v1 = vrot.slane %v16121_v46, %v10677_v54 }
 0x417   :  { %5080 = vmatprep.subr.bf16.mxu0 %v10208_v41  ;;  %v9455_v52 = vpack.c.bf16 %v12003_v60, %v11987_v26  ;;  %v16138_v26 = vld [vmem:[#allocation26_spill] sm:$0xff] }
 0x418   :  { %5081 = vmatpush1.bf16.msra.mxu0 %v10209_v21 }
 0x419   :  { %5082 = vmatprep.subr.bf16.mxu0 %v16077_v59  ;;  %v11964_v24 = vpop.permute.xlu1 %2692  ;;  %2849 = vst [vmem:[#allocation2 + $0xc8] sm:$0xff] %v9455_v52 }
 0x41a   :  { %16080 = vst [vmem:[#allocation74_spill] sm:$0xff] %v11964_v24  ;;  %v8975_v24 = vld [vmem:[%s15997_s15 + $0x45] ss:$8 sm:$0xf] }
 0x41c   :  { %5083 = vmatpush1.bf16.msra.mxu0 %v16078_v22  ;;  %v4704_v22 = vld [vmem:[#allocation2 + $0x140] sm:$0xff] }
 0x41d   :  { %v11971_v30 = vpop.permute.xlu1 %2696  ;;  %v9028_v23 = vcombine.high %v4704_v22, %v4706_v57  ;;  %v9027_v32 = vcombine.low %v4704_v22, %v4706_v57 }
 0x41e   :  { %16082 = vst [vmem:[#allocation76_spill] sm:$0xff] %v11971_v30 }
 0x41f   :  { %5084 = vmatprep.subr.bf16.mxu0 %v9028_v23  ;;  %v10090_v23 = vld [vmem:[%s15996_s26 + $0x38] sm:$0xff] }
 0x420   :  { %5085 = vmatpush1.bf16.msra.mxu0 %v9027_v32 }
 0x421   :  { %v2701_v56 = vpop.permute.xlu1 %2700 }
 0x422   :  { %v2734_v20 = vsel %vm2722_vm10, %v11971_v30, %v2701_v56  ;;  %v8976_v30 = vld [vmem:[%s15997_s15 + $0x45] ss:$8 sm:$0xf0] }
 0x423   :  { %v11989_v36 = vmul.f32 %v2755_v38, %v2734_v20  ;;  %v12419_v51 = vor.u32 %v8976_v30, %v8975_v24  ;;  %v8966_v24 = vld [vmem:[%s15997_s15 + $0x44] ss:$8 sm:$0xf0] }
 0x425   :  { %16085 = vst [vmem:[#allocation79_spill] sm:$0xff] %v11989_v36  ;;  %v11995_v62 = vpop.permute.xlu1 %2704 }
 0x426   :  { %16087 = vst [vmem:[#allocation81_spill] sm:$0xff] %v11995_v62  ;;  %v2732_v27 = vsel %vm2722_vm10, %v2701_v56, %v11995_v62  ;;  %v12117_v56 = vpop.permute.xlu0 %4518 }
 0x427   :  { %v12005_v39 = vmul.f32 %v2759_v61, %v2732_v27  ;;  %16100 = vst [vmem:[#allocation90_spill] sm:$0xff] %v12117_v56 }
 0x429   :  { %v9459_v44 = vpack.c.bf16 %v12005_v39, %v11989_v36  ;;  %v12127_v61 = vpop.permute.xlu1 %4520 }
 0x42a   :  { %16103 = vst [vmem:[#allocation93_spill] sm:$0xff] %v12127_v61  ;;  %v12129_v34 = vpop.permute.xlu0 %4522 }
 0x42b   :  { %2853 = vst [vmem:[#allocation2 + $0xe8] sm:$0xff] %v9459_v44 }
 0x42d   :  { %v12139_v27 = vpop.permute.xlu1 %4524 }
 0x42e   :  { %v12141_v52 = vpop.permute.xlu0 %4526 }
 0x431   :  { %v12147_v44 = vpop.permute.xlu1 %4528 }
 0x432   :  { %v12149_v35 = vpop.permute.xlu0 %4530 }
 0x4c3   :  { %v12025_v58 = vpop.f32.mrf.mxu0 }
 0x4c4   :  { %2254 = vst [vmem:[%s15650_s19] sm:$0xff] %v12025_v58  ;;  %3275 = vrot.lane.b32.xlu0 %v12025_v58, %s15767_s24  ;;  %v3048_v48 = vmul.f32 %v3023_v6, %v12025_v58 }
 0x4c5   :  { %v12033_v8 = vpop.f32.mrf.mxu0 }
 0x4c6   :  { %2255 = vst [vmem:[%s15650_s19 + $0x8] sm:$0xff] %v12033_v8  ;;  %v3049_v13 = vmul.f32 %v3027_v10, %v12033_v8 }
 0x4c7   :  { %v12041_v49 = vpop.f32.mrf.mxu0 }
 0x4c8   :  { %2258 = vst [vmem:[%s15650_s19 + $0x20] sm:$0xff] %v12041_v49  ;;  %3116 = vrot.lane.b32.xlu0 %v12025_v58, %s16067_s29  ;;  %3277 = vrot.lane.b32.xlu1 %v12041_v49, %s15767_s24  ;;  %v3056_v45 = vmul.f32 %v3023_v6, %v12041_v49  ;;  %v10083_v6 = vld [vmem:[%s15996_s26] sm:$0xff]  ;;  %s16150_s24 = smov 96  }
 0x4c9   :  { %v12054_v3 = vpop.f32.mrf.mxu0 }
 0x4ca   :  { %16092 = vst [vmem:[#allocation84_spill] sm:$0xff] %v12054_v3  ;;  %2259 = vst [vmem:[%s15650_s19 + $0x28] sm:$0xff] %v12054_v3  ;;  %v3057_v47 = vmul.f32 %v3027_v10, %v12054_v3  ;;  %v12071_v43 = vpack.c.bf16 %v3056_v45, %v3048_v48  ;;  %v12161_v10 = vpop.permute.xlu1 %4532  ;;  %v12163_v48 = vpop.permute.xlu0 %4352  ;;  %v10085_v45 = vld [vmem:[%s15996_s26 + $0x20] sm:$0xff]  ;;  %v12332_v3 = vor.u32 %v8996_v0, %v8995_v2  ;;  %v16127_v0 = vld [vmem:[#allocation29_spill] sm:$0xff] }
 0x4cb   :  { %16105 = vst [vmem:[#allocation94_spill] sm:$0xff] %v12163_v48 }
 0x4cc   :  { %4534 = vrot.lane.b32.xlu0 %v12025_v58, %s15763_s3  ;;  %3118 = vrot.lane.b32.xlu1 %v12041_v49, %s16067_s29  ;;  %16094 = vst [vmem:[#allocation86_spill] sm:$0xff] %v12071_v43  ;;  %v12073_v4 = vpack.c.bf16 %v3057_v47, %v3049_v13  ;;  %v10084_v13 = vld [vmem:[%s15996_s26 + $0x8] sm:$0xff]  ;;  %16125 = vst [vmem:[#allocation108_spill] sm:$0xff] %v12332_v3 }
 0x4ce   :  { %16095 = vst [vmem:[#allocation87_spill] sm:$0xff] %v12073_v4  ;;  %v12173_v47 = vpop.permute.xlu1 %4354 }
 0x4cf   :  { %v12077_v42 = vpop.f32.mrf.mxu1  ;;  %16106 = vst [vmem:[#allocation95_spill] sm:$0xff] %v12173_v47  ;;  %v16128_v47 = vld [vmem:[#allocation52_spill] sm:$0xff] }
 0x4d0   :  { %4368 = vrot.lane.b32.xlu0 %v12025_v58, %s16096_s25  ;;  %4536 = vrot.lane.b32.xlu1 %v12041_v49, %s15763_s3  ;;  %2256 = vst [vmem:[%s15650_s19 + $0x10] sm:$0xff] %v12077_v42  ;;  %v3050_v16 = vmul.f32 %v3031_v5, %v12077_v42  ;;  %s16099_s3 = smov 97  }
 0x4d1   :  { %v12088_v29 = vpop.f32.mrf.mxu1 }
 0x4d2   :  { %16097 = vst [vmem:[#allocation88_spill] sm:$0xff] %v12088_v29  ;;  %2257 = vst [vmem:[%s15650_s19 + $0x18] sm:$0xff] %v12088_v29  ;;  %v3051_v19 = vmul.f32 %v3035_v9, %v12088_v29  ;;  %v12193_v22 = vpop.permute.xlu1 %4358 }
 0x4d3   :  { %v12095_v41 = vpop.f32.mrf.mxu1  ;;  %16108 = vst [vmem:[#allocation97_spill] sm:$0xff] %v12193_v22  ;;  %v12354_v22 = vrot.slane %v16128_v47, %v10619_v18 }
 0x4d4   :  { %4202 = vrot.lane.b32.xlu0 %v12025_v58, %s15765_s22  ;;  %4370 = vrot.lane.b32.xlu1 %v12041_v49, %s16096_s25  ;;  %2260 = vst [vmem:[%s15650_s19 + $0x30] sm:$0xff] %v12095_v41  ;;  %v3058_v21 = vmul.f32 %v3031_v5, %v12095_v41  ;;  %v12175_v5 = vpop.permute.xlu0 %4356 }
 0x4d5   :  { %v12106_v59 = vpop.f32.mrf.mxu1  ;;  %16107 = vst [vmem:[#allocation96_spill] sm:$0xff] %v12175_v5 }
 0x4d6   :  { %16098 = vst [vmem:[#allocation89_spill] sm:$0xff] %v12106_v59  ;;  %2261 = vst [vmem:[%s15650_s19 + $0x38] sm:$0xff] %v12106_v59  ;;  %v3059_v38 = vmul.f32 %v3035_v9, %v12106_v59  ;;  %v12119_v31 = vpack.c.bf16 %v3058_v21, %v3050_v16  ;;  %v10086_v9 = vld [vmem:[%s15996_s26 + $0x10] sm:$0xff]  ;;  %v10087_v16 = vld [vmem:[%s15996_s26 + $0x28] sm:$0xff] }
 0x4d7   :  { %v10089_v21 = vld [vmem:[%s15996_s26 + $0x30] sm:$0xff] }
 0x4d8   :  { %4036 = vrot.lane.b32.xlu0 %v12025_v58, %s16099_s3  ;;  %4204 = vrot.lane.b32.xlu1 %v12041_v49, %s15765_s22  ;;  %16101 = vst [vmem:[#allocation91_spill] sm:$0xff] %v12119_v31  ;;  %v12121_v20 = vpack.c.bf16 %v3059_v38, %v3051_v19  ;;  %v10088_v19 = vld [vmem:[%s15996_s26 + $0x18] sm:$0xff]  ;;  %v12195_v57 = vpop.permute.xlu0 %4360  ;;  %v12203_v38 = vpop.permute.xlu1 %4362  ;;  %s16115_s22 = smov 126   ;;  %s16142_s26 = smov 94  }
 0x4d9   :  { %16109 = vst [vmem:[#allocation98_spill] sm:$0xff] %v12195_v57 }
 0x4da   :  { %16102 = vst [vmem:[#allocation92_spill] sm:$0xff] %v12121_v20 }
 0x4dc   :  { %4038 = vrot.lane.b32.xlu1 %v12041_v49, %s16099_s3  ;;  %2868 = vrot.lane.b32.xlu0 %v12088_v29, %s16068_s1  ;;  %v12205_v32 = vpop.permute.xlu0 %4364 }
 0x4e0   :  { %2718 = vrot.lane.b32.xlu0 %v12088_v29, %s16104_s2  ;;  %2870 = vrot.lane.b32.xlu1 %v12106_v59, %s16068_s1 }
 0x4e4   :  { %2559 = vrot.lane.b32.xlu0 %v12088_v29, %s16070_s14  ;;  %2720 = vrot.lane.b32.xlu1 %v12106_v59, %s16104_s2 }
 0x4e8   :  { %2416 = vrot.lane.b32.xlu0 %v12088_v29, %s16071_s30  ;;  %2561 = vrot.lane.b32.xlu1 %v12106_v59, %s16070_s14 }
 0x4ec   :  { %2274 = vrot.lane.b32.xlu0 %v12088_v29, %s16072_s27  ;;  %2418 = vrot.lane.b32.xlu1 %v12106_v59, %s16071_s30 }
 0x4f0   :  { %3854 = vrot.lane.b32.xlu0 %v10083_v6, %s10305_s23  ;;  %2276 = vrot.lane.b32.xlu1 %v12106_v59, %s16072_s27  ;;  %v12215_v6 = vpop.permute.xlu1 %4366  ;;  %v12322_v59 = vmul.f32 %v3324_v7, %v3300_v33  ;;  %v8986_v33 = vld [vmem:[%s15997_s15 + $0x46] ss:$8 sm:$0xf0] }
 0x4f4   :  { %3858 = vrot.lane.b32.xlu0 %v10084_v13, %s10305_s23  ;;  %3856 = vrot.lane.b32.xlu1 %v10085_v45, %s10305_s23  ;;  %v12217_v13 = vpop.permute.xlu0 %4186  ;;  %v10004_v45 = vld [vmem:[%s15651_s10 + $0x4] ss:$8 sps:$4 sm:$0xff]  }
 0x4f5   :  { %16111 = vst [vmem:[#allocation99_spill] sm:$0xff] %v12217_v13  ;;  %5112 = vmatprep.mubr.bf16.mxu0 %v10004_v45  ;;  %5155 = vmatprep.mubr.bf16.mxu1 %v10004_v45  ;;  %v8985_v13 = vld [vmem:[%s15997_s15 + $0x46] ss:$8 sm:$0xf] }
 0x4f6   :  { %v12372_v47 = vor.u32 %v8986_v33, %v8985_v13 }
 0x4f8   :  { %3862 = vrot.lane.b32.xlu0 %v10086_v9, %s10305_s23  ;;  %3860 = vrot.lane.b32.xlu1 %v10087_v16, %s10305_s23  ;;  %v12226_v9 = vpop.permute.xlu1 %4188  ;;  %v12228_v16 = vpop.permute.xlu0 %4190  ;;  %v4421_v36 = vrot.slane %v12372_v47, %v10680_v55 }
 0x4f9   :  { %16113 = vst [vmem:[#allocation100_spill] sm:$0xff] %v12226_v9  ;;  %16114 = vst [vmem:[#allocation101_spill] sm:$0xff] %v12228_v16  ;;  %v3301_v9 = vsel %vm3291_vm9, %v11947_v25, %v11960_v15  ;;  %v3162_v25 = vrot.slane %v16121_v46, %v10680_v55  ;;  %v4583_v46 = vrot.slane %v12332_v3, %v10677_v54 }
 0x4fa   :  { %v3363_v5 = vmul.f32 %v3324_v7, %v3301_v9  ;;  %v16132_v7 = vld [vmem:[#allocation27_spill] sm:$0xff] }
 0x4fc   :  { %3866 = vrot.lane.b32.xlu0 %v10088_v19, %s10305_s23  ;;  %3864 = vrot.lane.b32.xlu1 %v10089_v21, %s10305_s23  ;;  %v12238_v19 = vpop.permute.xlu1 %4192  ;;  %v12240_v21 = vpop.permute.xlu0 %4194 }
 0x4fd   :  { %16116 = vst [vmem:[#allocation102_spill] sm:$0xff] %v12238_v19 }
 0x500   :  { %3870 = vrot.lane.b32.xlu0 %v12025_v58, %s10305_s23  ;;  %3868 = vrot.lane.b32.xlu1 %v10090_v23, %s10305_s23  ;;  %v12246_v23 = vpop.permute.xlu1 %4196  ;;  %v12248_v45 = vpop.permute.xlu0 %4198 }
 0x504   :  { %3711 = vrot.lane.b32.xlu0 %v12025_v58, %s16073_s28  ;;  %3872 = vrot.lane.b32.xlu1 %v12041_v49, %s10305_s23  ;;  %v12254_v37 = vpop.permute.xlu1 %4200  ;;  %v12260_v63 = vpop.permute.xlu0 %4020 }
 0x505   :  { %16117 = vst [vmem:[#allocation103_spill] sm:$0xff] %v12260_v63 }
 0x508   :  { %3568 = vrot.lane.b32.xlu0 %v12025_v58, %s16110_s12  ;;  %3713 = vrot.lane.b32.xlu1 %v12041_v49, %s16073_s28  ;;  %v12266_v31 = vpop.permute.xlu1 %4022  ;;  %v12268_v43 = vpop.permute.xlu0 %4024 }
 0x509   :  { %16118 = vst [vmem:[#allocation104_spill] sm:$0xff] %v12266_v31  ;;  %16119 = vst [vmem:[#allocation105_spill] sm:$0xff] %v12268_v43  ;;  %v12320_v43 = vrot.slane %v16124_v53, %v10619_v18 }
 0x50c   :  { %3425 = vrot.lane.b32.xlu0 %v12025_v58, %s16112_s13  ;;  %3570 = vrot.lane.b32.xlu1 %v12041_v49, %s16110_s12  ;;  %v12274_v20 = vpop.permute.xlu1 %4026  ;;  %v12276_v4 = vpop.permute.xlu0 %4028 }
 0x50d   :  { %16120 = vst [vmem:[#allocation106_spill] sm:$0xff] %v12274_v20 }
 0x510   :  { %3279 = vrot.lane.b32.xlu0 %v12033_v8, %s16115_s22  ;;  %3427 = vrot.lane.b32.xlu1 %v12041_v49, %s16112_s13  ;;  %v12286_v62 = vpop.permute.xlu0 %4032  ;;  %v12288_v11 = vpop.permute.xlu1 %4030 }
 0x514   :  { %3283 = vrot.lane.b32.xlu0 %v12077_v42, %s16115_s22  ;;  %3285 = vrot.lane.b32.xlu1 %v12095_v41, %s16115_s22  ;;  %v12314_v20 = vpop.permute.xlu1 %4034 }
 0x518   :  { %3287 = vrot.lane.b32.xlu0 %v12088_v29, %s16115_s22  ;;  %3126 = vrot.lane.b32.xlu1 %v12095_v41, %s16067_s29 }
 0x51c   :  { %3120 = vrot.lane.b32.xlu0 %v12033_v8, %s16067_s29  ;;  %2858 = vrot.lane.b32.xlu1 %v12041_v49, %s16068_s1 }
 0x520   :  { %3124 = vrot.lane.b32.xlu0 %v12077_v42, %s16067_s29  ;;  %2866 = vrot.lane.b32.xlu1 %v12095_v41, %s16068_s1 }
 0x524   :  { %3128 = vrot.lane.b32.xlu0 %v12088_v29, %s16067_s29  ;;  %2708 = vrot.lane.b32.xlu1 %v12041_v49, %s16104_s2  ;;  %v16122_v29 = vld [vmem:[#allocation38_spill] sm:$0xff] }
 0x525   :  { %v12312_v31 = vrot.slane %v16122_v29, %v10619_v18 }
 0x528   :  { %2856 = vrot.lane.b32.xlu0 %v12025_v58, %s16068_s1  ;;  %2716 = vrot.lane.b32.xlu1 %v12095_v41, %s16104_s2 }
 0x52c   :  { %2860 = vrot.lane.b32.xlu0 %v12033_v8, %s16068_s1  ;;  %2549 = vrot.lane.b32.xlu1 %v12041_v49, %s16070_s14 }
 0x530   :  { %2864 = vrot.lane.b32.xlu0 %v12077_v42, %s16068_s1  ;;  %2557 = vrot.lane.b32.xlu1 %v12095_v41, %s16070_s14 }
 0x534   :  { %2706 = vrot.lane.b32.xlu0 %v12025_v58, %s16104_s2  ;;  %2406 = vrot.lane.b32.xlu1 %v12041_v49, %s16071_s30 }
 0x536   :  { %v12316_v63 = vpop.permute.xlu0 %3275 }
 0x537   :  { %16123 = vst [vmem:[#allocation107_spill] sm:$0xff] %v12316_v63  ;;  %v3298_v19 = vsel %vm3291_vm9, %v11958_v17, %v12316_v63  ;;  %v16126_v17 = vld [vmem:[#allocation28_spill] sm:$0xff]  ;;  %v12350_v63 = vmul.f32 %v3158_v1, %v16127_v0  ;;  %v4559_v0 = vsel %vm4550_vm11, %v12141_v52, %v12149_v35 }
 0x538   :  { %v3356_v16 = vmul.f32 %v3328_v40, %v3298_v19  ;;  %2710 = vrot.lane.b32.xlu0 %v12033_v8, %s16104_s2  ;;  %2414 = vrot.lane.b32.xlu1 %v12095_v41, %s16071_s30  ;;  %v12347_v2 = vmul.f32 %v3158_v1, %v16126_v17  ;;  %v16129_v19 = vld [vmem:[#allocation55_spill] sm:$0xff] }
 0x539   :  { %v12358_v48 = vrot.slane %v16129_v19, %v10619_v18 }
 0x53a   :  { %v9487_v17 = vpack.c.bf16 %v3356_v16, %v12322_v59  ;;  %v12364_v53 = vpop.permute.xlu0 %3116  ;;  %v12366_v1 = vpop.permute.xlu1 %3277 }
 0x53b   :  { %16130 = vst [vmem:[#allocation28_spill] sm:$0xff] %v12364_v53  ;;  %16131 = vst [vmem:[#allocation29_spill] sm:$0xff] %v12366_v1  ;;  %v3138_v9 = vsel %vm486_vm3, %v16132_v7, %v12364_v53  ;;  %v3299_v19 = vsel %vm3291_vm9, %v11960_v15, %v12366_v1  ;;  %v4587_v15 = vrot.slane %v12332_v3, %v10680_v55  ;;  %v16133_v7 = vld [vmem:[#allocation32_spill] sm:$0xff] }
 0x53c   :  { %3418 = vst [vmem:[#allocation2 + $0x1c8] sm:$0xff] %v9487_v17  ;;  %v12388_v13 = vmul.f32 %v3162_v25, %v3138_v9  ;;  %v3364_v33 = vmul.f32 %v3328_v40, %v3299_v19  ;;  %2714 = vrot.lane.b32.xlu0 %v12077_v42, %s16104_s2  ;;  %2264 = vrot.lane.b32.xlu1 %v12041_v49, %s16072_s27 }
 0x53d   :  { %v12398_v1 = vmul.f32 %v12312_v31, %v16133_v7  ;;  %v4560_v17 = vsel %vm4550_vm11, %v12147_v44, %v12161_v10  ;;  %v4417_v40 = vrot.slane %v12372_v47, %v10677_v54  ;;  %v12407_v19 = vmul.f32 %v4583_v46, %v4559_v0 }
 0x53e   :  { %v4393_v49 = vsel %vm4384_vm12, %v12195_v57, %v12205_v32  ;;  %v9479_v9 = vpack.c.bf16 %v12388_v13, %v12350_v63  ;;  %v9491_v7 = vpack.c.bf16 %v3364_v33, %v3363_v5  ;;  %v12415_v53 = vpop.permute.xlu0 %4534 }
 0x53f   :  { %16134 = vst [vmem:[#allocation27_spill] sm:$0xff] %v12398_v1  ;;  %16135 = vst [vmem:[#allocation32_spill] sm:$0xff] %v12407_v19  ;;  %v12417_v1 = vpop.permute.xlu1 %3118  ;;  %v4557_v0 = vsel %vm4550_vm11, %v12149_v35, %v12415_v53 }
 0x540   :  { %16136 = vst [vmem:[#allocation109_spill] sm:$0xff] %v12415_v53  ;;  %16137 = vst [vmem:[#allocation110_spill] sm:$0xff] %v12417_v1  ;;  %v3139_v57 = vsel %vm486_vm3, %v16138_v26, %v12417_v1  ;;  %v12437_v30 = vmul.f32 %v4587_v15, %v4557_v0  ;;  %2547 = vrot.lane.b32.xlu0 %v12025_v58, %s16070_s14  ;;  %2272 = vrot.lane.b32.xlu1 %v12095_v41, %s16072_s27  ;;  %v12452_v0 = vld [vmem:[#allocation2 + $0x148] sm:$0xff] }
 0x541   :  { %3252 = vst [vmem:[#allocation2 + $0x188] sm:$0xff] %v9479_v9  ;;  %3422 = vst [vmem:[#allocation2 + $0x1e8] sm:$0xff] %v9491_v7  ;;  %v3198_v35 = vmul.f32 %v3162_v25, %v3139_v57  ;;  %v10216_v26 = vpack.c.bf16 %v3364_v33, %v3356_v16  ;;  %v12443_v1 = vmul.f32 %v4583_v46, %v4560_v17  ;;  %v4707_v17 = vld [vmem:[#allocation2 + $0x168] sm:$0xff] }
 0x542   :  { %16139 = vst [vmem:[#allocation26_spill] sm:$0xff] %v12437_v30  ;;  %v12445_v53 = vmul.f32 %v4417_v40, %v4393_v49  ;;  %v4394_v9 = vsel %vm4384_vm12, %v12203_v38, %v12215_v6  ;;  %v10217_v7 = vpack.c.bf16 %v3363_v5, %v12322_v59  ;;  %v4251_v57 = vrot.slane %v12419_v51, %v10677_v54  ;;  %v12460_v25 = vpop.permute.xlu0 %4368 }
 0x543   :  { %v9551_v46 = vpack.c.bf16 %v12437_v30, %v12407_v19  ;;  %v9483_v16 = vpack.c.bf16 %v3198_v35, %v12347_v2  ;;  %16140 = vst [vmem:[#allocation111_spill] sm:$0xff] %v12460_v25  ;;  %v12462_v33 = vpop.permute.xlu1 %4536  ;;  %5123 = vmatprep.subr.bf16.mxu1 %v10216_v26  ;;  %v4227_v59 = vsel %vm4218_vm13, %v12240_v21, %v12248_v45 }
 0x544   :  { %16141 = vst [vmem:[#allocation112_spill] sm:$0xff] %v12462_v33  ;;  %v4391_v5 = vsel %vm4384_vm12, %v12205_v32, %v12460_v25  ;;  %v4558_v49 = vsel %vm4550_vm11, %v12161_v10, %v12462_v33  ;;  %v4255_v19 = vrot.slane %v12419_v51, %v10680_v55  ;;  %5124 = vmatpush1.bf16.msra.mxu1 %v10217_v7 }
 0x545   :  { %4677 = vst [vmem:[#allocation2 + $0x3c8] sm:$0xff] %v9551_v46  ;;  %3256 = vst [vmem:[#allocation2 + $0x1a8] sm:$0xff] %v9483_v16  ;;  %v12478_v26 = vmul.f32 %v4421_v36, %v4391_v5  ;;  %v12480_v30 = vmul.f32 %v4587_v15, %v4558_v49  ;;  %2551 = vrot.lane.b32.xlu0 %v12033_v8, %s16070_s14  ;;  %4544 = vrot.lane.b32.xlu1 %v12095_v41, %s16142_s26  ;;  %v4703_v16 = vld [vmem:[#allocation2 + $0x128] sm:$0xff] }
 0x546   :  { %v10218_v32 = vpack.c.bf16 %v3198_v35, %v12388_v13  ;;  %v12487_v25 = vmul.f32 %v4417_v40, %v4394_v9  ;;  %v12489_v10 = vor.u32 %v8966_v24, %v8965_v50  ;;  %v10219_v7 = vpack.c.bf16 %v12347_v2, %v12350_v63  ;;  %v12504_v40 = vpop.permute.xlu0 %4202  ;;  %v4701_v63 = vld [vmem:[#allocation2 + $0x108] sm:$0xff] }
 0x547   :  { %v9030_v46 = vcombine.high %v12452_v0, %v4707_v17  ;;  %v12494_v15 = vmul.f32 %v4251_v57, %v4227_v59  ;;  %v4228_v5 = vsel %vm4218_vm13, %v12246_v23, %v12254_v37  ;;  %v9543_v13 = vpack.c.bf16 %v12478_v26, %v12445_v53  ;;  %16144 = vst [vmem:[#allocation114_spill] sm:$0xff] %v12504_v40  ;;  %v12506_v24 = vpop.permute.xlu1 %4370 }
 0x548   :  { %16143 = vst [vmem:[#allocation113_spill] sm:$0xff] %v12489_v10  ;;  %v9555_v50 = vpack.c.bf16 %v12480_v30, %v12443_v1  ;;  %16145 = vst [vmem:[#allocation115_spill] sm:$0xff] %v12506_v24  ;;  %5125 = vmatprep.subr.bf16.mxu1 %v10218_v32  ;;  %v4085_v2 = vrot.slane %v12489_v10, %v10677_v54  ;;  %v4225_v35 = vsel %vm4218_vm13, %v12248_v45, %v12504_v40  ;;  %v16146_v45 = vld [vmem:[#allocation33_spill] sm:$0xff]  ;;  %v16178_v54 = vld [vmem:[#allocation60_spill] sm:$0xff] }
 0x549   :  { %v4392_v9 = vsel %vm4384_vm12, %v12215_v6, %v12506_v24  ;;  %5126 = vmatpush1.bf16.msra.mxu1 %v10219_v7  ;;  %v9029_v59 = vcombine.low %v12452_v0, %v4707_v17  ;;  %4511 = vst [vmem:[#allocation2 + $0x388] sm:$0xff] %v9543_v13  ;;  %v12520_v49 = vmul.f32 %v4255_v19, %v4225_v35  ;;  %v16147_v17 = vld [vmem:[#allocation39_spill] sm:$0xff] }
 0x54a   :  { %4681 = vst [vmem:[#allocation2 + $0x3e8] sm:$0xff] %v9555_v50  ;;  %v12522_v32 = vmul.f32 %v4421_v36, %v4392_v9  ;;  %2555 = vrot.lane.b32.xlu0 %v12077_v42, %s16070_s14  ;;  %4378 = vrot.lane.b32.xlu1 %v12095_v41, %s16096_s25  ;;  %v4089_v6 = vrot.slane %v12489_v10, %v10680_v55  ;;  %v12550_v9 = vpop.permute.xlu0 %4036 }
 0x54b   :  { %v12532_v0 = vmul.f32 %v12312_v31, %v16146_v45  ;;  %v12536_v7 = vmul.f32 %v12320_v43, %v16147_v17  ;;  %v4061_v36 = vsel %vm4052_vm14, %v12276_v4, %v12286_v62  ;;  %5127 = vmatprep.subr.bf16.mxu1 %v9030_v46  ;;  %v9026_v13 = vcombine.high %v4701_v63, %v4703_v16  ;;  %v12552_v45 = vpop.permute.xlu1 %4204 }
 0x54c   :  { %v4563_v50 = vsel %vm4550_vm11, %v12117_v56, %v12129_v34  ;;  %v9535_v31 = vpack.c.bf16 %v12520_v49, %v12494_v15  ;;  %v9547_v35 = vpack.c.bf16 %v12522_v32, %v12487_v25  ;;  %16148 = vst [vmem:[#allocation33_spill] sm:$0xff] %v12550_v9  ;;  %16149 = vst [vmem:[#allocation39_spill] sm:$0xff] %v12552_v45 }
 0x54d   :  { %v9025_v17 = vcombine.low %v4701_v63, %v4703_v16  ;;  %v4564_v46 = vsel %vm4550_vm11, %v12127_v61, %v12139_v27  ;;  %v12558_v24 = vmul.f32 %v4251_v57, %v4228_v5  ;;  %v4059_v33 = vsel %vm4052_vm14, %v12286_v62, %v12550_v9  ;;  %5128 = vmatpush1.bf16.msra.mxu1 %v9029_v59  ;;  %v16156_v61 = vld [vmem:[#allocation47_spill] sm:$0xff] }
 0x54e   :  { %v4226_v40 = vsel %vm4218_vm13, %v12254_v37, %v12552_v45  ;;  %v12568_v56 = vmul.f32 %v4085_v2, %v4061_v36  ;;  %4345 = vst [vmem:[#allocation2 + $0x348] sm:$0xff] %v9535_v31  ;;  %4515 = vst [vmem:[#allocation2 + $0x3a8] sm:$0xff] %v9547_v35  ;;  %v12570_v16 = vmul.f32 %v4089_v6, %v4059_v33  ;;  %2404 = vrot.lane.b32.xlu0 %v12025_v58, %s16071_s30  ;;  %v16153_v36 = vld [vmem:[#allocation40_spill] sm:$0xff]  ;;  %v16154_v31 = vld [vmem:[#allocation46_spill] sm:$0xff] }
 0x54f   :  { %v12572_v63 = vmul.f32 %v4255_v19, %v4226_v40  ;;  %4212 = vrot.lane.b32.xlu1 %v12095_v41, %s16150_s24  ;;  %v4575_v62 = vrot.slane %v12332_v3, %v10602_v14  ;;  %v4579_v37 = vrot.slane %v12332_v3, %v10619_v18  ;;  %v4561_v57 = vsel %vm4550_vm11, %v12129_v34, %v12141_v52  ;;  %v12600_v52 = vpop.permute.xlu0 %2868  ;;  %v12602_v59 = vpop.permute.xlu1 %4038 }
 0x550   :  { %v4062_v19 = vsel %vm4052_vm14, %v12288_v11, %v12314_v20  ;;  %5129 = vmatprep.subr.bf16.mxu1 %v9026_v13  ;;  %v4562_v33 = vsel %vm4550_vm11, %v12139_v27, %v12147_v44  ;;  %v9527_v5 = vpack.c.bf16 %v12570_v16, %v12568_v56  ;;  %v2890_v34 = vrot.slane %v16122_v29, %v10602_v14  ;;  %v16155_v44 = vld [vmem:[#allocation31_spill] sm:$0xff]  ;;  %v16174_v29 = vld [vmem:[#allocation37_spill] sm:$0xff] }
 0x551   :  { %v9539_v40 = vpack.c.bf16 %v12572_v63, %v12558_v24  ;;  %16151 = vst [vmem:[#allocation116_spill] sm:$0xff] %v12600_v52  ;;  %16152 = vst [vmem:[#allocation117_spill] sm:$0xff] %v12602_v59  ;;  %v12606_v13 = vmul.f32 %v12320_v43, %v16153_v36  ;;  %v12610_v27 = vmul.f32 %v12354_v22, %v16154_v31  ;;  %5130 = vmatpush1.bf16.msra.mxu1 %v9025_v17  ;;  %v4693_v31 = vld [vmem:[#allocation2 + $0x88] sm:$0xff] }
 0x552   :  { %v2880_v35 = vsel %vm343_vm4, %v12600_v52, %v16155_v44  ;;  %v4060_v45 = vsel %vm4052_vm14, %v12314_v20, %v12602_v59  ;;  %v12622_v9 = vmul.f32 %v12354_v22, %v16156_v61  ;;  %v12624_v43 = vmul.f32 %v4085_v2, %v4062_v19  ;;  %4179 = vst [vmem:[#allocation2 + $0x308] sm:$0xff] %v9527_v5  ;;  %v4695_v44 = vld [vmem:[#allocation2 + $0xa8] sm:$0xff]  ;;  %v16167_v59 = vld [vmem:[#allocation54_spill] sm:$0xff] }
 0x553   :  { %4349 = vst [vmem:[#allocation2 + $0x368] sm:$0xff] %v9539_v40  ;;  %v12626_v36 = vmul.f32 %v4089_v6, %v4060_v45  ;;  %2408 = vrot.lane.b32.xlu0 %v12033_v8, %s16071_s30  ;;  %4046 = vrot.lane.b32.xlu1 %v12095_v41, %s16099_s3  ;;  %v12632_v20 = vmul.f32 %v4575_v62, %v4563_v50  ;;  %v16159_v6 = vld [vmem:[#allocation53_spill] sm:$0xff]  ;;  %v16164_v40 = vld [vmem:[#allocation79_spill] sm:$0xff] }
 0x554   :  { %16157 = vst [vmem:[#allocation40_spill] sm:$0xff] %v12624_v43  ;;  %v12634_v17 = vmul.f32 %v4575_v62, %v4564_v46  ;;  %v12636_v61 = vmul.f32 %v4579_v37, %v4561_v57  ;;  %v12638_v22 = vmul.f32 %v4579_v37, %v4562_v33  ;;  %v16158_v2 = vpack.c.bf16 %v12005_v39, %v12003_v60  ;;  %v12651_v46 = vpop.permute.xlu0 %2718  ;;  %v12653_v62 = vpop.permute.xlu1 %2870  ;;  %v16162_v60 = vld [vmem:[#allocation73_spill] sm:$0xff]  ;;  %v16163_v57 = vld [vmem:[#allocation30_spill] sm:$0xff] }
 0x555   :  { %v12645_v45 = vmul.f32 %v12358_v48, %v16159_v6  ;;  %v2927_v19 = vmul.f32 %v2890_v34, %v2880_v35  ;;  %v9531_v5 = vpack.c.bf16 %v12626_v36, %v12624_v43  ;;  %v2747_v50 = vrot.slane %v11976_v28, %v10602_v14  ;;  %16160 = vst [vmem:[#allocation46_spill] sm:$0xff] %v12651_v46  ;;  %v16165_v35 = vld [vmem:[#allocation78_spill] sm:$0xff] }
 0x556   :  { %5131 = vmatprep.subr.bf16.mxu1 %v16158_v2  ;;  %16161 = vst [vmem:[#allocation31_spill] sm:$0xff] %v12653_v62  ;;  %v2751_v37 = vrot.slane %v11976_v28, %v10619_v18  ;;  %v2737_v39 = vsel %vm2722_vm10, %v12651_v46, %v16162_v60  ;;  %v2881_v33 = vsel %vm343_vm4, %v12653_v62, %v16163_v57  ;;  %v16168_v28 = vld [vmem:[#allocation75_spill] sm:$0xff] }
 0x557   :  { %v16166_v2 = vpack.c.bf16 %v16164_v40, %v16165_v35  ;;  %v9018_v6 = vcombine.high %v4693_v31, %v4695_v44  ;;  %v12670_v3 = vmul.f32 %v12358_v48, %v16167_v59  ;;  %v2735_v52 = vsel %vm2722_vm10, %v16162_v60, %v16168_v28  ;;  %4183 = vst [vmem:[#allocation2 + $0x328] sm:$0xff] %v9531_v5  ;;  %v4685_v57 = vld [vmem:[#allocation2 + $0x8] sm:$0xff]  ;;  %v16169_v35 = vld [vmem:[#allocation76_spill] sm:$0xff]  ;;  %v16171_v28 = vld [vmem:[#allocation45_spill] sm:$0xff] }
 0x558   :  { %v2935_v46 = vmul.f32 %v2890_v34, %v2881_v33  ;;  %2412 = vrot.lane.b32.xlu0 %v12077_v42, %s16071_s30  ;;  %3880 = vrot.lane.b32.xlu1 %v12095_v41, %s10305_s23  ;;  %v4687_v40 = vld [vmem:[#allocation2 + $0x28] sm:$0xff]  ;;  %v9017_v59 = vcombine.low %v4693_v31, %v4695_v44  ;;  %v2784_v62 = vmul.f32 %v2747_v50, %v2737_v39  ;;  %v12686_v34 = vpop.permute.xlu0 %2559  ;;  %v12688_v60 = vpop.permute.xlu1 %2720 }
 0x559   :  { %5132 = vmatpush1.bf16.msra.mxu1 %v16166_v2  ;;  %v16170_v2 = vld [vmem:[#allocation74_spill] sm:$0xff]  ;;  %v2581_v5 = vrot.slane %v16171_v28, %v10602_v14  ;;  %16172 = vst [vmem:[#allocation47_spill] sm:$0xff] %v12686_v34  ;;  %16173 = vst [vmem:[#allocation53_spill] sm:$0xff] %v12688_v60  ;;  %v2785_v33 = vmul.f32 %v2751_v37, %v2735_v52  ;;  %v2571_v55 = vsel %vm259_vm5, %v12686_v34, %v16174_v29  ;;  %v16175_v52 = vld [vmem:[#allocation27_spill] sm:$0xff] }
 0x55a   :  { %v2736_v48 = vsel %vm2722_vm10, %v16170_v2, %v16169_v35  ;;  %5133 = vmatprep.subr.bf16.mxu1 %v9018_v6  ;;  %v2738_v6 = vsel %vm2722_vm10, %v12688_v60, %v16170_v2  ;;  %v9010_v31 = vcombine.high %v4685_v57, %v4687_v40  ;;  %v10220_v35 = vpack.c.bf16 %v16175_v52, %v12532_v0  ;;  %v16176_v28 = vld [vmem:[#allocation96_spill] sm:$0xff]  ;;  %v16177_v29 = vld [vmem:[#allocation94_spill] sm:$0xff]  ;;  %v16183_v52 = vld [vmem:[#allocation97_spill] sm:$0xff] }
 0x55b   :  { %v2793_v44 = vmul.f32 %v2751_v37, %v2736_v48  ;;  %v2792_v39 = vmul.f32 %v2747_v50, %v2738_v6  ;;  %v4397_v34 = vsel %vm4384_vm12, %v16177_v29, %v16176_v28  ;;  %v16179_v2 = vld [vmem:[#allocation62_spill] sm:$0xff]  ;;  %v10221_v37 = vpack.c.bf16 %v2935_v46, %v2927_v19  ;;  %v16181_v6 = vld [vmem:[#allocation52_spill] sm:$0xff]  ;;  %v16184_v29 = vld [vmem:[#allocation95_spill] sm:$0xff] }
 0x55c   :  { %2262 = vrot.lane.b32.xlu0 %v12025_v58, %s16072_s27  ;;  %3721 = vrot.lane.b32.xlu1 %v12095_v41, %s16073_s28  ;;  %v9009_v50 = vcombine.low %v4685_v57, %v4687_v40  ;;  %v2618_v48 = vmul.f32 %v2581_v5, %v2571_v55  ;;  %v2438_v60 = vrot.slane %v16181_v6, %v10602_v14  ;;  %v12715_v43 = vpop.permute.xlu0 %2416  ;;  %v12717_v0 = vpop.permute.xlu1 %2561  ;;  %v16186_v46 = vld [vmem:[#allocation36_spill] sm:$0xff]  ;;  %v16187_v57 = vld [vmem:[#allocation59_spill] sm:$0xff]  ;;  %v16188_v40 = vld [vmem:[#allocation61_spill] sm:$0xff] }
 0x55d   :  { %5134 = vmatpush1.bf16.msra.mxu1 %v9017_v59  ;;  %v16180_v59 = vpack.c.bf16 %v16178_v54, %v16179_v2  ;;  %16182 = vst [vmem:[#allocation73_spill] sm:$0xff] %v12717_v0  ;;  %5086 = vmatprep.subr.bf16.mxu0 %v10220_v35  ;;  %v4398_v54 = vsel %vm4384_vm12, %v16184_v29, %v16183_v52  ;;  %v16185_v2 = vld [vmem:[#allocation44_spill] sm:$0xff] }
 0x55e   :  { %v2428_v19 = vsel %vm175_vm6, %v12715_v43, %v16185_v2  ;;  %v2572_v55 = vsel %vm259_vm5, %v12717_v0, %v16186_v46  ;;  %5087 = vmatpush1.bf16.msra.mxu0 %v10221_v37  ;;  %v4409_v35 = vrot.slane %v12372_v47, %v10602_v14  ;;  %v10223_v2 = vpack.c.bf16 %v2793_v44, %v2785_v33  ;;  %v16190_v46 = vld [vmem:[#allocation98_spill] sm:$0xff]  ;;  %v16192_v0 = vld [vmem:[#allocation51_spill] sm:$0xff] }
 0x55f   :  { %5135 = vmatprep.subr.bf16.mxu1 %v16180_v59  ;;  %v16189_v59 = vpack.c.bf16 %v16187_v57, %v16188_v40  ;;  %v2626_v58 = vmul.f32 %v2581_v5, %v2572_v55  ;;  %v4413_v29 = vrot.slane %v12372_v47, %v10619_v18  ;;  %v4395_v37 = vsel %vm4384_vm12, %v16176_v28, %v16190_v46  ;;  %v16191_v40 = vld [vmem:[#allocation55_spill] sm:$0xff] }
 0x560   :  { %2266 = vrot.lane.b32.xlu0 %v12033_v8, %s16072_s27  ;;  %3578 = vrot.lane.b32.xlu1 %v12095_v41, %s16110_s12  ;;  %v4396_v5 = vsel %vm4384_vm12, %v16183_v52, %v12203_v38  ;;  %v10224_v55 = vpack.c.bf16 %v2792_v39, %v2784_v62  ;;  %v2475_v57 = vmul.f32 %v2438_v60, %v2428_v19  ;;  %v12752_v33 = vpop.permute.xlu0 %2274  ;;  %v12754_v44 = vpop.permute.xlu1 %2418  ;;  %v16193_v46 = vld [vmem:[#allocation43_spill] sm:$0xff]  ;;  %v16194_v62 = vld [vmem:[#allocation26_spill] sm:$0xff] }
 0x561   :  { %5136 = vmatpush1.bf16.msra.mxu1 %v16189_v59  ;;  %v2295_v59 = vrot.slane %v16191_v40, %v10602_v14  ;;  %5088 = vmatprep.subr.bf16.mxu0 %v10223_v2  ;;  %v2286_v28 = vsel %vm92_vm7, %v12752_v33, %v16192_v0  ;;  %v2429_v38 = vsel %vm175_vm6, %v12754_v44, %v16193_v46  ;;  %v16195_v2 = vld [vmem:[#allocation101_spill] sm:$0xff] }
 0x562   :  { %5137 = vmatprep.subr.bf16.mxu1 %v9010_v31  ;;  %5089 = vmatpush1.bf16.msra.mxu0 %v10224_v55  ;;  %v10225_v31 = vpack.c.bf16 %v12480_v30, %v16194_v62  ;;  %v12766_v39 = vmul.f32 %v4409_v35, %v4397_v34  ;;  %v2483_v52 = vmul.f32 %v2438_v60, %v2429_v38  ;;  %v16196_v55 = vld [vmem:[#allocation99_spill] sm:$0xff]  ;;  %v16197_v34 = vld [vmem:[#allocation32_spill] sm:$0xff] }
 0x563   :  { %v10226_v0 = vpack.c.bf16 %v12536_v7, %v12606_v13  ;;  %v12774_v19 = vmul.f32 %v4413_v29, %v4395_v37  ;;  %v10227_v30 = vpack.c.bf16 %v2626_v58, %v2618_v48  ;;  %v10228_v60 = vpack.c.bf16 %v12443_v1, %v16197_v34  ;;  %v16199_v13 = vld [vmem:[#allocation50_spill] sm:$0xff]  ;;  %v16200_v37 = vld [vmem:[#allocation84_spill] sm:$0xff] }
 0x564   :  { %2270 = vrot.lane.b32.xlu0 %v12077_v42, %s16072_s27  ;;  %3435 = vrot.lane.b32.xlu1 %v12095_v41, %s16112_s13  ;;  %v4243_v46 = vrot.slane %v12419_v51, %v10602_v14  ;;  %v2332_v38 = vmul.f32 %v2295_v59, %v2286_v28  ;;  %v12784_v41 = vpop.permute.xlu0 %3854  ;;  %v12786_v62 = vpop.permute.xlu1 %2276  ;;  %v4247_v7 = vrot.slane %v12419_v51, %v10619_v18 }
 0x565   :  { %5138 = vmatpush1.bf16.msra.mxu1 %v9009_v50  ;;  %v4231_v50 = vsel %vm4218_vm13, %v16196_v55, %v16195_v2  ;;  %16198 = vst [vmem:[#allocation30_spill] sm:$0xff] %v12784_v41  ;;  %5090 = vmatprep.subr.bf16.mxu0 %v10226_v0  ;;  %v2287_v58 = vsel %vm92_vm7, %v12786_v62, %v16199_v13  ;;  %v8956_v13 = vld [vmem:[%s15997_s15 + $0x43] ss:$8 sm:$0xf0] }
 0x566   :  { %5139 = vmatprep.subr.bf16.mxu1 %v10225_v31  ;;  %5091 = vmatpush1.bf16.msra.mxu0 %v10227_v30  ;;  %v10229_v1 = vpack.c.bf16 %v12522_v32, %v12478_v26  ;;  %v2340_v48 = vmul.f32 %v2295_v59, %v2287_v58  ;;  %v10230_v28 = vpack.c.bf16 %v12610_v27, %v12622_v9  ;;  %v16201_v32 = vld [vmem:[#allocation102_spill] sm:$0xff]  ;;  %v16202_v59 = vld [vmem:[#allocation100_spill] sm:$0xff] }
 0x567   :  { %v10231_v31 = vpack.c.bf16 %v2483_v52, %v2475_v57  ;;  %v12802_v0 = vmul.f32 %v4409_v35, %v4398_v54  ;;  %v12804_v34 = vmul.f32 %v4413_v29, %v4396_v5  ;;  %v4229_v26 = vsel %vm4218_vm13, %v16195_v2, %v12240_v21  ;;  %v16204_v54 = vld [vmem:[#allocation89_spill] sm:$0xff] }
 0x568   :  { %4538 = vrot.lane.b32.xlu0 %v12033_v8, %s16142_s26  ;;  %3281 = vrot.lane.b32.xlu1 %v16200_v37, %s16115_s22  ;;  %v10232_v8 = vpack.c.bf16 %v12487_v25, %v12445_v53  ;;  %v4232_v30 = vsel %vm4218_vm13, %v16202_v59, %v16201_v32  ;;  %v4230_v9 = vsel %vm4218_vm13, %v16201_v32, %v12246_v23  ;;  %v12820_v27 = vpop.permute.xlu0 %3858  ;;  %v12822_v29 = vpop.permute.xlu1 %3856 }
 0x569   :  { %5140 = vmatpush2.bf16.msra.mxu1 %v10228_v60  ;;  %16203 = vst [vmem:[#allocation79_spill] sm:$0xff] %v12822_v29  ;;  %5092 = vmatprep.subr.bf16.mxu0 %v10230_v28  ;;  %v12824_v21 = vmul.f32 %v4243_v46, %v4231_v50  ;;  %v10233_v53 = vpack.c.bf16 %v12572_v63, %v12520_v49  ;;  %v16205_v63 = vld [vmem:[#allocation105_spill] sm:$0xff]  ;;  %v16207_v50 = vld [vmem:[#allocation106_spill] sm:$0xff]  ;;  %v16208_v60 = vld [vmem:[#allocation104_spill] sm:$0xff] }
 0x56a   :  { %5141 = vmatprep.subr.bf16.mxu1 %v10229_v1  ;;  %5093 = vmatpush1.bf16.msra.mxu0 %v10231_v31  ;;  %v12828_v25 = vmul.f32 %v4247_v7, %v4229_v26  ;;  %v10234_v23 = vpack.c.bf16 %v12645_v45, %v12670_v3  ;;  %v10235_v35 = vpack.c.bf16 %v2340_v48, %v2332_v38  ;;  %v16211_v28 = vld [vmem:[#allocation40_spill] sm:$0xff] }
 0x56b   :  { %v12836_v5 = vmul.f32 %v4243_v46, %v4232_v30  ;;  %v12838_v57 = vmul.f32 %v4247_v7, %v4230_v9  ;;  %v4077_v52 = vrot.slane %v12489_v10, %v10602_v14  ;;  %v10236_v49 = vpack.c.bf16 %v12558_v24, %v12494_v15  ;;  %v8955_v7 = vld [vmem:[%s15997_s15 + $0x43] ss:$8 sm:$0xf]  ;;  %s10309_s15 = smov 7  }
 0x56c   :  { %4542 = vrot.lane.b32.xlu0 %v12077_v42, %s16142_s26  ;;  %3289 = vrot.lane.b32.xlu1 %v16204_v54, %s16115_s22  ;;  %v16206_v42 = vld [vmem:[#allocation103_spill] sm:$0xff]  ;;  %v4066_v3 = vsel %vm4052_vm14, %v16208_v60, %v16207_v50  ;;  %v4081_v45 = vrot.slane %v12489_v10, %v10619_v18  ;;  %v3863_v46 = vpop.permute.xlu0 %3862  ;;  %v3861_v38 = vpop.permute.xlu1 %3860  ;;  %v4063_v15 = vsel %vm4052_vm14, %v16205_v63, %v12276_v4  ;;  %v16209_v4 = vld [vmem:[#allocation88_spill] sm:$0xff]  ;;  %v16213_v30 = vld [vmem:[#allocation13_spill] sm:$0xff] }
 0x56d   :  { %5142 = vmatpush2.bf16.msra.mxu1 %v10232_v8  ;;  %v4065_v2 = vsel %vm4052_vm14, %v16206_v42, %v16205_v63  ;;  %5094 = vmatprep.subr.bf16.mxu0 %v10234_v23  ;;  %v4064_v24 = vsel %vm4052_vm14, %v16207_v50, %v12288_v11  ;;  %v10237_v58 = vpack.c.bf16 %v12626_v36, %v12570_v16  ;;  %v16215_v9 = vld [vmem:[#allocation58_spill] sm:$0xff]  ;;  %v12903_v23 = vld [vmem:[%s15650_s19 + $0x8] sm:$0xff] }
 0x56e   :  { %5143 = vmatprep.subr.bf16.mxu1 %v10233_v53  ;;  %5095 = vmatpush1.bf16.msra.mxu0 %v10235_v35  ;;  %v10238_v11 = vpack.c.bf16 %v12634_v17, %v12632_v20  ;;  %v12876_v1 = vmul.f32 %v4077_v52, %v4065_v2  ;;  %v16210_v48 = vpack.c.bf16 %v12638_v22, %v12636_v61  ;;  %v16214_v20 = vld [vmem:[#allocation6_spill] sm:$0xff] }
 0x56f   :  { %v10239_v31 = vpack.c.bf16 %v16211_v28, %v12568_v56  ;;  %v12883_v16 = vmul.f32 %v4077_v52, %v4066_v3  ;;  %v4115_v36 = vmul.f32 %v4081_v45, %v4063_v15  ;;  %v4123_v26 = vmul.f32 %v4081_v45, %v4064_v24  ;;  %v16216_v35 = vld [vmem:[#allocation14_spill] sm:$0xff]  ;;  %v12950_v24 = vld [vmem:[%s15650_s19 + $0x28] sm:$0xff] }
 0x570   :  { %4546 = vrot.lane.b32.xlu0 %v16209_v4, %s16142_s26  ;;  %3122 = vrot.lane.b32.xlu1 %v16200_v37, %s16067_s29  ;;  %v12885_v8 = vor.u32 %v8956_v13, %v8955_v7  ;;  %v3867_v37 = vpop.permute.xlu0 %3866  ;;  %v3865_v32 = vpop.permute.xlu1 %3864  ;;  %v12889_v17 = vrot.slane %v16214_v20, %v16213_v30  ;;  %v3753_v61 = vrot.slane %v16215_v9, %v16213_v30  ;;  %v16218_v4 = vld [vmem:[#allocation68_spill] sm:$0xff] }
 0x571   :  { %5144 = vmatpush2.bf16.msra.mxu1 %v10236_v49  ;;  %5096 = vmatprep.subr.bf16.mxu0 %v16210_v48  ;;  %v10240_v56 = vpack.c.bf16 %v12804_v34, %v12774_v19  ;;  %v3898_v53 = vsel %vm3886_vm15, %v3861_v38, %v3865_v32  ;;  %v3895_v52 = vsel %vm3886_vm15, %v3863_v46, %v3867_v37 }
 0x572   :  { %5145 = vmatprep.subr.bf16.mxu1 %v10237_v58  ;;  %16212 = vst [vmem:[#allocation78_spill] sm:$0xff] %v12885_v8  ;;  %5097 = vmatpush2.bf16.msra.mxu0 %v10238_v11  ;;  %v3919_v22 = vrot.slane %v12885_v8, %v16213_v30  ;;  %v3923_v19 = vrot.slane %v12885_v8, %v16216_v35 }
 0x573   :  { %v3915_v34 = vrot.slane %v12885_v8, %v10619_v18  ;;  %5098 = vmatprep.subr.bf16.mxu0 %v10240_v56  ;;  %v10241_v49 = vpack.c.bf16 %v12802_v0, %v12766_v39  ;;  %v10242_v63 = vpack.c.bf16 %v12838_v57, %v12828_v25  ;;  %v3900_v2 = vsel %vm3886_vm15, %v12822_v29, %v3861_v38  ;;  %v12943_v38 = vld [vmem:[%s15650_s19 + $0x10] sm:$0xff] }
 0x574   :  { %4372 = vrot.lane.b32.xlu0 %v12903_v23, %s16096_s25  ;;  %3130 = vrot.lane.b32.xlu1 %v16204_v54, %s16067_s29  ;;  %v3897_v54 = vsel %vm3886_vm15, %v12820_v27, %v3863_v46  ;;  %v12925_v50 = vpop.permute.xlu0 %3870  ;;  %v3869_v3 = vpop.permute.xlu1 %3868  ;;  %v3911_v45 = vrot.slane %v12885_v8, %v10602_v14  ;;  %v3757_v0 = vrot.slane %v16215_v9, %v16216_v35 }
 0x575   :  { %5146 = vmatpush2.bf16.msra.mxu1 %v10239_v31  ;;  %16217 = vst [vmem:[#allocation54_spill] sm:$0xff] %v12925_v50  ;;  %v3957_v15 = vmul.f32 %v3915_v34, %v3898_v53  ;;  %v3893_v39 = vsel %vm3886_vm15, %v3867_v37, %v12925_v50  ;;  %v3899_v25 = vsel %vm3886_vm15, %v12784_v41, %v12820_v27 }
 0x576   :  { %5099 = vmatpush2.bf16.msra.mxu0 %v10241_v49  ;;  %v12938_v57 = vmul.f32 %v3919_v22, %v3895_v52  ;;  %v3951_v46 = vmul.f32 %v3923_v19, %v3893_v39  ;;  %v3949_v27 = vmul.f32 %v3915_v34, %v3897_v54  ;;  %v3956_v7 = vmul.f32 %v3911_v45, %v3900_v2  ;;  %v16223_v54 = vld [vmem:[#allocation18_spill] sm:$0xff] }
 0x577   :  { %v3896_v13 = vsel %vm3886_vm15, %v3865_v32, %v3869_v3  ;;  %5100 = vmatprep.subr.bf16.mxu0 %v10242_v63  ;;  %v10243_v58 = vpack.c.bf16 %v12836_v5, %v12824_v21  ;;  %v12959_v11 = vmul.f32 %v3753_v61, %v16218_v4  ;;  %v3614_v37 = vrot.slane %v16214_v20, %v16216_v35  ;;  %v16221_v32 = vld [vmem:[#allocation67_spill] sm:$0xff]  ;;  %v12978_v63 = vld [vmem:[%s15650_s19 + $0x18] sm:$0xff]  ;;  %v16224_v2 = vld [vmem:[#allocation66_spill] sm:$0xff] }
 0x578   :  { %4376 = vrot.lane.b32.xlu0 %v12943_v38, %s16096_s25  ;;  %2862 = vrot.lane.b32.xlu1 %v12950_v24, %s16068_s1  ;;  %v9519_v48 = vpack.c.bf16 %v3951_v46, %v12938_v57  ;;  %v12962_v28 = vpop.permute.xlu0 %3711  ;;  %v12964_v31 = vpop.permute.xlu1 %3872  ;;  %v10244_v56 = vpack.c.bf16 %v4123_v26, %v4115_v36  ;;  %v3948_v53 = vmul.f32 %v3911_v45, %v3899_v25  ;;  %v16222_v36 = vld [vmem:[#allocation10_spill] sm:$0xff]  ;;  %v16250_v20 = vld [vmem:[#allocation116_spill] sm:$0xff] }
 0x579   :  { %16219 = vst [vmem:[#allocation75_spill] sm:$0xff] %v12962_v28  ;;  %16220 = vst [vmem:[#allocation76_spill] sm:$0xff] %v12964_v31  ;;  %v3733_v34 = vsel %vm738_vm8, %v16221_v32, %v12962_v28  ;;  %v3894_v21 = vsel %vm3886_vm15, %v3869_v3, %v12964_v31  ;;  %v3958_v5 = vmul.f32 %v3919_v22, %v3896_v13 }
 0x57a   :  { %5101 = vmatpush2.bf16.msra.mxu0 %v10243_v58  ;;  %4013 = vst [vmem:[#allocation2 + $0x2c8] sm:$0xff] %v9519_v48  ;;  %v3785_v52 = vmul.f32 %v3757_v0, %v3733_v34  ;;  %v3959_v49 = vmul.f32 %v3923_v19, %v3894_v21  ;;  %v3467_v26 = vrot.slane %v16222_v36, %v16213_v30  ;;  %v16227_v58 = vld [vmem:[#allocation16_spill] sm:$0xff]  ;;  %v4724_v21 = vld [vmem:[#allocation2 + $0x280] sm:$0xff] }
 0x57b   :  { %5102 = vmatprep.subr.bf16.mxu0 %v10244_v56  ;;  %v10245_v22 = vpack.c.bf16 %v12883_v16, %v12876_v1  ;;  %v12990_v19 = vmul.f32 %v12889_v17, %v16223_v54  ;;  %v3792_v3 = vmul.f32 %v3753_v61, %v16224_v2  ;;  %v16228_v1 = vld [vmem:[#allocation65_spill] sm:$0xff]  ;;  %v3471_v61 = vrot.slane %v16222_v36, %v16216_v35  ;;  %v4726_v54 = vld [vmem:[#allocation2 + $0x2a0] sm:$0xff] }
 0x57c   :  { %4380 = vrot.lane.b32.xlu0 %v12978_v63, %s16096_s25  ;;  %2712 = vrot.lane.b32.xlu1 %v12950_v24, %s16104_s2  ;;  %v9511_v45 = vpack.c.bf16 %v3785_v52, %v12959_v11  ;;  %v9523_v39 = vpack.c.bf16 %v3959_v49, %v3958_v5  ;;  %v12994_v25 = vpop.permute.xlu0 %3568  ;;  %v12996_v13 = vpop.permute.xlu1 %3713  ;;  %v10246_v48 = vpack.c.bf16 %v3957_v15, %v3949_v27  ;;  %v16229_v35 = vld [vmem:[#allocation17_spill] sm:$0xff]  ;;  %s16540_s2 = sld [smem:[#allocation126_spill]] }
 0x57d   :  { %16225 = vst [vmem:[#allocation74_spill] sm:$0xff] %v12994_v25  ;;  %16226 = vst [vmem:[#allocation37_spill] sm:$0xff] %v12996_v13  ;;  %v3590_v4 = vsel %vm654_vm0, %v16227_v58, %v12994_v25  ;;  %v3734_v16 = vsel %vm738_vm8, %v16228_v1, %v12996_v13  ;;  %v10247_v34 = vpack.c.bf16 %v3959_v49, %v3951_v46  ;;  %v16230_v27 = vld [vmem:[#allocation25_spill] sm:$0xff]  ;;  %v16233_v46 = vld [vmem:[#allocation23_spill] sm:$0xff] }
 0x57e   :  { %5103 = vmatpush2.bf16.msra.mxu0 %v10245_v22  ;;  %3847 = vst [vmem:[#allocation2 + $0x288] sm:$0xff] %v9511_v45  ;;  %4017 = vst [vmem:[#allocation2 + $0x2e8] sm:$0xff] %v9523_v39  ;;  %v3642_v56 = vmul.f32 %v3614_v37, %v3590_v4  ;;  %v3793_v32 = vmul.f32 %v3757_v0, %v3734_v16  ;;  %v10248_v2 = vpack.c.bf16 %v3956_v7, %v3948_v53  ;;  %v4722_v49 = vld [vmem:[#allocation2 + $0x260] sm:$0xff] }
 0x57f   :  { %5104 = vmatprep.subr.bf16.mxu0 %v10246_v48  ;;  %v10249_v58 = vpack.c.bf16 %v3958_v5, %v12938_v57  ;;  %v3649_v15 = vmul.f32 %v12889_v17, %v16229_v35  ;;  %v13016_v22 = vmul.f32 %v3467_v26, %v16230_v27  ;;  %5147 = vmatprep.subr.bf16.mxu1 %v10247_v34  ;;  %v16234_v57 = vld [vmem:[#allocation15_spill] sm:$0xff]  ;;  %v4720_v5 = vld [vmem:[#allocation2 + $0x240] sm:$0xff] }
 0x580   :  { %4206 = vrot.lane.b32.xlu0 %v12903_v23, %s16150_s24  ;;  %2553 = vrot.lane.b32.xlu1 %v12950_v24, %s16070_s14  ;;  %v9503_v0 = vpack.c.bf16 %v3642_v56, %v12990_v19  ;;  %v9515_v45 = vpack.c.bf16 %v3793_v32, %v3792_v3  ;;  %v13019_v39 = vpop.permute.xlu0 %3425  ;;  %v13021_v4 = vpop.permute.xlu1 %3570  ;;  %v9048_v53 = vcombine.high %v4724_v21, %v4726_v54  ;;  %s16541_s14 = sld [smem:[#allocation127_spill]] }
 0x581   :  { %16231 = vst [vmem:[#allocation27_spill] sm:$0xff] %v13019_v39  ;;  %16232 = vst [vmem:[#allocation96_spill] sm:$0xff] %v13021_v4  ;;  %v3447_v7 = vsel %vm570_vm2, %v16233_v46, %v13019_v39  ;;  %v3591_v17 = vsel %vm654_vm0, %v16234_v57, %v13021_v4  ;;  %5148 = vmatpush2.bf16.msra.mxu1 %v10249_v58  ;;  %v10250_v48 = vpack.c.bf16 %v3793_v32, %v3785_v52  ;;  %v16238_v57 = vld [vmem:[#allocation71_spill] sm:$0xff]  ;;  %v16239_v52 = vld [vmem:[#allocation22_spill] sm:$0xff] }
 0x582   :  { %5105 = vmatpush2.bf16.msra.mxu0 %v10248_v2  ;;  %3704 = vst [vmem:[#allocation2 + $0x248] sm:$0xff] %v9503_v0  ;;  %3851 = vst [vmem:[#allocation2 + $0x2a8] sm:$0xff] %v9515_v45  ;;  %v3499_v1 = vmul.f32 %v3471_v61, %v3447_v7  ;;  %v3650_v16 = vmul.f32 %v3614_v37, %v3591_v17  ;;  %v9047_v34 = vcombine.low %v4724_v21, %v4726_v54  ;;  %v16235_v2 = vld [vmem:[#allocation24_spill] sm:$0xff]  ;;  %v16237_v7 = vld [vmem:[#allocation82_spill] sm:$0xff] }
 0x583   :  { %5106 = vmatprep.subr.bf16.mxu0 %v9048_v53  ;;  %v10251_v35 = vpack.c.bf16 %v3792_v3, %v12959_v11  ;;  %v3506_v58 = vmul.f32 %v3467_v26, %v16235_v2  ;;  %5149 = vmatprep.subr.bf16.mxu1 %v10250_v48  ;;  %v9044_v37 = vcombine.high %v4720_v5, %v4722_v49  ;;  %v16240_v11 = vld [vmem:[#allocation83_spill] sm:$0xff]  ;;  %v4716_v3 = vld [vmem:[#allocation2 + $0x200] sm:$0xff]  ;;  %v16247_v39 = vld [vmem:[#allocation20_spill] sm:$0xff] }
 0x584   :  { %4210 = vrot.lane.b32.xlu0 %v12943_v38, %s16150_s24  ;;  %2410 = vrot.lane.b32.xlu1 %v12950_v24, %s16071_s30  ;;  %v9495_v27 = vpack.c.bf16 %v3499_v1, %v13016_v22  ;;  %v9507_v46 = vpack.c.bf16 %v3650_v16, %v3649_v15  ;;  %v3280_v0 = vpop.permute.xlu0 %3279  ;;  %v13038_v45 = vpop.permute.xlu1 %3427  ;;  %v13042_v17 = vrot.slane %v16238_v57, %v16237_v7  ;;  %v4718_v21 = vld [vmem:[#allocation2 + $0x220] sm:$0xff]  ;;  %v16241_v54 = vld [vmem:[#allocation107_spill] sm:$0xff] }
 0x585   :  { %16236 = vst [vmem:[#allocation60_spill] sm:$0xff] %v13038_v45  ;;  %v3448_v32 = vsel %vm570_vm2, %v16239_v52, %v13038_v45  ;;  %v13050_v26 = vrot.slane %v16238_v57, %v16240_v11  ;;  %5150 = vmatpush2.bf16.msra.mxu1 %v10251_v35  ;;  %v3296_v53 = vsel %vm3291_vm9, %v16241_v54, %v3280_v0 }
 0x586   :  { %5107 = vmatpush2.bf16.msra.mxu0 %v9047_v34  ;;  %3561 = vst [vmem:[#allocation2 + $0x208] sm:$0xff] %v9495_v27  ;;  %3708 = vst [vmem:[#allocation2 + $0x268] sm:$0xff] %v9507_v46  ;;  %v3507_v48 = vmul.f32 %v3471_v61, %v3448_v32  ;;  %v10252_v2 = vpack.c.bf16 %v3650_v16, %v3642_v56  ;;  %v9043_v52 = vcombine.low %v4720_v5, %v4722_v49  ;;  %v16242_v46 = vld [vmem:[#allocation69_spill] sm:$0xff] }
 0x587   :  { %5108 = vmatprep.subr.bf16.mxu0 %v9044_v37  ;;  %v10253_v34 = vpack.c.bf16 %v3649_v15, %v12990_v19  ;;  %v13064_v14 = vrot.slane %v16238_v57, %v16242_v46  ;;  %v9040_v61 = vcombine.high %v4716_v3, %v4718_v21  ;;  %v3357_v32 = vmul.f32 %v13042_v17, %v3296_v53  ;;  %v16243_v56 = vld [vmem:[#allocation85_spill] sm:$0xff] }
 0x588   :  { %4214 = vrot.lane.b32.xlu0 %v12978_v63, %s16150_s24  ;;  %2268 = vrot.lane.b32.xlu1 %v12950_v24, %s16072_s27  ;;  %v9499_v35 = vpack.c.bf16 %v3507_v48, %v3506_v58  ;;  %v3284_v18 = vpop.permute.xlu0 %3283  ;;  %v13060_v27 = vpop.permute.xlu1 %3285  ;;  %v13071_v5 = vrot.slane %v16238_v57, %v16243_v56  ;;  %v10254_v15 = vpack.c.bf16 %v3507_v48, %v3499_v1  ;;  %v10010_v37 = vld [vmem:[%s15652_s17 + $0xf8] sm:$0xff]  }
 0x589   :  { %5151 = vmatprep.subr.bf16.mxu1 %v10252_v2  ;;  %v3294_v54 = vsel %vm3291_vm9, %v3280_v0, %v3284_v18  ;;  %v10255_v49 = vpack.c.bf16 %v3506_v58, %v13016_v22  ;;  %v9039_v16 = vcombine.low %v4716_v3, %v4718_v21  ;;  %v10007_v0 = vld [vmem:[%s15652_s17 + $0x78] sm:$0xff]   ;;  %v10006_v22 = vld [vmem:[%s15651_s10] ss:$8 sps:$4 sm:$0xff]  }
 0x58a   :  { %5109 = vmatpush2.bf16.msra.mxu0 %v9043_v52  ;;  %5152 = vmatpush2.bf16.msra.mxu1 %v10253_v34  ;;  %3565 = vst [vmem:[#allocation2 + $0x228] sm:$0xff] %v9499_v35  ;;  %v13074_v19 = vmul.f32 %v13050_v26, %v3294_v54  ;;  %v16244_v58 = vld [vmem:[#allocation70_spill] sm:$0xff]  ;;  %v10008_v21 = vld [vmem:[%s15652_s17 + $0x38] sm:$0xff]   ;;  %v10009_v35 = vld [vmem:[%s15652_s17 + $0x70] sm:$0xff]  }
 0x58b   :  { %5110 = vmatprep.subr.bf16.mxu0 %v9040_v61  ;;  %5153 = vmatprep.subr.bf16.mxu1 %v10254_v15  ;;  %v10012_v48 = vld [vmem:[%s15652_s17 + $0xb8] sm:$0xff]   ;;  %v10014_v61 = vld [vmem:[%s15652_s17 + $0xf0] sm:$0xff]  }
 0x58c   :  { %4040 = vrot.lane.b32.xlu0 %v12903_v23, %s16099_s3  ;;  %4540 = vrot.lane.b32.xlu1 %v12950_v24, %s16142_s26  ;;  %v9488_v57 = vpack.c.bf16 %v13074_v19, %v3357_v32  ;;  %v3288_v53 = vpop.permute.xlu0 %3287  ;;  %v13088_v2 = vpop.permute.xlu1 %3126 }
 0x58d   :  { %v3292_v1 = vsel %vm3291_vm9, %v3284_v18, %v3288_v53  ;;  %v3306_v3 = vsel %vm3291_vm9, %v3288_v53, %v16244_v58  ;;  %v13113_v18 = vld [vmem:[%s15650_s19 + $0x38] sm:$0xff]  ;;  %v16246_v53 = vld [vmem:[#allocation28_spill] sm:$0xff]  ;;  %v10018_v58 = vld [vmem:[%s15652_s17 + $0xe8] sm:$0xff]   ;;  %s10310_s19 = smov 120  }
 0x58e   :  { %5111 = vmatpush2.bf16.msra.mxu0 %v9039_v16  ;;  %5154 = vmatpush2.bf16.msra.mxu1 %v10255_v49  ;;  %3419 = vst [vmem:[#allocation2 + $0x1d0] sm:$0xff] %v9488_v57  ;;  %v3359_v52 = vmul.f32 %v13064_v14, %v3292_v1  ;;  %v13106_v34 = vmul.f32 %v13071_v5, %v3306_v3  ;;  %v10011_v49 = vld [vmem:[%s15652_s17 + $0x30] sm:$0xff]   ;;  %v10013_v1 = vld [vmem:[%s15652_s17 + $0x68] sm:$0xff]  }
 0x58f   :  { %9654 = vmatprep.subr.bf16.mxu0 %v10007_v0  ;;  %9676 = vmatprep.subr.bf16.mxu1 %v10010_v37  ;;  %v10016_v16 = vld [vmem:[%s15652_s17 + $0xb0] sm:$0xff]   ;;  %v16245_v0 = vld [vmem:[#allocation21_spill] sm:$0xff] }
 0x590   :  { %4044 = vrot.lane.b32.xlu0 %v12943_v38, %s16099_s3  ;;  %4548 = vrot.lane.b32.xlu1 %v13113_v18, %s16142_s26  ;;  %v9489_v32 = vpack.c.bf16 %v13106_v34, %v3359_v52  ;;  %v3121_v54 = vpop.permute.xlu0 %3120  ;;  %v13124_v15 = vpop.permute.xlu1 %2858  ;;  %v13134_v37 = vrot.slane %v16245_v0, %v16237_v7  ;;  %v13142_v57 = vrot.slane %v16245_v0, %v16240_v11  ;;  %s10312_s26 = smov 121  }
 0x591   :  { %5113 = vmatmul.mubr.bf16.vlgmr.msra.gmra.mxu0 %v10006_v22  ;;  %5156 = vmatmul.mubr.bf16.vlgmr.msra.gmra.mxu1 %v10006_v22  ;;  %v3136_v22 = vsel %vm486_vm3, %v16246_v53, %v3121_v54  ;;  %v13159_v52 = vrot.slane %v16245_v0, %v16242_v46 }
 0x592   :  { %9655 = vmatpush3.bf16.msra.mxu0 %v10008_v21  ;;  %9677 = vmatpush3.bf16.msra.mxu1 %v10012_v48  ;;  %3420 = vst [vmem:[#allocation2 + $0x1d8] sm:$0xff] %v9489_v32  ;;  %v3191_v32 = vmul.f32 %v13134_v37, %v3136_v22 }
 0x593   :  { %9656 = vmatprep.subr.bf16.mxu0 %v10009_v35  ;;  %9678 = vmatprep.subr.bf16.mxu1 %v10014_v61  ;;  %v10015_v35 = vld [vmem:[%s15652_s17 + $0x28] sm:$0xff]  }
 0x594   :  { %4048 = vrot.lane.b32.xlu0 %v12978_v63, %s16099_s3  ;;  %4374 = vrot.lane.b32.xlu1 %v12950_v24, %s16096_s25  ;;  %v3125_v3 = vpop.permute.xlu0 %3124  ;;  %v13153_v21 = vpop.permute.xlu1 %2866  ;;  %v10020_v61 = vld [vmem:[%s15652_s17 + $0xa8] sm:$0xff]  }
 0x595   :  { %v3134_v48 = vsel %vm486_vm3, %v3121_v54, %v3125_v3  ;;  %v13175_v54 = vrot.slane %v16245_v0, %v16243_v56 }
 0x596   :  { %9657 = vmatpush3.bf16.msra.mxu0 %v10011_v49  ;;  %9679 = vmatpush3.bf16.msra.mxu1 %v10016_v16  ;;  %v3192_v53 = vmul.f32 %v13142_v57, %v3134_v48  ;;  %v10017_v49 = vld [vmem:[%s15652_s17 + $0x60] sm:$0xff]  }
 0x597   :  { %9658 = vmatprep.subr.bf16.mxu0 %v10013_v1  ;;  %9680 = vmatprep.subr.bf16.mxu1 %v10018_v58  ;;  %v10022_v16 = vld [vmem:[%s15652_s17 + $0xe0] sm:$0xff]  }
 0x598   :  { %3874 = vrot.lane.b32.xlu0 %v12903_v23, %s10305_s23  ;;  %4382 = vrot.lane.b32.xlu1 %v13113_v18, %s16096_s25  ;;  %v9480_v22 = vpack.c.bf16 %v3192_v53, %v3191_v32  ;;  %v3129_v48 = vpop.permute.xlu0 %3128  ;;  %v13183_v30 = vpop.permute.xlu1 %2708  ;;  %v10019_v1 = vld [vmem:[%s15652_s17 + $0x20] sm:$0xff]   ;;  %s10317_s25 = smov 122  }
 0x599   :  { %v3132_v45 = vsel %vm486_vm3, %v3125_v3, %v3129_v48  ;;  %v3140_v0 = vsel %vm486_vm3, %v3129_v48, %v16247_v39  ;;  %v10024_v58 = vld [vmem:[%s15652_s17 + $0xa0] sm:$0xff]   ;;  %v10021_v39 = vld [vmem:[%s15652_s17 + $0x58] sm:$0xff]  }
 0x59a   :  { %9659 = vmatpush3.bf16.msra.mxu0 %v10015_v35  ;;  %9681 = vmatpush3.bf16.msra.mxu1 %v10020_v61  ;;  %3253 = vst [vmem:[#allocation2 + $0x190] sm:$0xff] %v9480_v22  ;;  %v3193_v32 = vmul.f32 %v13159_v52, %v3132_v45  ;;  %v3194_v53 = vmul.f32 %v13175_v54, %v3140_v0  ;;  %v10026_v3 = vld [vmem:[%s15652_s17 + $0xd8] sm:$0xff]   ;;  %v16249_v0 = vld [vmem:[#allocation35_spill] sm:$0xff] }
 0x59b   :  { %9660 = vmatprep.subr.bf16.mxu0 %v10017_v49  ;;  %9682 = vmatprep.subr.bf16.mxu1 %v10022_v16  ;;  %v10023_v22 = vld [vmem:[%s15652_s17 + $0x18] sm:$0xff]   ;;  %v16248_v16 = vld [vmem:[#allocation38_spill] sm:$0xff] }
 0x59c   :  { %3878 = vrot.lane.b32.xlu0 %v12943_v38, %s10305_s23  ;;  %4208 = vrot.lane.b32.xlu1 %v12950_v24, %s16150_s24  ;;  %v9481_v35 = vpack.c.bf16 %v3194_v53, %v3193_v32  ;;  %v2857_v45 = vpop.permute.xlu0 %2856  ;;  %v13208_v61 = vpop.permute.xlu1 %2716  ;;  %v10028_v49 = vld [vmem:[%s15652_s17 + $0x98] sm:$0xff]   ;;  %v13222_v48 = vrot.slane %v16248_v16, %v16240_v11  ;;  %v10030_v32 = vld [vmem:[%s15652_s17 + $0xd0] sm:$0xff]   ;;  %v13235_v53 = vrot.slane %v16248_v16, %v16237_v7 }
 0x59e   :  { %9661 = vmatpush3.bf16.msra.mxu0 %v10019_v1  ;;  %9683 = vmatpush3.bf16.msra.mxu1 %v10024_v58  ;;  %3254 = vst [vmem:[#allocation2 + $0x198] sm:$0xff] %v9481_v35  ;;  %v2878_v1 = vsel %vm343_vm4, %v16249_v0, %v2857_v45  ;;  %v10025_v58 = vld [vmem:[%s15652_s17 + $0x50] sm:$0xff]  }
 0x59f   :  { %9662 = vmatprep.subr.bf16.mxu0 %v10021_v39  ;;  %9684 = vmatprep.subr.bf16.mxu1 %v10026_v3  ;;  %v10027_v39 = vld [vmem:[%s15652_s17 + $0x10] sm:$0xff]   ;;  %v2931_v36 = vmul.f32 %v13235_v53, %v2878_v1  ;;  %v13265_v1 = vrot.slane %v16248_v16, %v16243_v56 }
 0x5a0   :  { %3882 = vrot.lane.b32.xlu0 %v12978_v63, %s10305_s23  ;;  %4216 = vrot.lane.b32.xlu1 %v13113_v18, %s16150_s24  ;;  %v2861_v35 = vpop.permute.xlu0 %2860  ;;  %v13237_v4 = vpop.permute.xlu1 %2549  ;;  %v10032_v3 = vld [vmem:[%s15652_s17 + $0x90] sm:$0xff]  }
 0x5a1   :  { %v2876_v0 = vsel %vm343_vm4, %v2857_v45, %v2861_v35  ;;  %v13255_v45 = vrot.slane %v16248_v16, %v16242_v46 }
 0x5a2   :  { %9663 = vmatpush3.bf16.msra.mxu0 %v10023_v22  ;;  %9685 = vmatpush3.bf16.msra.mxu1 %v10028_v49  ;;  %v2932_v13 = vmul.f32 %v13222_v48, %v2876_v0  ;;  %v10029_v22 = vld [vmem:[%s15652_s17 + $0x48] sm:$0xff]  }
 0x5a3   :  { %9664 = vmatprep.subr.bf16.mxu0 %v10025_v58  ;;  %9686 = vmatprep.subr.bf16.mxu1 %v10030_v32  ;;  %v10034_v49 = vld [vmem:[%s15652_s17 + $0xc8] sm:$0xff]  }
 0x5a4   :  { %3715 = vrot.lane.b32.xlu0 %v12903_v23, %s16073_s28  ;;  %4042 = vrot.lane.b32.xlu1 %v12950_v24, %s16099_s3  ;;  %v9464_v0 = vpack.c.bf16 %v2932_v13, %v2931_v36  ;;  %v2865_v25 = vpop.permute.xlu0 %2864  ;;  %v13267_v29 = vpop.permute.xlu1 %2557  ;;  %v10031_v32 = vld [vmem:[%s15652_s17 + $0x8] sm:$0xff]  }
 0x5a5   :  { %v2872_v58 = vsel %vm343_vm4, %v2865_v25, %v16250_v20  ;;  %v2874_v31 = vsel %vm343_vm4, %v2861_v35, %v2865_v25  ;;  %v10036_v36 = vld [vmem:[%s15652_s17 + $0x88] sm:$0xff]   ;;  %v10033_v20 = vld [vmem:[%s15652_s17 + $0x40] sm:$0xff]  }
 0x5a6   :  { %9665 = vmatpush3.bf16.msra.mxu0 %v10027_v39  ;;  %9687 = vmatpush3.bf16.msra.mxu1 %v10032_v3  ;;  %2993 = vst [vmem:[#allocation2 + $0x110] sm:$0xff] %v9464_v0  ;;  %v2933_v13 = vmul.f32 %v13255_v45, %v2874_v31  ;;  %v2934_v16 = vmul.f32 %v13265_v1, %v2872_v58  ;;  %v10037_v25 = vld [vmem:[%s15652_s17 + $0xc0] sm:$0xff]   ;;  %v16252_v58 = vld [vmem:[#allocation80_spill] sm:$0xff] }
 0x5a7   :  { %9666 = vmatprep.subr.bf16.mxu0 %v10029_v22  ;;  %9688 = vmatprep.subr.bf16.mxu1 %v10034_v49  ;;  %v10035_v3 = vld [vmem:[%s15652_s17] sm:$0xff]   ;;  %v16251_v49 = vld [vmem:[#allocation77_spill] sm:$0xff] }
 0x5a8   :  { %3719 = vrot.lane.b32.xlu0 %v12943_v38, %s16073_s28  ;;  %4050 = vrot.lane.b32.xlu1 %v13113_v18, %s16099_s3  ;;  %v9465_v35 = vpack.c.bf16 %v2934_v16, %v2933_v13  ;;  %v2707_v31 = vpop.permute.xlu0 %2706  ;;  %v13292_v39 = vpop.permute.xlu1 %2406  ;;  %v10038_v22 = vld [vmem:[%s15652_s17 + $0x80] sm:$0xff]   ;;  %v13306_v0 = vrot.slane %v16251_v49, %v16240_v11  ;;  %s10311_s3 = smov 8  }
 0x5aa   :  { %9667 = vmatpush3.bf16.msra.mxu0 %v10031_v32  ;;  %9689 = vmatpush3.bf16.msra.mxu1 %v10036_v36  ;;  %2994 = vst [vmem:[#allocation2 + $0x118] sm:$0xff] %v9465_v35  ;;  %v2729_v32 = vsel %vm2722_vm10, %v16252_v58, %v2707_v31  ;;  %v13313_v36 = vrot.slane %v16251_v49, %v16237_v7  ;;  %v16253_v58 = vld [vmem:[#allocation46_spill] sm:$0xff] }
 0x5ab   :  { %9668 = vmatprep.subr.bf16.mxu0 %v10033_v20  ;;  %9690 = vmatprep.subr.bf16.mxu1 %v10037_v25  ;;  %v13327_v20 = vrot.slane %v16251_v49, %v16242_v46  ;;  %v13331_v25 = vrot.slane %v16251_v49, %v16243_v56 }
 0x5ac   :  { %3723 = vrot.lane.b32.xlu0 %v12978_v63, %s16073_s28  ;;  %3876 = vrot.lane.b32.xlu1 %v12950_v24, %s10305_s23  ;;  %v2711_v13 = vpop.permute.xlu0 %2710  ;;  %v13315_v16 = vpop.permute.xlu1 %2414  ;;  %v2788_v60 = vmul.f32 %v13313_v36, %v2729_v32 }
 0x5ad   :  { %v2727_v35 = vsel %vm2722_vm10, %v2707_v31, %v2711_v13 }
 0x5ae   :  { %9669 = vmatpush3.bf16.msra.mxu0 %v10035_v3  ;;  %9691 = vmatpush3.bf16.msra.mxu1 %v10038_v22  ;;  %v2789_v28 = vmul.f32 %v13306_v0, %v2727_v35 }
 0x5b0   :  { %3572 = vrot.lane.b32.xlu0 %v12903_v23, %s16110_s12  ;;  %3884 = vrot.lane.b32.xlu1 %v13113_v18, %s10305_s23  ;;  %v9456_v31 = vpack.c.bf16 %v2789_v28, %v2788_v60  ;;  %v2715_v3 = vpop.permute.xlu0 %2714  ;;  %v13333_v22 = vpop.permute.xlu1 %2264 }
 0x5b1   :  { %v2723_v32 = vsel %vm2722_vm10, %v2715_v3, %v16253_v58  ;;  %v2725_v35 = vsel %vm2722_vm10, %v2711_v13, %v2715_v3  ;;  %v16254_v13 = vld [vmem:[#allocation45_spill] sm:$0xff]  ;;  %v16255_v3 = vld [vmem:[#allocation42_spill] sm:$0xff] }
 0x5b2   :  { %2850 = vst [vmem:[#allocation2 + $0xd0] sm:$0xff] %v9456_v31  ;;  %v2790_v9 = vmul.f32 %v13327_v20, %v2725_v35  ;;  %v2791_v59 = vmul.f32 %v13331_v25, %v2723_v32  ;;  %v13354_v31 = vrot.slane %v16254_v13, %v16240_v11  ;;  %v13379_v50 = vrot.slane %v16254_v13, %v16243_v56 }
 0x5b4   :  { %3576 = vrot.lane.b32.xlu0 %v12943_v38, %s16110_s12  ;;  %3717 = vrot.lane.b32.xlu1 %v12950_v24, %s16073_s28  ;;  %v9457_v60 = vpack.c.bf16 %v2791_v59, %v2790_v9  ;;  %v2548_v28 = vpop.permute.xlu0 %2547  ;;  %v13346_v49 = vpop.permute.xlu1 %2272  ;;  %v13361_v59 = vrot.slane %v16254_v13, %v16237_v7 }
 0x5b5   :  { %v2569_v58 = vsel %vm259_vm5, %v16255_v3, %v2548_v28  ;;  %v13375_v3 = vrot.slane %v16254_v13, %v16242_v46 }
 0x5b6   :  { %2851 = vst [vmem:[#allocation2 + $0xd8] sm:$0xff] %v9457_v60  ;;  %v2622_v60 = vmul.f32 %v13361_v59, %v2569_v58  ;;  %v16258_v58 = vld [vmem:[#allocation47_spill] sm:$0xff] }
 0x5b8   :  { %3580 = vrot.lane.b32.xlu0 %v12978_v63, %s16110_s12  ;;  %3725 = vrot.lane.b32.xlu1 %v13113_v18, %s16073_s28  ;;  %v2552_v9 = vpop.permute.xlu0 %2551  ;;  %v13363_v32 = vpop.permute.xlu1 %4544 }
 0x5b9   :  { %16256 = vst [vmem:[#allocation62_spill] sm:$0xff] %v13363_v32  ;;  %v2567_v35 = vsel %vm259_vm5, %v2548_v28, %v2552_v9 }
 0x5ba   :  { %v2623_v41 = vmul.f32 %v13354_v31, %v2567_v35 }
 0x5bc   :  { %3429 = vrot.lane.b32.xlu0 %v12903_v23, %s16112_s13  ;;  %3574 = vrot.lane.b32.xlu1 %v12950_v24, %s16110_s12  ;;  %v9448_v8 = vpack.c.bf16 %v2623_v41, %v2622_v60  ;;  %v2556_v28 = vpop.permute.xlu0 %2555  ;;  %v13381_v42 = vpop.permute.xlu1 %4378 }
 0x5bd   :  { %16257 = vst [vmem:[#allocation52_spill] sm:$0xff] %v13381_v42  ;;  %v2563_v35 = vsel %vm259_vm5, %v2556_v28, %v16258_v58  ;;  %v2565_v23 = vsel %vm259_vm5, %v2552_v9, %v2556_v28  ;;  %v16260_v9 = vld [vmem:[#allocation49_spill] sm:$0xff] }
 0x5be   :  { %2684 = vst [vmem:[#allocation2 + $0x90] sm:$0xff] %v9448_v8  ;;  %v2624_v32 = vmul.f32 %v13375_v3, %v2565_v23  ;;  %v2625_v10 = vmul.f32 %v13379_v50, %v2563_v35  ;;  %v13402_v8 = vrot.slane %v16181_v6, %v16240_v11  ;;  %v13421_v35 = vrot.slane %v16181_v6, %v16242_v46 }
 0x5bf   :  { %v13425_v23 = vrot.slane %v16181_v6, %v16243_v56 }
 0x5c0   :  { %3433 = vrot.lane.b32.xlu0 %v12943_v38, %s16112_s13  ;;  %3582 = vrot.lane.b32.xlu1 %v13113_v18, %s16110_s12  ;;  %v9449_v41 = vpack.c.bf16 %v2625_v10, %v2624_v32  ;;  %v2405_v13 = vpop.permute.xlu0 %2404  ;;  %v13409_v10 = vrot.slane %v16181_v6, %v16237_v7 }
 0x5c1   :  { %v13394_v60 = vpop.permute.xlu1 %4212  ;;  %v2426_v38 = vsel %vm175_vm6, %v16260_v9, %v2405_v13 }
 0x5c2   :  { %16259 = vst [vmem:[#allocation97_spill] sm:$0xff] %v13394_v60  ;;  %2685 = vst [vmem:[#allocation2 + $0x98] sm:$0xff] %v9449_v41 }
 0x5c4   :  { %3437 = vrot.lane.b32.xlu0 %v12978_v63, %s16112_s13  ;;  %3431 = vrot.lane.b32.xlu1 %v12950_v24, %s16112_s13  ;;  %v2479_v24 = vmul.f32 %v13409_v10, %v2426_v38 }
 0x5c5   :  { %v2409_v32 = vpop.permute.xlu0 %2408  ;;  %v13411_v28 = vpop.permute.xlu1 %4046 }
 0x5c6   :  { %16261 = vst [vmem:[#allocation44_spill] sm:$0xff] %v13411_v28  ;;  %v2424_v63 = vsel %vm175_vm6, %v2405_v13, %v2409_v32 }
 0x5c7   :  { %v2480_v58 = vmul.f32 %v13402_v8, %v2424_v63 }
 0x5c8   :  { %3439 = vrot.lane.b32.xlu1 %v13113_v18, %s16112_s13 }
 0x5c9   :  { %v9440_v41 = vpack.c.bf16 %v2480_v58, %v2479_v24  ;;  %v13440_v24 = vrot.slane %v16191_v40, %v16240_v11  ;;  %v16265_v58 = vld [vmem:[#allocation57_spill] sm:$0xff] }
 0x5ca   :  { %v2413_v9 = vpop.permute.xlu0 %2412  ;;  %v13427_v28 = vpop.permute.xlu1 %3880 }
 0x5cb   :  { %16262 = vst [vmem:[#allocation36_spill] sm:$0xff] %v13427_v28  ;;  %v2420_v13 = vsel %vm175_vm6, %v2413_v9, %v12715_v43  ;;  %v2422_v38 = vsel %vm175_vm6, %v2409_v32, %v2413_v9  ;;  %2541 = vst [vmem:[#allocation2 + $0x50] sm:$0xff] %v9440_v41  ;;  %v13447_v32 = vrot.slane %v16191_v40, %v16237_v7 }
 0x5cc   :  { %v2481_v18 = vmul.f32 %v13421_v35, %v2422_v38  ;;  %v2482_v63 = vmul.f32 %v13425_v23, %v2420_v13  ;;  %16264 = vst [vmem:[#allocation61_spill] sm:$0xff] %v13440_v24 }
 0x5ce   :  { %v9441_v60 = vpack.c.bf16 %v2482_v63, %v2481_v18  ;;  %v2263_v42 = vpop.permute.xlu0 %2262  ;;  %v13436_v6 = vpop.permute.xlu1 %3721  ;;  %v13457_v18 = vrot.slane %v16191_v40, %v16242_v46  ;;  %v13461_v63 = vrot.slane %v16191_v40, %v16243_v56 }
 0x5cf   :  { %16263 = vst [vmem:[#allocation59_spill] sm:$0xff] %v13436_v6  ;;  %v2284_v43 = vsel %vm92_vm7, %v16265_v58, %v2263_v42 }
 0x5d0   :  { %2542 = vst [vmem:[#allocation2 + $0x58] sm:$0xff] %v9441_v60  ;;  %v2336_v60 = vmul.f32 %v13447_v32, %v2284_v43  ;;  %16267 = vst [vmem:[#allocation55_spill] sm:$0xff] %v13457_v18 }
 0x5d2   :  { %v2267_v41 = vpop.permute.xlu0 %2266  ;;  %v13449_v9 = vpop.permute.xlu1 %3578 }
 0x5d3   :  { %16266 = vst [vmem:[#allocation98_spill] sm:$0xff] %v13449_v9  ;;  %v2282_v13 = vsel %vm92_vm7, %v2263_v42, %v2267_v41 }
 0x5d4   :  { %v2337_v38 = vmul.f32 %v13440_v24, %v2282_v13 }
 0x5d6   :  { %v9432_v58 = vpack.c.bf16 %v2337_v38, %v2336_v60  ;;  %v2271_v6 = vpop.permute.xlu0 %2270  ;;  %v13463_v28 = vpop.permute.xlu1 %3435  ;;  %v16269_v38 = vld [vmem:[#allocation29_spill] sm:$0xff] }
 0x5d7   :  { %16268 = vst [vmem:[#allocation51_spill] sm:$0xff] %v13463_v28  ;;  %v2278_v42 = vsel %vm92_vm7, %v2271_v6, %v12752_v33  ;;  %v2280_v43 = vsel %vm92_vm7, %v2267_v41, %v2271_v6  ;;  %v16270_v33 = vld [vmem:[#allocation108_spill] sm:$0xff] }
 0x5d8   :  { %2398 = vst [vmem:[#allocation2 + $0x10] sm:$0xff] %v9432_v58  ;;  %v2338_v13 = vmul.f32 %v13457_v18, %v2280_v43  ;;  %v2339_v9 = vmul.f32 %v13461_v63, %v2278_v42  ;;  %v13480_v6 = vrot.slane %v16270_v33, %v16237_v7  ;;  %v13490_v58 = vrot.slane %v16270_v33, %v16240_v11  ;;  %v16273_v42 = vld [vmem:[#allocation109_spill] sm:$0xff] }
 0x5da   :  { %v9433_v24 = vpack.c.bf16 %v2339_v9, %v2338_v13  ;;  %v4539_v55 = vpop.permute.xlu0 %4538  ;;  %v3282_v40 = vpop.permute.xlu1 %3281 }
 0x5db   :  { %v3295_v60 = vsel %vm3291_vm9, %v3282_v40, %v13060_v27  ;;  %v3297_v28 = vsel %vm3291_vm9, %v16269_v38, %v3282_v40  ;;  %v4555_v43 = vsel %vm4550_vm11, %v16273_v42, %v4539_v55  ;;  %v13511_v42 = vrot.slane %v16270_v33, %v16243_v56 }
 0x5dc   :  { %2399 = vst [vmem:[#allocation2 + $0x18] sm:$0xff] %v9433_v24  ;;  %v13483_v41 = vmul.f32 %v13042_v17, %v3297_v28  ;;  %v13486_v9 = vmul.f32 %v13050_v26, %v3295_v60  ;;  %v13499_v17 = vrot.slane %v16270_v33, %v16242_v46  ;;  %v16274_v60 = vld [vmem:[#allocation72_spill] sm:$0xff]  ;;  %v13514_v24 = vmul.f32 %v13480_v6, %v4555_v43 }
 0x5de   :  { %16271 = vst [vmem:[#allocation43_spill] sm:$0xff] %v13483_v41  ;;  %16272 = vst [vmem:[#allocation26_spill] sm:$0xff] %v13486_v9  ;;  %v4543_v13 = vpop.permute.xlu0 %4542  ;;  %v3290_v40 = vpop.permute.xlu1 %3289 }
 0x5df   :  { %v4553_v26 = vsel %vm4550_vm11, %v4539_v55, %v4543_v13  ;;  %v3293_v28 = vsel %vm3291_vm9, %v13060_v27, %v3290_v40  ;;  %v3307_v38 = vsel %vm3291_vm9, %v3290_v40, %v16274_v60  ;;  %v13527_v27 = vpack.c.bf16 %v13486_v9, %v13074_v19 }
 0x5e0   :  { %v13517_v41 = vmul.f32 %v13490_v58, %v4553_v26  ;;  %v13520_v55 = vmul.f32 %v13064_v14, %v3293_v28  ;;  %v13523_v18 = vmul.f32 %v13071_v5, %v3307_v38  ;;  %v16278_v26 = vld [vmem:[#allocation90_spill] sm:$0xff] }
 0x5e1   :  { %16277 = vst [vmem:[#allocation50_spill] sm:$0xff] %v13527_v27  ;;  %v16279_v28 = vld [vmem:[#allocation110_spill] sm:$0xff]  ;;  %5898 = vmatprep.subr.bf16.mxu0 %v13527_v27  ;;  %v16283_v27 = vld [vmem:[#allocation31_spill] sm:$0xff] }
 0x5e2   :  { %16275 = vst [vmem:[#allocation101_spill] sm:$0xff] %v13520_v55  ;;  %16276 = vst [vmem:[#allocation32_spill] sm:$0xff] %v13523_v18  ;;  %v4547_v40 = vpop.permute.xlu0 %4546  ;;  %v3123_v60 = vpop.permute.xlu1 %3122 }
 0x5e3   :  { %v4551_v43 = vsel %vm4550_vm11, %v4543_v13, %v4547_v40  ;;  %v4565_v14 = vsel %vm4550_vm11, %v4547_v40, %v16278_v26  ;;  %v3135_v5 = vsel %vm486_vm3, %v3123_v60, %v13088_v2  ;;  %v3137_v19 = vsel %vm486_vm3, %v16279_v28, %v3123_v60  ;;  %v16282_v28 = vld [vmem:[#allocation34_spill] sm:$0xff] }
 0x5e4   :  { %v13544_v38 = vmul.f32 %v13499_v17, %v4551_v43  ;;  %v13547_v33 = vmul.f32 %v13511_v42, %v4565_v14  ;;  %v3199_v13 = vmul.f32 %v13134_v37, %v3137_v19  ;;  %v3200_v40 = vmul.f32 %v13142_v57, %v3135_v5 }
 0x5e5   :  { %v13553_v26 = vpack.c.bf16 %v13523_v18, %v13106_v34  ;;  %v2879_v43 = vsel %vm343_vm4, %v16282_v28, %v13124_v15  ;;  %v2873_v37 = vsel %vm343_vm4, %v13153_v21, %v16283_v27  ;;  %v16284_v34 = vld [vmem:[#allocation19_spill] sm:$0xff]  ;;  %v13574_v5 = vrot.slane %v12372_v47, %v16237_v7 }
 0x5e6   :  { %v13555_v55 = vpack.c.bf16 %v3200_v40, %v3199_v13  ;;  %v4373_v9 = vpop.permute.xlu0 %4372  ;;  %v3131_v60 = vpop.permute.xlu1 %3130  ;;  %v13580_v27 = vrot.slane %v12372_v47, %v16240_v11  ;;  %v16285_v40 = vld [vmem:[#allocation111_spill] sm:$0xff]  ;;  %v13591_v28 = vrot.slane %v12372_v47, %v16243_v56 }
 0x5e7   :  { %16280 = vst [vmem:[#allocation84_spill] sm:$0xff] %v13553_v26  ;;  %v3133_v57 = vsel %vm486_vm3, %v13088_v2, %v3131_v60  ;;  %v3141_v14 = vsel %vm486_vm3, %v3131_v60, %v16284_v34  ;;  %5941 = vmatprep.subr.bf16.mxu1 %v13553_v26  ;;  %v4389_v2 = vsel %vm4384_vm12, %v16285_v40, %v4373_v9 }
 0x5e8   :  { %16281 = vst [vmem:[#allocation102_spill] sm:$0xff] %v13555_v55  ;;  %v3201_v19 = vmul.f32 %v13159_v52, %v3133_v57  ;;  %v3202_v13 = vmul.f32 %v13175_v54, %v3141_v14  ;;  %v13587_v60 = vrot.slane %v12372_v47, %v16242_v46  ;;  %v2939_v52 = vmul.f32 %v13235_v53, %v2879_v43  ;;  %v16286_v57 = vld [vmem:[#allocation81_spill] sm:$0xff] }
 0x5e9   :  { %v2942_v54 = vmul.f32 %v13265_v1, %v2873_v37  ;;  %v2730_v34 = vsel %vm2722_vm10, %v16286_v57, %v13183_v30  ;;  %v16288_v55 = vld [vmem:[#allocation53_spill] sm:$0xff]  ;;  %v13614_v43 = vmul.f32 %v13574_v5, %v4389_v2  ;;  %v16289_v2 = vld [vmem:[#allocation94_spill] sm:$0xff] }
 0x5ea   :  { %v13599_v14 = vpack.c.bf16 %v3202_v13, %v3201_v19  ;;  %v4377_v40 = vpop.permute.xlu0 %4376  ;;  %v2863_v26 = vpop.permute.xlu1 %2862  ;;  %v2724_v18 = vsel %vm2722_vm10, %v13208_v61, %v16288_v55 }
 0x5eb   :  { %v4387_v47 = vsel %vm4384_vm12, %v4373_v9, %v4377_v40  ;;  %v2875_v53 = vsel %vm343_vm4, %v2863_v26, %v13153_v21  ;;  %v2877_v1 = vsel %vm343_vm4, %v13124_v15, %v2863_v26  ;;  %v2796_v9 = vmul.f32 %v13313_v36, %v2730_v34 }
 0x5ec   :  { %16287 = vst [vmem:[#allocation89_spill] sm:$0xff] %v13599_v14  ;;  %v13617_v37 = vmul.f32 %v13580_v27, %v4387_v47  ;;  %v2940_v19 = vmul.f32 %v13222_v48, %v2877_v1  ;;  %v2941_v55 = vmul.f32 %v13255_v45, %v2875_v53  ;;  %v2799_v13 = vmul.f32 %v13331_v25, %v2724_v18 }
 0x5ee   :  { %v13623_v57 = vpack.c.bf16 %v2940_v19, %v2939_v52  ;;  %v13625_v21 = vpack.c.bf16 %v2942_v54, %v2941_v55  ;;  %v4381_v14 = vpop.permute.xlu0 %4380  ;;  %v2713_v15 = vpop.permute.xlu1 %2712  ;;  %v16290_v54 = vld [vmem:[#allocation41_spill] sm:$0xff]  ;;  %v2421_v55 = vsel %vm175_vm6, %v13315_v16, %v12754_v44 }
 0x5ef   :  { %v4385_v26 = vsel %vm4384_vm12, %v4377_v40, %v4381_v14  ;;  %v4399_v47 = vsel %vm4384_vm12, %v4381_v14, %v16289_v2  ;;  %v2726_v48 = vsel %vm2722_vm10, %v2713_v15, %v13208_v61  ;;  %v2728_v45 = vsel %vm2722_vm10, %v13183_v30, %v2713_v15  ;;  %v16291_v61 = vld [vmem:[#allocation73_spill] sm:$0xff]  ;;  %v16292_v40 = vld [vmem:[#allocation48_spill] sm:$0xff] }
 0x5f0   :  { %v13639_v36 = vmul.f32 %v13587_v60, %v4385_v26  ;;  %v13642_v25 = vmul.f32 %v13591_v28, %v4399_v47  ;;  %v2797_v18 = vmul.f32 %v13306_v0, %v2728_v45  ;;  %v2798_v52 = vmul.f32 %v13327_v20, %v2726_v48  ;;  %v16293_v45 = vld [vmem:[#allocation114_spill] sm:$0xff] }
 0x5f1   :  { %v2570_v34 = vsel %vm259_vm5, %v16290_v54, %v13237_v4  ;;  %v2564_v30 = vsel %vm259_vm5, %v13267_v29, %v16291_v61  ;;  %v13656_v14 = vrot.slane %v12419_v51, %v16237_v7  ;;  %v2427_v0 = vsel %vm175_vm6, %v16292_v40, %v13292_v39 }
 0x5f2   :  { %v13662_v20 = vpack.c.bf16 %v2797_v18, %v2796_v9  ;;  %v13664_v53 = vpack.c.bf16 %v2799_v13, %v2798_v52  ;;  %v4207_v1 = vpop.permute.xlu0 %4206  ;;  %v2554_v19 = vpop.permute.xlu1 %2553  ;;  %v13678_v9 = vrot.slane %v12419_v51, %v16240_v11  ;;  %v2630_v13 = vmul.f32 %v13361_v59, %v2570_v34 }
 0x5f3   :  { %v2566_v15 = vsel %vm259_vm5, %v2554_v19, %v13267_v29  ;;  %v2568_v26 = vsel %vm259_vm5, %v13237_v4, %v2554_v19  ;;  %v2633_v2 = vmul.f32 %v13379_v50, %v2564_v30  ;;  %v2487_v48 = vmul.f32 %v13409_v10, %v2427_v0 }
 0x5f4   :  { %v2631_v47 = vmul.f32 %v13354_v31, %v2568_v26  ;;  %v2632_v44 = vmul.f32 %v13375_v3, %v2566_v15  ;;  %v4223_v29 = vsel %vm4218_vm13, %v16293_v45, %v4207_v1  ;;  %v13690_v4 = vrot.slane %v12419_v51, %v16242_v46  ;;  %v16294_v31 = vld [vmem:[#allocation56_spill] sm:$0xff] }
 0x5f5   :  { %v13694_v18 = vrot.slane %v12419_v51, %v16243_v56  ;;  %v2490_v50 = vmul.f32 %v13425_v23, %v2421_v55  ;;  %v2285_v59 = vsel %vm92_vm7, %v16294_v31, %v13333_v22  ;;  %v2279_v34 = vsel %vm92_vm7, %v13346_v49, %v12786_v62 }
 0x5f6   :  { %v13701_v3 = vpack.c.bf16 %v2631_v47, %v2630_v13  ;;  %v13703_v10 = vpack.c.bf16 %v2633_v2, %v2632_v44  ;;  %v4211_v52 = vpop.permute.xlu0 %4210  ;;  %v2411_v54 = vpop.permute.xlu1 %2410  ;;  %v13718_v30 = vmul.f32 %v13656_v14, %v4223_v29  ;;  %v2347_v19 = vmul.f32 %v13461_v63, %v2279_v34  ;;  %v16295_v13 = vld [vmem:[#allocation99_spill] sm:$0xff]  ;;  %v16296_v47 = vld [vmem:[#allocation61_spill] sm:$0xff]  ;;  %v16300_v34 = vld [vmem:[#allocation112_spill] sm:$0xff] }
 0x5f7   :  { %v4221_v51 = vsel %vm4218_vm13, %v4207_v1, %v4211_v52  ;;  %v2423_v23 = vsel %vm175_vm6, %v2411_v54, %v13315_v16  ;;  %v2425_v61 = vsel %vm175_vm6, %v13292_v39, %v2411_v54  ;;  %v2344_v1 = vmul.f32 %v13447_v32, %v2285_v59  ;;  %v16298_v59 = vld [vmem:[#allocation113_spill] sm:$0xff] }
 0x5f8   :  { %v13721_v40 = vmul.f32 %v13678_v9, %v4221_v51  ;;  %v2488_v0 = vmul.f32 %v13402_v8, %v2425_v61  ;;  %v2489_v62 = vmul.f32 %v13421_v35, %v2423_v23  ;;  %v16301_v23 = vld [vmem:[#allocation33_spill] sm:$0xff] }
 0x5fa   :  { %v13727_v55 = vpack.c.bf16 %v2488_v0, %v2487_v48  ;;  %v13729_v16 = vpack.c.bf16 %v2490_v50, %v2489_v62  ;;  %v4215_v15 = vpop.permute.xlu0 %4214  ;;  %v2269_v39 = vpop.permute.xlu1 %2268  ;;  %v16297_v48 = vld [vmem:[#allocation55_spill] sm:$0xff] }
 0x5fb   :  { %v4219_v26 = vsel %vm4218_vm13, %v4211_v52, %v4215_v15  ;;  %v4233_v2 = vsel %vm4218_vm13, %v4215_v15, %v16295_v13  ;;  %v2281_v8 = vsel %vm92_vm7, %v2269_v39, %v13346_v49  ;;  %v2283_v35 = vsel %vm92_vm7, %v13333_v22, %v2269_v39  ;;  %v16299_v22 = vld [vmem:[#allocation62_spill] sm:$0xff] }
 0x5fc   :  { %v13743_v32 = vmul.f32 %v13690_v4, %v4219_v26  ;;  %v13746_v63 = vmul.f32 %v13694_v18, %v4233_v2  ;;  %v2345_v44 = vmul.f32 %v16296_v47, %v2283_v35  ;;  %v2346_v45 = vmul.f32 %v16297_v48, %v2281_v8  ;;  %v16302_v2 = vld [vmem:[#allocation93_spill] sm:$0xff] }
 0x5fd   :  { %v13756_v52 = vrot.slane %v16298_v59, %v16237_v7  ;;  %v13775_v39 = vrot.slane %v16298_v59, %v16242_v46  ;;  %v13779_v26 = vrot.slane %v16298_v59, %v16243_v56 }
 0x5fe   :  { %v13750_v29 = vpack.c.bf16 %v2345_v44, %v2344_v1  ;;  %v13752_v50 = vpack.c.bf16 %v2347_v19, %v2346_v45  ;;  %v4041_v31 = vpop.permute.xlu0 %4040  ;;  %v4541_v49 = vpop.permute.xlu1 %4540  ;;  %v13771_v1 = vrot.slane %v16298_v59, %v16240_v11 }
 0x5ff   :  { %v4554_v54 = vsel %vm4550_vm11, %v4541_v49, %v16299_v22  ;;  %v4556_v51 = vsel %vm4550_vm11, %v16300_v34, %v4541_v49  ;;  %v4057_v61 = vsel %vm4052_vm14, %v16301_v23, %v4041_v31  ;;  %v16304_v34 = vld [vmem:[#allocation52_spill] sm:$0xff] }
 0x600   :  { %v4624_v0 = vmul.f32 %v13480_v6, %v4556_v51  ;;  %v4625_v62 = vmul.f32 %v13490_v58, %v4554_v54  ;;  %v13782_v13 = vmul.f32 %v13756_v52, %v4057_v61 }
 0x602   :  { %v4045_v19 = vpop.permute.xlu0 %4044  ;;  %v4549_v15 = vpop.permute.xlu1 %4548  ;;  %v13798_v48 = vpack.c.bf16 %v4624_v0, %v13514_v24  ;;  %v13801_v45 = vpack.c.bf16 %v4625_v62, %v13517_v41 }
 0x603   :  { %v4055_v6 = vsel %vm4052_vm14, %v4041_v31, %v4045_v19  ;;  %v4552_v58 = vsel %vm4550_vm11, %v16299_v22, %v4549_v15  ;;  %v4566_v8 = vsel %vm4550_vm11, %v4549_v15, %v16302_v2  ;;  %v16303_v22 = vld [vmem:[#allocation103_spill] sm:$0xff] }
 0x604   :  { %v13793_v35 = vmul.f32 %v13771_v1, %v4055_v6  ;;  %v4626_v47 = vmul.f32 %v13499_v17, %v4552_v58  ;;  %v4627_v44 = vmul.f32 %v13511_v42, %v4566_v8  ;;  %v16305_v42 = vld [vmem:[#allocation115_spill] sm:$0xff]  ;;  %v16306_v6 = vld [vmem:[#allocation78_spill] sm:$0xff] }
 0x605   :  { %v13830_v58 = vrot.slane %v16306_v6, %v16237_v7  ;;  %v16307_v8 = vld [vmem:[#allocation95_spill] sm:$0xff] }
 0x606   :  { %v4049_v31 = vpop.permute.xlu0 %4048  ;;  %v4375_v49 = vpop.permute.xlu1 %4374  ;;  %v13823_v0 = vpack.c.bf16 %v4626_v47, %v13544_v38  ;;  %v13826_v62 = vpack.c.bf16 %v4627_v44, %v13547_v33  ;;  %v13840_v38 = vrot.slane %v16306_v6, %v16240_v11  ;;  %v16308_v33 = vld [vmem:[#allocation54_spill] sm:$0xff] }
 0x607   :  { %v4053_v59 = vsel %vm4052_vm14, %v4045_v19, %v4049_v31  ;;  %v4067_v54 = vsel %vm4052_vm14, %v4049_v31, %v16303_v22  ;;  %v4388_v17 = vsel %vm4384_vm12, %v4375_v49, %v16304_v34  ;;  %v4390_v24 = vsel %vm4384_vm12, %v16305_v42, %v4375_v49 }
 0x608   :  { %v13815_v41 = vmul.f32 %v13775_v39, %v4053_v59  ;;  %v13818_v51 = vmul.f32 %v13779_v26, %v4067_v54  ;;  %v4458_v23 = vmul.f32 %v13574_v5, %v4390_v24  ;;  %v4459_v61 = vmul.f32 %v13580_v27, %v4388_v17  ;;  %v16310_v17 = vld [vmem:[#allocation39_spill] sm:$0xff] }
 0x609   :  { %v13855_v54 = vrot.slane %v16306_v6, %v16242_v46 }
 0x60a   :  { %v3875_v19 = vpop.permute.xlu0 %3874  ;;  %v4383_v15 = vpop.permute.xlu1 %4382  ;;  %v13848_v31 = vpack.c.bf16 %v4458_v23, %v13614_v43  ;;  %v13851_v49 = vpack.c.bf16 %v4459_v61, %v13617_v37  ;;  %v16309_v43 = vld [vmem:[#allocation97_spill] sm:$0xff] }
 0x60b   :  { %v4386_v2 = vsel %vm4384_vm12, %v16304_v34, %v4383_v15  ;;  %v4400_v5 = vsel %vm4384_vm12, %v4383_v15, %v16307_v8  ;;  %v3891_v27 = vsel %vm3886_vm15, %v16308_v33, %v3875_v19  ;;  %v13859_v34 = vrot.slane %v16306_v6, %v16243_v56 }
 0x60c   :  { %v4460_v47 = vmul.f32 %v13587_v60, %v4386_v2  ;;  %v4461_v44 = vmul.f32 %v13591_v28, %v4400_v5  ;;  %v13862_v60 = vmul.f32 %v13830_v58, %v3891_v27  ;;  %v16311_v5 = vld [vmem:[#allocation30_spill] sm:$0xff] }
 0x60e   :  { %v3879_v59 = vpop.permute.xlu0 %3878  ;;  %v4209_v22 = vpop.permute.xlu1 %4208  ;;  %v13878_v15 = vpack.c.bf16 %v4460_v47, %v13639_v36 }
 0x60f   :  { %v3889_v28 = vsel %vm3886_vm15, %v3875_v19, %v3879_v59  ;;  %v4222_v37 = vsel %vm4218_vm13, %v4209_v22, %v16309_v43  ;;  %v4224_v42 = vsel %vm4218_vm13, %v16310_v17, %v4209_v22  ;;  %v13881_v19 = vpack.c.bf16 %v4461_v44, %v13642_v25 }
 0x610   :  { %v13873_v24 = vmul.f32 %v13840_v38, %v3889_v28  ;;  %v4292_v23 = vmul.f32 %v13656_v14, %v4224_v42  ;;  %v4293_v61 = vmul.f32 %v13678_v9, %v4222_v37  ;;  %v16312_v9 = vld [vmem:[#allocation100_spill] sm:$0xff]  ;;  %v16313_v37 = vld [vmem:[#allocation58_spill] sm:$0xff] }
 0x611   :  { %v3761_v17 = vrot.slane %v16313_v37, %v16237_v7  ;;  %v16314_v42 = vld [vmem:[#allocation44_spill] sm:$0xff] }
 0x612   :  { %v3883_v6 = vpop.permute.xlu0 %3882  ;;  %v4217_v2 = vpop.permute.xlu1 %4216  ;;  %v13906_v22 = vpack.c.bf16 %v4293_v61, %v13721_v40 }
 0x613   :  { %v3887_v8 = vsel %vm3886_vm15, %v3879_v59, %v3883_v6  ;;  %v3901_v33 = vsel %vm3886_vm15, %v3883_v6, %v16311_v5  ;;  %v4220_v14 = vsel %vm4218_vm13, %v16309_v43, %v4217_v2  ;;  %v4234_v36 = vsel %vm4218_vm13, %v4217_v2, %v16312_v9  ;;  %v16315_v2 = vld [vmem:[#allocation117_spill] sm:$0xff] }
 0x614   :  { %v13895_v25 = vmul.f32 %v13855_v54, %v3887_v8  ;;  %v13898_v27 = vmul.f32 %v13859_v34, %v3901_v33  ;;  %v4294_v47 = vmul.f32 %v13690_v4, %v4220_v14  ;;  %v4295_v44 = vmul.f32 %v13694_v18, %v4234_v36 }
 0x615   :  { %v13903_v59 = vpack.c.bf16 %v4292_v23, %v13718_v30  ;;  %v3765_v18 = vrot.slane %v16313_v37, %v16240_v11  ;;  %v16316_v30 = vld [vmem:[#allocation75_spill] sm:$0xff]  ;;  %v3769_v9 = vrot.slane %v16313_v37, %v16242_v46  ;;  %v3773_v36 = vrot.slane %v16313_v37, %v16243_v56 }
 0x616   :  { %v3716_v28 = vpop.permute.xlu0 %3715  ;;  %v4043_v43 = vpop.permute.xlu1 %4042  ;;  %v13924_v8 = vpack.c.bf16 %v4294_v47, %v13743_v32  ;;  %v13927_v5 = vpack.c.bf16 %v4295_v44, %v13746_v63 }
 0x617   :  { %v4056_v6 = vsel %vm4052_vm14, %v4043_v43, %v16314_v42  ;;  %v4058_v4 = vsel %vm4052_vm14, %v16315_v2, %v4043_v43  ;;  %v3731_v40 = vsel %vm738_vm8, %v16316_v30, %v3716_v28  ;;  %v16318_v30 = vld [vmem:[#allocation64_spill] sm:$0xff] }
 0x618   :  { %v4126_v23 = vmul.f32 %v13756_v52, %v4058_v4  ;;  %v4127_v61 = vmul.f32 %v13771_v1, %v4056_v6  ;;  %v3786_v43 = vmul.f32 %v3761_v17, %v3731_v40  ;;  %v16317_v1 = vld [vmem:[#allocation104_spill] sm:$0xff] }
 0x61a   :  { %v3720_v33 = vpop.permute.xlu0 %3719  ;;  %v4051_v14 = vpop.permute.xlu1 %4050  ;;  %v13944_v2 = vpack.c.bf16 %v4126_v23, %v13782_v13  ;;  %v13947_v37 = vpack.c.bf16 %v4127_v61, %v13793_v35 }
 0x61b   :  { %v3729_v52 = vsel %vm738_vm8, %v3716_v28, %v3720_v33  ;;  %v4054_v32 = vsel %vm4052_vm14, %v16314_v42, %v4051_v14  ;;  %v4068_v63 = vsel %vm4052_vm14, %v4051_v14, %v16317_v1  ;;  %v16319_v14 = vld [vmem:[#allocation36_spill] sm:$0xff] }
 0x61c   :  { %v3787_v47 = vmul.f32 %v3765_v18, %v3729_v52  ;;  %v4128_v44 = vmul.f32 %v13775_v39, %v4054_v32  ;;  %v4129_v6 = vmul.f32 %v13779_v26, %v4068_v63  ;;  %v16320_v26 = vld [vmem:[#allocation76_spill] sm:$0xff] }
 0x61e   :  { %v3724_v28 = vpop.permute.xlu0 %3723  ;;  %v3877_v4 = vpop.permute.xlu1 %3876  ;;  %v13966_v32 = vpack.c.bf16 %v4129_v6, %v13818_v51 }
 0x61f   :  { %v3727_v42 = vsel %vm738_vm8, %v3720_v33, %v3724_v28  ;;  %v3735_v40 = vsel %vm738_vm8, %v3724_v28, %v16318_v30  ;;  %v3890_v39 = vsel %vm3886_vm15, %v3877_v4, %v16319_v14  ;;  %v3892_v13 = vsel %vm3886_vm15, %v16320_v26, %v3877_v4  ;;  %v16322_v28 = vld [vmem:[#allocation6_spill] sm:$0xff] }
 0x620   :  { %v3788_v23 = vmul.f32 %v3769_v9, %v3727_v42  ;;  %v3789_v35 = vmul.f32 %v3773_v36, %v3735_v40  ;;  %v3960_v61 = vmul.f32 %v13830_v58, %v3892_v13  ;;  %v3961_v52 = vmul.f32 %v13840_v38, %v3890_v39  ;;  %v16323_v42 = vld [vmem:[#allocation79_spill] sm:$0xff]  ;;  %v16324_v38 = vld [vmem:[#allocation74_spill] sm:$0xff] }
 0x621   :  { %v13963_v33 = vpack.c.bf16 %v4128_v44, %v13815_v41  ;;  %v3618_v30 = vrot.slane %v16322_v28, %v16237_v7  ;;  %v3622_v41 = vrot.slane %v16322_v28, %v16240_v11  ;;  %v3626_v13 = vrot.slane %v16322_v28, %v16242_v46 }
 0x622   :  { %v3573_v1 = vpop.permute.xlu0 %3572  ;;  %v3885_v63 = vpop.permute.xlu1 %3884  ;;  %v13984_v40 = vpack.c.bf16 %v3960_v61, %v13862_v60  ;;  %v16328_v60 = vld [vmem:[#allocation37_spill] sm:$0xff] }
 0x623   :  { %16321 = vst [vmem:[#allocation105_spill] sm:$0xff] %v13963_v33  ;;  %v3888_v4 = vsel %vm3886_vm15, %v16319_v14, %v3885_v63  ;;  %v3902_v58 = vsel %vm3886_vm15, %v3885_v63, %v16323_v42  ;;  %v3588_v51 = vsel %vm654_vm0, %v16324_v38, %v3573_v1  ;;  %v13987_v14 = vpack.c.bf16 %v3961_v52, %v13873_v24 }
 0x624   :  { %v3962_v44 = vmul.f32 %v13855_v54, %v3888_v4  ;;  %v3963_v6 = vmul.f32 %v13859_v34, %v3902_v58  ;;  %16325 = vst [vmem:[#allocation106_spill] sm:$0xff] %v13984_v40  ;;  %v3630_v63 = vrot.slane %v16322_v28, %v16243_v56  ;;  %v3643_v42 = vmul.f32 %v3618_v30, %v3588_v51  ;;  %v16327_v4 = vld [vmem:[#allocation59_spill] sm:$0xff] }
 0x625   :  { %16326 = vst [vmem:[#allocation88_spill] sm:$0xff] %v13987_v14  ;;  %v16331_v14 = vld [vmem:[#allocation7_spill] sm:$0xff] }
 0x626   :  { %v3577_v39 = vpop.permute.xlu0 %3576  ;;  %v3718_v26 = vpop.permute.xlu1 %3717  ;;  %v14002_v38 = vpack.c.bf16 %v3962_v44, %v13895_v25  ;;  %v14005_v28 = vpack.c.bf16 %v3963_v6, %v13898_v27 }
 0x627   :  { %v3586_v54 = vsel %vm654_vm0, %v3573_v1, %v3577_v39  ;;  %v3730_v34 = vsel %vm738_vm8, %v3718_v26, %v16327_v4  ;;  %v3732_v24 = vsel %vm738_vm8, %v16328_v60, %v3718_v26 }
 0x628   :  { %v3644_v61 = vmul.f32 %v3622_v41, %v3586_v54  ;;  %v3794_v52 = vmul.f32 %v3761_v17, %v3732_v24  ;;  %v3795_v58 = vmul.f32 %v3765_v18, %v3730_v34  ;;  %16329 = vst [vmem:[#allocation40_spill] sm:$0xff] %v14002_v38  ;;  %16330 = vst [vmem:[#allocation14_spill] sm:$0xff] %v14005_v28  ;;  %v16332_v18 = vld [vmem:[#allocation63_spill] sm:$0xff]  ;;  %v16337_v38 = vld [vmem:[#allocation96_spill] sm:$0xff] }
 0x62a   :  { %v3581_v51 = vpop.permute.xlu0 %3580  ;;  %v3726_v40 = vpop.permute.xlu1 %3725  ;;  %v14018_v54 = vpack.c.bf16 %v3794_v52, %v3786_v43  ;;  %v14020_v34 = vpack.c.bf16 %v3795_v58, %v3787_v47 }
 0x62b   :  { %v3584_v1 = vsel %vm654_vm0, %v3577_v39, %v3581_v51  ;;  %v3592_v33 = vsel %vm654_vm0, %v3581_v51, %v16331_v14  ;;  %v3728_v17 = vsel %vm738_vm8, %v16327_v4, %v3726_v40  ;;  %v3736_v25 = vsel %vm738_vm8, %v3726_v40, %v16332_v18  ;;  %v16335_v14 = vld [vmem:[#allocation10_spill] sm:$0xff] }
 0x62c   :  { %v3645_v44 = vmul.f32 %v3626_v13, %v3584_v1  ;;  %v3646_v27 = vmul.f32 %v3630_v63, %v3592_v33  ;;  %v3796_v6 = vmul.f32 %v3769_v9, %v3728_v17  ;;  %v3797_v26 = vmul.f32 %v3773_v36, %v3736_v25  ;;  %16333 = vst [vmem:[#allocation68_spill] sm:$0xff] %v14018_v54  ;;  %v16336_v51 = vld [vmem:[#allocation98_spill] sm:$0xff]  ;;  %v16338_v36 = vld [vmem:[#allocation27_spill] sm:$0xff] }
 0x62d   :  { %16334 = vst [vmem:[#allocation67_spill] sm:$0xff] %v14020_v34  ;;  %v3475_v24 = vrot.slane %v16335_v14, %v16237_v7  ;;  %v3479_v9 = vrot.slane %v16335_v14, %v16240_v11  ;;  %v3483_v17 = vrot.slane %v16335_v14, %v16242_v46 }
 0x62e   :  { %v3430_v39 = vpop.permute.xlu0 %3429  ;;  %v3575_v60 = vpop.permute.xlu1 %3574  ;;  %v14035_v52 = vpack.c.bf16 %v3796_v6, %v3788_v23  ;;  %v14037_v7 = vpack.c.bf16 %v3797_v26, %v3789_v35  ;;  %v16341_v23 = vld [vmem:[#allocation9_spill] sm:$0xff] }
 0x62f   :  { %v3587_v4 = vsel %vm654_vm0, %v3575_v60, %v16336_v51  ;;  %v3589_v40 = vsel %vm654_vm0, %v16337_v38, %v3575_v60  ;;  %v3445_v43 = vsel %vm570_vm2, %v16338_v36, %v3430_v39  ;;  %v3487_v38 = vrot.slane %v16335_v14, %v16243_v56  ;;  %v16344_v14 = vld [vmem:[#allocation12_spill] sm:$0xff] }
 0x630   :  { %v3651_v47 = vmul.f32 %v3618_v30, %v3589_v40  ;;  %v3652_v33 = vmul.f32 %v3622_v41, %v3587_v4  ;;  %16339 = vst [vmem:[#allocation18_spill] sm:$0xff] %v14035_v52  ;;  %16340 = vst [vmem:[#allocation66_spill] sm:$0xff] %v14037_v7  ;;  %v3500_v18 = vmul.f32 %v3475_v24, %v3445_v43  ;;  %v16345_v4 = vld [vmem:[#allocation51_spill] sm:$0xff]  ;;  %v16346_v36 = vld [vmem:[#allocation60_spill] sm:$0xff] }
 0x632   :  { %v3434_v58 = vpop.permute.xlu0 %3433  ;;  %v3583_v1 = vpop.permute.xlu1 %3582  ;;  %v14051_v26 = vpack.c.bf16 %v3651_v47, %v3643_v42  ;;  %v14053_v46 = vpack.c.bf16 %v3652_v33, %v3644_v61 }
 0x633   :  { %v3443_v11 = vsel %vm570_vm2, %v3430_v39, %v3434_v58  ;;  %v3585_v30 = vsel %vm654_vm0, %v16336_v51, %v3583_v1  ;;  %v3593_v35 = vsel %vm654_vm0, %v3583_v1, %v16341_v23 }
 0x634   :  { %v3501_v41 = vmul.f32 %v3479_v9, %v3443_v11  ;;  %v3653_v25 = vmul.f32 %v3626_v13, %v3585_v30  ;;  %v3654_v6 = vmul.f32 %v3630_v63, %v3593_v35  ;;  %16342 = vst [vmem:[#allocation16_spill] sm:$0xff] %v14051_v26  ;;  %16343 = vst [vmem:[#allocation65_spill] sm:$0xff] %v14053_v46  ;;  %v16349_v11 = vld [vmem:[#allocation11_spill] sm:$0xff] }
 0x636   :  { %v3438_v56 = vpop.permute.xlu0 %3437  ;;  %v3432_v60 = vpop.permute.xlu1 %3431  ;;  %v14066_v47 = vpack.c.bf16 %v3653_v25, %v3645_v44  ;;  %v14068_v33 = vpack.c.bf16 %v3654_v6, %v3646_v27 }
 0x637   :  { %v3441_v39 = vsel %vm570_vm2, %v3434_v58, %v3438_v56  ;;  %v3449_v51 = vsel %vm570_vm2, %v3438_v56, %v16344_v14  ;;  %v3444_v40 = vsel %vm570_vm2, %v3432_v60, %v16345_v4  ;;  %v3446_v13 = vsel %vm570_vm2, %v16346_v36, %v3432_v60 }
 0x638   :  { %v3502_v63 = vmul.f32 %v3483_v17, %v3441_v39  ;;  %v3503_v42 = vmul.f32 %v3487_v38, %v3449_v51  ;;  %v3508_v61 = vmul.f32 %v3475_v24, %v3446_v13  ;;  %v3509_v43 = vmul.f32 %v3479_v9, %v3444_v40  ;;  %16347 = vst [vmem:[#allocation17_spill] sm:$0xff] %v14066_v47  ;;  %v16354_v13 = vld [vmem:[#allocation26_spill] sm:$0xff] }
 0x639   :  { %16348 = vst [vmem:[#allocation25_spill] sm:$0xff] %v14068_v33 }
 0x63a   :  { %v3440_v58 = vpop.permute.xlu1 %3439  ;;  %v14076_v56 = vpack.c.bf16 %v3508_v61, %v3500_v18  ;;  %v14078_v60 = vpack.c.bf16 %v3509_v43, %v3501_v41  ;;  %v10096_v18 = vld [vmem:[#allocation2 + $0x1d0] sm:$0xff]  ;;  %v16355_v41 = vld [vmem:[#allocation43_spill] sm:$0xff] }
 0x63b   :  { %v3442_v1 = vsel %vm570_vm2, %v16345_v4, %v3440_v58  ;;  %v3450_v30 = vsel %vm570_vm2, %v3440_v58, %v16349_v11  ;;  %v16356_v61 = vpack.c.bf16 %v16354_v13, %v16355_v41  ;;  %v16357_v43 = vld [vmem:[#allocation32_spill] sm:$0xff]  ;;  %v16358_v58 = vld [vmem:[#allocation101_spill] sm:$0xff]  ;;  %v16365_v13 = vld [vmem:[#allocation91_spill] sm:$0xff] }
 0x63c   :  { %v3510_v23 = vmul.f32 %v3483_v17, %v3442_v1  ;;  %v3511_v35 = vmul.f32 %v3487_v38, %v3450_v30  ;;  %16350 = vst [vmem:[#allocation23_spill] sm:$0xff] %v14076_v56  ;;  %16351 = vst [vmem:[#allocation15_spill] sm:$0xff] %v14078_v60  ;;  %v16359_v1 = vpack.c.bf16 %v16357_v43, %v16358_v58  ;;  %v5538_v30 = vld [vmem:[#allocation2 + $0x190] sm:$0xff]  ;;  %v5527_v43 = vld [vmem:[#allocation2 + $0xd8] sm:$0xff] }
 0x63e   :  { %v14080_v24 = vpack.c.bf16 %v3510_v23, %v3502_v63  ;;  %v14082_v44 = vpack.c.bf16 %v3511_v35, %v3503_v42  ;;  %v14087_v63 = vcombine.low %v10096_v18, %v16356_v61  ;;  %v10097_v42 = vld [vmem:[#allocation2 + $0x1d8] sm:$0xff]  ;;  %v16360_v35 = vld [vmem:[#allocation102_spill] sm:$0xff] }
 0x63f   :  { %v14092_v11 = vcombine.low %v10097_v42, %v16359_v1  ;;  %v5539_v23 = vld [vmem:[#allocation2 + $0x198] sm:$0xff]  ;;  %v16364_v18 = vld [vmem:[#allocation86_spill] sm:$0xff]  ;;  %v5526_v42 = vld [vmem:[#allocation2 + $0xd0] sm:$0xff]  ;;  %v14137_v1 = vcombine.high %v5527_v43, %v13664_v53 }
 0x640   :  { %16352 = vst [vmem:[#allocation24_spill] sm:$0xff] %v14080_v24  ;;  %16353 = vst [vmem:[#allocation82_spill] sm:$0xff] %v14082_v44  ;;  %v14134_v58 = vcombine.high %v5526_v42, %v13662_v20 }
 0x651   :  { %v5114_v27 = vpop.f32.mrf.mxu0  ;;  %v5157_v9 = vpop.f32.mrf.mxu1 }
 0x653   :  { %v5116_v25 = vpop.f32.mrf.mxu0  ;;  %v5159_v6 = vpop.f32.mrf.mxu1 }
 0x655   :  { %v5118_v39 = vpop.f32.mrf.mxu0  ;;  %v5161_v14 = vpop.f32.mrf.mxu1 }
 0x656   :  { %v5230_v17 = vpack.c.bf16 %v5118_v39, %v5114_v27  ;;  %v5232_v38 = vpack.c.bf16 %v5161_v14, %v5157_v9  ;;  %v14095_v27 = vcombine.high %v5538_v30, %v16360_v35  ;;  %v16361_v9 = vld [vmem:[#allocation89_spill] sm:$0xff]  ;;  %v10098_v14 = vld [vmem:[%s15651_s10 + $0x4] ss:$8 sps:$4 sm:$0xff]  }
 0x657   :  { %v5120_v51 = vpop.f32.mrf.mxu0  ;;  %v5163_v4 = vpop.f32.mrf.mxu1  ;;  %v14108_v39 = vcombine.low %v5539_v23, %v16361_v9 }
 0x658   :  { %v5231_v40 = vpack.c.bf16 %v5120_v51, %v5116_v25  ;;  %v5233_v36 = vpack.c.bf16 %v5163_v4, %v5159_v6  ;;  %v14098_v25 = vcombine.high %v5539_v23, %v16361_v9  ;;  %v14105_v6 = vcombine.low %v5538_v30, %v16360_v35  ;;  %v16362_v51 = vld [vmem:[#allocation87_spill] sm:$0xff]  ;;  %v16363_v4 = vld [vmem:[#allocation92_spill] sm:$0xff]  ;;  %v5523_v23 = vld [vmem:[#allocation2 + $0x98] sm:$0xff] }
 0x659   :  { %v5522_v30 = vld [vmem:[#allocation2 + $0x90] sm:$0xff]  ;;  %v14153_v9 = vcombine.high %v5523_v23, %v13703_v10 }
 0x65a   :  { %5458 = vmatprep.mubr.bf16.mxu0 %v5231_v40  ;;  %5499 = vmatprep.mubr.bf16.mxu1 %v5233_v36  ;;  %v5530_v40 = vld [vmem:[#allocation2 + $0x110] sm:$0xff]  ;;  %v5531_v36 = vld [vmem:[#allocation2 + $0x118] sm:$0xff]  ;;  %v14150_v35 = vcombine.high %v5522_v30, %v13701_v3 }
 0x65b   :  { %5459 = vmatmul.mubr.bf16.vlgmr.msra.gmra.mxu0 %v5230_v17  ;;  %5500 = vmatmul.mubr.bf16.vlgmr.msra.gmra.mxu1 %v5232_v38  ;;  %v14118_v17 = vcombine.high %v5530_v40, %v13623_v57  ;;  %v14121_v38 = vcombine.high %v5531_v36, %v13625_v21  ;;  %v14128_v41 = vcombine.low %v5530_v40, %v13623_v57  ;;  %v5519_v40 = vld [vmem:[#allocation2 + $0x58] sm:$0xff] }
 0x65c   :  { %5899 = vmatpush1.bf16.msra.mxu0 %v14087_v63  ;;  %5942 = vmatpush1.bf16.msra.mxu1 %v14092_v11  ;;  %v14131_v61 = vcombine.low %v5531_v36, %v13625_v21  ;;  %v14144_v57 = vcombine.low %v5526_v42, %v13662_v20  ;;  %v14147_v21 = vcombine.low %v5527_v43, %v13664_v53  ;;  %v5514_v43 = vld [vmem:[#allocation2 + $0x10] sm:$0xff] }
 0x65d   :  { %5900 = vmatprep.subr.bf16.mxu0 %v14095_v27  ;;  %5943 = vmatprep.subr.bf16.mxu1 %v14098_v25  ;;  %v14160_v20 = vcombine.low %v5522_v30, %v13701_v3  ;;  %v14163_v53 = vcombine.low %v5523_v23, %v13703_v10  ;;  %v14169_v42 = vcombine.high %v5519_v40, %v13729_v16  ;;  %v5515_v30 = vld [vmem:[#allocation2 + $0x18] sm:$0xff] }
 0x65e   :  { %5930 = vmatprep.mubr.bf16.mxu0 %v10098_v14  ;;  %5973 = vmatprep.mubr.bf16.mxu1 %v10098_v14  ;;  %v5518_v14 = vld [vmem:[#allocation2 + $0x50] sm:$0xff]  ;;  %v14179_v10 = vcombine.low %v5519_v40, %v13729_v16  ;;  %v14182_v23 = vcombine.high %v5514_v43, %v13750_v29  ;;  %v14185_v12 = vcombine.high %v5515_v30, %v13752_v50 }
 0x65f   :  { %v14166_v36 = vcombine.high %v5518_v14, %v13727_v55  ;;  %v14176_v3 = vcombine.low %v5518_v14, %v13727_v55  ;;  %v14192_v55 = vcombine.low %v5514_v43, %v13750_v29  ;;  %v14195_v16 = vcombine.low %v5515_v30, %v13752_v50  ;;  %v16366_v29 = vld [vmem:[#allocation105_spill] sm:$0xff]  ;;  %v16367_v50 = vld [vmem:[#allocation88_spill] sm:$0xff]  ;;  %v16368_v14 = vld [vmem:[#allocation106_spill] sm:$0xff] }
 0x660   :  { %5901 = vmatpush1.bf16.msra.mxu0 %v14105_v6  ;;  %5944 = vmatpush1.bf16.msra.mxu1 %v14108_v39  ;;  %v16369_v40 = vld [vmem:[#allocation40_spill] sm:$0xff]  ;;  %v14234_v43 = vld [vmem:[%s15652_s17 + $0x78] sm:$0xff]  }
 0x661   :  { %5902 = vmatprep.subr.bf16.mxu0 %v16362_v51  ;;  %5945 = vmatprep.subr.bf16.mxu1 %v16363_v4  ;;  %16370 = vst [vmem:[#allocation71_spill] sm:$0xff] %v14234_v43  ;;  %v14240_v30 = vld [vmem:[%s15652_s17 + $0xf8] sm:$0xff]  }
 0x662   :  { %16371 = vst [vmem:[#allocation22_spill] sm:$0xff] %v14240_v30 }
 0x664   :  { %5903 = vmatpush1.bf16.msra.mxu0 %v16364_v18  ;;  %5946 = vmatpush1.bf16.msra.mxu1 %v16365_v13 }
 0x665   :  { %5904 = vmatprep.subr.bf16.mxu0 %v14118_v17  ;;  %5947 = vmatprep.subr.bf16.mxu1 %v14121_v38 }
 0x668   :  { %5905 = vmatpush1.bf16.msra.mxu0 %v14128_v41  ;;  %5948 = vmatpush1.bf16.msra.mxu1 %v14131_v61 }
 0x669   :  { %5906 = vmatprep.subr.bf16.mxu0 %v14134_v58  ;;  %5949 = vmatprep.subr.bf16.mxu1 %v14137_v1 }
 0x66c   :  { %5907 = vmatpush1.bf16.msra.mxu0 %v14144_v57  ;;  %5950 = vmatpush1.bf16.msra.mxu1 %v14147_v21 }
 0x66d   :  { %5908 = vmatprep.subr.bf16.mxu0 %v14150_v35  ;;  %5951 = vmatprep.subr.bf16.mxu1 %v14153_v9 }
 0x670   :  { %5909 = vmatpush1.bf16.msra.mxu0 %v14160_v20  ;;  %5952 = vmatpush1.bf16.msra.mxu1 %v14163_v53 }
 0x671   :  { %5910 = vmatprep.subr.bf16.mxu0 %v14166_v36  ;;  %5953 = vmatprep.subr.bf16.mxu1 %v14169_v42 }
 0x674   :  { %5911 = vmatpush1.bf16.msra.mxu0 %v14176_v3  ;;  %5954 = vmatpush1.bf16.msra.mxu1 %v14179_v10 }
 0x675   :  { %5912 = vmatprep.subr.bf16.mxu0 %v14182_v23  ;;  %5955 = vmatprep.subr.bf16.mxu1 %v14185_v12 }
 0x678   :  { %5913 = vmatpush1.bf16.msra.mxu0 %v14192_v55  ;;  %5956 = vmatpush1.bf16.msra.mxu1 %v14195_v16 }
 0x679   :  { %5914 = vmatprep.subr.bf16.mxu0 %v13801_v45  ;;  %5957 = vmatprep.subr.bf16.mxu1 %v13826_v62 }
 0x67c   :  { %5915 = vmatpush2.bf16.msra.mxu0 %v13798_v48  ;;  %5958 = vmatpush2.bf16.msra.mxu1 %v13823_v0 }
 0x67d   :  { %5916 = vmatprep.subr.bf16.mxu0 %v13851_v49  ;;  %5959 = vmatprep.subr.bf16.mxu1 %v13881_v19 }
 0x680   :  { %5917 = vmatpush2.bf16.msra.mxu0 %v13848_v31  ;;  %5960 = vmatpush2.bf16.msra.mxu1 %v13878_v15 }
 0x681   :  { %5918 = vmatprep.subr.bf16.mxu0 %v13906_v22  ;;  %5961 = vmatprep.subr.bf16.mxu1 %v13927_v5 }
 0x684   :  { %5919 = vmatpush2.bf16.msra.mxu0 %v13903_v59  ;;  %5962 = vmatpush2.bf16.msra.mxu1 %v13924_v8 }
 0x685   :  { %5920 = vmatprep.subr.bf16.mxu0 %v13947_v37  ;;  %5963 = vmatprep.subr.bf16.mxu1 %v13966_v32 }
 0x688   :  { %5921 = vmatpush2.bf16.msra.mxu0 %v13944_v2  ;;  %5964 = vmatpush2.bf16.msra.mxu1 %v16366_v29 }
 0x689   :  { %5922 = vmatprep.subr.bf16.mxu0 %v16367_v50  ;;  %5965 = vmatprep.subr.bf16.mxu1 %v14005_v28 }
 0x68c   :  { %5923 = vmatpush2.bf16.msra.mxu0 %v16368_v14  ;;  %5966 = vmatpush2.bf16.msra.mxu1 %v16369_v40 }
 0x68d   :  { %5924 = vmatprep.subr.bf16.mxu0 %v14020_v34  ;;  %5967 = vmatprep.subr.bf16.mxu1 %v14037_v7 }
 0x690   :  { %5925 = vmatpush2.bf16.msra.mxu0 %v14018_v54  ;;  %5968 = vmatpush2.bf16.msra.mxu1 %v14035_v52 }
 0x691   :  { %5926 = vmatprep.subr.bf16.mxu0 %v14053_v46  ;;  %5969 = vmatprep.subr.bf16.mxu1 %v14068_v33 }
 0x694   :  { %5927 = vmatpush2.bf16.msra.mxu0 %v14051_v26  ;;  %5970 = vmatpush2.bf16.msra.mxu1 %v14066_v47 }
 0x695   :  { %5928 = vmatprep.subr.bf16.mxu0 %v14078_v60  ;;  %5971 = vmatprep.subr.bf16.mxu1 %v14082_v44  ;;  %v16403_v44 = vld [vmem:[#allocation84_spill] sm:$0xff] }
 0x698   :  { %5929 = vmatpush2.bf16.msra.mxu0 %v14076_v56  ;;  %5972 = vmatpush2.bf16.msra.mxu1 %v14080_v24  ;;  %v10101_v56 = vld [vmem:[%s15651_s10] ss:$8 sps:$4 sm:$0xff]   ;;  %v14249_v24 = vld [vmem:[%s15652_s17 + $0x38] sm:$0xff]   ;;  %s10313_s10 = smov 9  }
 0x699   :  { %9698 = vmatprep.subr.bf16.mxu0 %v14234_v43  ;;  %9720 = vmatprep.subr.bf16.mxu1 %v14240_v30  ;;  %16372 = vst [vmem:[#allocation83_spill] sm:$0xff] %v14249_v24  ;;  %v14255_v43 = vld [vmem:[%s15652_s17 + $0xb8] sm:$0xff]   ;;  %v14261_v30 = vld [vmem:[%s15652_s17 + $0x70] sm:$0xff]  }
 0x69a   :  { %16373 = vst [vmem:[#allocation107_spill] sm:$0xff] %v14255_v43  ;;  %16374 = vst [vmem:[#allocation69_spill] sm:$0xff] %v14261_v30 }
 0x69b   :  { %5931 = vmatmul.mubr.bf16.vlgmr.msra.gmra.mxu0 %v10101_v56  ;;  %5974 = vmatmul.mubr.bf16.vlgmr.msra.gmra.mxu1 %v10101_v56  ;;  %v14267_v56 = vld [vmem:[%s15652_s17 + $0xf0] sm:$0xff]  }
 0x69c   :  { %9699 = vmatpush3.bf16.msra.mxu0 %v14249_v24  ;;  %9721 = vmatpush3.bf16.msra.mxu1 %v14255_v43  ;;  %16375 = vst [vmem:[#allocation85_spill] sm:$0xff] %v14267_v56  ;;  %v14273_v24 = vld [vmem:[%s15652_s17 + $0x30] sm:$0xff]  }
 0x69d   :  { %9700 = vmatprep.subr.bf16.mxu0 %v14261_v30  ;;  %9722 = vmatprep.subr.bf16.mxu1 %v14267_v56  ;;  %16376 = vst [vmem:[#allocation70_spill] sm:$0xff] %v14273_v24  ;;  %v14279_v43 = vld [vmem:[%s15652_s17 + $0xb0] sm:$0xff]   ;;  %v14285_v30 = vld [vmem:[%s15652_s17 + $0x68] sm:$0xff]  }
 0x69e   :  { %16377 = vst [vmem:[#allocation21_spill] sm:$0xff] %v14279_v43  ;;  %16378 = vst [vmem:[#allocation28_spill] sm:$0xff] %v14285_v30  ;;  %v14291_v56 = vld [vmem:[%s15652_s17 + $0xe8] sm:$0xff]  }
 0x69f   :  { %16379 = vst [vmem:[#allocation20_spill] sm:$0xff] %v14291_v56 }
 0x6a0   :  { %9701 = vmatpush3.bf16.msra.mxu0 %v14273_v24  ;;  %9723 = vmatpush3.bf16.msra.mxu1 %v14279_v43  ;;  %v14297_v24 = vld [vmem:[%s15652_s17 + $0x28] sm:$0xff]  }
 0x6a1   :  { %9702 = vmatprep.subr.bf16.mxu0 %v14285_v30  ;;  %9724 = vmatprep.subr.bf16.mxu1 %v14291_v56  ;;  %16380 = vst [vmem:[#allocation38_spill] sm:$0xff] %v14297_v24  ;;  %v14303_v43 = vld [vmem:[%s15652_s17 + $0xa8] sm:$0xff]   ;;  %v14309_v30 = vld [vmem:[%s15652_s17 + $0x60] sm:$0xff]  }
 0x6a2   :  { %16381 = vst [vmem:[#allocation35_spill] sm:$0xff] %v14303_v43  ;;  %16382 = vst [vmem:[#allocation116_spill] sm:$0xff] %v14309_v30  ;;  %v14315_v56 = vld [vmem:[%s15652_s17 + $0xe0] sm:$0xff]  }
 0x6a3   :  { %16383 = vst [vmem:[#allocation77_spill] sm:$0xff] %v14315_v56 }
 0x6a4   :  { %9703 = vmatpush3.bf16.msra.mxu0 %v14297_v24  ;;  %9725 = vmatpush3.bf16.msra.mxu1 %v14303_v43  ;;  %v14321_v24 = vld [vmem:[%s15652_s17 + $0x20] sm:$0xff]  }
 0x6a5   :  { %9704 = vmatprep.subr.bf16.mxu0 %v14309_v30  ;;  %9726 = vmatprep.subr.bf16.mxu1 %v14315_v56  ;;  %16384 = vst [vmem:[#allocation80_spill] sm:$0xff] %v14321_v24  ;;  %v14327_v43 = vld [vmem:[%s15652_s17 + $0xa0] sm:$0xff]   ;;  %v14333_v30 = vld [vmem:[%s15652_s17 + $0x58] sm:$0xff]  }
 0x6a6   :  { %16385 = vst [vmem:[#allocation46_spill] sm:$0xff] %v14327_v43  ;;  %16386 = vst [vmem:[#allocation45_spill] sm:$0xff] %v14333_v30  ;;  %v14339_v56 = vld [vmem:[%s15652_s17 + $0xd8] sm:$0xff]  }
 0x6a7   :  { %16387 = vst [vmem:[#allocation42_spill] sm:$0xff] %v14339_v56 }
 0x6a8   :  { %9705 = vmatpush3.bf16.msra.mxu0 %v14321_v24  ;;  %9727 = vmatpush3.bf16.msra.mxu1 %v14327_v43  ;;  %v14345_v24 = vld [vmem:[%s15652_s17 + $0x18] sm:$0xff]  }
 0x6a9   :  { %9706 = vmatprep.subr.bf16.mxu0 %v14333_v30  ;;  %9728 = vmatprep.subr.bf16.mxu1 %v14339_v56  ;;  %16388 = vst [vmem:[#allocation47_spill] sm:$0xff] %v14345_v24  ;;  %v14351_v43 = vld [vmem:[%s15652_s17 + $0x98] sm:$0xff]   ;;  %v14357_v30 = vld [vmem:[%s15652_s17 + $0x50] sm:$0xff]  }
 0x6aa   :  { %16389 = vst [vmem:[#allocation49_spill] sm:$0xff] %v14351_v43  ;;  %16390 = vst [vmem:[#allocation57_spill] sm:$0xff] %v14357_v30  ;;  %v14363_v56 = vld [vmem:[%s15652_s17 + $0xd0] sm:$0xff]  }
 0x6ab   :  { %16391 = vst [vmem:[#allocation29_spill] sm:$0xff] %v14363_v56 }
 0x6ac   :  { %9707 = vmatpush3.bf16.msra.mxu0 %v14345_v24  ;;  %9729 = vmatpush3.bf16.msra.mxu1 %v14351_v43  ;;  %v14369_v24 = vld [vmem:[%s15652_s17 + $0x10] sm:$0xff]  }
 0x6ad   :  { %9708 = vmatprep.subr.bf16.mxu0 %v14357_v30  ;;  %9730 = vmatprep.subr.bf16.mxu1 %v14363_v56  ;;  %16392 = vst [vmem:[#allocation108_spill] sm:$0xff] %v14369_v24  ;;  %v14375_v43 = vld [vmem:[%s15652_s17 + $0x90] sm:$0xff]   ;;  %v14381_v30 = vld [vmem:[%s15652_s17 + $0x48] sm:$0xff]  }
 0x6ae   :  { %16393 = vst [vmem:[#allocation109_spill] sm:$0xff] %v14375_v43  ;;  %16394 = vst [vmem:[#allocation72_spill] sm:$0xff] %v14381_v30  ;;  %v14387_v56 = vld [vmem:[%s15652_s17 + $0xc8] sm:$0xff]  }
 0x6af   :  { %16395 = vst [vmem:[#allocation90_spill] sm:$0xff] %v14387_v56 }
 0x6b0   :  { %9709 = vmatpush3.bf16.msra.mxu0 %v14369_v24  ;;  %9731 = vmatpush3.bf16.msra.mxu1 %v14375_v43  ;;  %v14393_v24 = vld [vmem:[%s15652_s17 + $0x8] sm:$0xff]  }
 0x6b1   :  { %9710 = vmatprep.subr.bf16.mxu0 %v14381_v30  ;;  %9732 = vmatprep.subr.bf16.mxu1 %v14387_v56  ;;  %16396 = vst [vmem:[#allocation110_spill] sm:$0xff] %v14393_v24  ;;  %v14399_v43 = vld [vmem:[%s15652_s17 + $0x88] sm:$0xff]   ;;  %v14405_v30 = vld [vmem:[%s15652_s17 + $0x40] sm:$0xff]  }
 0x6b2   :  { %16397 = vst [vmem:[#allocation34_spill] sm:$0xff] %v14399_v43  ;;  %16398 = vst [vmem:[#allocation31_spill] sm:$0xff] %v14405_v30  ;;  %v14411_v56 = vld [vmem:[%s15652_s17 + $0xc0] sm:$0xff]  }
 0x6b3   :  { %16399 = vst [vmem:[#allocation19_spill] sm:$0xff] %v14411_v56 }
 0x6b4   :  { %9711 = vmatpush3.bf16.msra.mxu0 %v14393_v24  ;;  %9733 = vmatpush3.bf16.msra.mxu1 %v14399_v43  ;;  %v14417_v24 = vld [vmem:[%s15652_s17] sm:$0xff]  }
 0x6b5   :  { %9712 = vmatprep.subr.bf16.mxu0 %v14405_v30  ;;  %9734 = vmatprep.subr.bf16.mxu1 %v14411_v56  ;;  %16400 = vst [vmem:[#allocation111_spill] sm:$0xff] %v14417_v24  ;;  %v14423_v43 = vld [vmem:[%s15652_s17 + $0x80] sm:$0xff]   ;;  %s10306_s17 = smov 118  }
 0x6b6   :  { %16401 = vst [vmem:[#allocation81_spill] sm:$0xff] %v14423_v43  ;;  %v16402_v30 = vld [vmem:[#allocation50_spill] sm:$0xff] }
 0x6b8   :  { %9713 = vmatpush3.bf16.msra.mxu0 %v14417_v24  ;;  %9735 = vmatpush3.bf16.msra.mxu1 %v14423_v43 }
 0x6b9   :  { %6088 = vmatprep.subr.bf16.mxu0 %v16402_v30  ;;  %6131 = vmatprep.subr.bf16.mxu1 %v16403_v44 }
 0x71b   :  { %v9670_v60 = vpop.f32.mrf.mxu0  ;;  %v9692_v56 = vpop.f32.mrf.mxu1 }
 0x71d   :  { %v9671_v47 = vpop.f32.mrf.mxu0  ;;  %v9693_v26 = vpop.f32.mrf.mxu1 }
 0x71e   :  { %v9672_v33 = vadd.f32 %v9671_v47, %v9670_v60  ;;  %v9694_v46 = vadd.f32 %v9693_v26, %v9692_v56  ;;  %v16449_v56 = vld [vmem:[#allocation19_spill] sm:$0xff] }
 0x71f   :  { %v9673_v52 = vpop.f32.mrf.mxu0  ;;  %v9695_v54 = vpop.f32.mrf.mxu1 }
 0x720   :  { %v5502_v24 = vadd.f32 %v9694_v46, %v9672_v33 }
 0x721   :  { %v9674_v7 = vpop.f32.mrf.mxu0  ;;  %v9696_v34 = vpop.f32.mrf.mxu1 }
 0x722   :  { %vm5508_vm1 = vcmp.gt.f32.partialorder %v5502_v24, 0.0  ;;  %v5510_v40 = vmul.f32 0.2, %v5502_v24  ;;  %v9675_v14 = vadd.f32 %v9674_v7, %v9673_v52  ;;  %v9697_v28 = vadd.f32 %v9696_v34, %v9695_v54 }
 0x724   :  { %v14428_v43 = vsel %vm5508_vm1, %v5502_v24, %v5510_v40  ;;  %v5505_v30 = vadd.f32 %v9697_v28, %v9675_v14  ;;  %v10041_v40 = vld [vmem:[%s15653_s5 + $0x4] ss:$8 sps:$4 sm:$0xff]  }
 0x725   :  { %7249 = vrot.lane.b32.xlu0 %v14428_v43, %s10305_s23 }
 0x726   :  { %vm5509_vm5 = vcmp.gt.f32.partialorder %v5505_v30, 0.0  ;;  %v5511_v44 = vmul.f32 0.2, %v5505_v30 }
 0x728   :  { %v14432_v50 = vsel %vm5509_vm5, %v5505_v30, %v5511_v44  ;;  %v16450_v30 = vld [vmem:[#allocation111_spill] sm:$0xff]  ;;  %v16451_v44 = vld [vmem:[#allocation81_spill] sm:$0xff] }
 0x729   :  { %7251 = vrot.lane.b32.xlu1 %v14432_v50, %s10305_s23  ;;  %6717 = vrot.lane.b32.xlu0 %v14428_v43, %s16115_s22 }
 0x72d   :  { %6719 = vrot.lane.b32.xlu1 %v14432_v50, %s16115_s22  ;;  %7183 = vrot.lane.b32.xlu0 %v14428_v43, %s16073_s28 }
 0x731   :  { %7185 = vrot.lane.b32.xlu1 %v14432_v50, %s16073_s28  ;;  %6651 = vrot.lane.b32.xlu0 %v14428_v43, %s16067_s29 }
 0x735   :  { %6653 = vrot.lane.b32.xlu1 %v14432_v50, %s16067_s29  ;;  %7117 = vrot.lane.b32.xlu0 %v14428_v43, %s16110_s12 }
 0x739   :  { %7051 = vrot.lane.b32.xlu0 %v14428_v43, %s16112_s13  ;;  %7119 = vrot.lane.b32.xlu1 %v14432_v50, %s16110_s12 }
 0x73d   :  { %6537 = vrot.lane.b32.xlu0 %v14428_v43, %s16068_s1  ;;  %7053 = vrot.lane.b32.xlu1 %v14432_v50, %s16112_s13 }
 0x741   :  { %6984 = vrot.lane.b32.xlu0 %v14428_v43, %s10306_s17  ;;  %6539 = vrot.lane.b32.xlu1 %v14432_v50, %s16068_s1 }
 0x745   :  { %6470 = vrot.lane.b32.xlu0 %v14428_v43, %s10307_s4  ;;  %6986 = vrot.lane.b32.xlu1 %v14432_v50, %s10306_s17 }
 0x749   :  { %6917 = vrot.lane.b32.xlu0 %v14428_v43, %s10308_s0  ;;  %6472 = vrot.lane.b32.xlu1 %v14432_v50, %s10307_s4 }
 0x74d   :  { %6403 = vrot.lane.b32.xlu0 %v14428_v43, %s10309_s15  ;;  %6919 = vrot.lane.b32.xlu1 %v14432_v50, %s10308_s0 }
 0x751   :  { %6850 = vrot.lane.b32.xlu0 %v14428_v43, %s10310_s19  ;;  %6405 = vrot.lane.b32.xlu1 %v14432_v50, %s10309_s15 }
 0x755   :  { %6336 = vrot.lane.b32.xlu0 %v14428_v43, %s10311_s3  ;;  %6852 = vrot.lane.b32.xlu1 %v14432_v50, %s10310_s19 }
 0x759   :  { %6783 = vrot.lane.b32.xlu0 %v14428_v43, %s10312_s26  ;;  %6338 = vrot.lane.b32.xlu1 %v14432_v50, %s10311_s3 }
 0x75b   :  { %v5932_v28 = vpop.f32.mrf.mxu0  ;;  %v5975_v54 = vpop.f32.mrf.mxu1 }
 0x75d   :  { %v5934_v34 = vpop.f32.mrf.mxu0  ;;  %v5977_v52 = vpop.f32.mrf.mxu1  ;;  %6270 = vrot.lane.b32.xlu0 %v14428_v43, %s10313_s10  ;;  %6785 = vrot.lane.b32.xlu1 %v14432_v50, %s10312_s26 }
 0x75f   :  { %v5936_v7 = vpop.f32.mrf.mxu0  ;;  %v5979_v26 = vpop.f32.mrf.mxu1 }
 0x760   :  { %v5984_v24 = vpack.c.bf16 %v5936_v7, %v5932_v28  ;;  %v5986_v14 = vpack.c.bf16 %v5979_v26, %v5975_v54 }
 0x761   :  { %v5938_v46 = vpop.f32.mrf.mxu0  ;;  %v5981_v47 = vpop.f32.mrf.mxu1  ;;  %6272 = vrot.lane.b32.xlu1 %v14432_v50, %s10313_s10 }
 0x762   :  { %v5985_v33 = vpack.c.bf16 %v5938_v46, %v5934_v34  ;;  %v5987_v60 = vpack.c.bf16 %v5981_v47, %v5977_v52 }
 0x764   :  { %6020 = vmatprep.mubr.bf16.mxu0 %v5985_v33  ;;  %6061 = vmatprep.mubr.bf16.mxu1 %v5987_v60  ;;  %v14595_v60 = vld [vmem:[%s15654_s16 + $0x5] ss:$8 sm:$0x7] }
 0x765   :  { %6021 = vmatmul.mubr.bf16.vlgmr.msra.gmra.mxu0 %v5984_v24  ;;  %6062 = vmatmul.mubr.bf16.vlgmr.msra.gmra.mxu1 %v5986_v14 }
 0x766   :  { %6089 = vmatpush1.bf16.msra.mxu0 %v14087_v63  ;;  %6132 = vmatpush1.bf16.msra.mxu1 %v14092_v11  ;;  %v16419_v63 = vld [vmem:[#allocation24_spill] sm:$0xff]  ;;  %v16420_v11 = vld [vmem:[#allocation71_spill] sm:$0xff] }
 0x767   :  { %6090 = vmatprep.subr.bf16.mxu0 %v14095_v27  ;;  %6133 = vmatprep.subr.bf16.mxu1 %v14098_v25  ;;  %v16421_v27 = vld [vmem:[#allocation22_spill] sm:$0xff]  ;;  %v16422_v25 = vld [vmem:[#allocation83_spill] sm:$0xff] }
 0x768   :  { %6120 = vmatprep.mubr.bf16.mxu0 %v10041_v40  ;;  %6163 = vmatprep.mubr.bf16.mxu1 %v10041_v40  ;;  %v16452_v40 = vld [vmem:[#allocation13_spill] sm:$0xff] }
 0x76a   :  { %6091 = vmatpush1.bf16.msra.mxu0 %v14105_v6  ;;  %6134 = vmatpush1.bf16.msra.mxu1 %v14108_v39  ;;  %v16423_v6 = vld [vmem:[#allocation107_spill] sm:$0xff]  ;;  %v16424_v39 = vld [vmem:[#allocation69_spill] sm:$0xff] }
 0x76b   :  { %6092 = vmatprep.subr.bf16.mxu0 %v16362_v51  ;;  %6135 = vmatprep.subr.bf16.mxu1 %v16363_v4  ;;  %v16425_v51 = vld [vmem:[#allocation85_spill] sm:$0xff]  ;;  %v16426_v4 = vld [vmem:[#allocation70_spill] sm:$0xff] }
 0x76e   :  { %6093 = vmatpush1.bf16.msra.mxu0 %v16364_v18  ;;  %6136 = vmatpush1.bf16.msra.mxu1 %v16365_v13  ;;  %v16429_v18 = vld [vmem:[#allocation20_spill] sm:$0xff]  ;;  %v16430_v13 = vld [vmem:[#allocation38_spill] sm:$0xff] }
 0x76f   :  { %6094 = vmatprep.subr.bf16.mxu0 %v14118_v17  ;;  %6137 = vmatprep.subr.bf16.mxu1 %v14121_v38  ;;  %v16427_v17 = vld [vmem:[#allocation21_spill] sm:$0xff]  ;;  %v16428_v38 = vld [vmem:[#allocation28_spill] sm:$0xff] }
 0x772   :  { %6095 = vmatpush1.bf16.msra.mxu0 %v14128_v41  ;;  %6138 = vmatpush1.bf16.msra.mxu1 %v14131_v61  ;;  %v16431_v41 = vld [vmem:[#allocation35_spill] sm:$0xff]  ;;  %v16432_v61 = vld [vmem:[#allocation116_spill] sm:$0xff] }
 0x773   :  { %6096 = vmatprep.subr.bf16.mxu0 %v14134_v58  ;;  %6139 = vmatprep.subr.bf16.mxu1 %v14137_v1  ;;  %v16433_v58 = vld [vmem:[#allocation77_spill] sm:$0xff]  ;;  %v16434_v1 = vld [vmem:[#allocation80_spill] sm:$0xff] }
 0x776   :  { %6097 = vmatpush1.bf16.msra.mxu0 %v14144_v57  ;;  %6140 = vmatpush1.bf16.msra.mxu1 %v14147_v21  ;;  %v16435_v57 = vld [vmem:[#allocation46_spill] sm:$0xff]  ;;  %v16436_v21 = vld [vmem:[#allocation45_spill] sm:$0xff] }
 0x777   :  { %6098 = vmatprep.subr.bf16.mxu0 %v14150_v35  ;;  %6141 = vmatprep.subr.bf16.mxu1 %v14153_v9  ;;  %v16437_v35 = vld [vmem:[#allocation42_spill] sm:$0xff]  ;;  %v16438_v9 = vld [vmem:[#allocation47_spill] sm:$0xff] }
 0x77a   :  { %6099 = vmatpush1.bf16.msra.mxu0 %v14160_v20  ;;  %6142 = vmatpush1.bf16.msra.mxu1 %v14163_v53  ;;  %v16439_v20 = vld [vmem:[#allocation49_spill] sm:$0xff] }
 0x77b   :  { %6100 = vmatprep.subr.bf16.mxu0 %v14166_v36  ;;  %6143 = vmatprep.subr.bf16.mxu1 %v14169_v42  ;;  %v16440_v53 = vld [vmem:[#allocation57_spill] sm:$0xff]  ;;  %v16442_v42 = vld [vmem:[#allocation108_spill] sm:$0xff] }
 0x77c   :  { %v16441_v36 = vld [vmem:[#allocation29_spill] sm:$0xff] }
 0x77e   :  { %6101 = vmatpush1.bf16.msra.mxu0 %v14176_v3  ;;  %6144 = vmatpush1.bf16.msra.mxu1 %v14179_v10  ;;  %v16443_v3 = vld [vmem:[#allocation109_spill] sm:$0xff]  ;;  %v16444_v10 = vld [vmem:[#allocation72_spill] sm:$0xff] }
 0x77f   :  { %6102 = vmatprep.subr.bf16.mxu0 %v14182_v23  ;;  %6145 = vmatprep.subr.bf16.mxu1 %v14185_v12  ;;  %v16404_v12 = vld [vmem:[#allocation88_spill] sm:$0xff]  ;;  %v16445_v23 = vld [vmem:[#allocation90_spill] sm:$0xff] }
 0x782   :  { %6103 = vmatpush1.bf16.msra.mxu0 %v14192_v55  ;;  %6146 = vmatpush1.bf16.msra.mxu1 %v14195_v16  ;;  %v16446_v55 = vld [vmem:[#allocation110_spill] sm:$0xff] }
 0x783   :  { %6104 = vmatprep.subr.bf16.mxu0 %v13801_v45  ;;  %6147 = vmatprep.subr.bf16.mxu1 %v13826_v62  ;;  %v16406_v45 = vld [vmem:[#allocation106_spill] sm:$0xff]  ;;  %v16408_v62 = vld [vmem:[#allocation67_spill] sm:$0xff] }
 0x784   :  { %v16447_v16 = vld [vmem:[#allocation34_spill] sm:$0xff] }
 0x786   :  { %6105 = vmatpush2.bf16.msra.mxu0 %v13798_v48  ;;  %6148 = vmatpush2.bf16.msra.mxu1 %v13823_v0  ;;  %v16405_v48 = vld [vmem:[#allocation14_spill] sm:$0xff]  ;;  %v16407_v0 = vld [vmem:[#allocation40_spill] sm:$0xff] }
 0x787   :  { %6106 = vmatprep.subr.bf16.mxu0 %v13851_v49  ;;  %6149 = vmatprep.subr.bf16.mxu1 %v13881_v19  ;;  %v16410_v49 = vld [vmem:[#allocation68_spill] sm:$0xff]  ;;  %v16412_v19 = vld [vmem:[#allocation65_spill] sm:$0xff] }
 0x78a   :  { %6107 = vmatpush2.bf16.msra.mxu0 %v13848_v31  ;;  %6150 = vmatpush2.bf16.msra.mxu1 %v13878_v15  ;;  %v16409_v31 = vld [vmem:[#allocation66_spill] sm:$0xff] }
 0x78b   :  { %6108 = vmatprep.subr.bf16.mxu0 %v13906_v22  ;;  %6151 = vmatprep.subr.bf16.mxu1 %v13927_v5  ;;  %v16411_v15 = vld [vmem:[#allocation18_spill] sm:$0xff]  ;;  %v16414_v22 = vld [vmem:[#allocation16_spill] sm:$0xff]  ;;  %v16416_v5 = vld [vmem:[#allocation15_spill] sm:$0xff] }
 0x78e   :  { %6109 = vmatpush2.bf16.msra.mxu0 %v13903_v59  ;;  %6152 = vmatpush2.bf16.msra.mxu1 %v13924_v8  ;;  %v16413_v59 = vld [vmem:[#allocation25_spill] sm:$0xff] }
 0x78f   :  { %6110 = vmatprep.subr.bf16.mxu0 %v13947_v37  ;;  %6153 = vmatprep.subr.bf16.mxu1 %v13966_v32  ;;  %v16415_v8 = vld [vmem:[#allocation17_spill] sm:$0xff]  ;;  %v10039_v37 = vld [vmem:[%s15653_s5] ss:$8 sps:$4 sm:$0xff]   ;;  %s10318_s5 = smov 115  }
 0x790   :  { %v16418_v32 = vld [vmem:[#allocation23_spill] sm:$0xff] }
 0x792   :  { %6111 = vmatpush2.bf16.msra.mxu0 %v13944_v2  ;;  %6154 = vmatpush2.bf16.msra.mxu1 %v16366_v29  ;;  %v16417_v2 = vld [vmem:[#allocation82_spill] sm:$0xff]  ;;  %v16448_v29 = vld [vmem:[#allocation31_spill] sm:$0xff] }
 0x793   :  { %6112 = vmatprep.subr.bf16.mxu0 %v16404_v12  ;;  %6155 = vmatprep.subr.bf16.mxu1 %v16405_v48  ;;  %v6613_v12 = vrot.slane %v14595_v60, %v16452_v40 }
 0x796   :  { %6113 = vmatpush2.bf16.msra.mxu0 %v16406_v45  ;;  %6156 = vmatpush2.bf16.msra.mxu1 %v16407_v0 }
 0x797   :  { %6114 = vmatprep.subr.bf16.mxu0 %v16408_v62  ;;  %6157 = vmatprep.subr.bf16.mxu1 %v16409_v31 }
 0x79a   :  { %6115 = vmatpush2.bf16.msra.mxu0 %v16410_v49  ;;  %6158 = vmatpush2.bf16.msra.mxu1 %v16411_v15 }
 0x79b   :  { %6116 = vmatprep.subr.bf16.mxu0 %v16412_v19  ;;  %6159 = vmatprep.subr.bf16.mxu1 %v16413_v59 }
 0x79e   :  { %6117 = vmatpush2.bf16.msra.mxu0 %v16414_v22  ;;  %6160 = vmatpush2.bf16.msra.mxu1 %v16415_v8 }
 0x79f   :  { %6118 = vmatprep.subr.bf16.mxu0 %v16416_v5  ;;  %6161 = vmatprep.subr.bf16.mxu1 %v16417_v2  ;;  %v14631_v5 = vpop.permute.xlu0 %7249  ;;  %v14637_v2 = vpop.permute.xlu1 %7251 }
 0x7a2   :  { %6119 = vmatpush2.bf16.msra.mxu0 %v16418_v32  ;;  %6162 = vmatpush2.bf16.msra.mxu1 %v16419_v63 }
 0x7a3   :  { %9742 = vmatprep.subr.bf16.mxu0 %v16420_v11  ;;  %9764 = vmatprep.subr.bf16.mxu1 %v16421_v27  ;;  %v14645_v32 = vpop.permute.xlu1 %6719 }
 0x7a5   :  { %6121 = vmatmul.mubr.bf16.vlgmr.msra.gmra.mxu0 %v10039_v37  ;;  %6164 = vmatmul.mubr.bf16.vlgmr.msra.gmra.mxu1 %v10039_v37  ;;  %v14639_v37 = vpop.permute.xlu0 %6717 }
 0x7a6   :  { %9743 = vmatpush3.bf16.msra.mxu0 %v16422_v25  ;;  %9765 = vmatpush3.bf16.msra.mxu1 %v16423_v6 }
 0x7a7   :  { %9744 = vmatprep.subr.bf16.mxu0 %v16424_v39  ;;  %9766 = vmatprep.subr.bf16.mxu1 %v16425_v51  ;;  %v14657_v11 = vpop.permute.xlu1 %7185 }
 0x7a9   :  { %v14651_v63 = vpop.permute.xlu0 %7183 }
 0x7aa   :  { %9745 = vmatpush3.bf16.msra.mxu0 %v16426_v4  ;;  %9767 = vmatpush3.bf16.msra.mxu1 %v16427_v17 }
 0x7ab   :  { %9746 = vmatprep.subr.bf16.mxu0 %v16428_v38  ;;  %9768 = vmatprep.subr.bf16.mxu1 %v16429_v18  ;;  %v14665_v25 = vpop.permute.xlu1 %6653 }
 0x7ad   :  { %v14659_v27 = vpop.permute.xlu0 %6651 }
 0x7ae   :  { %9747 = vmatpush3.bf16.msra.mxu0 %v16430_v13  ;;  %9769 = vmatpush3.bf16.msra.mxu1 %v16431_v41 }
 0x7af   :  { %9748 = vmatprep.subr.bf16.mxu0 %v16432_v61  ;;  %9770 = vmatprep.subr.bf16.mxu1 %v16433_v58  ;;  %v14677_v39 = vpop.permute.xlu1 %7119 }
 0x7b1   :  { %v14671_v6 = vpop.permute.xlu0 %7117 }
 0x7b2   :  { %9749 = vmatpush3.bf16.msra.mxu0 %v16434_v1  ;;  %9771 = vmatpush3.bf16.msra.mxu1 %v16435_v57 }
 0x7b3   :  { %9750 = vmatprep.subr.bf16.mxu0 %v16436_v21  ;;  %9772 = vmatprep.subr.bf16.mxu1 %v16437_v35  ;;  %v14683_v61 = vpop.permute.xlu1 %7053 }
 0x7b5   :  { %v14679_v17 = vpop.permute.xlu0 %7051 }
 0x7b6   :  { %9751 = vmatpush3.bf16.msra.mxu0 %v16438_v9  ;;  %9773 = vmatpush3.bf16.msra.mxu1 %v16439_v20 }
 0x7b7   :  { %9752 = vmatprep.subr.bf16.mxu0 %v16440_v53  ;;  %9774 = vmatprep.subr.bf16.mxu1 %v16441_v36  ;;  %v14687_v53 = vpop.permute.xlu1 %6539 }
 0x7b8   :  { %16454 = vst [vmem:[#allocation94_spill] sm:$0xff] %v14687_v53 }
 0x7b9   :  { %v14685_v35 = vpop.permute.xlu0 %6537 }
 0x7ba   :  { %9753 = vmatpush3.bf16.msra.mxu0 %v16442_v42  ;;  %9775 = vmatpush3.bf16.msra.mxu1 %v16443_v3  ;;  %16453 = vst [vmem:[#allocation53_spill] sm:$0xff] %v14685_v35 }
 0x7bb   :  { %9754 = vmatprep.subr.bf16.mxu0 %v16444_v10  ;;  %9776 = vmatprep.subr.bf16.mxu1 %v16445_v23  ;;  %v14691_v42 = vpop.permute.xlu1 %6986 }
 0x7bc   :  { %16455 = vst [vmem:[#allocation41_spill] sm:$0xff] %v14691_v42 }
 0x7bd   :  { %v14689_v36 = vpop.permute.xlu0 %6984 }
 0x7be   :  { %9755 = vmatpush3.bf16.msra.mxu0 %v16446_v55  ;;  %9777 = vmatpush3.bf16.msra.mxu1 %v16447_v16 }
 0x7bf   :  { %9756 = vmatprep.subr.bf16.mxu0 %v16448_v29  ;;  %9778 = vmatprep.subr.bf16.mxu1 %v16449_v56  ;;  %v14695_v10 = vpop.permute.xlu1 %6472 }
 0x7c0   :  { %16457 = vst [vmem:[#allocation48_spill] sm:$0xff] %v14695_v10 }
 0x7c1   :  { %v14693_v3 = vpop.permute.xlu0 %6470 }
 0x7c2   :  { %9757 = vmatpush3.bf16.msra.mxu0 %v16450_v30  ;;  %9779 = vmatpush3.bf16.msra.mxu1 %v16451_v44  ;;  %16456 = vst [vmem:[#allocation73_spill] sm:$0xff] %v14693_v3 }
 0x7c3   :  { %v14699_v55 = vpop.permute.xlu1 %6919 }
 0x7c4   :  { %16459 = vst [vmem:[#allocation56_spill] sm:$0xff] %v14699_v55 }
 0x7c5   :  { %v14697_v23 = vpop.permute.xlu0 %6917 }
 0x7c6   :  { %16458 = vst [vmem:[#allocation114_spill] sm:$0xff] %v14697_v23 }
 0x7c7   :  { %v14703_v29 = vpop.permute.xlu1 %6405 }
 0x7c8   :  { %16461 = vst [vmem:[#allocation61_spill] sm:$0xff] %v14703_v29 }
 0x7c9   :  { %v14701_v16 = vpop.permute.xlu0 %6403 }
 0x7ca   :  { %16460 = vst [vmem:[#allocation99_spill] sm:$0xff] %v14701_v16 }
 0x7cb   :  { %v14707_v30 = vpop.permute.xlu1 %6852 }
 0x7cc   :  { %16463 = vst [vmem:[#allocation113_spill] sm:$0xff] %v14707_v30 }
 0x7cd   :  { %v14705_v56 = vpop.permute.xlu0 %6850 }
 0x7ce   :  { %16462 = vst [vmem:[#allocation55_spill] sm:$0xff] %v14705_v56 }
 0x7d1   :  { %v14709_v44 = vpop.permute.xlu0 %6336 }
 0x7d2   :  { %16464 = vst [vmem:[#allocation62_spill] sm:$0xff] %v14709_v44 }
 0x825   :  { %v9714_v28 = vpop.f32.mrf.mxu0  ;;  %v9736_v54 = vpop.f32.mrf.mxu1 }
 0x827   :  { %v9715_v34 = vpop.f32.mrf.mxu0  ;;  %v9737_v52 = vpop.f32.mrf.mxu1 }
 0x828   :  { %v9716_v7 = vadd.f32 %v9715_v34, %v9714_v28  ;;  %v9738_v26 = vadd.f32 %v9737_v52, %v9736_v54  ;;  %v14711_v28 = vpop.permute.xlu1 %6338  ;;  %v14713_v54 = vpop.permute.xlu0 %6783 }
 0x829   :  { %v9717_v46 = vpop.f32.mrf.mxu0  ;;  %v9739_v47 = vpop.f32.mrf.mxu1  ;;  %16465 = vst [vmem:[#allocation112_spill] sm:$0xff] %v14711_v28  ;;  %16466 = vst [vmem:[#allocation33_spill] sm:$0xff] %v14713_v54 }
 0x82a   :  { %v6064_v33 = vadd.f32 %v9738_v26, %v9716_v7 }
 0x82b   :  { %v9718_v24 = vpop.f32.mrf.mxu0  ;;  %v9740_v14 = vpop.f32.mrf.mxu1 }
 0x82c   :  { %vm6070_vm6 = vcmp.gt.f32.partialorder %v6064_v33, 0.0  ;;  %v6072_v48 = vmul.f32 0.2, %v6064_v33  ;;  %v9719_v45 = vadd.f32 %v9718_v24, %v9717_v46  ;;  %v9741_v0 = vadd.f32 %v9740_v14, %v9739_v47  ;;  %v14715_v34 = vpop.permute.xlu1 %6785  ;;  %v14717_v52 = vpop.permute.xlu0 %6270 }
 0x82d   :  { %16467 = vst [vmem:[#allocation93_spill] sm:$0xff] %v14715_v34  ;;  %16468 = vst [vmem:[#allocation103_spill] sm:$0xff] %v14717_v52 }
 0x82e   :  { %v14599_v62 = vsel %vm6070_vm6, %v6064_v33, %v6072_v48  ;;  %v6067_v31 = vadd.f32 %v9741_v0, %v9719_v45  ;;  %v14742_v0 = vld [vmem:[%s15654_s16 + $0x4] ss:$8 sm:$0x7] }
 0x82f   :  { %7253 = vrot.lane.b32.xlu0 %v14599_v62, %s10305_s23  ;;  %v6619_v49 = vmul.f32 %v6613_v12, %v14599_v62 }
 0x830   :  { %vm6071_vm7 = vcmp.gt.f32.partialorder %v6067_v31, 0.0  ;;  %v6073_v15 = vmul.f32 0.2, %v6067_v31  ;;  %v14719_v7 = vpop.permute.xlu1 %6272 }
 0x831   :  { %v9579_v19 = vpack.c.bf16 %v6619_v49, %v6619_v49  ;;  %16469 = vst [vmem:[#allocation52_spill] sm:$0xff] %v14719_v7 }
 0x832   :  { %v14604_v59 = vsel %vm6071_vm7, %v6067_v31, %v6073_v15  ;;  %v6565_v15 = vrot.slane %v14742_v0, %v16452_v40  ;;  %vm8241_vm7 = vcmask 257024  }
 0x833   :  { %7255 = vrot.lane.b32.xlu1 %v14604_v59, %s10305_s23  ;;  %6721 = vrot.lane.b32.xlu0 %v14599_v62, %s16115_s22  ;;  %v6622_v22 = vmul.f32 %v6613_v12, %v14604_v59  ;;  %6644 = vst [vmem:[#allocation2 + $0x148] sm:$0xf] %v9579_v19 }
 0x835   :  { %v9581_v8 = vpack.c.bf16 %v6622_v22, %v6622_v22 }
 0x837   :  { %6723 = vrot.lane.b32.xlu1 %v14604_v59, %s16115_s22  ;;  %7187 = vrot.lane.b32.xlu0 %v14599_v62, %s16073_s28  ;;  %6646 = vst [vmem:[#allocation2 + $0x168] sm:$0xf] %v9581_v8  ;;  %v16471_v8 = vld [vmem:[#allocation4_spill] sm:$0xff] }
 0x838   :  { %vm6478_vm10 = vcmp.lt.s32.totalorder %v16471_v8, 6  ;;  %vm6411_vm11 = vcmp.lt.s32.totalorder %v16471_v8, 7  ;;  %vm6344_vm12 = vcmp.lt.s32.totalorder %v16471_v8, 8  ;;  %vm6992_vm1 = vcmp.lt.s32.totalorder %v16471_v8, 118 }
 0x83b   :  { %7189 = vrot.lane.b32.xlu1 %v14604_v59, %s16073_s28  ;;  %6655 = vrot.lane.b32.xlu0 %v14599_v62, %s16067_s29 }
 0x83f   :  { %6657 = vrot.lane.b32.xlu1 %v14604_v59, %s16067_s29  ;;  %7121 = vrot.lane.b32.xlu0 %v14599_v62, %s16110_s12 }
 0x843   :  { %7123 = vrot.lane.b32.xlu1 %v14604_v59, %s16110_s12  ;;  %7055 = vrot.lane.b32.xlu0 %v14599_v62, %s16112_s13 }
 0x847   :  { %7057 = vrot.lane.b32.xlu1 %v14604_v59, %s16112_s13  ;;  %6541 = vrot.lane.b32.xlu0 %v14599_v62, %s16068_s1 }
 0x84b   :  { %6543 = vrot.lane.b32.xlu1 %v14604_v59, %s16068_s1  ;;  %6988 = vrot.lane.b32.xlu0 %v14599_v62, %s10306_s17 }
 0x84f   :  { %6990 = vrot.lane.b32.xlu1 %v14604_v59, %s10306_s17  ;;  %6474 = vrot.lane.b32.xlu0 %v14599_v62, %s10307_s4 }
 0x853   :  { %6476 = vrot.lane.b32.xlu1 %v14604_v59, %s10307_s4  ;;  %6921 = vrot.lane.b32.xlu0 %v14599_v62, %s10308_s0 }
 0x857   :  { %6923 = vrot.lane.b32.xlu1 %v14604_v59, %s10308_s0  ;;  %6407 = vrot.lane.b32.xlu0 %v14599_v62, %s10309_s15 }
 0x85b   :  { %6409 = vrot.lane.b32.xlu1 %v14604_v59, %s10309_s15  ;;  %6854 = vrot.lane.b32.xlu0 %v14599_v62, %s10310_s19 }
 0x85f   :  { %6856 = vrot.lane.b32.xlu1 %v14604_v59, %s10310_s19  ;;  %6340 = vrot.lane.b32.xlu0 %v14599_v62, %s10311_s3 }
 0x863   :  { %6342 = vrot.lane.b32.xlu1 %v14604_v59, %s10311_s3  ;;  %6787 = vrot.lane.b32.xlu0 %v14599_v62, %s10312_s26 }
 0x865   :  { %v6122_v51 = vpop.f32.mrf.mxu0  ;;  %v6165_v4 = vpop.f32.mrf.mxu1 }
 0x867   :  { %v6124_v38 = vpop.f32.mrf.mxu0  ;;  %v6167_v18 = vpop.f32.mrf.mxu1  ;;  %6789 = vrot.lane.b32.xlu1 %v14604_v59, %s10312_s26 }
 0x869   :  { %v6126_v13 = vpop.f32.mrf.mxu0  ;;  %v6169_v41 = vpop.f32.mrf.mxu1 }
 0x86a   :  { %v6174_v9 = vpack.c.bf16 %v6126_v13, %v6122_v51  ;;  %v6176_v20 = vpack.c.bf16 %v6169_v41, %v6165_v4 }
 0x86b   :  { %v6128_v58 = vpop.f32.mrf.mxu0  ;;  %v6171_v1 = vpop.f32.mrf.mxu1 }
 0x86c   :  { %v6175_v57 = vpack.c.bf16 %v6128_v58, %v6124_v38  ;;  %v6177_v21 = vpack.c.bf16 %v6171_v1, %v6167_v18  ;;  %v14761_v38 = vld [vmem:[%s15654_s16 + $0x3] ss:$8 sm:$0x7] }
 0x86d   :  { %16472 = vst [vmem:[#allocation78_spill] sm:$0xff] %v14761_v38 }
 0x86e   :  { %6210 = vmatprep.mubr.bf16.mxu0 %v6175_v57  ;;  %6251 = vmatprep.mubr.bf16.mxu1 %v6177_v21  ;;  %v6499_v57 = vrot.slane %v14761_v38, %v16452_v40 }
 0x86f   :  { %6211 = vmatmul.mubr.bf16.vlgmr.msra.gmra.mxu0 %v6174_v9  ;;  %6252 = vmatmul.mubr.bf16.vlgmr.msra.gmra.mxu1 %v6176_v20 }
 0x8a1   :  { %v14721_v26 = vpop.permute.xlu0 %7253 }
 0x8a5   :  { %v14723_v46 = vpop.permute.xlu0 %6721  ;;  %v14725_v47 = vpop.permute.xlu1 %7255 }
 0x8a9   :  { %v14727_v33 = vpop.permute.xlu0 %7187  ;;  %v14729_v24 = vpop.permute.xlu1 %6723 }
 0x8ad   :  { %v14731_v14 = vpop.permute.xlu0 %6655  ;;  %v14733_v12 = vpop.permute.xlu1 %7189 }
 0x8b1   :  { %v14735_v48 = vpop.permute.xlu0 %7121  ;;  %v14737_v45 = vpop.permute.xlu1 %6657 }
 0x8b2   :  { %v7125_v42 = vsel %vm654_vm0, %v14671_v6, %v14735_v48 }
 0x8b5   :  { %v14744_v31 = vpop.permute.xlu0 %7055  ;;  %v14746_v49 = vpop.permute.xlu1 %7123 }
 0x8b9   :  { %v14750_v19 = vpop.permute.xlu0 %6541  ;;  %v14752_v22 = vpop.permute.xlu1 %7057 }
 0x8ba   :  { %16470 = vst [vmem:[#allocation115_spill] sm:$0xff] %v14750_v19  ;;  %v6545_v51 = vsel %vm343_vm4, %v14685_v35, %v14750_v19 }
 0x8bb   :  { %v6571_v4 = vmul.f32 %v6565_v15, %v6545_v51 }
 0x8bd   :  { %v9575_v18 = vpack.c.bf16 %v6571_v4, %v6571_v4  ;;  %v14763_v13 = vpop.permute.xlu0 %6988  ;;  %v14765_v41 = vpop.permute.xlu1 %6543 }
 0x8be   :  { %16473 = vst [vmem:[#allocation95_spill] sm:$0xff] %v14765_v41  ;;  %v6546_v58 = vsel %vm343_vm4, %v14687_v53, %v14765_v41  ;;  %v6659_v41 = vsel %vm486_vm3, %v14659_v27, %v14731_v14 }
 0x8bf   :  { %6596 = vst [vmem:[#allocation2 + $0x108] sm:$0xf] %v9575_v18  ;;  %v6574_v1 = vmul.f32 %v6565_v15, %v6546_v58  ;;  %v14785_v15 = vld [vmem:[%s15654_s16 + $0x2] ss:$8 sm:$0x7] }
 0x8c0   :  { %16476 = vst [vmem:[#allocation39_spill] sm:$0xff] %v14785_v15 }
 0x8c1   :  { %v9577_v21 = vpack.c.bf16 %v6574_v1, %v6574_v1  ;;  %v14774_v9 = vpop.permute.xlu0 %6474  ;;  %v14776_v20 = vpop.permute.xlu1 %6990 }
 0x8c2   :  { %16474 = vst [vmem:[#allocation54_spill] sm:$0xff] %v14774_v9  ;;  %16475 = vst [vmem:[#allocation97_spill] sm:$0xff] %v14776_v20  ;;  %v6479_v51 = vsel %vm6478_vm10, %v14693_v3, %v14774_v9  ;;  %v16488_v3 = vld [vmem:[#allocation8_spill] sm:$0xff] }
 0x8c3   :  { %6598 = vst [vmem:[#allocation2 + $0x128] sm:$0xf] %v9577_v21  ;;  %v6505_v4 = vmul.f32 %v6499_v57, %v6479_v51  ;;  %v6432_v21 = vrot.slane %v14785_v15, %v16452_v40 }
 0x8c5   :  { %v9571_v18 = vpack.c.bf16 %v6505_v4, %v6505_v4  ;;  %v14787_v58 = vpop.permute.xlu0 %6921  ;;  %v14789_v1 = vpop.permute.xlu1 %6476 }
 0x8c6   :  { %16477 = vst [vmem:[#allocation30_spill] sm:$0xff] %v14787_v58  ;;  %16478 = vst [vmem:[#allocation100_spill] sm:$0xff] %v14789_v1  ;;  %v6480_v7 = vsel %vm6478_vm10, %v14695_v10, %v14789_v1  ;;  %v7192_v58 = vsel %vm738_vm8, %v14657_v11, %v14733_v12 }
 0x8c7   :  { %6530 = vst [vmem:[#allocation2 + $0xc8] sm:$0xf] %v9571_v18  ;;  %v6508_v52 = vmul.f32 %v6499_v57, %v6480_v7  ;;  %v14809_v7 = vld [vmem:[%s15654_s16 + $0x1] ss:$8 sm:$0x7] }
 0x8c8   :  { %16481 = vst [vmem:[#allocation117_spill] sm:$0xff] %v14809_v7 }
 0x8c9   :  { %v9573_v51 = vpack.c.bf16 %v6508_v52, %v6508_v52  ;;  %v14798_v34 = vpop.permute.xlu0 %6407  ;;  %v14800_v4 = vpop.permute.xlu1 %6923 }
 0x8ca   :  { %16479 = vst [vmem:[#allocation58_spill] sm:$0xff] %v14798_v34  ;;  %16480 = vst [vmem:[#allocation44_spill] sm:$0xff] %v14800_v4  ;;  %v6412_v54 = vsel %vm6411_vm11, %v14701_v16, %v14798_v34  ;;  %v16487_v4 = vld [vmem:[#allocation5_spill] sm:$0xff] }
 0x8cb   :  { %6532 = vst [vmem:[#allocation2 + $0xe8] sm:$0xf] %v9573_v51  ;;  %v6438_v30 = vmul.f32 %v6432_v21, %v6412_v54  ;;  %v6365_v54 = vrot.slane %v14809_v7, %v16452_v40  ;;  %v6605_v9 = vrot.slane %v14595_v60, %v16487_v4 }
 0x8cd   :  { %v9567_v57 = vpack.c.bf16 %v6438_v30, %v6438_v30  ;;  %v14811_v18 = vpop.permute.xlu0 %6854  ;;  %v14813_v52 = vpop.permute.xlu1 %6409 }
 0x8ce   :  { %16482 = vst [vmem:[#allocation75_spill] sm:$0xff] %v14811_v18  ;;  %16483 = vst [vmem:[#allocation104_spill] sm:$0xff] %v14813_v52  ;;  %v6413_v56 = vsel %vm6411_vm11, %v14703_v29, %v14813_v52 }
 0x8cf   :  { %6463 = vst [vmem:[#allocation2 + $0x88] sm:$0xf] %v9567_v57  ;;  %v6441_v1 = vmul.f32 %v6432_v21, %v6413_v56 }
 0x8d1   :  { %v9569_v51 = vpack.c.bf16 %v6441_v1, %v6441_v1  ;;  %v14822_v34 = vpop.permute.xlu0 %6340  ;;  %v14824_v30 = vpop.permute.xlu1 %6856 }
 0x8d2   :  { %16484 = vst [vmem:[#allocation64_spill] sm:$0xff] %v14822_v34  ;;  %16485 = vst [vmem:[#allocation36_spill] sm:$0xff] %v14824_v30  ;;  %v6345_v16 = vsel %vm6344_vm12, %v14709_v44, %v14822_v34 }
 0x8d3   :  { %6465 = vst [vmem:[#allocation2 + $0xa8] sm:$0xf] %v9569_v51  ;;  %v6371_v18 = vmul.f32 %v6365_v54, %v6345_v16 }
 0x8d5   :  { %v9563_v52 = vpack.c.bf16 %v6371_v18, %v6371_v18  ;;  %v14830_v57 = vpop.permute.xlu1 %6342 }
 0x8d6   :  { %16486 = vst [vmem:[#allocation76_spill] sm:$0xff] %v14830_v57  ;;  %v6346_v56 = vsel %vm6344_vm12, %v14711_v28, %v14830_v57 }
 0x8d7   :  { %6396 = vst [vmem:[#allocation2 + $0x48] sm:$0xf] %v9563_v52  ;;  %v6374_v1 = vmul.f32 %v6365_v54, %v6346_v56  ;;  %v6609_v52 = vrot.slane %v14595_v60, %v16488_v3 }
 0x8d9   :  { %v9565_v21 = vpack.c.bf16 %v6374_v1, %v6374_v1 }
 0x8db   :  { %6398 = vst [vmem:[#allocation2 + $0x68] sm:$0xf] %v9565_v21 }
 0x92f   :  { %v9758_v29 = vpop.f32.mrf.mxu0  ;;  %v9780_v7 = vpop.f32.mrf.mxu1 }
 0x931   :  { %v9759_v30 = vpop.f32.mrf.mxu0  ;;  %v9781_v10 = vpop.f32.mrf.mxu1 }
 0x932   :  { %v9760_v15 = vadd.f32 %v9759_v30, %v9758_v29  ;;  %v9782_v34 = vadd.f32 %v9781_v10, %v9780_v7  ;;  %v6618_v29 = vmul.f32 %v6609_v52, %v14428_v43  ;;  %v6621_v30 = vmul.f32 %v6609_v52, %v14432_v50  ;;  %v10044_v50 = vld [vmem:[%s15655_s6 + $0x4] ss:$8 sps:$4 sm:$0xff]   ;;  %v14917_v52 = vld [vmem:[%s15654_s16 + $0x19] ss:$8 sm:$0x7] }
 0x933   :  { %v9761_v51 = vpop.f32.mrf.mxu0  ;;  %v9783_v16 = vpop.f32.mrf.mxu1  ;;  %7483 = vmatprep.mubr.bf16.mxu0 %v10044_v50  ;;  %v9243_v43 = vld [vmem:[%s15654_s16 + $0x1f] ss:$8 sm:$0x7]  ;;  %16490 = vst [vmem:[#allocation79_spill] sm:$0xff] %v14917_v52  ;;  %v14964_v28 = vrot.slane %v14917_v52, %v16488_v3 }
 0x934   :  { %v6254_v18 = vadd.f32 %v9782_v34, %v9760_v15  ;;  %v7269_v53 = vrot.slane %v9243_v43, %v16487_v4  ;;  %v7277_v38 = vrot.slane %v9243_v43, %v16452_v40 }
 0x935   :  { %v9762_v44 = vpop.f32.mrf.mxu0  ;;  %v9784_v55 = vpop.f32.mrf.mxu1  ;;  %16494 = vst [vmem:[#allocation7_spill] sm:$0xff] %v14964_v28 }
 0x936   :  { %vm6260_vm13 = vcmp.gt.f32.partialorder %v6254_v18, 0.0  ;;  %v6262_v54 = vmul.f32 0.2, %v6254_v18  ;;  %v9763_v56 = vadd.f32 %v9762_v44, %v9761_v51  ;;  %v9785_v1 = vadd.f32 %v9784_v55, %v9783_v16  ;;  %v9203_v44 = vld [vmem:[%s15654_s16 + $0x7] ss:$8 sm:$0x7] }
 0x937   :  { %v14906_v51 = vld [vmem:[%s15654_s16 + $0x1b] ss:$8 sm:$0x7]  ;;  %v7273_v16 = vrot.slane %v9243_v43, %v16488_v3  ;;  %v6660_v43 = vsel %vm486_vm3, %v14665_v25, %v14737_v45  ;;  %v6737_v19 = vrot.slane %v9203_v44, %v16487_v4  ;;  %v6745_v35 = vrot.slane %v9203_v44, %v16452_v40 }
 0x938   :  { %v6264_v21 = vsel %vm6260_vm13, %v6254_v18, %v6262_v54  ;;  %v6257_v57 = vadd.f32 %v9785_v1, %v9763_v56  ;;  %v14912_v18 = vld [vmem:[%s15654_s16 + $0x1a] ss:$8 sm:$0x7]  ;;  %v6741_v54 = vrot.slane %v9203_v44, %v16488_v3 }
 0x939   :  { %7245 = vrot.lane.b32.xlu0 %v6264_v21, %s10305_s23  ;;  %v6617_v10 = vmul.f32 %v6605_v9, %v6264_v21  ;;  %16489 = vst [vmem:[#allocation6_spill] sm:$0xff] %v14912_v18  ;;  %v14960_v50 = vrot.slane %v14912_v18, %v16488_v3 }
 0x93a   :  { %vm6261_vm14 = vcmp.gt.f32.partialorder %v6257_v57, 0.0  ;;  %v6263_v34 = vmul.f32 0.2, %v6257_v57 }
 0x93b   :  { %v9578_v15 = vpack.c.bf16 %v6618_v29, %v6617_v10  ;;  %v7257_v10 = vsel %vm3886_vm15, %v14631_v5, %v14721_v26  ;;  %v6725_v29 = vsel %vm3291_vm9, %v14639_v37, %v14723_v46  ;;  %16493 = vst [vmem:[#allocation37_spill] sm:$0xff] %v14960_v50 }
 0x93c   :  { %v6265_v7 = vsel %vm6261_vm14, %v6257_v57, %v6263_v34  ;;  %v14901_v57 = vld [vmem:[%s15654_s16 + $0x1c] ss:$8 sm:$0x7]  ;;  %v7258_v34 = vsel %vm3886_vm15, %v14637_v2, %v14725_v47  ;;  %v7282_v18 = vmul.f32 %v7273_v16, %v7257_v10  ;;  %v6750_v50 = vmul.f32 %v6741_v54, %v6725_v29 }
 0x93d   :  { %7247 = vrot.lane.b32.xlu1 %v6265_v7, %s10305_s23  ;;  %6713 = vrot.lane.b32.xlu0 %v6264_v21, %s16115_s22  ;;  %v6620_v60 = vmul.f32 %v6605_v9, %v6265_v7  ;;  %6643 = vst [vmem:[#allocation2 + $0x140] sm:$0xff] %v9578_v15  ;;  %v14896_v9 = vld [vmem:[%s15654_s16 + $0x1d] ss:$8 sm:$0x7]  ;;  %v14941_v15 = vrot.slane %v14901_v57, %v16488_v3  ;;  %s10323_s23 = smov 125  }
 0x93e   :  { %v7285_v23 = vmul.f32 %v7273_v16, %v7258_v34  ;;  %v14994_v16 = vpop.permute.xlu1 %6789 }
 0x93f   :  { %v9580_v55 = vpack.c.bf16 %v6621_v30, %v6620_v60  ;;  %v14948_v60 = vpop.permute.xlu0 %6787  ;;  %v7191_v30 = vsel %vm738_vm8, %v14651_v63, %v14727_v33  ;;  %16496 = vst [vmem:[#allocation10_spill] sm:$0xff] %v14994_v16 }
 0x940   :  { %16492 = vst [vmem:[#allocation59_spill] sm:$0xff] %v14948_v60  ;;  %v6726_v60 = vsel %vm3291_vm9, %v14645_v32, %v14729_v24 }
 0x941   :  { %6715 = vrot.lane.b32.xlu1 %v6265_v7, %s16115_s22  ;;  %7179 = vrot.lane.b32.xlu0 %v6264_v21, %s16073_s28  ;;  %6645 = vst [vmem:[#allocation2 + $0x160] sm:$0xff] %v9580_v55  ;;  %v14956_v55 = vrot.slane %v14906_v51, %v16488_v3  ;;  %v14996_v29 = vmul.f32 %v6741_v54, %v6726_v60 }
 0x945   :  { %7181 = vrot.lane.b32.xlu1 %v6265_v7, %s16073_s28  ;;  %6647 = vrot.lane.b32.xlu0 %v6264_v21, %s16067_s29  ;;  %s10321_s28 = smov 124  }
 0x949   :  { %6649 = vrot.lane.b32.xlu1 %v6265_v7, %s16067_s29  ;;  %7113 = vrot.lane.b32.xlu0 %v6264_v21, %s16110_s12 }
 0x94d   :  { %7115 = vrot.lane.b32.xlu1 %v6265_v7, %s16110_s12  ;;  %7047 = vrot.lane.b32.xlu0 %v6264_v21, %s16112_s13 }
 0x951   :  { %7049 = vrot.lane.b32.xlu1 %v6265_v7, %s16112_s13  ;;  %6533 = vrot.lane.b32.xlu0 %v6264_v21, %s16068_s1 }
 0x955   :  { %6535 = vrot.lane.b32.xlu1 %v6265_v7, %s16068_s1  ;;  %6980 = vrot.lane.b32.xlu0 %v6264_v21, %s10306_s17  ;;  %s10320_s1 = smov 116  }
 0x959   :  { %6982 = vrot.lane.b32.xlu1 %v6265_v7, %s10306_s17  ;;  %6466 = vrot.lane.b32.xlu0 %v6264_v21, %s10307_s4 }
 0x95d   :  { %6468 = vrot.lane.b32.xlu1 %v6265_v7, %s10307_s4  ;;  %6913 = vrot.lane.b32.xlu0 %v6264_v21, %s10308_s0 }
 0x961   :  { %6915 = vrot.lane.b32.xlu1 %v6265_v7, %s10308_s0  ;;  %6399 = vrot.lane.b32.xlu0 %v6264_v21, %s10309_s15 }
 0x965   :  { %6401 = vrot.lane.b32.xlu1 %v6265_v7, %s10309_s15  ;;  %6846 = vrot.lane.b32.xlu0 %v6264_v21, %s10310_s19 }
 0x969   :  { %6848 = vrot.lane.b32.xlu1 %v6265_v7, %s10310_s19  ;;  %6332 = vrot.lane.b32.xlu0 %v6264_v21, %s10311_s3 }
 0x96d   :  { %6334 = vrot.lane.b32.xlu1 %v6265_v7, %s10311_s3  ;;  %6779 = vrot.lane.b32.xlu0 %v6264_v21, %s10312_s26 }
 0x971   :  { %6781 = vrot.lane.b32.xlu1 %v6265_v7, %s10312_s26  ;;  %6266 = vrot.lane.b32.xlu0 %v6264_v21, %s10313_s10  ;;  %v14925_v21 = vrot.slane %v14896_v9, %v16488_v3 }
 0x973   :  { %v15011_v54 = vmul.f32 %v14925_v21, %v7125_v42 }
 0x975   :  { %6268 = vrot.lane.b32.xlu1 %v6265_v7, %s10313_s10  ;;  %6274 = vrot.lane.b32.xlu0 %v14599_v62, %s10313_s10  ;;  %v9238_v62 = vld [vmem:[%s15654_s16 + $0x1e] ss:$8 sm:$0x7]  ;;  %v14946_v7 = vld [vmem:[%s15654_s16 + $0x18] ss:$8 sm:$0x7] }
 0x976   :  { %v7207_v56 = vrot.slane %v9238_v62, %v16488_v3  ;;  %16491 = vst [vmem:[#allocation74_spill] sm:$0xff] %v14946_v7  ;;  %v14978_v28 = vrot.slane %v14946_v7, %v16488_v3  ;;  %v7203_v44 = vrot.slane %v9238_v62, %v16487_v4 }
 0x978   :  { %16495 = vst [vmem:[#allocation63_spill] sm:$0xff] %v14978_v28  ;;  %v14980_v52 = vmul.f32 %v7207_v56, %v7191_v30  ;;  %v15008_v16 = vmul.f32 %v7207_v56, %v7192_v58  ;;  %v7211_v58 = vrot.slane %v9238_v62, %v16452_v40 }
 0x979   :  { %6276 = vrot.lane.b32.xlu1 %v14604_v59, %s10313_s10  ;;  %v14891_v59 = vld [vmem:[%s15654_s16 + $0x6] ss:$8 sm:$0x7] }
 0x97a   :  { %v6675_v1 = vrot.slane %v14891_v59, %v16488_v3 }
 0x97c   :  { %v14998_v34 = vmul.f32 %v6675_v1, %v6659_v41  ;;  %v15013_v41 = vmul.f32 %v6675_v1, %v6660_v43 }
 0x9ab   :  { %v7246_v10 = vpop.permute.xlu0 %7245 }
 0x9ac   :  { %v7259_v30 = vsel %vm3886_vm15, %v7246_v10, %v14631_v5  ;;  %v7261_v28 = vsel %vm3886_vm15, %v14721_v26, %v7246_v10  ;;  %v7059_v5 = vsel %vm570_vm2, %v14679_v17, %v14744_v31 }
 0x9ad   :  { %v7281_v7 = vmul.f32 %v7269_v53, %v7259_v30  ;;  %v7283_v20 = vmul.f32 %v7277_v38, %v7261_v28 }
 0x9af   :  { %v9618_v26 = vpack.c.bf16 %v7282_v18, %v7281_v7  ;;  %v9619_v28 = vpack.c.bf16 %v7283_v20, %v7283_v20  ;;  %v6714_v60 = vpop.permute.xlu0 %6713  ;;  %v7248_v10 = vpop.permute.xlu1 %7247 }
 0x9b0   :  { %v6727_v42 = vsel %vm3291_vm9, %v6714_v60, %v14639_v37  ;;  %v6729_v56 = vsel %vm3291_vm9, %v14723_v46, %v6714_v60  ;;  %v7260_v1 = vsel %vm3886_vm15, %v7248_v10, %v14637_v2  ;;  %v7262_v20 = vsel %vm3886_vm15, %v14725_v47, %v7248_v10 }
 0x9b1   :  { %7307 = vst [vmem:[#allocation2 + $0x3c0] sm:$0xff] %v9618_v26  ;;  %7308 = vst [vmem:[#allocation2 + $0x3c8] sm:$0xf] %v9619_v28  ;;  %v6749_v18 = vmul.f32 %v6737_v19, %v6727_v42  ;;  %v6751_v62 = vmul.f32 %v6745_v35, %v6729_v56  ;;  %v7284_v7 = vmul.f32 %v7269_v53, %v7260_v1  ;;  %vm8224_vm15 = vcmask 523520  }
 0x9b2   :  { %v7286_v43 = vmul.f32 %v7277_v38, %v7262_v20  ;;  %v15035_v37 = vmul.f32 %v14941_v15, %v7059_v5  ;;  %v7126_v46 = vsel %vm654_vm0, %v14677_v39, %v14746_v49  ;;  %v15043_v2 = vrot.slane %v14891_v59, %v16487_v4 }
 0x9b3   :  { %v15047_v47 = vrot.slane %v14891_v59, %v16452_v40  ;;  %v9586_v30 = vpack.c.bf16 %v6750_v50, %v6749_v18  ;;  %v9587_v26 = vpack.c.bf16 %v6751_v62, %v6751_v62  ;;  %v9620_v53 = vpack.c.bf16 %v7285_v23, %v7284_v7  ;;  %v7180_v28 = vpop.permute.xlu0 %7179  ;;  %v6716_v5 = vpop.permute.xlu1 %6715 }
 0x9b4   :  { %v9621_v38 = vpack.c.bf16 %v7286_v43, %v7286_v43  ;;  %v7193_v60 = vsel %vm738_vm8, %v7180_v28, %v14651_v63  ;;  %v7195_v10 = vsel %vm738_vm8, %v14727_v33, %v7180_v28  ;;  %v6728_v42 = vsel %vm3291_vm9, %v6716_v5, %v14645_v32 }
 0x9b5   :  { %v6730_v59 = vsel %vm3291_vm9, %v14729_v24, %v6716_v5  ;;  %6775 = vst [vmem:[#allocation2 + $0x1c0] sm:$0xff] %v9586_v30  ;;  %6776 = vst [vmem:[#allocation2 + $0x1c8] sm:$0xf] %v9587_v26  ;;  %v7215_v23 = vmul.f32 %v7203_v44, %v7193_v60  ;;  %v7217_v50 = vmul.f32 %v7211_v58, %v7195_v10  ;;  %vm7602_vm9 = vcmask 261120  }
 0x9b6   :  { %7309 = vst [vmem:[#allocation2 + $0x3e0] sm:$0xff] %v9620_v53  ;;  %7310 = vst [vmem:[#allocation2 + $0x3e8] sm:$0xf] %v9621_v38  ;;  %v6752_v56 = vmul.f32 %v6737_v19, %v6728_v42  ;;  %v6754_v63 = vmul.f32 %v6745_v35, %v6730_v59  ;;  %v15062_v1 = vmul.f32 %v14925_v21, %v7126_v46 }
 0x9b7   :  { %v7060_v32 = vsel %vm570_vm2, %v14683_v61, %v14752_v22  ;;  %v15070_v33 = vrot.slane %v14896_v9, %v16487_v4  ;;  %v15074_v24 = vrot.slane %v14896_v9, %v16452_v40  ;;  %v9614_v20 = vpack.c.bf16 %v14980_v52, %v7215_v23  ;;  %v6648_v18 = vpop.permute.xlu0 %6647  ;;  %v7182_v62 = vpop.permute.xlu1 %7181 }
 0x9b8   :  { %v9615_v19 = vpack.c.bf16 %v7217_v50, %v7217_v50  ;;  %v9588_v35 = vpack.c.bf16 %v14996_v29, %v6752_v56  ;;  %v9589_v21 = vpack.c.bf16 %v6754_v63, %v6754_v63  ;;  %v6661_v7 = vsel %vm486_vm3, %v6648_v18, %v14659_v27  ;;  %v7341_v59 = vld [vmem:[#allocation2 + $0x3c0] sm:$0xf]  ;;  %v15137_v50 = vld [vmem:[%s15657_s18 + $0x38] sm:$0xff]  }
 0x9b9   :  { %v6663_v43 = vsel %vm486_vm3, %v14731_v14, %v6648_v18  ;;  %v7194_v9 = vsel %vm738_vm8, %v7182_v62, %v14657_v11  ;;  %v7196_v52 = vsel %vm738_vm8, %v14733_v12, %v7182_v62  ;;  %7241 = vst [vmem:[#allocation2 + $0x380] sm:$0xff] %v9614_v20  ;;  %v6683_v29 = vmul.f32 %v15043_v2, %v6661_v7 }
 0x9ba   :  { %7242 = vst [vmem:[#allocation2 + $0x388] sm:$0xf] %v9615_v19  ;;  %6777 = vst [vmem:[#allocation2 + $0x1e0] sm:$0xff] %v9588_v35  ;;  %v6685_v27 = vmul.f32 %v15047_v47, %v6663_v43  ;;  %v7218_v46 = vmul.f32 %v7203_v44, %v7194_v9  ;;  %v7220_v30 = vmul.f32 %v7211_v58, %v7196_v52  ;;  %vm6925_vm8 = vcmp.lt.s32.totalorder %v16471_v8, 119 }
 0x9bb   :  { %6778 = vst [vmem:[#allocation2 + $0x1e8] sm:$0xf] %v9589_v21  ;;  %v15093_v14 = vmul.f32 %v14941_v15, %v7060_v32  ;;  %v6993_v11 = vsel %vm6992_vm1, %v14689_v36, %v14763_v13  ;;  %v15101_v12 = vrot.slane %v14901_v57, %v16487_v4  ;;  %v15105_v26 = vrot.slane %v14901_v57, %v16452_v40  ;;  %v7114_v38 = vpop.permute.xlu0 %7113  ;;  %v6650_v28 = vpop.permute.xlu1 %6649 }
 0x9bc   :  { %v9582_v44 = vpack.c.bf16 %v14998_v34, %v6683_v29  ;;  %v9583_v58 = vpack.c.bf16 %v6685_v27, %v6685_v27  ;;  %v9616_v15 = vpack.c.bf16 %v15008_v16, %v7218_v46  ;;  %v9617_v53 = vpack.c.bf16 %v7220_v30, %v7220_v30  ;;  %v7325_v7 = vld [vmem:[#allocation2 + $0x1c0] sm:$0xf] }
 0x9bd   :  { %v7127_v5 = vsel %vm654_vm0, %v7114_v38, %v14671_v6  ;;  %v7129_v60 = vsel %vm654_vm0, %v14735_v48, %v7114_v38  ;;  %v6662_v57 = vsel %vm486_vm3, %v6650_v28, %v14665_v25  ;;  %v6664_v34 = vsel %vm486_vm3, %v14737_v45, %v6650_v28  ;;  %v7342_v16 = vld [vmem:[#allocation2 + $0x3e0] sm:$0xf] }
 0x9be   :  { %6709 = vst [vmem:[#allocation2 + $0x180] sm:$0xff] %v9582_v44  ;;  %6710 = vst [vmem:[#allocation2 + $0x188] sm:$0xf] %v9583_v58  ;;  %v7149_v10 = vmul.f32 %v15070_v33, %v7127_v5  ;;  %v7151_v6 = vmul.f32 %v15074_v24, %v7129_v60  ;;  %v6686_v42 = vmul.f32 %v15043_v2, %v6662_v57  ;;  %v10314_v19 = vmov 0.0   ;;  %v16498_v58 = vld [vmem:[#allocation115_spill] sm:$0xff]  ;;  %v16500_v57 = vld [vmem:[#allocation41_spill] sm:$0xff] }
 0x9bf   :  { %7243 = vst [vmem:[#allocation2 + $0x3a0] sm:$0xff] %v9616_v15  ;;  %7244 = vst [vmem:[#allocation2 + $0x3a8] sm:$0xf] %v9617_v53  ;;  %v6688_v48 = vmul.f32 %v15047_v47, %v6664_v34  ;;  %v9265_v23 = vcombine.low %v7341_v59, %v7342_v16  ;;  %v15128_v25 = vrot.slane %v14742_v0, %v16487_v4  ;;  %v7048_v32 = vpop.permute.xlu0 %7047  ;;  %v7116_v20 = vpop.permute.xlu1 %7115  ;;  %9901 = vmatprep.subr.bf16.mxu1 %v10314_v19  ;;  %v16501_v16 = vld [vmem:[#allocation30_spill] sm:$0xff] }
 0x9c0   :  { %v15132_v45 = vrot.slane %v14742_v0, %v16488_v3  ;;  %v9610_v56 = vpack.c.bf16 %v15011_v54, %v7149_v10  ;;  %v9611_v2 = vpack.c.bf16 %v7151_v6, %v7151_v6  ;;  %v9584_v47 = vpack.c.bf16 %v15013_v41, %v6686_v42  ;;  %9902 = vmatpush3.bf16.msra.mxu1 %v15137_v50  ;;  %v7339_v60 = vld [vmem:[#allocation2 + $0x380] sm:$0xf] }
 0x9c1   :  { %v9585_v63 = vpack.c.bf16 %v6688_v48, %v6688_v48  ;;  %v7061_v0 = vsel %vm570_vm2, %v7048_v32, %v14679_v17  ;;  %v7063_v35 = vsel %vm570_vm2, %v14744_v31, %v7048_v32  ;;  %9786 = vmatprep.subr.bf16.mxu0 %v9265_v23  ;;  %v7128_v54 = vsel %vm654_vm0, %v7116_v20, %v14677_v39  ;;  %v7326_v21 = vld [vmem:[#allocation2 + $0x1e0] sm:$0xf]  ;;  %v15162_v39 = vld [vmem:[%s15657_s18 + $0x30] sm:$0xff]  }
 0x9c2   :  { %v7130_v41 = vsel %vm654_vm0, %v14746_v49, %v7116_v20  ;;  %7175 = vst [vmem:[#allocation2 + $0x340] sm:$0xff] %v9610_v56  ;;  %7176 = vst [vmem:[#allocation2 + $0x348] sm:$0xf] %v9611_v2  ;;  %v7083_v17 = vmul.f32 %v15101_v12, %v7061_v0  ;;  %v7085_v18 = vmul.f32 %v15105_v26, %v7063_v35  ;;  %9903 = vmatprep.subr.bf16.mxu1 %v10314_v19  ;;  %v16502_v10 = vld [vmem:[#allocation114_spill] sm:$0xff]  ;;  %v16505_v0 = vld [vmem:[#allocation95_spill] sm:$0xff] }
 0x9c3   :  { %6711 = vst [vmem:[#allocation2 + $0x1a0] sm:$0xff] %v9584_v47  ;;  %6712 = vst [vmem:[#allocation2 + $0x1a8] sm:$0xf] %v9585_v63  ;;  %v7152_v31 = vmul.f32 %v15070_v33, %v7128_v54  ;;  %v7154_v62 = vmul.f32 %v15074_v24, %v7130_v41  ;;  %v15165_v49 = vmul.f32 %v14956_v55, %v6993_v11  ;;  %v6534_v46 = vpop.permute.xlu0 %6533  ;;  %v7050_v30 = vpop.permute.xlu1 %7049  ;;  %v16497_v11 = vld [vmem:[#allocation53_spill] sm:$0xff]  ;;  %vm6858_vm0 = vcmp.lt.s32.totalorder %v16471_v8, 120  ;;  %v16504_v20 = vld [vmem:[#allocation94_spill] sm:$0xff] }
 0x9c4   :  { %v9257_v43 = vcombine.low %v7325_v7, %v7326_v21  ;;  %v15169_v9 = vrot.slane %v14906_v51, %v16487_v4  ;;  %v15173_v33 = vrot.slane %v14906_v51, %v16452_v40  ;;  %v9606_v24 = vpack.c.bf16 %v15035_v37, %v7083_v17  ;;  %9904 = vmatpush3.bf16.msra.mxu1 %v15162_v39 }
 0x9c5   :  { %v9607_v52 = vpack.c.bf16 %v7085_v18, %v7085_v18  ;;  %v9612_v29 = vpack.c.bf16 %v15062_v1, %v7152_v31  ;;  %v9613_v27 = vpack.c.bf16 %v7154_v62, %v7154_v62  ;;  %v6547_v44 = vsel %vm343_vm4, %v6534_v46, %v16497_v11  ;;  %9905 = vmatprep.subr.bf16.mxu1 %v10314_v19  ;;  %v7323_v17 = vld [vmem:[#allocation2 + $0x180] sm:$0xf]  ;;  %v16506_v62 = vld [vmem:[#allocation37_spill] sm:$0xff] }
 0x9c6   :  { %v6549_v15 = vsel %vm343_vm4, %v16498_v58, %v6534_v46  ;;  %9787 = vmatpush3.bf16.msra.mxu0 %v9257_v43  ;;  %v7062_v51 = vsel %vm570_vm2, %v7050_v30, %v14683_v61  ;;  %v7064_v37 = vsel %vm570_vm2, %v14752_v22, %v7050_v30  ;;  %v7340_v1 = vld [vmem:[#allocation2 + $0x3a0] sm:$0xf]  ;;  %7109 = vst [vmem:[#allocation2 + $0x300] sm:$0xff] %v9606_v24  ;;  %v15198_v61 = vld [vmem:[%s15657_s18 + $0x28] sm:$0xff]   ;;  %v16499_v22 = vld [vmem:[#allocation97_spill] sm:$0xff]  ;;  %vm6791_vm2 = vcmp.lt.s32.totalorder %v16471_v8, 121 }
 0x9c7   :  { %7110 = vst [vmem:[#allocation2 + $0x308] sm:$0xf] %v9607_v52  ;;  %7177 = vst [vmem:[#allocation2 + $0x360] sm:$0xff] %v9612_v29  ;;  %v6569_v53 = vmul.f32 %v15128_v25, %v6549_v15  ;;  %v6570_v38 = vmul.f32 %v15132_v45, %v6547_v44  ;;  %v7086_v28 = vmul.f32 %v15101_v12, %v7062_v51  ;;  %v6981_v56 = vpop.permute.xlu0 %6980  ;;  %v6536_v2 = vpop.permute.xlu1 %6535  ;;  %v15239_v18 = vld [vmem:[%s15657_s18 + $0x20] sm:$0xff]   ;;  %v16508_v11 = vld [vmem:[#allocation73_spill] sm:$0xff]  ;;  %vm6278_vm3 = vcmp.lt.s32.totalorder %v16471_v8, 9 }
 0x9c8   :  { %7178 = vst [vmem:[#allocation2 + $0x368] sm:$0xf] %v9613_v27  ;;  %v7088_v5 = vmul.f32 %v15105_v26, %v7064_v37  ;;  %v6994_v34 = vsel %vm6992_vm1, %v16500_v57, %v16499_v22  ;;  %v6926_v12 = vsel %vm6925_vm8, %v16502_v10, %v16501_v16  ;;  %v9264_v6 = vcombine.low %v7339_v60, %v7340_v1  ;;  %v16503_v26 = vld [vmem:[#allocation78_spill] sm:$0xff] }
 0x9c9   :  { %v15210_v42 = vrot.slane %v16503_v26, %v16487_v4  ;;  %v9574_v48 = vpack.c.bf16 %v6570_v38, %v6569_v53  ;;  %v9608_v59 = vpack.c.bf16 %v15093_v14, %v7086_v28  ;;  %v15217_v47 = vrot.slane %v16503_v26, %v16488_v3  ;;  %9906 = vmatpush3.bf16.msra.mxu1 %v15198_v61  ;;  %v16507_v24 = vld [vmem:[#allocation6_spill] sm:$0xff]  ;;  %v16512_v26 = vld [vmem:[#allocation39_spill] sm:$0xff] }
 0x9ca   :  { %v9609_v23 = vpack.c.bf16 %v7088_v5, %v7088_v5  ;;  %v6995_v63 = vsel %vm6992_vm1, %v6981_v56, %v14689_v36  ;;  %v6997_v32 = vsel %vm6992_vm1, %v14763_v13, %v6981_v56  ;;  %9788 = vmatprep.subr.bf16.mxu0 %v9264_v6  ;;  %v6548_v14 = vsel %vm343_vm4, %v6536_v2, %v16504_v20  ;;  %v7324_v54 = vld [vmem:[#allocation2 + $0x1a0] sm:$0xf] }
 0x9cb   :  { %v6550_v35 = vsel %vm343_vm4, %v16505_v0, %v6536_v2  ;;  %6595 = vst [vmem:[#allocation2 + $0x100] sm:$0xff] %v9574_v48  ;;  %7111 = vst [vmem:[#allocation2 + $0x320] sm:$0xff] %v9608_v59  ;;  %v7017_v41 = vmul.f32 %v15169_v9, %v6995_v63  ;;  %v7019_v36 = vmul.f32 %v15173_v33, %v6997_v32  ;;  %9907 = vmatprep.subr.bf16.mxu1 %v10314_v19  ;;  %v6467_v27 = vpop.permute.xlu0 %6466  ;;  %v6983_v46 = vpop.permute.xlu1 %6982  ;;  %v16509_v58 = vld [vmem:[#allocation54_spill] sm:$0xff]  ;;  %vm10315_vm4 = vmmov 0  }
 0x9cc   :  { %7112 = vst [vmem:[#allocation2 + $0x328] sm:$0xf] %v9609_v23  ;;  %v6572_v21 = vmul.f32 %v15128_v25, %v6550_v35  ;;  %v6573_v13 = vmul.f32 %v15132_v45, %v6548_v14  ;;  %v7021_v31 = vmul.f32 %v14956_v55, %v6994_v34  ;;  %v15243_v7 = vmul.f32 %v16506_v62, %v6926_v12  ;;  %v7322_v55 = vld [vmem:[#allocation2 + $0x160] sm:$0xf]  ;;  %v16511_v34 = vld [vmem:[#allocation56_spill] sm:$0xff] }
 0x9cd   :  { %v9256_v43 = vcombine.low %v7323_v17, %v7324_v54  ;;  %v15247_v52 = vrot.slane %v16507_v24, %v16487_v4  ;;  %v9602_v25 = vpack.c.bf16 %v15165_v49, %v7017_v41  ;;  %v9603_v45 = vpack.c.bf16 %v7019_v36, %v7019_v36  ;;  %v7337_v5 = vld [vmem:[#allocation2 + $0x340] sm:$0xf]  ;;  %9908 = vmatpush3.bf16.msra.mxu1 %v15239_v18  ;;  %v16513_v14 = vld [vmem:[#allocation48_spill] sm:$0xff] }
 0x9ce   :  { %v9576_v29 = vpack.c.bf16 %v6573_v13, %v6572_v21  ;;  %v15253_v30 = vrot.slane %v16507_v24, %v16452_v40  ;;  %v6481_v44 = vsel %vm6478_vm10, %v6467_v27, %v16508_v11  ;;  %v6483_v15 = vsel %vm6478_vm10, %v16509_v58, %v6467_v27  ;;  %v7338_v37 = vld [vmem:[#allocation2 + $0x360] sm:$0xf]  ;;  %9909 = vmatprep.subr.bf16.mxu1 %v10314_v19  ;;  %v16514_v35 = vld [vmem:[#allocation100_spill] sm:$0xff]  ;;  %v16518_v11 = vld [vmem:[#allocation99_spill] sm:$0xff] }
 0x9cf   :  { %9789 = vmatpush3.bf16.msra.mxu0 %v9256_v43  ;;  %v6996_v49 = vsel %vm6992_vm1, %v6983_v46, %v16500_v57  ;;  %v6998_v51 = vsel %vm6992_vm1, %v16499_v22, %v6983_v46  ;;  %7043 = vst [vmem:[#allocation2 + $0x2c0] sm:$0xff] %v9602_v25  ;;  %7044 = vst [vmem:[#allocation2 + $0x2c8] sm:$0xf] %v9603_v45  ;;  %v6503_v1 = vmul.f32 %v15210_v42, %v6483_v15  ;;  %v7321_v60 = vld [vmem:[#allocation2 + $0x140] sm:$0xf]  ;;  %v16510_v57 = vld [vmem:[#allocation44_spill] sm:$0xff]  ;;  %v6914_v56 = vpop.permute.xlu0 %6913  ;;  %v6469_v2 = vpop.permute.xlu1 %6468 }
 0x9d0   :  { %6597 = vst [vmem:[#allocation2 + $0x120] sm:$0xff] %v9576_v29  ;;  %v6504_v53 = vmul.f32 %v15217_v47, %v6481_v44  ;;  %v7020_v38 = vmul.f32 %v15169_v9, %v6996_v49  ;;  %v7022_v28 = vmul.f32 %v15173_v33, %v6998_v51  ;;  %v6927_v22 = vsel %vm6925_vm8, %v16511_v34, %v16510_v57  ;;  %v15284_v9 = vld [vmem:[%s15657_s18 + $0x18] sm:$0xff]   ;;  %v7335_v13 = vld [vmem:[#allocation2 + $0x300] sm:$0xf]  ;;  %v16516_v43 = vld [vmem:[#allocation55_spill] sm:$0xff] }
 0x9d1   :  { %v9263_v12 = vcombine.low %v7337_v5, %v7338_v37  ;;  %v9255_v6 = vcombine.low %v7321_v60, %v7322_v55  ;;  %v15278_v48 = vrot.slane %v16512_v26, %v16487_v4  ;;  %v15289_v63 = vrot.slane %v16512_v26, %v16488_v3  ;;  %v16517_v45 = vld [vmem:[#allocation79_spill] sm:$0xff]  ;;  %9910 = vmatpush3.bf16.msra.mxu1 %v15284_v9  ;;  %v16519_v58 = vld [vmem:[#allocation58_spill] sm:$0xff] }
 0x9d2   :  { %v9570_v33 = vpack.c.bf16 %v6504_v53, %v6503_v1  ;;  %v9604_v59 = vpack.c.bf16 %v7021_v31, %v7020_v38  ;;  %v9605_v23 = vpack.c.bf16 %v7022_v28, %v7022_v28  ;;  %v6928_v32 = vsel %vm6925_vm8, %v6914_v56, %v16502_v10  ;;  %v7336_v41 = vld [vmem:[#allocation2 + $0x320] sm:$0xf]  ;;  %v16515_v31 = vld [vmem:[#allocation75_spill] sm:$0xff]  ;;  %9911 = vmatprep.subr.bf16.mxu1 %v10314_v19 }
 0x9d3   :  { %v6930_v20 = vsel %vm6925_vm8, %v16501_v16, %v6914_v56  ;;  %9790 = vmatprep.subr.bf16.mxu0 %v9263_v12  ;;  %v6482_v0 = vsel %vm6478_vm10, %v6469_v2, %v16513_v14  ;;  %v6484_v54 = vsel %vm6478_vm10, %v16514_v35, %v6469_v2  ;;  %v6950_v36 = vmul.f32 %v15247_v52, %v6928_v32  ;;  %v6400_v46 = vpop.permute.xlu0 %6399  ;;  %v6916_v55 = vpop.permute.xlu1 %6915  ;;  %v7319_v28 = vld [vmem:[#allocation2 + $0x100] sm:$0xf]  ;;  %v16520_v5 = vld [vmem:[#allocation7_spill] sm:$0xff] }
 0x9d4   :  { %6529 = vst [vmem:[#allocation2 + $0xc0] sm:$0xff] %v9570_v33  ;;  %7045 = vst [vmem:[#allocation2 + $0x2e0] sm:$0xff] %v9604_v59  ;;  %v6952_v10 = vmul.f32 %v15253_v30, %v6930_v20  ;;  %v6506_v21 = vmul.f32 %v15210_v42, %v6484_v54  ;;  %v6507_v16 = vmul.f32 %v15217_v47, %v6482_v0  ;;  %9791 = vmatpush3.bf16.msra.mxu0 %v9255_v6  ;;  %v16523_v6 = vld [vmem:[#allocation117_spill] sm:$0xff]  ;;  %v16525_v0 = vld [vmem:[#allocation104_spill] sm:$0xff] }
 0x9d5   :  { %7046 = vst [vmem:[#allocation2 + $0x2e8] sm:$0xf] %v9605_v23  ;;  %v6954_v17 = vmul.f32 %v16506_v62, %v6927_v22  ;;  %v6859_v24 = vsel %vm6858_vm0, %v16516_v43, %v16515_v31  ;;  %v9262_v25 = vcombine.low %v7335_v13, %v7336_v41  ;;  %v15314_v29 = vrot.slane %v16517_v45, %v16487_v4  ;;  %v16522_v22 = vld [vmem:[#allocation113_spill] sm:$0xff] }
 0x9d6   :  { %v9598_v42 = vpack.c.bf16 %v15243_v7, %v6950_v36  ;;  %v9599_v27 = vpack.c.bf16 %v6952_v10, %v6952_v10  ;;  %v9572_v47 = vpack.c.bf16 %v6507_v16, %v6506_v21  ;;  %v6879_v62 = vrot.slane %v16517_v45, %v16452_v40  ;;  %v16524_v20 = vld [vmem:[#allocation61_spill] sm:$0xff]  ;;  %v7333_v16 = vld [vmem:[#allocation2 + $0x2c0] sm:$0xf]  ;;  %9917 = vmatprep.mubr.msk.bf16.mxu1 %vm10315_vm4, %v10314_v19 }
 0x9d7   :  { %v6414_v44 = vsel %vm6411_vm11, %v6400_v46, %v16518_v11  ;;  %v6416_v15 = vsel %vm6411_vm11, %v16519_v58, %v6400_v46  ;;  %9792 = vmatprep.subr.bf16.mxu0 %v9262_v25  ;;  %v6929_v7 = vsel %vm6925_vm8, %v6916_v55, %v16511_v34  ;;  %v6931_v49 = vsel %vm6925_vm8, %v16510_v57, %v6916_v55  ;;  %v7320_v51 = vld [vmem:[#allocation2 + $0x120] sm:$0xf]  ;;  %v16521_v34 = vld [vmem:[#allocation36_spill] sm:$0xff]  ;;  %v6847_v56 = vpop.permute.xlu0 %6846 }
 0x9d8   :  { %6976 = vst [vmem:[#allocation2 + $0x280] sm:$0xff] %v9598_v42  ;;  %6977 = vst [vmem:[#allocation2 + $0x288] sm:$0xf] %v9599_v27  ;;  %v6436_v37 = vmul.f32 %v15278_v48, %v6416_v15  ;;  %v6437_v1 = vmul.f32 %v15289_v63, %v6414_v44  ;;  %v6953_v53 = vmul.f32 %v15247_v52, %v6929_v7  ;;  %v6402_v52 = vpop.permute.xlu1 %6401  ;;  %v16528_v25 = vld [vmem:[#allocation74_spill] sm:$0xff]  ;;  %v16530_v44 = vld [vmem:[#allocation64_spill] sm:$0xff] }
 0x9d9   :  { %6531 = vst [vmem:[#allocation2 + $0xe0] sm:$0xff] %v9572_v47  ;;  %v6955_v38 = vmul.f32 %v15253_v30, %v6931_v49  ;;  %v6884_v60 = vmul.f32 %v16520_v5, %v6859_v24  ;;  %v6860_v57 = vsel %vm6858_vm0, %v16522_v22, %v16521_v34  ;;  %v9254_v12 = vcombine.low %v7319_v28, %v7320_v51  ;;  %v16531_v28 = vld [vmem:[#allocation63_spill] sm:$0xff] }
 0x9da   :  { %v15344_v26 = vrot.slane %v16523_v6, %v16487_v4  ;;  %v9566_v33 = vpack.c.bf16 %v6437_v1, %v6436_v37  ;;  %v9600_v59 = vpack.c.bf16 %v6954_v17, %v6953_v53  ;;  %v6361_v30 = vrot.slane %v16523_v6, %v16488_v3  ;;  %v16526_v17 = vld [vmem:[#allocation59_spill] sm:$0xff]  ;;  %8227 = vst.msk [vmem:[#allocation3] sm:$0xff] %vm8224_vm15, %v10314_v19 }
 0x9db   :  { %v9601_v23 = vpack.c.bf16 %v6955_v38, %v6955_v38  ;;  %v6861_v2 = vsel %vm6858_vm0, %v6847_v56, %v16516_v43  ;;  %v6863_v32 = vsel %vm6858_vm0, %v16515_v31, %v6847_v56  ;;  %9793 = vmatpush3.bf16.msra.mxu0 %v9254_v12  ;;  %v6415_v14 = vsel %vm6411_vm11, %v6402_v52, %v16524_v20  ;;  %v7334_v54 = vld [vmem:[#allocation2 + $0x2e0] sm:$0xf]  ;;  %v16527_v31 = vld [vmem:[#allocation33_spill] sm:$0xff]  ;;  %v6333_v46 = vpop.permute.xlu0 %6332 }
 0x9dc   :  { %v6417_v35 = vsel %vm6411_vm11, %v16525_v0, %v6402_v52  ;;  %6462 = vst [vmem:[#allocation2 + $0x80] sm:$0xff] %v9566_v33  ;;  %6978 = vst [vmem:[#allocation2 + $0x2a0] sm:$0xff] %v9600_v59  ;;  %v6883_v41 = vmul.f32 %v15314_v29, %v6861_v2  ;;  %v6885_v36 = vmul.f32 %v6879_v62, %v6863_v32  ;;  %v6849_v55 = vpop.permute.xlu1 %6848  ;;  %v7317_v38 = vld [vmem:[#allocation2 + $0xc0] sm:$0xf]  ;;  %v16535_v2 = vld [vmem:[#allocation76_spill] sm:$0xff] }
 0x9dd   :  { %6979 = vst [vmem:[#allocation2 + $0x2a8] sm:$0xf] %v9601_v23  ;;  %v6439_v10 = vmul.f32 %v15278_v48, %v6417_v35  ;;  %v6440_v21 = vmul.f32 %v15289_v63, %v6415_v14  ;;  %v6887_v13 = vmul.f32 %v16520_v5, %v6860_v57  ;;  %v6792_v43 = vsel %vm6791_vm2, %v16527_v31, %v16526_v17  ;;  %v16529_v63 = vld [vmem:[#allocation62_spill] sm:$0xff] }
 0x9de   :  { %v9261_v24 = vcombine.low %v7333_v16, %v7334_v54  ;;  %v6804_v45 = vrot.slane %v16528_v25, %v16487_v4  ;;  %v9594_v42 = vpack.c.bf16 %v6884_v60, %v6883_v41  ;;  %v9595_v27 = vpack.c.bf16 %v6885_v36, %v6885_v36  ;;  %v16532_v57 = vld [vmem:[#allocation10_spill] sm:$0xff]  ;;  %8228 = vst.msk [vmem:[#allocation3 + $0x8] sm:$0xff] %vm8224_vm15, %v10314_v19 }
 0x9df   :  { %v9568_v47 = vpack.c.bf16 %v6440_v21, %v6439_v10  ;;  %v6812_v48 = vrot.slane %v16528_v25, %v16452_v40  ;;  %v6347_v11 = vsel %vm6344_vm12, %v6333_v46, %v16529_v63  ;;  %v6349_v58 = vsel %vm6344_vm12, %v16530_v44, %v6333_v46  ;;  %v6780_v59 = vpop.permute.xlu0 %6779  ;;  %v6285_v41 = vld [vmem:[%s15654_s16] ss:$8 sm:$0x7]  ;;  %s10319_s16 = smov 123  }
 0x9e0   :  { %9794 = vmatprep.subr.bf16.mxu0 %v9261_v24  ;;  %v6862_v15 = vsel %vm6858_vm0, %v6849_v55, %v16522_v22  ;;  %v6864_v7 = vsel %vm6858_vm0, %v16521_v34, %v6849_v55  ;;  %v7318_v49 = vld [vmem:[#allocation2 + $0xe0] sm:$0xf]  ;;  %6909 = vst [vmem:[#allocation2 + $0x240] sm:$0xff] %v9594_v42  ;;  %6910 = vst [vmem:[#allocation2 + $0x248] sm:$0xf] %v9595_v27  ;;  %v6369_v51 = vmul.f32 %v15344_v26, %v6349_v58  ;;  %v16533_v22 = vld [vmem:[#allocation93_spill] sm:$0xff]  ;;  %v6335_v23 = vpop.permute.xlu1 %6334 }
 0x9e1   :  { %6464 = vst [vmem:[#allocation2 + $0xa0] sm:$0xff] %v9568_v47  ;;  %v6370_v37 = vmul.f32 %v6361_v30, %v6347_v11  ;;  %v6886_v1 = vmul.f32 %v15314_v29, %v6862_v15  ;;  %v6888_v53 = vmul.f32 %v6879_v62, %v6864_v7  ;;  %v6817_v5 = vmul.f32 %v16531_v28, %v6792_v43  ;;  %v16534_v62 = vld [vmem:[#allocation112_spill] sm:$0xff]  ;;  %v7331_v36 = vld [vmem:[#allocation2 + $0x280] sm:$0xf]  ;;  %v16536_v63 = vld [vmem:[#allocation103_spill] sm:$0xff] }
 0x9e2   :  { %v9253_v60 = vcombine.low %v7317_v38, %v7318_v49  ;;  %v6793_v12 = vsel %vm6791_vm2, %v16533_v22, %v16532_v57  ;;  %v6794_v56 = vsel %vm6791_vm2, %v6780_v59, %v16527_v31  ;;  %v6796_v29 = vsel %vm6791_vm2, %v16526_v17, %v6780_v59 }
 0x9e3   :  { %v9562_v34 = vpack.c.bf16 %v6370_v37, %v6369_v51  ;;  %v9596_v6 = vpack.c.bf16 %v6887_v13, %v6886_v1  ;;  %v9597_v33 = vpack.c.bf16 %v6888_v53, %v6888_v53  ;;  %v6348_v52 = vsel %vm6344_vm12, %v6335_v23, %v16534_v62  ;;  %v7332_v20 = vld [vmem:[#allocation2 + $0x2a0] sm:$0xf]  ;;  %v6267_v31 = vpop.permute.xlu0 %6266  ;;  %v16537_v53 = vld [vmem:[#allocation52_spill] sm:$0xff] }
 0x9e4   :  { %9795 = vmatpush3.bf16.msra.mxu0 %v9253_v60  ;;  %v6350_v32 = vsel %vm6344_vm12, %v16535_v2, %v6335_v23  ;;  %v6816_v14 = vmul.f32 %v6804_v45, %v6794_v56  ;;  %v6818_v0 = vmul.f32 %v6812_v48, %v6796_v29  ;;  %v6373_v54 = vmul.f32 %v6361_v30, %v6348_v52  ;;  %v6782_v43 = vpop.permute.xlu1 %6781  ;;  %v7315_v42 = vld [vmem:[#allocation2 + $0x80] sm:$0xf] }
 0x9e5   :  { %6395 = vst [vmem:[#allocation2 + $0x40] sm:$0xff] %v9562_v34  ;;  %6911 = vst [vmem:[#allocation2 + $0x260] sm:$0xff] %v9596_v6  ;;  %v6372_v35 = vmul.f32 %v15344_v26, %v6350_v32  ;;  %v6820_v10 = vmul.f32 %v16531_v28, %v6793_v12  ;;  %v9260_v21 = vcombine.low %v7331_v36, %v7332_v20  ;;  %v7691_v32 = vld [vmem:[#allocation2 + $0x3e4] sm:$0xf] }
 0x9e6   :  { %6912 = vst [vmem:[#allocation2 + $0x268] sm:$0xf] %v9597_v33  ;;  %v9590_v16 = vpack.c.bf16 %v6817_v5, %v6816_v14  ;;  %v9591_v13 = vpack.c.bf16 %v6818_v0, %v6818_v0  ;;  %v6294_v24 = vrot.slane %v6285_v41, %v16488_v3  ;;  %v6795_v26 = vsel %vm6791_vm2, %v6782_v43, %v16533_v22  ;;  %v7690_v0 = vld [vmem:[#allocation2 + $0x3c4] sm:$0xf] }
 0x9e7   :  { %v9564_v17 = vpack.c.bf16 %v6373_v54, %v6372_v35  ;;  %9796 = vmatprep.subr.bf16.mxu0 %v9260_v21  ;;  %v6797_v30 = vsel %vm6791_vm2, %v16532_v57, %v6782_v43  ;;  %v6290_v25 = vrot.slane %v6285_v41, %v16487_v4  ;;  %v6819_v47 = vmul.f32 %v6804_v45, %v6795_v26  ;;  %v6275_v15 = vpop.permute.xlu0 %6274  ;;  %v10042_v54 = vld [vmem:[%s15655_s6] ss:$8 sps:$4 sm:$0xff]   ;;  %v7689_v36 = vld [vmem:[#allocation2 + $0x3a4] sm:$0xf] }
 0x9e8   :  { %v7316_v27 = vld [vmem:[#allocation2 + $0xa0] sm:$0xf]  ;;  %6842 = vst [vmem:[#allocation2 + $0x200] sm:$0xff] %v9590_v16  ;;  %6843 = vst [vmem:[#allocation2 + $0x208] sm:$0xf] %v9591_v13  ;;  %v6821_v46 = vmul.f32 %v6812_v48, %v6797_v30  ;;  %v6298_v3 = vrot.slane %v6285_v41, %v16452_v40  ;;  %v6281_v11 = vsel %vm6278_vm3, %v6267_v31, %v16536_v63  ;;  %v6269_v7 = vpop.permute.xlu1 %6268 }
 0x9e9   :  { %6397 = vst [vmem:[#allocation2 + $0x60] sm:$0xff] %v9564_v17  ;;  %v9252_v55 = vcombine.low %v7315_v42, %v7316_v27  ;;  %v9592_v44 = vpack.c.bf16 %v6820_v10, %v6819_v47  ;;  %v6279_v4 = vsel %vm6278_vm3, %v16536_v63, %v6275_v15  ;;  %v6283_v45 = vsel %vm6278_vm3, %v6275_v15, %v6267_v31  ;;  %v7329_v48 = vld [vmem:[#allocation2 + $0x240] sm:$0xf]  ;;  %v7675_v41 = vld [vmem:[#allocation2 + $0x1e4] sm:$0xf] }
 0x9ea   :  { %v9593_v58 = vpack.c.bf16 %v6821_v46, %v6821_v46  ;;  %v6303_v40 = vmul.f32 %v6294_v24, %v6281_v11  ;;  %v6302_v51 = vmul.f32 %v6290_v25, %v6283_v45  ;;  %v6304_v37 = vmul.f32 %v6298_v3, %v6279_v4  ;;  %v15440_v10 = vld [vmem:[%s15656_s11 + $0x4] ss:$8 sps:$4 sm:$0xff]  }
 0x9eb   :  { %9797 = vmatpush3.bf16.msra.mxu0 %v9252_v55  ;;  %6844 = vst [vmem:[#allocation2 + $0x220] sm:$0xff] %v9592_v44  ;;  %v6282_v38 = vsel %vm6278_vm3, %v6269_v7, %v16537_v53  ;;  %v9291_v35 = vcombine.low %v7690_v0, %v7691_v32  ;;  %v7674_v21 = vld [vmem:[#allocation2 + $0x1c4] sm:$0xf]  ;;  %v7912_v32 = vld [vmem:[#allocation2 + $0x3a8] sm:$0xf] }
 0x9ec   :  { %v7330_v49 = vld [vmem:[#allocation2 + $0x260] sm:$0xf]  ;;  %6845 = vst [vmem:[#allocation2 + $0x228] sm:$0xf] %v9593_v58  ;;  %v9558_v28 = vpack.c.bf16 %v6303_v40, %v6302_v51  ;;  %v9559_v5 = vpack.c.bf16 %v6304_v37, %v6304_v37  ;;  %v6277_v60 = vpop.permute.xlu1 %6276  ;;  %v6306_v6 = vmul.f32 %v6294_v24, %v6282_v38  ;;  %v9283_v16 = vcombine.low %v7674_v21, %v7675_v41  ;;  %v7688_v13 = vld [vmem:[#allocation2 + $0x384] sm:$0xf] }
 0x9ed   :  { %v9259_v1 = vcombine.low %v7329_v48, %v7330_v49  ;;  %v6280_v57 = vsel %vm6278_vm3, %v16537_v53, %v6277_v60  ;;  %v6284_v22 = vsel %vm6278_vm3, %v6277_v60, %v6269_v7  ;;  %v7313_v12 = vld [vmem:[#allocation2 + $0x40] sm:$0xf]  ;;  %v9290_v17 = vcombine.low %v7688_v13, %v7689_v36  ;;  %v7673_v31 = vld [vmem:[#allocation2 + $0x1a4] sm:$0xf]  ;;  %v7895_v41 = vld [vmem:[#allocation2 + $0x188] sm:$0xf] }
 0x9ee   :  { %6328 = vst [vmem:[#allocation2] sm:$0xff] %v9558_v28  ;;  %6329 = vst [vmem:[#allocation2 + $0x8] sm:$0xf] %v9559_v5  ;;  %v6305_v33 = vmul.f32 %v6290_v25, %v6284_v22  ;;  %v6307_v59 = vmul.f32 %v6298_v3, %v6280_v57  ;;  %v7687_v43 = vld [vmem:[#allocation2 + $0x364] sm:$0xf] }
 0x9ef   :  { %9798 = vmatprep.subr.bf16.mxu0 %v9259_v1  ;;  %v7327_v62 = vld [vmem:[#allocation2 + $0x200] sm:$0xf]  ;;  %v7672_v24 = vld [vmem:[#allocation2 + $0x184] sm:$0xf]  ;;  %v7909_v21 = vld [vmem:[#allocation2 + $0x348] sm:$0xf] }
 0x9f0   :  { %v7314_v34 = vld [vmem:[#allocation2 + $0x60] sm:$0xf]  ;;  %v9560_v56 = vpack.c.bf16 %v6306_v6, %v6305_v33  ;;  %v9561_v29 = vpack.c.bf16 %v6307_v59, %v6307_v59  ;;  %v9282_v26 = vcombine.low %v7672_v24, %v7673_v31  ;;  %v7686_v30 = vld [vmem:[#allocation2 + $0x344] sm:$0xf]  ;;  %v7914_v59 = vld [vmem:[#allocation2 + $0x3e8] sm:$0xf] }
 0x9f1   :  { %v9251_v23 = vcombine.low %v7313_v12, %v7314_v34  ;;  %v9289_v25 = vcombine.low %v7686_v30, %v7687_v43  ;;  %v7671_v42 = vld [vmem:[#allocation2 + $0x164] sm:$0xf]  ;;  %v7894_v13 = vld [vmem:[#allocation2 + $0x168] sm:$0xf] }
 0x9f2   :  { %v7328_v52 = vld [vmem:[#allocation2 + $0x220] sm:$0xf]  ;;  %6330 = vst [vmem:[#allocation2 + $0x20] sm:$0xff] %v9560_v56  ;;  %6331 = vst [vmem:[#allocation2 + $0x28] sm:$0xf] %v9561_v29 }
 0x9f3   :  { %9799 = vmatpush3.bf16.msra.mxu0 %v9251_v23  ;;  %v9258_v2 = vcombine.low %v7327_v62, %v7328_v52  ;;  %v7685_v27 = vld [vmem:[#allocation2 + $0x324] sm:$0xf]  ;;  %v7913_v29 = vld [vmem:[#allocation2 + $0x3c8] sm:$0xf] }
 0x9f4   :  { %v7670_v47 = vld [vmem:[#allocation2 + $0x144] sm:$0xf]  ;;  %v9307_v62 = vcombine.low %v7913_v29, %v7914_v59  ;;  %v15446_v52 = vld [vmem:[%s15656_s11] ss:$8 sps:$4 sm:$0xff]   ;;  %s16539_s11 = sld [smem:[#allocation125_spill]] }
 0x9f5   :  { %9800 = vmatprep.subr.bf16.mxu0 %v9258_v2  ;;  %v7311_v8 = vld [vmem:[#allocation2] sm:$0xf]  ;;  %v9281_v46 = vcombine.low %v7670_v47, %v7671_v42  ;;  %v7684_v3 = vld [vmem:[#allocation2 + $0x304] sm:$0xf]  ;;  %v7898_v2 = vld [vmem:[#allocation2 + $0x1e8] sm:$0xf] }
 0x9f6   :  { %v9288_v55 = vcombine.low %v7684_v3, %v7685_v27  ;;  %v7669_v63 = vld [vmem:[#allocation2 + $0x124] sm:$0xf]  ;;  %v7893_v31 = vld [vmem:[#allocation2 + $0x148] sm:$0xf] }
 0x9f7   :  { %v7683_v11 = vld [vmem:[#allocation2 + $0x2e4] sm:$0xf]  ;;  %v9297_v43 = vcombine.low %v7893_v31, %v7894_v13  ;;  %v7907_v24 = vld [vmem:[#allocation2 + $0x308] sm:$0xf] }
 0x9f8   :  { %v7668_v44 = vld [vmem:[#allocation2 + $0x104] sm:$0xf]  ;;  %v7892_v30 = vld [vmem:[#allocation2 + $0x128] sm:$0xf] }
 0x9f9   :  { %v7312_v20 = vld [vmem:[#allocation2 + $0x20] sm:$0xf]  ;;  %v9280_v58 = vcombine.low %v7668_v44, %v7669_v63  ;;  %v7682_v15 = vld [vmem:[#allocation2 + $0x2c4] sm:$0xf]  ;;  %v7891_v42 = vld [vmem:[#allocation2 + $0x108] sm:$0xf] }
 0x9fa   :  { %v9250_v14 = vcombine.low %v7311_v8, %v7312_v20  ;;  %v9287_v7 = vcombine.low %v7682_v15, %v7683_v11  ;;  %v7667_v4 = vld [vmem:[#allocation2 + $0xe4] sm:$0xf]  ;;  %v7897_v8 = vld [vmem:[#allocation2 + $0x1c8] sm:$0xf]  ;;  %v9296_v27 = vcombine.low %v7891_v42, %v7892_v30 }
 0x9fb   :  { %v7681_v45 = vld [vmem:[#allocation2 + $0x2a4] sm:$0xf]  ;;  %v9299_v20 = vcombine.low %v7897_v8, %v7898_v2  ;;  %v7904_v3 = vld [vmem:[#allocation2 + $0x2a8] sm:$0xf] }
 0x9fc   :  { %9801 = vmatpush3.bf16.msra.mxu0 %v9250_v14  ;;  %v7666_v48 = vld [vmem:[#allocation2 + $0xc4] sm:$0xf]  ;;  %v7911_v14 = vld [vmem:[#allocation2 + $0x388] sm:$0xf] }
 0x9fd   :  { %9817 = vmatprep.subr.bf16.mxu0 %v9291_v35  ;;  %v9279_v49 = vcombine.low %v7666_v48, %v7667_v4  ;;  %v7680_v40 = vld [vmem:[#allocation2 + $0x284] sm:$0xf]  ;;  %v9306_v0 = vcombine.low %v7911_v14, %v7912_v32  ;;  %v7896_v35 = vld [vmem:[#allocation2 + $0x1a8] sm:$0xf] }
 0x9fe   :  { %v9286_v51 = vcombine.low %v7680_v40, %v7681_v45  ;;  %v7665_v37 = vld [vmem:[#allocation2 + $0xa4] sm:$0xf]  ;;  %v9298_v36 = vcombine.low %v7895_v41, %v7896_v35  ;;  %v7903_v11 = vld [vmem:[#allocation2 + $0x288] sm:$0xf] }
 0x9ff   :  { %7484 = vmatmul.mubr.bf16.vlgmr.msra.gmra.mxu0 %v10042_v54  ;;  %v7679_v1 = vld [vmem:[#allocation2 + $0x264] sm:$0xf]  ;;  %v7910_v54 = vld [vmem:[#allocation2 + $0x368] sm:$0xf]  ;;  %v9302_v44 = vcombine.low %v7903_v11, %v7904_v3 }
 0xa00   :  { %9818 = vmatpush3.bf16.msra.mxu0 %v9283_v16  ;;  %7832 = vmatprep.mubr.bf16.mxu0 %v15440_v10  ;;  %v7664_v53 = vld [vmem:[#allocation2 + $0x84] sm:$0xf]  ;;  %v9305_v16 = vcombine.low %v7909_v21, %v7910_v54  ;;  %v7902_v15 = vld [vmem:[#allocation2 + $0x268] sm:$0xf] }
 0xa01   :  { %9819 = vmatprep.subr.bf16.mxu0 %v9290_v17  ;;  %v9278_v38 = vcombine.low %v7664_v53, %v7665_v37  ;;  %v7678_v28 = vld [vmem:[#allocation2 + $0x244] sm:$0xf]  ;;  %v7908_v17 = vld [vmem:[#allocation2 + $0x328] sm:$0xf] }
 0xa02   :  { %v9285_v5 = vcombine.low %v7678_v28, %v7679_v1  ;;  %v7663_v60 = vld [vmem:[#allocation2 + $0x64] sm:$0xf]  ;;  %v7901_v45 = vld [vmem:[#allocation2 + $0x248] sm:$0xf] }
 0xa03   :  { %v7677_v57 = vld [vmem:[#allocation2 + $0x224] sm:$0xf]  ;;  %v9301_v48 = vcombine.low %v7901_v45, %v7902_v15  ;;  %v7900_v40 = vld [vmem:[#allocation2 + $0x228] sm:$0xf] }
 0xa04   :  { %9820 = vmatpush3.bf16.msra.mxu0 %v9282_v26  ;;  %v7662_v22 = vld [vmem:[#allocation2 + $0x44] sm:$0xf]  ;;  %v9304_v26 = vcombine.low %v7907_v24, %v7908_v17  ;;  %v7899_v1 = vld [vmem:[#allocation2 + $0x208] sm:$0xf] }
 0xa05   :  { %9821 = vmatprep.subr.bf16.mxu0 %v9289_v25  ;;  %v9277_v12 = vcombine.low %v7662_v22, %v7663_v60  ;;  %v7676_v34 = vld [vmem:[#allocation2 + $0x204] sm:$0xf]  ;;  %v7906_v25 = vld [vmem:[#allocation2 + $0x2e8] sm:$0xf]  ;;  %v9300_v53 = vcombine.low %v7899_v1, %v7900_v40  ;;  %v15453_v60 = vld [vmem:[%s15657_s18 + $0x10] sm:$0xff]  }
 0xa06   :  { %v9284_v6 = vcombine.low %v7676_v34, %v7677_v57  ;;  %v7661_v33 = vld [vmem:[#allocation2 + $0x24] sm:$0xf]  ;;  %v7883_v28 = vld [vmem:[#allocation2 + $0x8] sm:$0xf]  ;;  %9912 = vmatpush3.bf16.msra.mxu1 %v15453_v60 }
 0xa07   :  { %v7660_v23 = vld [vmem:[#allocation2 + $0x4] sm:$0xf]  ;;  %9913 = vmatprep.subr.bf16.mxu1 %v10314_v19  ;;  %v15461_v57 = vld [vmem:[%s15657_s18 + $0x8] sm:$0xff]  }
 0xa08   :  { %9822 = vmatpush3.bf16.msra.mxu0 %v9281_v46  ;;  %v9276_v56 = vcombine.low %v7660_v23, %v7661_v33  ;;  %v7890_v46 = vld [vmem:[#allocation2 + $0xe8] sm:$0xf]  ;;  %v15468_v22 = vld [vmem:[%s15657_s18] sm:$0xff]  }
 0xa09   :  { %9823 = vmatprep.subr.bf16.mxu0 %v9288_v55  ;;  %v7889_v55 = vld [vmem:[#allocation2 + $0xc8] sm:$0xf]  ;;  %v7600_v14 = vld [vmem:[%s15659_s8] sm:$0xff] }
 0xa0a   :  { %v9295_v63 = vcombine.low %v7889_v55, %v7890_v46  ;;  %9914 = vmatpush3.bf16.msra.mxu1 %v15461_v57  ;;  %v7601_v35 = vld [vmem:[%s15659_s8 + $0x8] sm:$0xff] }
 0xa0b   :  { %9915 = vmatprep.subr.bf16.mxu1 %v10314_v19  ;;  %v7599_v3 = vld [vmem:[%s15658_s7 + $0x8] sm:$0xff] }
 0xa0c   :  { %9824 = vmatpush3.bf16.msra.mxu0 %v9280_v58  ;;  %v7888_v58 = vld [vmem:[#allocation2 + $0xa8] sm:$0xf] }
 0xa0d   :  { %9825 = vmatprep.subr.bf16.mxu0 %v9287_v7  ;;  %v7887_v7 = vld [vmem:[#allocation2 + $0x88] sm:$0xf] }
 0xa0e   :  { %v9294_v4 = vcombine.low %v7887_v7, %v7888_v58  ;;  %9916 = vmatpush3.bf16.msra.mxu1 %v15468_v22 }
 0xa0f   :  { %9921 = vmatprep.subr.bf16.mxu1 %v10314_v19 }
 0xa10   :  { %9826 = vmatpush3.bf16.msra.mxu0 %v9279_v49  ;;  %v7886_v49 = vld [vmem:[#allocation2 + $0x68] sm:$0xf] }
 0xa11   :  { %9827 = vmatprep.subr.bf16.mxu0 %v9286_v51  ;;  %v7885_v51 = vld [vmem:[#allocation2 + $0x48] sm:$0xf] }
 0xa12   :  { %v9293_v37 = vcombine.low %v7885_v51, %v7886_v49 }
 0xa14   :  { %9828 = vmatpush3.bf16.msra.mxu0 %v9278_v38  ;;  %v7884_v38 = vld [vmem:[#allocation2 + $0x28] sm:$0xf] }
 0xa15   :  { %9829 = vmatprep.subr.bf16.mxu0 %v9285_v5  ;;  %v9292_v5 = vcombine.low %v7883_v28, %v7884_v38 }
 0xa18   :  { %9830 = vmatpush3.bf16.msra.mxu0 %v9277_v12 }
 0xa19   :  { %9831 = vmatprep.subr.bf16.mxu0 %v9284_v6 }
 0xa1c   :  { %9832 = vmatpush3.bf16.msra.mxu0 %v9276_v56 }
 0xa1d   :  { %9848 = vmatprep.subr.bf16.mxu0 %v9307_v62 }
 0xa1f   :  { %7833 = vmatmul.mubr.bf16.vlgmr.msra.gmra.mxu0 %v15446_v52 }
 0xa20   :  { %9849 = vmatpush3.bf16.msra.mxu0 %v9299_v20  ;;  %8043 = vmatprep.mubr.bf16.mxu0 %v15440_v10  ;;  %v7905_v10 = vld [vmem:[#allocation2 + $0x2c8] sm:$0xf]  ;;  %v7598_v20 = vld [vmem:[%s15658_s7] sm:$0xff]  ;;  %s10316_s7 = smov 114  }
 0xa21   :  { %9850 = vmatprep.subr.bf16.mxu0 %v9306_v0  ;;  %v9303_v47 = vcombine.low %v7905_v10, %v7906_v25 }
 0xa24   :  { %9851 = vmatpush3.bf16.msra.mxu0 %v9298_v36 }
 0xa25   :  { %9852 = vmatprep.subr.bf16.mxu0 %v9305_v16 }
 0xa28   :  { %9853 = vmatpush3.bf16.msra.mxu0 %v9297_v43 }
 0xa29   :  { %9854 = vmatprep.subr.bf16.mxu0 %v9304_v26 }
 0xa2c   :  { %9855 = vmatpush3.bf16.msra.mxu0 %v9296_v27 }
 0xa2d   :  { %9856 = vmatprep.subr.bf16.mxu0 %v9303_v47 }
 0xa30   :  { %9857 = vmatpush3.bf16.msra.mxu0 %v9295_v63 }
 0xa31   :  { %9858 = vmatprep.subr.bf16.mxu0 %v9302_v44 }
 0xa34   :  { %9859 = vmatpush3.bf16.msra.mxu0 %v9294_v4 }
 0xa35   :  { %9860 = vmatprep.subr.bf16.mxu0 %v9301_v48 }
 0xa38   :  { %9861 = vmatpush3.bf16.msra.mxu0 %v9293_v37 }
 0xa39   :  { %9862 = vmatprep.subr.bf16.mxu0 %v9300_v53 }
 0xa3c   :  { %9863 = vmatpush3.bf16.msra.mxu0 %v9292_v5 }
 0xa3f   :  { %8044 = vmatmul.mubr.bf16.vlgmr.msra.gmra.mxu0 %v15446_v52 }
 0xabf   :  { %v9802_v12 = vpop.f32.mrf.mxu0 }
 0xac1   :  { %v9803_v34 = vpop.f32.mrf.mxu0 }
 0xac2   :  { %v9804_v59 = vadd.f32 %v9803_v34, %v9802_v12 }
 0xac3   :  { %v9805_v6 = vpop.f32.mrf.mxu0 }
 0xac5   :  { %v9806_v33 = vpop.f32.mrf.mxu0 }
 0xac6   :  { %v9807_v23 = vadd.f32 %v9806_v33, %v9805_v6 }
 0xac8   :  { %v7508_v56 = vpack.c.bf16 %v9807_v23, %v9804_v59 }
 0xaca   :  { %9918 = vmatmul.mubr.bf16.vlgmr.msra.gmra.mxu1 %v7508_v56 }
 0xacb   :  { %9922 = vmatpush3.bf16.msra.mxu1 %v15137_v50  ;;  %9937 = vmatprep.mubr.msk.bf16.mxu1 %vm10315_vm4, %v10314_v19 }
 0xacc   :  { %9923 = vmatprep.subr.bf16.mxu1 %v10314_v19 }
 0xacf   :  { %9924 = vmatpush3.bf16.msra.mxu1 %v15162_v39 }
 0xad0   :  { %9925 = vmatprep.subr.bf16.mxu1 %v10314_v19 }
 0xad3   :  { %9926 = vmatpush3.bf16.msra.mxu1 %v15198_v61 }
 0xad4   :  { %9927 = vmatprep.subr.bf16.mxu1 %v10314_v19 }
 0xad7   :  { %9928 = vmatpush3.bf16.msra.mxu1 %v15239_v18 }
 0xad8   :  { %9929 = vmatprep.subr.bf16.mxu1 %v10314_v19 }
 0xadb   :  { %9930 = vmatpush3.bf16.msra.mxu1 %v15284_v9 }
 0xadc   :  { %9931 = vmatprep.subr.bf16.mxu1 %v10314_v19 }
 0xadf   :  { %9932 = vmatpush3.bf16.msra.mxu1 %v15453_v60  ;;  %v9833_v0 = vpop.f32.mrf.mxu0 }
 0xae0   :  { %9933 = vmatprep.subr.bf16.mxu1 %v10314_v19 }
 0xae1   :  { %v9834_v54 = vpop.f32.mrf.mxu0 }
 0xae2   :  { %v9835_v36 = vadd.f32 %v9834_v54, %v9833_v0 }
 0xae3   :  { %9934 = vmatpush3.bf16.msra.mxu1 %v15461_v57  ;;  %v9836_v41 = vpop.f32.mrf.mxu0 }
 0xae4   :  { %9935 = vmatprep.subr.bf16.mxu1 %v10314_v19 }
 0xae5   :  { %v9837_v21 = vpop.f32.mrf.mxu0 }
 0xae6   :  { %v9838_v16 = vadd.f32 %v9837_v21, %v9836_v41 }
 0xae7   :  { %9936 = vmatpush3.bf16.msra.mxu1 %v15468_v22 }
 0xae8   :  { %9941 = vmatprep.subr.bf16.mxu1 %v10314_v19  ;;  %v7841_v13 = vpack.c.bf16 %v9838_v16, %v9835_v36 }
 0xaea   :  { %9938 = vmatmul.mubr.bf16.vlgmr.msra.gmra.mxu1 %v7841_v13 }
 0xaeb   :  { %9942 = vmatpush3.bf16.msra.mxu1 %v15137_v50  ;;  %9957 = vmatprep.mubr.msk.bf16.mxu1 %vm10315_vm4, %v10314_v19 }
 0xaec   :  { %9943 = vmatprep.subr.bf16.mxu1 %v10314_v19 }
 0xaef   :  { %9944 = vmatpush3.bf16.msra.mxu1 %v15162_v39 }
 0xaf0   :  { %9945 = vmatprep.subr.bf16.mxu1 %v10314_v19 }
 0xaf3   :  { %9946 = vmatpush3.bf16.msra.mxu1 %v15198_v61 }
 0xaf4   :  { %9947 = vmatprep.subr.bf16.mxu1 %v10314_v19 }
 0xaf7   :  { %9948 = vmatpush3.bf16.msra.mxu1 %v15239_v18 }
 0xaf8   :  { %9949 = vmatprep.subr.bf16.mxu1 %v10314_v19 }
 0xafb   :  { %9950 = vmatpush3.bf16.msra.mxu1 %v15284_v9 }
 0xafc   :  { %9951 = vmatprep.subr.bf16.mxu1 %v10314_v19 }
 0xaff   :  { %v9864_v17 = vpop.f32.mrf.mxu0  ;;  %9952 = vmatpush3.bf16.msra.mxu1 %v15453_v60 }
 0xb00   :  { %9953 = vmatprep.subr.bf16.mxu1 %v10314_v19 }
 0xb01   :  { %v9865_v31 = vpop.f32.mrf.mxu0 }
 0xb02   :  { %v9866_v43 = vadd.f32 %v9865_v31, %v9864_v17 }
 0xb03   :  { %v9867_v50 = vpop.f32.mrf.mxu0  ;;  %9954 = vmatpush3.bf16.msra.mxu1 %v15461_v57 }
 0xb04   :  { %9955 = vmatprep.subr.bf16.mxu1 %v10314_v19 }
 0xb05   :  { %v9868_v39 = vpop.f32.mrf.mxu0 }
 0xb06   :  { %v9869_v61 = vadd.f32 %v9868_v39, %v9867_v50 }
 0xb07   :  { %9956 = vmatpush3.bf16.msra.mxu1 %v15468_v22 }
 0xb08   :  { %v8052_v18 = vpack.c.bf16 %v9869_v61, %v9866_v43 }
 0xb0a   :  { %9958 = vmatmul.mubr.bf16.vlgmr.msra.gmra.mxu1 %v8052_v18 }
 0xb8a   :  { %v7591_v29 = vpop.f32.mrf.mxu1 }
 0xb8b   :  { %v7603_v62 = vsel %vm7602_vm9, %v7591_v29, 0.0 }
 0xb8c   :  { %7604 = vadd.xlane.f32.xlu0 %v7603_v62  ;;  %v9919_v52 = vpop.f32.mrf.mxu1 }
 0xb8e   :  { %v7594_v2 = vpop.f32.mrf.mxu1 }
 0xb8f   :  { %v7606_v32 = vsel %vm7602_vm9, %v7594_v2, 0.0 }
 0xb90   :  { %7607 = vadd.xlane.f32.xlu1 %v7606_v32  ;;  %v9920_v8 = vpop.f32.mrf.mxu1 }
 0xba1   :  { %7632 = vperm.xlu1 %9996, %v7598_v20  }
 0xba5   :  { %7644 = vperm.xlu1 %9996, %v7600_v14  }
 0xba9   :  { %7649 = vperm.xlu1 %9996, %v7601_v35  }
 0xbaa   :  { %v15529_v55 = vpop.f32.mrf.mxu1 }
 0xbab   :  { %v8098_v8 = vsel %vm7602_vm9, %v15529_v55, 0.0 }
 0xbac   :  { %v9939_v63 = vpop.f32.mrf.mxu1 }
 0xbae   :  { %v15531_v11 = vpop.f32.mrf.mxu1 }
 0xbaf   :  { %v8101_v20 = vsel %vm7602_vm9, %v15531_v11, 0.0 }
 0xbb0   :  { %v9940_v44 = vpop.f32.mrf.mxu1 }
 0xbca   :  { %v15533_v58 = vpop.f32.mrf.mxu1 }
 0xbcb   :  { %v8160_v32 = vsel %vm7602_vm9, %v15533_v58, 0.0 }
 0xbcc   :  { %v9959_v15 = vpop.f32.mrf.mxu1 }
 0xbce   :  { %v15535_v7 = vpop.f32.mrf.mxu1 }
 0xbcf   :  { %v8163_v14 = vsel %vm7602_vm9, %v15535_v7, 0.0 }
 0xbd0   :  { %v9960_v4 = vpop.f32.mrf.mxu1 }
 0xc15   :  { %v7605_v24 = vpop.xlane.xlu0 %7604 }
 0xc16   :  { %v7610_v9 = vmul.f32 0.03125, %v7605_v24 }
 0xc18   :  { %v7612_v26 = vsub.f32 %v7591_v29, %v7610_v9 }
 0xc19   :  { %v7608_v30 = vpop.xlane.xlu1 %7607 }
 0xc1a   :  { %v7611_v25 = vmul.f32 0.03125, %v7608_v30  ;;  %v7614_v42 = vmul.f32 %v7612_v26, %v7612_v26 }
 0xc1c   :  { %v7613_v27 = vsub.f32 %v7594_v2, %v7611_v25  ;;  %v7616_v10 = vsel %vm7602_vm9, %v7614_v42, 0.0 }
 0xc1d   :  { %7617 = vadd.xlane.f32.xlu0 %v7616_v10  ;;  %v7633_v19 = vpop.permute.xlu1 %7632 }
 0xc1e   :  { %v7615_v47 = vmul.f32 %v7613_v27, %v7613_v27 }
 0xc20   :  { %v7619_v46 = vsel %vm7602_vm9, %v7615_v47, 0.0 }
 0xc21   :  { %7620 = vadd.xlane.f32.xlu0 %v7619_v46  ;;  %v7645_v38 = vpop.permute.xlu1 %7644 }
 0xc25   :  { %v7650_v6 = vpop.permute.xlu1 %7649 }
 0xc37   :  { %7637 = vperm.xlu0 %9997, %v7599_v3  }
 0xca6   :  { %v7618_v45 = vpop.xlane.xlu0 %7617 }
 0xca7   :  { %v7622_v48 = vmul.f32 0.03125, %v7618_v45 }
 0xca9   :  { %v7624_v49 = vadd.f32 1e-05, %v7622_v48 }
 0xcaa   :  { %v7621_v40 = vpop.xlane.xlu0 %7620 }
 0xcab   :  { %10063 = vrsqrt.f32 %v7624_v49  ;;  %v7623_v51 = vmul.f32 0.03125, %v7621_v40 }
 0xcad   :  { %v7625_v37 = vadd.f32 1e-05, %v7623_v51 }
 0xcaf   :  { %10065 = vrsqrt.f32 %v7625_v37 }
 0xcb2   :  { %v7638_v22 = vpop.permute.xlu0 %7637 }
 0xcb8   :  { %v10064_v1 = vpop.eup %10063 }
 0xcb9   :  { %v7628_v53 = vmul.f32 %v10064_v1, %v7612_v26 }
 0xcbb   :  { %v7640_v28 = vmul.f32 %v7633_v19, %v7628_v53 }
 0xcbc   :  { %v10066_v5 = vpop.eup %10065 }
 0xcbd   :  { %v7652_v60 = vadd.f32 %v7645_v38, %v7640_v28  ;;  %v7629_v57 = vmul.f32 %v10066_v5, %v7613_v27 }
 0xcbf   :  { %vm7654_vm5 = vcmp.gt.f32.partialorder %v7652_v60, 0.0  ;;  %v7656_v12 = vmul.f32 0.2, %v7652_v60  ;;  %v7641_v34 = vmul.f32 %v7638_v22, %v7629_v57 }
 0xcc1   :  { %v7653_v33 = vadd.f32 %v7650_v6, %v7641_v34  ;;  %v7658_v59 = vsel %vm7654_vm5, %v7652_v60, %v7656_v12 }
 0xcc2   :  { %8229 = vst.msk [vmem:[#allocation3] sm:$0xff] %vm7602_vm9, %v7658_v59 }
 0xcc3   :  { %vm7655_vm6 = vcmp.gt.f32.partialorder %v7653_v33, 0.0  ;;  %v7657_v23 = vmul.f32 0.2, %v7653_v33 }
 0xcc5   :  { %v7659_v56 = vsel %vm7655_vm6, %v7653_v33, %v7657_v23 }
 0xcc6   :  { %8230 = vst.msk [vmem:[#allocation3 + $0x8] sm:$0xff] %vm7602_vm9, %v7659_v56 }
 0xcc9   :  { %v8468_v29 = vld [vmem:[#allocation3] sm:$0xff] }
 0xcca   :  { %v9652_v62 = vpack.c.bf16 %v8468_v29, %v8468_v29 }
 0xccc   :  { %8476 = vrot.lane.b32.xlu0 %v9652_v62, %s16112_s13  ;;  %8242 = vst.msk [vmem:[#allocation2] sm:$0xf] %vm8241_vm7, %v9652_v62 }
 0xccd   :  { %v8232_v52 = vld [vmem:[#allocation3 + $0x8] sm:$0xff] }
 0xcce   :  { %v9623_v2 = vpack.c.bf16 %v8232_v52, %v8232_v52 }
 0xcd0   :  { %8348 = vrot.lane.b32.xlu0 %v9652_v62, %s10312_s26  ;;  %8478 = vrot.lane.b32.xlu1 %v9623_v2, %s16112_s13  ;;  %8243 = vst.msk [vmem:[#allocation2 + $0x20] sm:$0xf] %vm8241_vm7, %v9623_v2  ;;  %s10322_s13 = smov 117  }
 0xcd4   :  { %8460 = vrot.lane.b32.xlu0 %v9652_v62, %s10316_s7  ;;  %8350 = vrot.lane.b32.xlu1 %v9623_v2, %s10312_s26  ;;  %s16538_s26 = sld [smem:[#allocation124_spill]] }
 0xcd8   :  { %8332 = vrot.lane.b32.xlu0 %v9652_v62, %s10317_s25  ;;  %8462 = vrot.lane.b32.xlu1 %v9623_v2, %s10316_s7 }
 0xcdc   :  { %8444 = vrot.lane.b32.xlu0 %v9652_v62, %s10318_s5  ;;  %8334 = vrot.lane.b32.xlu1 %v9623_v2, %s10317_s25 }
 0xce0   :  { %8316 = vrot.lane.b32.xlu0 %v9652_v62, %s10319_s16  ;;  %8446 = vrot.lane.b32.xlu1 %v9623_v2, %s10318_s5 }
 0xce4   :  { %8428 = vrot.lane.b32.xlu0 %v9652_v62, %s10320_s1  ;;  %8318 = vrot.lane.b32.xlu1 %v9623_v2, %s10319_s16 }
 0xce8   :  { %8300 = vrot.lane.b32.xlu0 %v9652_v62, %s10321_s28  ;;  %8430 = vrot.lane.b32.xlu1 %v9623_v2, %s10320_s1 }
 0xcec   :  { %8412 = vrot.lane.b32.xlu0 %v9652_v62, %s10322_s13  ;;  %8302 = vrot.lane.b32.xlu1 %v9623_v2, %s10321_s28 }
 0xcf0   :  { %8284 = vrot.lane.b32.xlu0 %v9652_v62, %s10323_s23  ;;  %8414 = vrot.lane.b32.xlu1 %v9623_v2, %s10322_s13 }
 0xcf4   :  { %8396 = vrot.lane.b32.xlu0 %v9652_v62, %s10306_s17  ;;  %8286 = vrot.lane.b32.xlu1 %v9623_v2, %s10323_s23 }
 0xcf8   :  { %8268 = vrot.lane.b32.xlu0 %v9652_v62, %s16115_s22  ;;  %8398 = vrot.lane.b32.xlu1 %v9623_v2, %s10306_s17 }
 0xcfc   :  { %8380 = vrot.lane.b32.xlu0 %v9652_v62, %s10308_s0  ;;  %8270 = vrot.lane.b32.xlu1 %v9623_v2, %s16115_s22 }
 0xd00   :  { %8252 = vrot.lane.b32.xlu0 %v9652_v62, %s16067_s29  ;;  %8382 = vrot.lane.b32.xlu1 %v9623_v2, %s10308_s0 }
 0xd04   :  { %8364 = vrot.lane.b32.xlu0 %v9652_v62, %s10310_s19  ;;  %8254 = vrot.lane.b32.xlu1 %v9623_v2, %s16067_s29 }
 0xd08   :  { %8366 = vrot.lane.b32.xlu1 %v9623_v2, %s10310_s19 }
 0xd23   :  { %8161 = vadd.xlane.f32.xlu0 %v8160_v32 }
 0xd27   :  { %8099 = vadd.xlane.f32.xlu0 %v8098_v8 }
 0xd2b   :  { %8102 = vadd.xlane.f32.xlu0 %v8101_v20 }
 0xd2c   :  { %8164 = vadd.xlane.f32.xlu1 %v8163_v14 }
 0xd3e   :  { %v8477_v0 = vpop.permute.xlu0 %8476 }
 0xd3f   :  { %8482 = vst.msk [vmem:[#allocation2 + $0x3c0] sm:$0xf] %vm8241_vm7, %v8477_v0 }
 0xd42   :  { %v8349_v35 = vpop.permute.xlu0 %8348  ;;  %v8479_v54 = vpop.permute.xlu1 %8478 }
 0xd43   :  { %8354 = vst.msk [vmem:[#allocation2 + $0x1c0] sm:$0xf] %vm8241_vm7, %v8349_v35  ;;  %8483 = vst.msk [vmem:[#allocation2 + $0x3e0] sm:$0xf] %vm8241_vm7, %v8479_v54 }
 0xd46   :  { %v8461_v41 = vpop.permute.xlu0 %8460  ;;  %v8351_v36 = vpop.permute.xlu1 %8350  ;;  %v8516_v13 = vld [vmem:[#allocation2 + $0x3c0] sm:$0xf] }
 0xd47   :  { %8466 = vst.msk [vmem:[#allocation2 + $0x380] sm:$0xf] %vm8241_vm7, %v8461_v41  ;;  %8355 = vst.msk [vmem:[#allocation2 + $0x1e0] sm:$0xf] %vm8241_vm7, %v8351_v36 }
 0xd4a   :  { %v8333_v21 = vpop.permute.xlu0 %8332  ;;  %v8463_v16 = vpop.permute.xlu1 %8462  ;;  %v8517_v17 = vld [vmem:[#allocation2 + $0x3e0] sm:$0xf] }
 0xd4b   :  { %8338 = vst.msk [vmem:[#allocation2 + $0x180] sm:$0xf] %vm8241_vm7, %v8333_v21  ;;  %8467 = vst.msk [vmem:[#allocation2 + $0x3a0] sm:$0xf] %vm8241_vm7, %v8463_v16  ;;  %v9357_v31 = vcombine.low %v8516_v13, %v8517_v17  ;;  %v8500_v43 = vld [vmem:[#allocation2 + $0x1c0] sm:$0xf] }
 0xd4d   :  { %9879 = vmatprep.subr.bf16.mxu0 %v9357_v31 }
 0xd4e   :  { %v8445_v50 = vpop.permute.xlu0 %8444  ;;  %v8335_v39 = vpop.permute.xlu1 %8334  ;;  %v8501_v61 = vld [vmem:[#allocation2 + $0x1e0] sm:$0xf] }
 0xd4f   :  { %8450 = vst.msk [vmem:[#allocation2 + $0x340] sm:$0xf] %vm8241_vm7, %v8445_v50  ;;  %8339 = vst.msk [vmem:[#allocation2 + $0x1a0] sm:$0xf] %vm8241_vm7, %v8335_v39  ;;  %v9349_v18 = vcombine.low %v8500_v43, %v8501_v61  ;;  %v8514_v26 = vld [vmem:[#allocation2 + $0x380] sm:$0xf] }
 0xd50   :  { %v8487_v43 = vld [vmem:[#allocation2 + $0x20] sm:$0xf] }
 0xd51   :  { %9880 = vmatpush3.bf16.msra.mxu0 %v9349_v18 }
 0xd52   :  { %v8317_v24 = vpop.permute.xlu0 %8316  ;;  %v8447_v9 = vpop.permute.xlu1 %8446  ;;  %v8515_v30 = vld [vmem:[#allocation2 + $0x3a0] sm:$0xf] }
 0xd53   :  { %8322 = vst.msk [vmem:[#allocation2 + $0x140] sm:$0xf] %vm8241_vm7, %v8317_v24  ;;  %8451 = vst.msk [vmem:[#allocation2 + $0x360] sm:$0xf] %vm8241_vm7, %v8447_v9  ;;  %v9356_v25 = vcombine.low %v8514_v26, %v8515_v30  ;;  %v8498_v10 = vld [vmem:[#allocation2 + $0x180] sm:$0xf] }
 0xd54   :  { %v8486_v9 = vld [vmem:[#allocation2] sm:$0xf]  ;;  %v10058_v30 = vld [vmem:[%s15660_s9 + $0x4] ss:$8 sps:$4 sm:$0xff]  }
 0xd55   :  { %9881 = vmatprep.subr.bf16.mxu0 %v9356_v25  ;;  %v9342_v26 = vcombine.low %v8486_v9, %v8487_v43  ;;  %v10056_v25 = vld [vmem:[%s15660_s9] ss:$8 sps:$4 sm:$0xff]   ;;  %8656 = vmatprep.mubr.bf16.mxu0 %v10058_v30 }
 0xd56   :  { %v8429_v42 = vpop.permute.xlu0 %8428  ;;  %v8319_v27 = vpop.permute.xlu1 %8318  ;;  %v8499_v47 = vld [vmem:[#allocation2 + $0x1a0] sm:$0xf] }
 0xd57   :  { %8434 = vst.msk [vmem:[#allocation2 + $0x300] sm:$0xf] %vm8241_vm7, %v8429_v42  ;;  %8323 = vst.msk [vmem:[#allocation2 + $0x160] sm:$0xf] %vm8241_vm7, %v8319_v27  ;;  %v9348_v46 = vcombine.low %v8498_v10, %v8499_v47  ;;  %v8512_v44 = vld [vmem:[#allocation2 + $0x340] sm:$0xf] }
 0xd59   :  { %9882 = vmatpush3.bf16.msra.mxu0 %v9348_v46 }
 0xd5a   :  { %v8301_v3 = vpop.permute.xlu0 %8300  ;;  %v8431_v63 = vpop.permute.xlu1 %8430  ;;  %v8513_v15 = vld [vmem:[#allocation2 + $0x360] sm:$0xf] }
 0xd5b   :  { %8306 = vst.msk [vmem:[#allocation2 + $0x100] sm:$0xf] %vm8241_vm7, %v8301_v3  ;;  %8435 = vst.msk [vmem:[#allocation2 + $0x320] sm:$0xf] %vm8241_vm7, %v8431_v63  ;;  %v9355_v4 = vcombine.low %v8512_v44, %v8513_v15  ;;  %v8496_v49 = vld [vmem:[#allocation2 + $0x140] sm:$0xf] }
 0xd5d   :  { %9883 = vmatprep.subr.bf16.mxu0 %v9355_v4 }
 0xd5e   :  { %v8413_v45 = vpop.permute.xlu0 %8412  ;;  %v8303_v48 = vpop.permute.xlu1 %8302  ;;  %v8497_v40 = vld [vmem:[#allocation2 + $0x160] sm:$0xf] }
 0xd5f   :  { %8418 = vst.msk [vmem:[#allocation2 + $0x2c0] sm:$0xf] %vm8241_vm7, %v8413_v45  ;;  %8307 = vst.msk [vmem:[#allocation2 + $0x120] sm:$0xf] %vm8241_vm7, %v8303_v48  ;;  %v9347_v51 = vcombine.low %v8496_v49, %v8497_v40  ;;  %v8510_v1 = vld [vmem:[#allocation2 + $0x300] sm:$0xf] }
 0xd60   :  { %v8156_v45 = vld [vmem:[%s16538_s26] sm:$0xff]  ;;  %v8159_v48 = vld [vmem:[%s16539_s11 + $0x8] sm:$0xff] }
 0xd61   :  { %9884 = vmatpush3.bf16.msra.mxu0 %v9347_v51 }
 0xd62   :  { %v8285_v37 = vpop.permute.xlu0 %8284  ;;  %v8415_v19 = vpop.permute.xlu1 %8414  ;;  %v8511_v53 = vld [vmem:[#allocation2 + $0x320] sm:$0xf] }
 0xd63   :  { %8290 = vst.msk [vmem:[#allocation2 + $0xc0] sm:$0xf] %vm8241_vm7, %v8285_v37  ;;  %8419 = vst.msk [vmem:[#allocation2 + $0x2e0] sm:$0xf] %vm8241_vm7, %v8415_v19  ;;  %v9354_v38 = vcombine.low %v8510_v1, %v8511_v53  ;;  %v8494_v60 = vld [vmem:[#allocation2 + $0x100] sm:$0xf] }
 0xd65   :  { %9885 = vmatprep.subr.bf16.mxu0 %v9354_v38 }
 0xd66   :  { %v8397_v28 = vpop.permute.xlu0 %8396  ;;  %v8287_v5 = vpop.permute.xlu1 %8286  ;;  %v8495_v57 = vld [vmem:[#allocation2 + $0x120] sm:$0xf] }
 0xd67   :  { %8402 = vst.msk [vmem:[#allocation2 + $0x280] sm:$0xf] %vm8241_vm7, %v8397_v28  ;;  %8291 = vst.msk [vmem:[#allocation2 + $0xe0] sm:$0xf] %vm8241_vm7, %v8287_v5  ;;  %v9346_v22 = vcombine.low %v8494_v60, %v8495_v57  ;;  %v8508_v6 = vld [vmem:[#allocation2 + $0x2c0] sm:$0xf] }
 0xd69   :  { %9886 = vmatpush3.bf16.msra.mxu0 %v9346_v22 }
 0xd6a   :  { %v8269_v12 = vpop.permute.xlu0 %8268  ;;  %v8399_v34 = vpop.permute.xlu1 %8398  ;;  %v8509_v33 = vld [vmem:[#allocation2 + $0x2e0] sm:$0xf] }
 0xd6b   :  { %8274 = vst.msk [vmem:[#allocation2 + $0x80] sm:$0xf] %vm8241_vm7, %v8269_v12  ;;  %8403 = vst.msk [vmem:[#allocation2 + $0x2a0] sm:$0xf] %vm8241_vm7, %v8399_v34  ;;  %v9353_v59 = vcombine.low %v8508_v6, %v8509_v33  ;;  %v8492_v29 = vld [vmem:[#allocation2 + $0xc0] sm:$0xf] }
 0xd6d   :  { %9887 = vmatprep.subr.bf16.mxu0 %v9353_v59 }
 0xd6e   :  { %v8381_v23 = vpop.permute.xlu0 %8380  ;;  %v8271_v56 = vpop.permute.xlu1 %8270  ;;  %v8493_v62 = vld [vmem:[#allocation2 + $0xe0] sm:$0xf] }
 0xd6f   :  { %8386 = vst.msk [vmem:[#allocation2 + $0x240] sm:$0xf] %vm8241_vm7, %v8381_v23  ;;  %8275 = vst.msk [vmem:[#allocation2 + $0xa0] sm:$0xf] %vm8241_vm7, %v8271_v56  ;;  %v9345_v52 = vcombine.low %v8492_v29, %v8493_v62  ;;  %v8506_v8 = vld [vmem:[#allocation2 + $0x280] sm:$0xf] }
 0xd71   :  { %9888 = vmatpush3.bf16.msra.mxu0 %v9345_v52 }
 0xd72   :  { %v8253_v2 = vpop.permute.xlu0 %8252  ;;  %v8383_v32 = vpop.permute.xlu1 %8382  ;;  %v8507_v20 = vld [vmem:[#allocation2 + $0x2a0] sm:$0xf] }
 0xd73   :  { %8258 = vst.msk [vmem:[#allocation2 + $0x40] sm:$0xf] %vm8241_vm7, %v8253_v2  ;;  %8387 = vst.msk [vmem:[#allocation2 + $0x260] sm:$0xf] %vm8241_vm7, %v8383_v32  ;;  %v9352_v14 = vcombine.low %v8506_v8, %v8507_v20  ;;  %v8490_v54 = vld [vmem:[#allocation2 + $0x80] sm:$0xf] }
 0xd75   :  { %9889 = vmatprep.subr.bf16.mxu0 %v9352_v14 }
 0xd76   :  { %v8365_v0 = vpop.permute.xlu0 %8364  ;;  %v8255_v35 = vpop.permute.xlu1 %8254  ;;  %v8491_v41 = vld [vmem:[#allocation2 + $0xa0] sm:$0xf] }
 0xd77   :  { %8370 = vst.msk [vmem:[#allocation2 + $0x200] sm:$0xf] %vm8241_vm7, %v8365_v0  ;;  %8259 = vst.msk [vmem:[#allocation2 + $0x60] sm:$0xf] %vm8241_vm7, %v8255_v35  ;;  %v9344_v36 = vcombine.low %v8490_v54, %v8491_v41  ;;  %v8504_v16 = vld [vmem:[#allocation2 + $0x240] sm:$0xf] }
 0xd79   :  { %9890 = vmatpush3.bf16.msra.mxu0 %v9344_v36 }
 0xd7a   :  { %v8367_v21 = vpop.permute.xlu1 %8366  ;;  %v8505_v13 = vld [vmem:[#allocation2 + $0x260] sm:$0xf] }
 0xd7b   :  { %8371 = vst.msk [vmem:[#allocation2 + $0x220] sm:$0xf] %vm8241_vm7, %v8367_v21  ;;  %v9351_v17 = vcombine.low %v8504_v16, %v8505_v13  ;;  %v8488_v31 = vld [vmem:[#allocation2 + $0x40] sm:$0xf] }
 0xd7d   :  { %9891 = vmatprep.subr.bf16.mxu0 %v9351_v17 }
 0xd7e   :  { %v8489_v50 = vld [vmem:[#allocation2 + $0x60] sm:$0xf] }
 0xd7f   :  { %v9343_v39 = vcombine.low %v8488_v31, %v8489_v50  ;;  %v8502_v61 = vld [vmem:[#allocation2 + $0x200] sm:$0xf] }
 0xd81   :  { %9892 = vmatpush3.bf16.msra.mxu0 %v9343_v39 }
 0xd82   :  { %v8503_v18 = vld [vmem:[#allocation2 + $0x220] sm:$0xf] }
 0xd83   :  { %v9350_v24 = vcombine.low %v8502_v61, %v8503_v18 }
 0xd85   :  { %9893 = vmatprep.subr.bf16.mxu0 %v9350_v24 }
 0xd86   :  { %9894 = vmatpush3.bf16.msra.mxu0 %v9342_v26 }
 0xd89   :  { %8657 = vmatmul.mubr.bf16.vlgmr.msra.gmra.mxu0 %v10056_v25 }
 0xdac   :  { %v8162_v42 = vpop.xlane.xlu0 %8161 }
 0xdad   :  { %v8166_v27 = vmul.f32 0.03125, %v8162_v42 }
 0xdaf   :  { %v8168_v10 = vsub.f32 %v15533_v58, %v8166_v27  ;;  %v8158_v58 = vld [vmem:[%s16539_s11] sm:$0xff] }
 0xdb0   :  { %v8100_v49 = vpop.xlane.xlu0 %8099 }
 0xdb1   :  { %v8170_v47 = vmul.f32 %v8168_v10, %v8168_v10  ;;  %v8104_v37 = vmul.f32 0.03125, %v8100_v49 }
 0xdb3   :  { %v8172_v46 = vsel %vm7602_vm9, %v8170_v47, 0.0  ;;  %v8106_v1 = vsub.f32 %v15529_v55, %v8104_v37 }
 0xdb4   :  { %8173 = vadd.xlane.f32.xlu1 %v8172_v46  ;;  %v8103_v40 = vpop.xlane.xlu0 %8102 }
 0xdb5   :  { %v8165_v3 = vpop.xlane.xlu1 %8164  ;;  %v8105_v51 = vmul.f32 0.03125, %v8103_v40  ;;  %v8108_v38 = vmul.f32 %v8106_v1, %v8106_v1 }
 0xdb6   :  { %v8167_v63 = vmul.f32 0.03125, %v8165_v3 }
 0xdb7   :  { %v8107_v19 = vsub.f32 %v15531_v11, %v8105_v51  ;;  %v8110_v5 = vsel %vm7602_vm9, %v8108_v38, 0.0 }
 0xdb8   :  { %v8169_v44 = vsub.f32 %v15535_v7, %v8167_v63  ;;  %v8157_v7 = vld [vmem:[%s16538_s26 + $0x8] sm:$0xff] }
 0xdb9   :  { %v8109_v53 = vmul.f32 %v8107_v19, %v8107_v19 }
 0xdba   :  { %v8171_v15 = vmul.f32 %v8169_v44, %v8169_v44 }
 0xdbb   :  { %v8113_v28 = vsel %vm7602_vm9, %v8109_v53, 0.0 }
 0xdbc   :  { %v8175_v4 = vsel %vm7602_vm9, %v8171_v15, 0.0 }
 0xdbd   :  { %8176 = vadd.xlane.f32.xlu0 %v8175_v4 }
 0xdc5   :  { %8188 = vperm.xlu1 %9996, %v8156_v45  }
 0xdc9   :  { %8200 = vperm.xlu1 %9996, %v8158_v58  }
 0xdcd   :  { %8205 = vperm.xlu1 %9996, %v8159_v48  }
 0xdd3   :  { %8193 = vperm.xlu0 %9997, %v8157_v7  }
 0xdf1   :  { %8114 = vadd.xlane.f32.xlu1 %v8113_v28 }
 0xdf2   :  { %8111 = vadd.xlane.f32.xlu0 %v8110_v5 }
 0xe02   :  { %8131 = vperm.xlu1 %9996, %v8157_v7  }
 0xe06   :  { %8143 = vperm.xlu1 %9996, %v8159_v48  }
 0xe08   :  { %8126 = vperm.xlu0 %9997, %v8156_v45  }
 0xe0c   :  { %8138 = vperm.xlu0 %9997, %v8158_v58  }
 0xe3d   :  { %v8174_v60 = vpop.xlane.xlu1 %8173 }
 0xe3e   :  { %v8178_v57 = vmul.f32 0.03125, %v8174_v60 }
 0xe40   :  { %v8180_v22 = vadd.f32 1e-05, %v8178_v57 }
 0xe41   :  { %v8189_v59 = vpop.permute.xlu1 %8188 }
 0xe42   :  { %10067 = vrsqrt.f32 %v8180_v22 }
 0xe45   :  { %v8201_v32 = vpop.permute.xlu1 %8200 }
 0xe46   :  { %v8177_v12 = vpop.xlane.xlu0 %8176 }
 0xe47   :  { %v8179_v11 = vmul.f32 0.03125, %v8177_v12 }
 0xe49   :  { %v8181_v34 = vadd.f32 1e-05, %v8179_v11  ;;  %v9895_v55 = vpop.f32.mrf.mxu0  ;;  %v8206_v36 = vpop.permute.xlu1 %8205 }
 0xe4b   :  { %10069 = vrsqrt.f32 %v8181_v34  ;;  %v9896_v6 = vpop.f32.mrf.mxu0 }
 0xe4c   :  { %v9897_v33 = vadd.f32 %v9896_v6, %v9895_v55 }
 0xe4d   :  { %v9898_v23 = vpop.f32.mrf.mxu0 }
 0xe4e   :  { %8665 = vst.msk [vmem:[%s16540_s2] sm:$0xff] %vm7602_vm9, %v9897_v33  ;;  %v8194_v54 = vpop.permute.xlu0 %8193 }
 0xe4f   :  { %v10068_v56 = vpop.eup %10067  ;;  %v9899_v29 = vpop.f32.mrf.mxu0 }
 0xe50   :  { %v8184_v62 = vmul.f32 %v10068_v56, %v8168_v10  ;;  %v9900_v52 = vadd.f32 %v9899_v29, %v9898_v23 }
 0xe52   :  { %v8196_v2 = vmul.f32 %v8189_v59, %v8184_v62  ;;  %8666 = vst.msk [vmem:[%s16540_s2 + $0x8] sm:$0xff] %vm7602_vm9, %v9900_v52 }
 0xe54   :  { %v8208_v8 = vadd.f32 %v8201_v32, %v8196_v2 }
 0xe56   :  { %vm8210_vm10 = vcmp.gt.f32.partialorder %v8208_v8, 0.0  ;;  %v8212_v20 = vmul.f32 0.2, %v8208_v8 }
 0xe58   :  { %v10070_v14 = vpop.eup %10069  ;;  %v8214_v0 = vsel %vm8210_vm10, %v8208_v8, %v8212_v20 }
 0xe59   :  { %v8185_v35 = vmul.f32 %v10070_v14, %v8169_v44  ;;  %8218 = vrot.lane.b32.xlu0 %v8214_v0, %s10324_s20 }
 0xe5b   :  { %v8197_v41 = vmul.f32 %v8194_v54, %v8185_v35 }
 0xe5d   :  { %v8209_v21 = vadd.f32 %v8206_v36, %v8197_v41 }
 0xe5f   :  { %v8213_v16 = vmul.f32 0.2, %v8209_v21  ;;  %vm8211_vm11 = vcmp.gt.f32.partialorder %v8209_v21, 0.0 }
 0xe61   :  { %v8215_v13 = vsel %vm8211_vm11, %v8209_v21, %v8213_v16 }
 0xe62   :  { %8220 = vrot.lane.b32.xlu1 %v8215_v13, %s10324_s20 }
 0xe7a   :  { %v8115_v17 = vpop.xlane.xlu1 %8114 }
 0xe7b   :  { %v8117_v31 = vmul.f32 0.03125, %v8115_v17  ;;  %v8112_v50 = vpop.xlane.xlu0 %8111 }
 0xe7c   :  { %v8116_v39 = vmul.f32 0.03125, %v8112_v50 }
 0xe7d   :  { %v8119_v43 = vadd.f32 1e-05, %v8117_v31 }
 0xe7e   :  { %v8118_v61 = vadd.f32 1e-05, %v8116_v39  ;;  %v8132_v18 = vpop.permute.xlu1 %8131 }
 0xe7f   :  { %10071 = vrsqrt.f32 %v8119_v43 }
 0xe80   :  { %10073 = vrsqrt.f32 %v8118_v61 }
 0xe82   :  { %v8144_v27 = vpop.permute.xlu1 %8143 }
 0xe83   :  { %v8127_v24 = vpop.permute.xlu0 %8126 }
 0xe87   :  { %v8139_v46 = vpop.permute.xlu0 %8138 }
 0xe8c   :  { %v10072_v9 = vpop.eup %10071 }
 0xe8d   :  { %v10074_v26 = vpop.eup %10073  ;;  %v8123_v30 = vmul.f32 %v10072_v9, %v8107_v19 }
 0xe8e   :  { %v8122_v25 = vmul.f32 %v10074_v26, %v8106_v1 }
 0xe8f   :  { %v8135_v42 = vmul.f32 %v8132_v18, %v8123_v30 }
 0xe90   :  { %v8134_v10 = vmul.f32 %v8127_v24, %v8122_v25 }
 0xe91   :  { %v8147_v47 = vadd.f32 %v8144_v27, %v8135_v42 }
 0xe92   :  { %v8146_v3 = vadd.f32 %v8139_v46, %v8134_v10 }
 0xe93   :  { %vm8149_vm12 = vcmp.gt.f32.partialorder %v8147_v47, 0.0  ;;  %v8151_v63 = vmul.f32 0.2, %v8147_v47 }
 0xe94   :  { %vm8148_vm13 = vcmp.gt.f32.partialorder %v8146_v3, 0.0  ;;  %v8150_v44 = vmul.f32 0.2, %v8146_v3 }
 0xe95   :  { %v8153_v15 = vsel %vm8149_vm12, %v8147_v47, %v8151_v63 }
 0xe96   :  { %8155 = vst.msk [vmem:[%s16541_s14 + $0x8] sm:$0xff] %vm7602_vm9, %v8153_v15  ;;  %v8152_v4 = vsel %vm8148_vm13, %v8146_v3, %v8150_v44 }
 0xe97   :  { %8154 = vst.msk [vmem:[%s16541_s14] sm:$0xff] %vm7602_vm9, %v8152_v4 }
 0xecb   :  { %v8219_v45 = vpop.permute.xlu0 %8218 }
 0xecc   :  { %8225 = vst.msk [vmem:[%s16541_s14] sm:$0xff] %vm8224_vm15, %v8219_v45 }
 0xed4   :  { %v8221_v58 = vpop.permute.xlu1 %8220 }
 0xed5   :  { %8226 = vst.msk [vmem:[%s16541_s14 + $0x8] sm:$0xff] %vm8224_vm15, %v8221_v58 }

</bundles_post_ra>
